<compile_context>
chip_gen: v5e
topology: v5e:2x2
jax: 0.10.0
libtpu: 0.0.40
codegen_flags: <defaults>
</compile_context>

<pallas_src>
import functools

import jax
import jax.numpy as jnp
from jax.experimental import pallas as pl
from jax.experimental.pallas import tpu as pltpu


_VMEM_LIMIT = 32 * 1024 * 1024  # lifts v5e's 16 MiB default, <= v7x physical


def _tile_m(M):
    # Full dim when small (always a legal block: equals the array dim),
    # else 128-row tiles with a ragged final block handled by Pallas.
    return M if M <= 128 else 128


# ----------------------------------------------------------------------------
# Pallas kernel: fused (X @ W + b) with optional ReLU.  Grid tiles M only;
# W and b are fully VMEM-resident per step.
# ----------------------------------------------------------------------------
def _matmul_bias_act_kernel(x_ref, w_ref, b_ref, o_ref, *, relu):
    acc = jnp.dot(x_ref[...], w_ref[...], preferred_element_type=jnp.float32)
    acc = acc + b_ref[...]
    if relu:
        acc = jnp.maximum(acc, 0.0)
    o_ref[...] = acc.astype(o_ref.dtype)


def _matmul_bias_pallas(x, w, b, *, relu):
    """y = relu?(x @ w + b).  x:(M,K), w:(K,N), b:(1,N) — all f32, unpadded."""
    M, K = x.shape
    Kw, N = w.shape
    assert K == Kw, (K, Kw)
    TM = _tile_m(M)
    return pl.pallas_call(
        functools.partial(_matmul_bias_act_kernel, relu=relu),
        out_shape=jax.ShapeDtypeStruct((M, N), jnp.float32),
        grid=(pl.cdiv(M, TM),),
        in_specs=[
            pl.BlockSpec((TM, K), lambda i: (i, 0)),
            pl.BlockSpec((K, N), lambda i: (0, 0)),
            pl.BlockSpec((1, N), lambda i: (0, 0)),
        ],
        out_specs=pl.BlockSpec((TM, N), lambda i: (i, 0)),
        compiler_params=pltpu.CompilerParams(
            dimension_semantics=("parallel",),
            vmem_limit_bytes=_VMEM_LIMIT),
    )(x, w, b)


# ----------------------------------------------------------------------------
# Pallas kernel: fused MLP head  relu(x @ W1 + b1) @ W2 + b2  in one call.
# All weights (~6.5 MB f32) stay VMEM-resident; hidden never touches HBM.
# ----------------------------------------------------------------------------
def _mlp_head_kernel(x_ref, w1_ref, b1_ref, w2_ref, b2_ref, o_ref):
    h = jnp.dot(x_ref[...], w1_ref[...], preferred_element_type=jnp.float32)
    h = jnp.maximum(h + b1_ref[...], 0.0)
    o = jnp.dot(h, w2_ref[...], preferred_element_type=jnp.float32)
    o_ref[...] = (o + b2_ref[...]).astype(o_ref.dtype)


def mlp_head_pallas(x, w1, b1, w2, b2):
    M, K = x.shape
    K1, H = w1.shape
    H2, N = w2.shape
    assert K == K1 and H == H2, (K, K1, H, H2)
    TM = _tile_m(M)
    return pl.pallas_call(
        _mlp_head_kernel,
        out_shape=jax.ShapeDtypeStruct((M, N), jnp.float32),
        grid=(pl.cdiv(M, TM),),
        in_specs=[
            pl.BlockSpec((TM, K), lambda i: (i, 0)),
            pl.BlockSpec((K, H), lambda i: (0, 0)),
            pl.BlockSpec((1, H), lambda i: (0, 0)),
            pl.BlockSpec((H, N), lambda i: (0, 0)),
            pl.BlockSpec((1, N), lambda i: (0, 0)),
        ],
        out_specs=pl.BlockSpec((TM, N), lambda i: (i, 0)),
        compiler_params=pltpu.CompilerParams(
            dimension_semantics=("parallel",),
            vmem_limit_bytes=_VMEM_LIMIT),
    )(x, w1, b1, w2, b2)


# ----------------------------------------------------------------------------
# Conv2d (valid, square stride) on NHWC: one patches op (glue) + Pallas matmul.
# Patch feature ordering of conv_general_dilated_patches is (C_in, KH, KW)
# with C_in slowest, matching the flattened PyTorch OIHW weight.
# ----------------------------------------------------------------------------
def conv2d_relu_pallas(x_nhwc, w2d, b2d, *, ksize, stride):
    B = x_nhwc.shape[0]
    K, C_out = w2d.shape
    patches = jax.lax.conv_general_dilated_patches(
        x_nhwc, (ksize, ksize), (stride, stride), "VALID",
        dimension_numbers=("NHWC", "HWIO", "NHWC"))
    _, oh, ow, Kp = patches.shape
    assert Kp == K, (Kp, K)
    y = _matmul_bias_pallas(patches.reshape(B * oh * ow, K), w2d, b2d, relu=True)
    return y.reshape(B, oh, ow, C_out)        # stays NHWC (no transpose)


# ----------------------------------------------------------------------------
# One-time parameter preparation (outside the hot path / jit of the forward).
# ----------------------------------------------------------------------------
def prepare_params(params):
    def conv_w(w):  # OIHW -> (C_in*KH*KW, C_out), K ordered (C_in, KH, KW)
        c_out = w.shape[0]
        return w.reshape(c_out, -1).T

    # fc1 rows permuted from PyTorch NCHW-flatten order (c,h,w) to the
    # NHWC-flatten order (h,w,c) produced by the Pallas conv stack.
    fc1_w = params["fc1_w"].reshape(64, 7, 7, -1).transpose(1, 2, 0, 3)
    fc1_w = fc1_w.reshape(64 * 7 * 7, -1)

    prepped = {
        "conv1_w": conv_w(params["conv1_w"]),
        "conv1_b": params["conv1_b"].reshape(1, -1),
        "conv2_w": conv_w(params["conv2_w"]),
        "conv2_b": params["conv2_b"].reshape(1, -1),
        "conv3_w": conv_w(params["conv3_w"]),
        "conv3_b": params["conv3_b"].reshape(1, -1),
        "fc1_w": fc1_w,
        "fc1_b": params["fc1_b"].reshape(1, -1),
        "fc2_w": params["fc2_w"],
        "fc2_b": params["fc2_b"].reshape(1, -1),
    }
    return jax.tree_util.tree_map(lambda a: jnp.asarray(a, jnp.float32), prepped)


# ----------------------------------------------------------------------------
# DQN forward (hot path) — takes already-prepared params.
# ----------------------------------------------------------------------------
def dqn_forward(prepped, x_nchw):
    x = x_nchw.transpose(0, 2, 3, 1)          # single NCHW -> NHWC of the input
    x = conv2d_relu_pallas(x, prepped["conv1_w"], prepped["conv1_b"], ksize=8, stride=4)
    x = conv2d_relu_pallas(x, prepped["conv2_w"], prepped["conv2_b"], ksize=4, stride=2)
    x = conv2d_relu_pallas(x, prepped["conv3_w"], prepped["conv3_b"], ksize=3, stride=1)
    x = x.reshape(x.shape[0], -1)             # NHWC flatten; fc1_w rows pre-permuted
    return mlp_head_pallas(x, prepped["fc1_w"], prepped["fc1_b"],
                           prepped["fc2_w"], prepped["fc2_b"])


# ----------------------------------------------------------------------------
# Pure-JAX reference (matches the PyTorch module exactly) + param init.
# ----------------------------------------------------------------------------
def dqn_forward_ref(params, x):
    def conv(x, w, b, s):
        y = jax.lax.conv_general_dilated(
            x, w, (s, s), "VALID",
            dimension_numbers=("NCHW", "OIHW", "NCHW"),
            precision=jax.lax.Precision.HIGHEST)
        return jax.nn.relu(y + b[None, :, None, None])
    x = conv(x, params["conv1_w"], params["conv1_b"], 4)
    x = conv(x, params["conv2_w"], params["conv2_b"], 2)
    x = conv(x, params["conv3_w"], params["conv3_b"], 1)
    x = x.reshape(x.shape[0], -1)
    x = jax.nn.relu(
        jnp.dot(x, params["fc1_w"], precision=jax.lax.Precision.HIGHEST)
        + params["fc1_b"])
    return (jnp.dot(x, params["fc2_w"], precision=jax.lax.Precision.HIGHEST)
            + params["fc2_b"])


def init_params(key, in_channels, num_actions):
    ks = jax.random.split(key, 10)
    s = 0.05
    return {
        "conv1_w": s * jax.random.normal(ks[0], (32, in_channels, 8, 8), jnp.float32),
        "conv1_b": s * jax.random.normal(ks[1], (32,), jnp.float32),
        "conv2_w": s * jax.random.normal(ks[2], (64, 32, 4, 4), jnp.float32),
        "conv2_b": s * jax.random.normal(ks[3], (64,), jnp.float32),
        "conv3_w": s * jax.random.normal(ks[4], (64, 64, 3, 3), jnp.float32),
        "conv3_b": s * jax.random.normal(ks[5], (64,), jnp.float32),
        # stored as (in, out); same math as PyTorch's (out, in) with transpose
        "fc1_w": s * jax.random.normal(ks[6], (64 * 7 * 7, 512), jnp.float32),
        "fc1_b": s * jax.random.normal(ks[7], (512,), jnp.float32),
        "fc2_w": s * jax.random.normal(ks[8], (512, num_actions), jnp.float32),
        "fc2_b": s * jax.random.normal(ks[9], (num_actions,), jnp.float32),
    }


if __name__ == "__main__":
    # Spatial size must be 84x84 so that flatten == 64*7*7 (as fc1 requires).
    batch, in_channels, num_actions = 2, 4, 6
    key = jax.random.PRNGKey(0)
    pkey, xkey = jax.random.split(key)
    params = init_params(pkey, in_channels, num_actions)
    x = jax.random.normal(xkey, (batch, in_channels, 84, 84), jnp.float32)

    prepped = prepare_params(params)          # one-time, outside the hot path
    fwd = jax.jit(dqn_forward)
    out = jax.block_until_ready(fwd(prepped, x))

    ref = jax.block_until_ready(jax.jit(dqn_forward_ref)(params, x))

    assert out.shape == (batch, num_actions), out.shape
    assert bool(jnp.all(jnp.isfinite(out)))
    assert jnp.allclose(out, ref, rtol=1e-2, atol=1e-2), float(
        jnp.max(jnp.abs(out - ref)))
    print("KERNEL_OK")
</pallas_src>

<mosaic_0001>
module attributes {stable_mosaic.version = 11 : i64} {
  func.func @_matmul_bias_act_kernel(%arg0: i32, %arg1: memref<128x256xf32, #tpu.memory_space<vmem>>, %arg2: memref<256x32xf32, #tpu.memory_space<vmem>>, %arg3: memref<1x32xf32, #tpu.memory_space<vmem>>, %arg4: memref<128x32xf32, #tpu.memory_space<vmem>>) attributes {dimension_semantics = [#tpu.dimension_semantics<parallel>], iteration_bounds = array<i64: 7>, scalar_prefetch = 0 : i64, scratch_operands = 0 : i64, tpu.core_type = #tpu.core_type<tc>, window_params = [{transform_indices = @transform_0, window_bounds = array<i64: 128, 256>}, {pipeline_mode = #tpu.pipeline_mode<synchronous>, transform_indices = @transform_1, window_bounds = array<i64: 256, 32>}, {pipeline_mode = #tpu.pipeline_mode<synchronous>, transform_indices = @transform_2, window_bounds = array<i64: 1, 32>}, {transform_indices = @transform_3, window_bounds = array<i64: 128, 32>}]} {
    %c0 = arith.constant 0 : index
    %c0_0 = arith.constant 0 : index
    %0 = vector.load %arg1[%c0, %c0_0] : memref<128x256xf32, #tpu.memory_space<vmem>>, vector<128x256xf32>
    %c0_1 = arith.constant 0 : index
    %c0_2 = arith.constant 0 : index
    %1 = vector.load %arg2[%c0_1, %c0_2] : memref<256x32xf32, #tpu.memory_space<vmem>>, vector<256x32xf32>
    %cst = arith.constant dense<0.000000e+00> : vector<128x32xf32>
    %2 = tpu.matmul %0, %1, %cst {dimension_numbers = #tpu.dot_dimension_numbers<[1], [0], [0], [1], [0, 0, 1, 1], [], []>} : vector<128x256xf32>, vector<256x32xf32>, vector<128x32xf32> -> vector<128x32xf32>
    %c0_3 = arith.constant 0 : index
    %c0_4 = arith.constant 0 : index
    %3 = vector.load %arg3[%c0_3, %c0_4] : memref<1x32xf32, #tpu.memory_space<vmem>>, vector<1x32xf32>
    %4 = vector.broadcast %3 : vector<1x32xf32> to vector<128x32xf32>
    %5 = arith.addf %2, %4 : vector<128x32xf32>
    %cst_5 = arith.constant 0.000000e+00 : f32
    %6 = vector.broadcast %cst_5 : f32 to vector<128x32xf32>
    %7 = arith.maximumf %5, %6 : vector<128x32xf32>
    %c0_6 = arith.constant 0 : index
    %c0_7 = arith.constant 0 : index
    %8 = vector.load %arg4[%c0_6, %c0_7] : memref<128x32xf32, #tpu.memory_space<vmem>>, vector<128x32xf32>
    tpu.vector_store %arg4[%c0_6, %c0_7], %7 {strides = array<i32>} : memref<128x32xf32, #tpu.memory_space<vmem>>, vector<128x32xf32>,
    return
  }
  func.func @transform_0(%arg0: i32) -> (i32, i32) {
    %c0_i32 = arith.constant 0 : i32
    %c0_i32_0 = arith.constant 0 : i32
    return %arg0, %c0_i32 : i32, i32
  }
  func.func @transform_1(%arg0: i32) -> (i32, i32) {
    %c0_i32 = arith.constant 0 : i32
    %c0_i32_0 = arith.constant 0 : i32
    %c0_i32_1 = arith.constant 0 : i32
    return %c0_i32, %c0_i32_0 : i32, i32
  }
  func.func @transform_2(%arg0: i32) -> (i32, i32) {
    %c0_i32 = arith.constant 0 : i32
    %c0_i32_0 = arith.constant 0 : i32
    %c0_i32_1 = arith.constant 0 : i32
    return %c0_i32, %c0_i32_0 : i32, i32
  }
  func.func @transform_3(%arg0: i32) -> (i32, i32) {
    %c0_i32 = arith.constant 0 : i32
    %c0_i32_0 = arith.constant 0 : i32
    return %arg0, %c0_i32 : i32, i32
  }
}

module attributes {stable_mosaic.version = 11 : i64} {
  func.func @_matmul_bias_act_kernel(%arg0: i32, %arg1: memref<128x512xf32, #tpu.memory_space<vmem>>, %arg2: memref<512x64xf32, #tpu.memory_space<vmem>>, %arg3: memref<1x64xf32, #tpu.memory_space<vmem>>, %arg4: memref<128x64xf32, #tpu.memory_space<vmem>>) attributes {dimension_semantics = [#tpu.dimension_semantics<parallel>], iteration_bounds = array<i64: 2>, scalar_prefetch = 0 : i64, scratch_operands = 0 : i64, tpu.core_type = #tpu.core_type<tc>, window_params = [{transform_indices = @transform_0, window_bounds = array<i64: 128, 512>}, {pipeline_mode = #tpu.pipeline_mode<synchronous>, transform_indices = @transform_1, window_bounds = array<i64: 512, 64>}, {pipeline_mode = #tpu.pipeline_mode<synchronous>, transform_indices = @transform_2, window_bounds = array<i64: 1, 64>}, {transform_indices = @transform_3, window_bounds = array<i64: 128, 64>}]} {
    %c0 = arith.constant 0 : index
    %c0_0 = arith.constant 0 : index
    %0 = vector.load %arg1[%c0, %c0_0] : memref<128x512xf32, #tpu.memory_space<vmem>>, vector<128x512xf32>
    %c0_1 = arith.constant 0 : index
    %c0_2 = arith.constant 0 : index
    %1 = vector.load %arg2[%c0_1, %c0_2] : memref<512x64xf32, #tpu.memory_space<vmem>>, vector<512x64xf32>
    %cst = arith.constant dense<0.000000e+00> : vector<128x64xf32>
    %2 = tpu.matmul %0, %1, %cst {dimension_numbers = #tpu.dot_dimension_numbers<[1], [0], [0], [1], [0, 0, 1, 1], [], []>} : vector<128x512xf32>, vector<512x64xf32>, vector<128x64xf32> -> vector<128x64xf32>
    %c0_3 = arith.constant 0 : index
    %c0_4 = arith.constant 0 : index
    %3 = vector.load %arg3[%c0_3, %c0_4] : memref<1x64xf32, #tpu.memory_space<vmem>>, vector<1x64xf32>
    %4 = vector.broadcast %3 : vector<1x64xf32> to vector<128x64xf32>
    %5 = arith.addf %2, %4 : vector<128x64xf32>
    %cst_5 = arith.constant 0.000000e+00 : f32
    %6 = vector.broadcast %cst_5 : f32 to vector<128x64xf32>
    %7 = arith.maximumf %5, %6 : vector<128x64xf32>
    %c0_6 = arith.constant 0 : index
    %c0_7 = arith.constant 0 : index
    %8 = vector.load %arg4[%c0_6, %c0_7] : memref<128x64xf32, #tpu.memory_space<vmem>>, vector<128x64xf32>
    tpu.vector_store %arg4[%c0_6, %c0_7], %7 {strides = array<i32>} : memref<128x64xf32, #tpu.memory_space<vmem>>, vector<128x64xf32>,
    return
  }
  func.func @transform_0(%arg0: i32) -> (i32, i32) {
    %c0_i32 = arith.constant 0 : i32
    %c0_i32_0 = arith.constant 0 : i32
    return %arg0, %c0_i32 : i32, i32
  }
  func.func @transform_1(%arg0: i32) -> (i32, i32) {
    %c0_i32 = arith.constant 0 : i32
    %c0_i32_0 = arith.constant 0 : i32
    %c0_i32_1 = arith.constant 0 : i32
    return %c0_i32, %c0_i32_0 : i32, i32
  }
  func.func @transform_2(%arg0: i32) -> (i32, i32) {
    %c0_i32 = arith.constant 0 : i32
    %c0_i32_0 = arith.constant 0 : i32
    %c0_i32_1 = arith.constant 0 : i32
    return %c0_i32, %c0_i32_0 : i32, i32
  }
  func.func @transform_3(%arg0: i32) -> (i32, i32) {
    %c0_i32 = arith.constant 0 : i32
    %c0_i32_0 = arith.constant 0 : i32
    return %arg0, %c0_i32 : i32, i32
  }
}

module attributes {stable_mosaic.version = 11 : i64} {
  func.func @_matmul_bias_act_kernel(%arg0: i32, %arg1: memref<98x576xf32, #tpu.memory_space<vmem>>, %arg2: memref<576x64xf32, #tpu.memory_space<vmem>>, %arg3: memref<1x64xf32, #tpu.memory_space<vmem>>, %arg4: memref<98x64xf32, #tpu.memory_space<vmem>>) attributes {dimension_semantics = [#tpu.dimension_semantics<parallel>], iteration_bounds = array<i64: 1>, scalar_prefetch = 0 : i64, scratch_operands = 0 : i64, tpu.core_type = #tpu.core_type<tc>, window_params = [{transform_indices = @transform_0, window_bounds = array<i64: 98, 576>}, {pipeline_mode = #tpu.pipeline_mode<synchronous>, transform_indices = @transform_1, window_bounds = array<i64: 576, 64>}, {pipeline_mode = #tpu.pipeline_mode<synchronous>, transform_indices = @transform_2, window_bounds = array<i64: 1, 64>}, {transform_indices = @transform_3, window_bounds = array<i64: 98, 64>}]} {
    %c0 = arith.constant 0 : index
    %c0_0 = arith.constant 0 : index
    %0 = vector.load %arg1[%c0, %c0_0] : memref<98x576xf32, #tpu.memory_space<vmem>>, vector<98x576xf32>
    %c0_1 = arith.constant 0 : index
    %c0_2 = arith.constant 0 : index
    %1 = vector.load %arg2[%c0_1, %c0_2] : memref<576x64xf32, #tpu.memory_space<vmem>>, vector<576x64xf32>
    %cst = arith.constant dense<0.000000e+00> : vector<98x64xf32>
    %2 = tpu.matmul %0, %1, %cst {dimension_numbers = #tpu.dot_dimension_numbers<[1], [0], [0], [1], [0, 0, 1, 1], [], []>} : vector<98x576xf32>, vector<576x64xf32>, vector<98x64xf32> -> vector<98x64xf32>
    %c0_3 = arith.constant 0 : index
    %c0_4 = arith.constant 0 : index
    %3 = vector.load %arg3[%c0_3, %c0_4] : memref<1x64xf32, #tpu.memory_space<vmem>>, vector<1x64xf32>
    %4 = vector.broadcast %3 : vector<1x64xf32> to vector<98x64xf32>
    %5 = arith.addf %2, %4 : vector<98x64xf32>
    %cst_5 = arith.constant 0.000000e+00 : f32
    %6 = vector.broadcast %cst_5 : f32 to vector<98x64xf32>
    %7 = arith.maximumf %5, %6 : vector<98x64xf32>
    %c0_6 = arith.constant 0 : index
    %c0_7 = arith.constant 0 : index
    %8 = vector.load %arg4[%c0_6, %c0_7] : memref<98x64xf32, #tpu.memory_space<vmem>>, vector<98x64xf32>
    tpu.vector_store %arg4[%c0_6, %c0_7], %7 {strides = array<i32>} : memref<98x64xf32, #tpu.memory_space<vmem>>, vector<98x64xf32>,
    return
  }
  func.func @transform_0(%arg0: i32) -> (i32, i32) {
    %c0_i32 = arith.constant 0 : i32
    %c0_i32_0 = arith.constant 0 : i32
    return %arg0, %c0_i32 : i32, i32
  }
  func.func @transform_1(%arg0: i32) -> (i32, i32) {
    %c0_i32 = arith.constant 0 : i32
    %c0_i32_0 = arith.constant 0 : i32
    %c0_i32_1 = arith.constant 0 : i32
    return %c0_i32, %c0_i32_0 : i32, i32
  }
  func.func @transform_2(%arg0: i32) -> (i32, i32) {
    %c0_i32 = arith.constant 0 : i32
    %c0_i32_0 = arith.constant 0 : i32
    %c0_i32_1 = arith.constant 0 : i32
    return %c0_i32, %c0_i32_0 : i32, i32
  }
  func.func @transform_3(%arg0: i32) -> (i32, i32) {
    %c0_i32 = arith.constant 0 : i32
    %c0_i32_0 = arith.constant 0 : i32
    return %arg0, %c0_i32 : i32, i32
  }
}

module attributes {stable_mosaic.version = 11 : i64} {
  func.func @_mlp_head_kernel(%arg0: i32, %arg1: memref<2x3136xf32, #tpu.memory_space<vmem>>, %arg2: memref<3136x512xf32, #tpu.memory_space<vmem>>, %arg3: memref<1x512xf32, #tpu.memory_space<vmem>>, %arg4: memref<512x6xf32, #tpu.memory_space<vmem>>, %arg5: memref<1x6xf32, #tpu.memory_space<vmem>>, %arg6: memref<2x6xf32, #tpu.memory_space<vmem>>) attributes {dimension_semantics = [#tpu.dimension_semantics<parallel>], iteration_bounds = array<i64: 1>, scalar_prefetch = 0 : i64, scratch_operands = 0 : i64, tpu.core_type = #tpu.core_type<tc>, window_params = [{transform_indices = @transform_0, window_bounds = array<i64: 2, 3136>}, {pipeline_mode = #tpu.pipeline_mode<synchronous>, transform_indices = @transform_1, window_bounds = array<i64: 3136, 512>}, {pipeline_mode = #tpu.pipeline_mode<synchronous>, transform_indices = @transform_2, window_bounds = array<i64: 1, 512>}, {pipeline_mode = #tpu.pipeline_mode<synchronous>, transform_indices = @transform_3, window_bounds = array<i64: 512, 6>}, {pipeline_mode = #tpu.pipeline_mode<synchronous>, transform_indices = @transform_4, window_bounds = array<i64: 1, 6>}, {transform_indices = @transform_5, window_bounds = array<i64: 2, 6>}]} {
    %c0 = arith.constant 0 : index
    %c0_0 = arith.constant 0 : index
    %0 = vector.load %arg1[%c0, %c0_0] : memref<2x3136xf32, #tpu.memory_space<vmem>>, vector<2x3136xf32>
    %c0_1 = arith.constant 0 : index
    %c0_2 = arith.constant 0 : index
    %1 = vector.load %arg2[%c0_1, %c0_2] : memref<3136x512xf32, #tpu.memory_space<vmem>>, vector<3136x512xf32>
    %cst = arith.constant dense<0.000000e+00> : vector<2x512xf32>
    %2 = tpu.matmul %0, %1, %cst {dimension_numbers = #tpu.dot_dimension_numbers<[1], [0], [0], [1], [0, 0, 1, 1], [], []>} : vector<2x3136xf32>, vector<3136x512xf32>, vector<2x512xf32> -> vector<2x512xf32>
    %c0_3 = arith.constant 0 : index
    %c0_4 = arith.constant 0 : index
    %3 = vector.load %arg3[%c0_3, %c0_4] : memref<1x512xf32, #tpu.memory_space<vmem>>, vector<1x512xf32>
    %4 = vector.broadcast %3 : vector<1x512xf32> to vector<2x512xf32>
    %5 = arith.addf %2, %4 : vector<2x512xf32>
    %cst_5 = arith.constant 0.000000e+00 : f32
    %6 = vector.broadcast %cst_5 : f32 to vector<2x512xf32>
    %7 = arith.maximumf %5, %6 : vector<2x512xf32>
    %c0_6 = arith.constant 0 : index
    %c0_7 = arith.constant 0 : index
    %8 = vector.load %arg4[%c0_6, %c0_7] : memref<512x6xf32, #tpu.memory_space<vmem>>, vector<512x6xf32>
    %cst_8 = arith.constant dense<0.000000e+00> : vector<2x6xf32>
    %9 = tpu.matmul %7, %8, %cst_8 {dimension_numbers = #tpu.dot_dimension_numbers<[1], [0], [0], [1], [0, 0, 1, 1], [], []>} : vector<2x512xf32>, vector<512x6xf32>, vector<2x6xf32> -> vector<2x6xf32>
    %c0_9 = arith.constant 0 : index
    %c0_10 = arith.constant 0 : index
    %10 = vector.load %arg5[%c0_9, %c0_10] : memref<1x6xf32, #tpu.memory_space<vmem>>, vector<1x6xf32>
    %11 = vector.broadcast %10 : vector<1x6xf32> to vector<2x6xf32>
    %12 = arith.addf %9, %11 : vector<2x6xf32>
    %c0_11 = arith.constant 0 : index
    %c0_12 = arith.constant 0 : index
    %13 = vector.load %arg6[%c0_11, %c0_12] : memref<2x6xf32, #tpu.memory_space<vmem>>, vector<2x6xf32>
    tpu.vector_store %arg6[%c0_11, %c0_12], %12 {strides = array<i32>} : memref<2x6xf32, #tpu.memory_space<vmem>>, vector<2x6xf32>,
    return
  }
  func.func @transform_0(%arg0: i32) -> (i32, i32) {
    %c0_i32 = arith.constant 0 : i32
    %c0_i32_0 = arith.constant 0 : i32
    return %arg0, %c0_i32 : i32, i32
  }
  func.func @transform_1(%arg0: i32) -> (i32, i32) {
    %c0_i32 = arith.constant 0 : i32
    %c0_i32_0 = arith.constant 0 : i32
    %c0_i32_1 = arith.constant 0 : i32
    return %c0_i32, %c0_i32_0 : i32, i32
  }
  func.func @transform_2(%arg0: i32) -> (i32, i32) {
    %c0_i32 = arith.constant 0 : i32
    %c0_i32_0 = arith.constant 0 : i32
    %c0_i32_1 = arith.constant 0 : i32
    return %c0_i32, %c0_i32_0 : i32, i32
  }
  func.func @transform_3(%arg0: i32) -> (i32, i32) {
    %c0_i32 = arith.constant 0 : i32
    %c0_i32_0 = arith.constant 0 : i32
    %c0_i32_1 = arith.constant 0 : i32
    return %c0_i32, %c0_i32_0 : i32, i32
  }
  func.func @transform_4(%arg0: i32) -> (i32, i32) {
    %c0_i32 = arith.constant 0 : i32
    %c0_i32_0 = arith.constant 0 : i32
    %c0_i32_1 = arith.constant 0 : i32
    return %c0_i32, %c0_i32_0 : i32, i32
  }
  func.func @transform_5(%arg0: i32) -> (i32, i32) {
    %c0_i32 = arith.constant 0 : i32
    %c0_i32_0 = arith.constant 0 : i32
    return %arg0, %c0_i32 : i32, i32
  }
}

</mosaic_0001>

<bundles_post_ra>
// kernel: dqn_forward.4
= control target key start
LH: loop header
LB: loop body
LE: loop exit
PB: predicated region body
PF: predicated region fallthrough
CT: control target
= control target key end

     0   :  { %s965_s12 = smov 0   ;;  %s967_s13 = smov 0   ;;  %s1292_s0 = inlined_call_operand.vmem [shape: f32[800,256], index: 0, kind: input, shape index: {}]   ;;  %s1293_s1 = inlined_call_operand.vmem [shape: f32[256,32], index: 1, kind: input, shape index: {}]   ;;  %s1294_s2 = inlined_call_operand.vmem [shape: f32[1,32], index: 2, kind: input, shape index: {}]   ;;  %s1295_s3 = inlined_call_operand.vmem [shape: f32[800,32], index: 3, kind: output, shape index: {}]  }
   0x1   :  { %s969_s14 = smov 0  }
   0x2 LB: > { %s978_s15 = sadd.s32 4294967295, %s911_s14   ;;  %s980_s16 = sadd.s32 1, %s911_s14   ;;  %s911_s14 = sphi %s969_s14, %s1304_s14   ;;  %s907_s13 = sphi %s967_s13, %s1303_s13   ;;  %s903_s12 = sphi %s965_s12, %s1302_s12  }
   0x3   : > { %s85_s17 = ssub.s32 %s911_s14, %s980_s16  ;;  %s88_s18 = sadd.s32 1, %s907_s13 }
   0x4   : > { %p86_p0 = scmp.eq.s32.totalorder %s85_s17, 0  ;;  %p98_p1 = scmp.ne.s32.totalorder %s907_s13, %s903_s12 }
   0x5   : > { %p99_p2 = scmp.eq.s32.totalorder %s978_s15, 6  ;;  %p710_p3 = scmp.ge.s32.totalorder %s911_s14, 1 }
   0x6   : > { %s988_s19 = scalar_select %p86_p0, %s907_s13, %s88_s18  }
   0x7   : > { %p990_p4 = por %p99_p2, %p98_p1  ;;  %p149_p5 = scmp.lt.s32.totalorder %s911_s14, 8 }
   0x9   : > { %p150_p6 = pnand %p710_p3, %p149_p5 }
   0xa   : > { %s1043_s5 = sshll.u32 (!%p150_p6), %s978_s15, 4  ;;  %s175_s4 = sand.u32 (!%p150_p6), 1, %s903_s12  }
   0xb   : > { %153 = sbr.rel (%p150_p6) target bundleno = 291 (0x123), region = 32  ;;  %p184_p7 = scmp.lt.s32.totalorder (!%p150_p6), %s1043_s5, 99 }
   0xc   : > { %s711_s6 = sshll.u32 (!%p150_p6), %s175_s4, 7 }
  0x10   : > { %v247_v0 = vld [vmem:[%s1293_s1 + $0x78] sm:$0xff]  ;;  %v246_v1 = vld [vmem:[%s1293_s1 + $0x70] sm:$0xff]  ;;  %v245_v4 = vld [vmem:[%s1293_s1 + $0x68] sm:$0xff]  ;;  %s185_s24 = scalar_select %p184_p7, %s1043_s5, 99  ;;  %vm414_vm0 = vcmask 261120  }
  0x11   : > { %v263_v2 = vld [vmem:[%s1293_s1 + $0xf8] sm:$0xff]  ;;  %736 = vmatpush.msra.mxu2 %v247_v0  ;;  %v262_v3 = vld [vmem:[%s1293_s1 + $0xf0] sm:$0xff]  ;;  %268 = vmatpush.msra.mxu0 %v247_v0  ;;  %v261_v5 = vld [vmem:[%s1293_s1 + $0xe8] sm:$0xff]  ;;  %s439_s12 = ssub.s32 (%p990_p4), 100, %s1043_s5  ;;  %s733_s8 = sshll.u32 (%p990_p4), %s978_s15, 7 }
  0x12   : > { %752 = vmatpush.msra.mxu3 %v263_v2  ;;  %333 = vmatpush.msra.mxu1 %v263_v2  ;;  %v244_v6 = vld [vmem:[%s1293_s1 + $0x60] sm:$0xff]  ;;  %v243_v8 = vld [vmem:[%s1293_s1 + $0x58] sm:$0xff]  ;;  %v242_v10 = vld [vmem:[%s1293_s1 + $0x50] sm:$0xff]  ;;  %s732_s7 = sshll.u32 %s185_s24, 4  ;;  %p440_p8 = scmp.lt.s32.totalorder (%p990_p4), %s439_s12, 16 }
  0x13   : > { %737 = vmatpush.msra.mxu2 %v246_v1  ;;  %269 = vmatpush.msra.mxu0 %v246_v1  ;;  %v260_v7 = vld [vmem:[%s1293_s1 + $0xe0] sm:$0xff]  ;;  %v259_v9 = vld [vmem:[%s1293_s1 + $0xd8] sm:$0xff]  ;;  %v258_v11 = vld [vmem:[%s1293_s1 + $0xd0] sm:$0xff]  ;;  %s1092_s24 = scalar_lea.vmem %s1292_s0, %s732_s7  ;;  %s1140_s7 = scalar_lea.vmem [#allocation2], %s711_s6  }
  0x14   : > { %753 = vmatpush.msra.mxu3 %v262_v3  ;;  %334 = vmatpush.msra.mxu1 %v262_v3  ;;  %v241_v12 = vld [vmem:[%s1293_s1 + $0x48] sm:$0xff]  ;;  %v240_v14 = vld [vmem:[%s1293_s1 + $0x40] sm:$0xff]  ;;  %v239_v16 = vld [vmem:[%s1293_s1 + $0x38] sm:$0xff]  ;;  %s1195_s11 = scalar_lea.vmem (%p990_p4), %s1295_s3, %s733_s8  }
  0x15   : > { %738 = vmatpush.msra.mxu2 %v245_v4  ;;  %270 = vmatpush.msra.mxu0 %v245_v4  ;;  %v257_v13 = vld [vmem:[%s1293_s1 + $0xc8] sm:$0xff]  ;;  %v256_v15 = vld [vmem:[%s1293_s1 + $0xc0] sm:$0xff]  ;;  %v255_v17 = vld [vmem:[%s1293_s1 + $0xb8] sm:$0xff] }
  0x16   : > { %754 = vmatpush.msra.mxu3 %v261_v5  ;;  %335 = vmatpush.msra.mxu1 %v261_v5  ;;  %v238_v18 = vld [vmem:[%s1293_s1 + $0x30] sm:$0xff]  ;;  %v237_v20 = vld [vmem:[%s1293_s1 + $0x28] sm:$0xff]  ;;  %v236_v22 = vld [vmem:[%s1293_s1 + $0x20] sm:$0xff] }
  0x17   : > { %739 = vmatpush.msra.mxu2 %v244_v6  ;;  %271 = vmatpush.msra.mxu0 %v244_v6  ;;  %v254_v19 = vld [vmem:[%s1293_s1 + $0xb0] sm:$0xff]  ;;  %v253_v21 = vld [vmem:[%s1293_s1 + $0xa8] sm:$0xff]  ;;  %v252_v23 = vld [vmem:[%s1293_s1 + $0xa0] sm:$0xff] }
  0x18   : > { %755 = vmatpush.msra.mxu3 %v260_v7  ;;  %336 = vmatpush.msra.mxu1 %v260_v7  ;;  %v235_v24 = vld [vmem:[%s1293_s1 + $0x18] sm:$0xff]  ;;  %v234_v26 = vld [vmem:[%s1293_s1 + $0x10] sm:$0xff]  ;;  %v233_v28 = vld [vmem:[%s1293_s1 + $0x8] sm:$0xff] }
  0x19   : > { %740 = vmatpush.msra.mxu2 %v243_v8  ;;  %272 = vmatpush.msra.mxu0 %v243_v8  ;;  %v251_v25 = vld [vmem:[%s1293_s1 + $0x98] sm:$0xff]  ;;  %v250_v27 = vld [vmem:[%s1293_s1 + $0x90] sm:$0xff]  ;;  %v249_v29 = vld [vmem:[%s1293_s1 + $0x88] sm:$0xff] }
  0x1a   : > { %756 = vmatpush.msra.mxu3 %v259_v9  ;;  %337 = vmatpush.msra.mxu1 %v259_v9  ;;  %v232_v30 = vld [vmem:[%s1293_s1] sm:$0xff]  ;;  %v217_v33 = vld [vmem:[%s1092_s24 + $0x88] sm:$0xff]  ;;  %v218_v36 = vld [vmem:[%s1092_s24 + $0x90] sm:$0xff] }
  0x1b   : > { %741 = vmatpush.msra.mxu2 %v242_v10  ;;  %273 = vmatpush.msra.mxu0 %v242_v10  ;;  %v248_v31 = vld [vmem:[%s1293_s1 + $0x80] sm:$0xff]  ;;  %v201_v35 = vld [vmem:[%s1092_s24 + $0x8] sm:$0xff]  ;;  %v219_v37 = vld [vmem:[%s1092_s24 + $0x98] sm:$0xff] }
  0x1c   : > { %757 = vmatpush.msra.mxu3 %v258_v11  ;;  %338 = vmatpush.msra.mxu1 %v258_v11  ;;  %v216_v32 = vld [vmem:[%s1092_s24 + $0x80] sm:$0xff]  ;;  %v202_v38 = vld [vmem:[%s1092_s24 + $0x10] sm:$0xff]  ;;  %v203_v39 = vld [vmem:[%s1092_s24 + $0x18] sm:$0xff] }
  0x1d   : > { %742 = vmatpush.msra.mxu2 %v241_v12  ;;  %274 = vmatpush.msra.mxu0 %v241_v12  ;;  %v200_v34 = vld [vmem:[%s1092_s24] sm:$0xff]  ;;  %v221_v41 = vld [vmem:[%s1092_s24 + $0xa8] sm:$0xff]  ;;  %v222_v44 = vld [vmem:[%s1092_s24 + $0xb0] sm:$0xff] }
  0x1e   : > { %758 = vmatpush.msra.mxu3 %v257_v13  ;;  %339 = vmatpush.msra.mxu1 %v257_v13  ;;  %v220_v40 = vld [vmem:[%s1092_s24 + $0xa0] sm:$0xff]  ;;  %v205_v43 = vld [vmem:[%s1092_s24 + $0x28] sm:$0xff]  ;;  %v223_v45 = vld [vmem:[%s1092_s24 + $0xb8] sm:$0xff] }
  0x1f   : > { %743 = vmatpush.msra.mxu2 %v240_v14  ;;  %275 = vmatpush.msra.mxu0 %v240_v14  ;;  %v204_v42 = vld [vmem:[%s1092_s24 + $0x20] sm:$0xff]  ;;  %v206_v46 = vld [vmem:[%s1092_s24 + $0x30] sm:$0xff]  ;;  %v207_v47 = vld [vmem:[%s1092_s24 + $0x38] sm:$0xff] }
  0x20   : > { %759 = vmatpush.msra.mxu3 %v256_v15  ;;  %340 = vmatpush.msra.mxu1 %v256_v15  ;;  %v224_v48 = vld [vmem:[%s1092_s24 + $0xc0] sm:$0xff]  ;;  %v225_v49 = vld [vmem:[%s1092_s24 + $0xc8] sm:$0xff]  ;;  %v226_v52 = vld [vmem:[%s1092_s24 + $0xd0] sm:$0xff] }
  0x21   : > { %744 = vmatpush.msra.mxu2 %v239_v16  ;;  %276 = vmatpush.msra.mxu0 %v239_v16  ;;  %v208_v50 = vld [vmem:[%s1092_s24 + $0x40] sm:$0xff]  ;;  %v209_v51 = vld [vmem:[%s1092_s24 + $0x48] sm:$0xff]  ;;  %v227_v53 = vld [vmem:[%s1092_s24 + $0xd8] sm:$0xff] }
  0x22   : > { %760 = vmatpush.msra.mxu3 %v255_v17  ;;  %341 = vmatpush.msra.mxu1 %v255_v17  ;;  %v210_v54 = vld [vmem:[%s1092_s24 + $0x50] sm:$0xff]  ;;  %v211_v55 = vld [vmem:[%s1092_s24 + $0x58] sm:$0xff]  ;;  %v228_v56 = vld [vmem:[%s1092_s24 + $0xe0] sm:$0xff] }
  0x23   : > { %745 = vmatpush.msra.mxu2 %v238_v18  ;;  %277 = vmatpush.msra.mxu0 %v238_v18  ;;  %v229_v57 = vld [vmem:[%s1092_s24 + $0xe8] sm:$0xff]  ;;  %v212_v58 = vld [vmem:[%s1092_s24 + $0x60] sm:$0xff]  ;;  %v230_v60 = vld [vmem:[%s1092_s24 + $0xf0] sm:$0xff] }
  0x24   : > { %761 = vmatpush.msra.mxu3 %v254_v19  ;;  %342 = vmatpush.msra.mxu1 %v254_v19  ;;  %v213_v59 = vld [vmem:[%s1092_s24 + $0x68] sm:$0xff]  ;;  %v231_v61 = vld [vmem:[%s1092_s24 + $0xf8] sm:$0xff]  ;;  %v214_v62 = vld [vmem:[%s1092_s24 + $0x70] sm:$0xff] }
  0x25   : > { %746 = vmatpush.msra.mxu2 %v237_v20  ;;  %278 = vmatpush.msra.mxu0 %v237_v20  ;;  %v215_v63 = vld [vmem:[%s1092_s24 + $0x78] sm:$0xff]  ;;  %v1135_v0 = vld [vmem:[%s1294_s2] ss:$0 sm:$0xff] }
  0x26   : > { %762 = vmatpush.msra.mxu3 %v253_v21  ;;  %343 = vmatpush.msra.mxu1 %v253_v21 }
  0x27   : > { %747 = vmatpush.msra.mxu2 %v236_v22  ;;  %279 = vmatpush.msra.mxu0 %v236_v22 }
  0x28   : > { %763 = vmatpush.msra.mxu3 %v252_v23  ;;  %344 = vmatpush.msra.mxu1 %v252_v23 }
  0x29   : > { %748 = vmatpush.msra.mxu2 %v235_v24  ;;  %280 = vmatpush.msra.mxu0 %v235_v24 }
  0x2a   : > { %764 = vmatpush.msra.mxu3 %v251_v25  ;;  %345 = vmatpush.msra.mxu1 %v251_v25 }
  0x2b   : > { %749 = vmatpush.msra.mxu2 %v234_v26  ;;  %281 = vmatpush.msra.mxu0 %v234_v26 }
  0x2c   : > { %765 = vmatpush.msra.mxu3 %v250_v27  ;;  %346 = vmatpush.msra.mxu1 %v250_v27 }
  0x2d   : > { %750 = vmatpush.msra.mxu2 %v233_v28  ;;  %282 = vmatpush.msra.mxu0 %v233_v28 }
  0x2e   : > { %766 = vmatpush.msra.mxu3 %v249_v29  ;;  %347 = vmatpush.msra.mxu1 %v249_v29 }
  0x2f   : > { %751 = vmatpush.msra.mxu2 %v232_v30  ;;  %283 = vmatpush.msra.mxu0 %v232_v30 }
  0x30   : > { %767 = vmatpush.msra.mxu3 %v248_v31  ;;  %308 = vmatmul.f32.vlgmr.msra.gmra.mxu2 %v216_v32 }
  0x31   : > { %373 = vmatmul.f32.vlgmr.msra.gmra.mxu3 %v217_v33  ;;  %348 = vmatpush.msra.mxu1 %v248_v31 }
  0x32   : > { %284 = vmatmul.f32.vlgmr.msra.gmra.mxu0 %v200_v34  ;;  %349 = vmatmul.f32.vlgmr.msra.gmra.mxu1 %v201_v35 }
  0x38   : > { %311 = vmatmul.f32.gmra.mxu2 %v218_v36 }
  0x39   : > { %376 = vmatmul.f32.gmra.mxu3 %v219_v37 }
  0x3a   : > { %287 = vmatmul.f32.gmra.mxu0 %v202_v38  ;;  %352 = vmatmul.f32.gmra.mxu1 %v203_v39 }
  0x40   : > { %314 = vmatmul.f32.gmra.mxu2 %v220_v40 }
  0x41   : > { %379 = vmatmul.f32.gmra.mxu3 %v221_v41 }
  0x42   : > { %290 = vmatmul.f32.gmra.mxu0 %v204_v42  ;;  %355 = vmatmul.f32.gmra.mxu1 %v205_v43 }
  0x48   : > { %317 = vmatmul.f32.gmra.mxu2 %v222_v44 }
  0x49   : > { %382 = vmatmul.f32.gmra.mxu3 %v223_v45 }
  0x4a   : > { %293 = vmatmul.f32.gmra.mxu0 %v206_v46  ;;  %358 = vmatmul.f32.gmra.mxu1 %v207_v47 }
  0x50   : > { %320 = vmatmul.f32.gmra.mxu2 %v224_v48 }
  0x51   : > { %385 = vmatmul.f32.gmra.mxu3 %v225_v49 }
  0x52   : > { %296 = vmatmul.f32.gmra.mxu0 %v208_v50  ;;  %361 = vmatmul.f32.gmra.mxu1 %v209_v51 }
  0x58   : > { %323 = vmatmul.f32.gmra.mxu2 %v226_v52 }
  0x59   : > { %388 = vmatmul.f32.gmra.mxu3 %v227_v53 }
  0x5a   : > { %299 = vmatmul.f32.gmra.mxu0 %v210_v54  ;;  %364 = vmatmul.f32.gmra.mxu1 %v211_v55 }
  0x60   : > { %326 = vmatmul.f32.gmra.mxu2 %v228_v56 }
  0x61   : > { %391 = vmatmul.f32.gmra.mxu3 %v229_v57 }
  0x62   : > { %302 = vmatmul.f32.gmra.mxu0 %v212_v58  ;;  %367 = vmatmul.f32.gmra.mxu1 %v213_v59 }
  0x68   : > { %329 = vmatmul.f32.gmra.mxu2 %v230_v60 }
  0x69   : > { %394 = vmatmul.f32.gmra.mxu3 %v231_v61 }
  0x6a   : > { %305 = vmatmul.f32.gmra.mxu0 %v214_v62  ;;  %370 = vmatmul.f32.gmra.mxu1 %v215_v63 }
  0xaf   : > { %v285_v1 = vpop.f32.mrf.mxu0  ;;  %v350_v2 = vpop.f32.mrf.mxu1 }
  0xb0   : > { %v286_v3 = vadd.f32 %v1135_v0, %v285_v1 }
  0xb2   : > { %v351_v4 = vadd.f32 %v350_v2, %v286_v3 }
  0xb3   : > { %v309_v5 = vpop.f32.mrf.mxu2 }
  0xb4   : > { %v374_v6 = vpop.f32.mrf.mxu3  ;;  %v310_v7 = vadd.f32 %v1135_v0, %v309_v5  ;;  %v398_v8 = vmax.f32 %v351_v4, 0.0 }
  0xb6   : > { %415 = vst.msk [vmem:[%s1140_s7] sm:$0xff] %vm414_vm0, %v398_v8  ;;  %v375_v9 = vadd.f32 %v374_v6, %v310_v7 }
  0xb7   : > { %v288_v10 = vpop.f32.mrf.mxu0  ;;  %v353_v11 = vpop.f32.mrf.mxu1 }
  0xb8   : > { %v406_v12 = vmax.f32 %v375_v9, 0.0  ;;  %v289_v13 = vadd.f32 %v1135_v0, %v288_v10 }
  0xba   : > { %423 = vst.msk [vmem:[%s1140_s7 + $0x40] sm:$0xff] %vm414_vm0, %v406_v12  ;;  %v354_v14 = vadd.f32 %v353_v11, %v289_v13 }
  0xbb   : > { %v312_v15 = vpop.f32.mrf.mxu2 }
  0xbc   : > { %v377_v16 = vpop.f32.mrf.mxu3  ;;  %v313_v17 = vadd.f32 %v1135_v0, %v312_v15  ;;  %v399_v18 = vmax.f32 %v354_v14, 0.0 }
  0xbe   : > { %416 = vst.msk [vmem:[%s1140_s7 + $0x8] sm:$0xff] %vm414_vm0, %v399_v18  ;;  %v378_v19 = vadd.f32 %v377_v16, %v313_v17 }
  0xbf   : > { %v291_v20 = vpop.f32.mrf.mxu0  ;;  %v356_v21 = vpop.f32.mrf.mxu1 }
  0xc0   : > { %v407_v22 = vmax.f32 %v378_v19, 0.0  ;;  %v292_v23 = vadd.f32 %v1135_v0, %v291_v20 }
  0xc2   : > { %424 = vst.msk [vmem:[%s1140_s7 + $0x48] sm:$0xff] %vm414_vm0, %v407_v22  ;;  %v357_v24 = vadd.f32 %v356_v21, %v292_v23 }
  0xc3   : > { %v315_v25 = vpop.f32.mrf.mxu2 }
  0xc4   : > { %v380_v26 = vpop.f32.mrf.mxu3  ;;  %v316_v27 = vadd.f32 %v1135_v0, %v315_v25  ;;  %v400_v28 = vmax.f32 %v357_v24, 0.0 }
  0xc6   : > { %417 = vst.msk [vmem:[%s1140_s7 + $0x10] sm:$0xff] %vm414_vm0, %v400_v28  ;;  %v381_v29 = vadd.f32 %v380_v26, %v316_v27 }
  0xc7   : > { %v294_v30 = vpop.f32.mrf.mxu0  ;;  %v359_v31 = vpop.f32.mrf.mxu1 }
  0xc8   : > { %v408_v32 = vmax.f32 %v381_v29, 0.0  ;;  %v295_v33 = vadd.f32 %v1135_v0, %v294_v30 }
  0xca   : > { %425 = vst.msk [vmem:[%s1140_s7 + $0x50] sm:$0xff] %vm414_vm0, %v408_v32  ;;  %v360_v34 = vadd.f32 %v359_v31, %v295_v33 }
  0xcb   : > { %v318_v35 = vpop.f32.mrf.mxu2 }
  0xcc   : > { %v383_v36 = vpop.f32.mrf.mxu3  ;;  %v319_v37 = vadd.f32 %v1135_v0, %v318_v35  ;;  %v401_v38 = vmax.f32 %v360_v34, 0.0 }
  0xce   : > { %418 = vst.msk [vmem:[%s1140_s7 + $0x18] sm:$0xff] %vm414_vm0, %v401_v38  ;;  %v384_v39 = vadd.f32 %v383_v36, %v319_v37 }
  0xcf   : > { %v297_v40 = vpop.f32.mrf.mxu0  ;;  %v362_v41 = vpop.f32.mrf.mxu1 }
  0xd0   : > { %v409_v42 = vmax.f32 %v384_v39, 0.0  ;;  %v298_v43 = vadd.f32 %v1135_v0, %v297_v40 }
  0xd2   : > { %426 = vst.msk [vmem:[%s1140_s7 + $0x58] sm:$0xff] %vm414_vm0, %v409_v42  ;;  %v363_v44 = vadd.f32 %v362_v41, %v298_v43 }
  0xd3   : > { %v321_v45 = vpop.f32.mrf.mxu2 }
  0xd4   : > { %v386_v46 = vpop.f32.mrf.mxu3  ;;  %v322_v47 = vadd.f32 %v1135_v0, %v321_v45  ;;  %v402_v48 = vmax.f32 %v363_v44, 0.0 }
  0xd6   : > { %419 = vst.msk [vmem:[%s1140_s7 + $0x20] sm:$0xff] %vm414_vm0, %v402_v48  ;;  %v387_v49 = vadd.f32 %v386_v46, %v322_v47 }
  0xd7   : > { %v300_v50 = vpop.f32.mrf.mxu0  ;;  %v365_v51 = vpop.f32.mrf.mxu1 }
  0xd8   : > { %v410_v52 = vmax.f32 %v387_v49, 0.0  ;;  %v301_v53 = vadd.f32 %v1135_v0, %v300_v50 }
  0xda   : > { %427 = vst.msk [vmem:[%s1140_s7 + $0x60] sm:$0xff] %vm414_vm0, %v410_v52  ;;  %v366_v54 = vadd.f32 %v365_v51, %v301_v53 }
  0xdb   : > { %v324_v55 = vpop.f32.mrf.mxu2 }
  0xdc   : > { %v389_v56 = vpop.f32.mrf.mxu3  ;;  %v325_v57 = vadd.f32 %v1135_v0, %v324_v55  ;;  %v403_v58 = vmax.f32 %v366_v54, 0.0 }
  0xde   : > { %420 = vst.msk [vmem:[%s1140_s7 + $0x28] sm:$0xff] %vm414_vm0, %v403_v58  ;;  %v390_v59 = vadd.f32 %v389_v56, %v325_v57 }
  0xdf   : > { %v303_v60 = vpop.f32.mrf.mxu0  ;;  %v368_v61 = vpop.f32.mrf.mxu1 }
  0xe0   : > { %v411_v62 = vmax.f32 %v390_v59, 0.0  ;;  %v304_v63 = vadd.f32 %v1135_v0, %v303_v60 }
  0xe2   : > { %428 = vst.msk [vmem:[%s1140_s7 + $0x68] sm:$0xff] %vm414_vm0, %v411_v62  ;;  %v369_v1 = vadd.f32 %v368_v61, %v304_v63 }
  0xe3   : > { %v327_v2 = vpop.f32.mrf.mxu2 }
  0xe4   : > { %v392_v3 = vpop.f32.mrf.mxu3  ;;  %v328_v4 = vadd.f32 %v1135_v0, %v327_v2  ;;  %v404_v5 = vmax.f32 %v369_v1, 0.0 }
  0xe6   : > { %421 = vst.msk [vmem:[%s1140_s7 + $0x30] sm:$0xff] %vm414_vm0, %v404_v5  ;;  %v393_v6 = vadd.f32 %v392_v3, %v328_v4 }
  0xe7   : > { %v306_v7 = vpop.f32.mrf.mxu0  ;;  %v371_v8 = vpop.f32.mrf.mxu1 }
  0xe8   : > { %v412_v9 = vmax.f32 %v393_v6, 0.0  ;;  %v307_v10 = vadd.f32 %v1135_v0, %v306_v7 }
  0xea   : > { %429 = vst.msk [vmem:[%s1140_s7 + $0x70] sm:$0xff] %vm414_vm0, %v412_v9  ;;  %v372_v11 = vadd.f32 %v371_v8, %v307_v10 }
  0xeb   : > { %v330_v12 = vpop.f32.mrf.mxu2 }
  0xec   : > { %v395_v13 = vpop.f32.mrf.mxu3  ;;  %v331_v14 = vadd.f32 %v1135_v0, %v330_v12  ;;  %v405_v15 = vmax.f32 %v372_v11, 0.0 }
  0xee   : > { %422 = vst.msk [vmem:[%s1140_s7 + $0x38] sm:$0xff] %vm414_vm0, %v405_v15  ;;  %v396_v16 = vadd.f32 %v395_v13, %v331_v14  ;;  %437 = sbr.rel (!%p990_p4) target bundleno = 291 (0x123), region = 36 }
  0xf0   : > { %v413_v17 = vmax.f32 %v396_v16, 0.0 }
  0xf2   : > { %430 = vst.msk [vmem:[%s1140_s7 + $0x78] sm:$0xff] %vm414_vm0, %v413_v17 }
  0xf3   : > { %s1306_s12 = smov (!%p440_p8, %s439_s12), 16 }
  0xf4   : > { %s717_s14 = sshll.u32 %s1306_s12, 3 }
  0xf5   : > { %p720_p9 = scmp.eq.s32.totalorder %s717_s14, 0 }
  0xf6   : > { %s1201_s17 = sshrl.u32 (!%p720_p9), %s1306_s12, 4 }
  0xf7   : > { %448 = sbr.rel (%p720_p9) target bundleno = 291 (0x123), region = 40  ;;  %p721_p10 = scmp.le.s32.totalorder (!%p720_p9), %s1201_s17, 0 }
  0xfc   : > { %663 = sbr.rel (%p721_p10) target bundleno = 274 (0x112), region = 116  ;;  %s1297_s15 = smov (!%p721_p10), %s1195_s11 }
  0xfd   : > { %s1298_s20 = smov (!%p721_p10), %s1140_s7  ;;  %s1210_s5 = smov (!%p721_p10), 0  }
  0xfe   : > { %s1212_s18 = smov (!%p721_p10), 0  }
 0x101 LB: >> { %v541_v0 = vld [vmem:[%s919_s20] sm:$0xff]  ;;  %v543_v18 = vld [vmem:[%s919_s20 + $0x8] sm:$0xff]  ;;  %v545_v19 = vld [vmem:[%s919_s20 + $0x10] sm:$0xff]  ;;  %s573_s21 = sadd.s32 1, %s923_s5  ;;  %s535_s18 = sadd.s32 1, %s927_s18   ;;  %s927_s18 = sphi %s1212_s18, %s535_s18   ;;  %s923_s5 = sphi %s1210_s5, %s1301_s5   ;;  %s919_s20 = sphi %s1298_s20, %s1300_s20   ;;  %s915_s15 = sphi %s1297_s15, %s1299_s15  }
 0x102   : >> { %542 = vst [vmem:[%s915_s15] sm:$0xff] %v541_v0  ;;  %v547_v20 = vld [vmem:[%s919_s20 + $0x18] sm:$0xff]  ;;  %p574_p11 = scmp.ge.s32.totalorder %s573_s21, %s1201_s17  ;;  %v549_v21 = vld [vmem:[%s919_s20 + $0x20] sm:$0xff]  ;;  %v551_v22 = vld [vmem:[%s919_s20 + $0x28] sm:$0xff]  ;;  %p534_p12 = scmp.ge.s32.totalorder %s535_s18, %s1201_s17 }
 0x103   : >> { %544 = vst [vmem:[%s915_s15 + $0x8] sm:$0xff] %v543_v18  ;;  %v553_v23 = vld [vmem:[%s919_s20 + $0x30] sm:$0xff]  ;;  %v555_v24 = vld [vmem:[%s919_s20 + $0x38] sm:$0xff]  ;;  %v557_v25 = vld [vmem:[%s919_s20 + $0x40] sm:$0xff] }
 0x104   : >> { %546 = vst [vmem:[%s915_s15 + $0x10] sm:$0xff] %v545_v19  ;;  %s1308_s21 = smov (%p574_p11, %s573_s21), 0  ;;  %v559_v26 = vld [vmem:[%s919_s20 + $0x48] sm:$0xff]  ;;  %v561_v27 = vld [vmem:[%s919_s20 + $0x50] sm:$0xff]  ;;  %v563_v28 = vld [vmem:[%s919_s20 + $0x58] sm:$0xff] }
 0x105   : >> { %548 = vst [vmem:[%s915_s15 + $0x18] sm:$0xff] %v547_v20  ;;  %s722_s22 = sshll.u32 %s1308_s21, 7  ;;  %v565_v29 = vld [vmem:[%s919_s20 + $0x60] sm:$0xff]  ;;  %v567_v30 = vld [vmem:[%s919_s20 + $0x68] sm:$0xff]  ;;  %v569_v31 = vld [vmem:[%s919_s20 + $0x70] sm:$0xff]  ;;  %s1301_s5 = smov %s1308_s21 }
 0x106   : >> { %550 = vst [vmem:[%s915_s15 + $0x20] sm:$0xff] %v549_v21  ;;  %s578_s23 = scalar_lea.vmem %s1140_s7, %s722_s22 [#allocation2]   ;;  %s579_s24 = scalar_lea.vmem %s1195_s11, %s722_s22   ;;  %v571_v32 = vld [vmem:[%s919_s20 + $0x78] sm:$0xff] }
 0x107   : >> { %552 = vst [vmem:[%s915_s15 + $0x28] sm:$0xff] %v551_v22  ;;  %s1300_s20 = smov %s578_s23 }
 0x108   : >> { %554 = vst [vmem:[%s915_s15 + $0x30] sm:$0xff] %v553_v23 }
 0x109   : >> { %556 = vst [vmem:[%s915_s15 + $0x38] sm:$0xff] %v555_v24 }
 0x10a   : >> { %558 = vst [vmem:[%s915_s15 + $0x40] sm:$0xff] %v557_v25 }
 0x10b   : >> { %560 = vst [vmem:[%s915_s15 + $0x48] sm:$0xff] %v559_v26 }
 0x10c   : >> { %562 = vst [vmem:[%s915_s15 + $0x50] sm:$0xff] %v561_v27 }
 0x10d   : >> { %564 = vst [vmem:[%s915_s15 + $0x58] sm:$0xff] %v563_v28  ;;  %537 = sbr.rel (!%p534_p12) target bundleno = 257 (0x101), region = 122 }
 0x10e   : >> { %566 = vst [vmem:[%s915_s15 + $0x60] sm:$0xff] %v565_v29 }
 0x10f   : >> { %568 = vst [vmem:[%s915_s15 + $0x68] sm:$0xff] %v567_v30 }
 0x110   : >> { %570 = vst [vmem:[%s915_s15 + $0x70] sm:$0xff] %v569_v31 }
 0x111   : >> { %572 = vst [vmem:[%s915_s15 + $0x78] sm:$0xff] %v571_v32  ;;  %s1299_s15 = smov %s579_s24 }
 0x112 PF: > { %s1274_s25 = sand.u32 15, %s1306_s12   ;;  %s734_s26 = sshll.u32 %s1201_s17, 7 }
 0x113   : > { %s584_s27 = scalar_lea.vmem %s1140_s7, %s734_s26 [#allocation2]   ;;  %s586_s28 = scalar_lea.vmem %s1195_s11, %s734_s26  }
 0x114   : > { %p727_p13 = scmp.le.s32.totalorder %s1274_s25, 0 }
 0x115   : > { %s929_s29 = smov (!%p727_p13), %s586_s28   ;;  %s933_s30 = smov (!%p727_p13), %s584_s27  }
 0x116   : > { %677 = sbr.rel (%p727_p13) target bundleno = 291 (0x123), region = 127  ;;  %s937_s4 = smov (!%p727_p13), 0  }
 0x117   : > { %s941_s6 = smov (!%p727_p13), 0  }
 0x11b LB: >> { %v596_v33 = vld [vmem:[%s935_s30] sm:$0xff]  ;;  %s598_s12 = sadd.s32 1, %s939_s4  ;;  %s590_s6 = sadd.s32 1, %s943_s6   ;;  %s943_s6 = sphi %s941_s6, %s590_s6   ;;  %s939_s4 = sphi %s937_s4, %s938_s4   ;;  %s935_s30 = sphi %s933_s30, %s603_s30   ;;  %s931_s29 = sphi %s929_s29, %s604_s29  }
 0x11c   : >> { %597 = vst [vmem:[%s931_s29] sm:$0xff] %v596_v33  ;;  %p599_p0 = scmp.ge.s32.totalorder %s598_s12, %s1274_s25  ;;  %p589_p1 = scmp.ge.s32.totalorder %s590_s6, %s1274_s25 }
 0x11e   : >> { %s1310_s12 = smov (%p599_p0, %s598_s12), 0  ;;  %592 = sbr.rel (!%p589_p1) target bundleno = 283 (0x11b), region = 133 }
 0x11f   : >> { %s728_s7 = sshll.u32 %s1310_s12, 3  ;;  %s938_s4 = smov %s1310_s12  }
 0x120   : >> { %s603_s30 = scalar_lea.vmem %s584_s27, %s728_s7 [#allocation2]   ;;  %s604_s29 = scalar_lea.vmem %s586_s28, %s728_s7  }
 0x123 PF: > { %p10_p2 = scmp.ge.s32.totalorder %s980_s16, 9   ;;  %s1302_s12 = smov %s907_s13 }
 0x124   : > { %s1303_s13 = smov %s988_s19  ;;  %s1304_s14 = smov %s980_s16 }
 0x125   :  { %12 = sbr.rel (!%p10_p2) target bundleno = 2 (0x2), region = 144 }

// kernel: dqn_forward.5
= control target key start
LH: loop header
LB: loop body
LE: loop exit
PB: predicated region body
PF: predicated region fallthrough
CT: control target
= control target key end

     0   :  { %s1127_s12 = smov 0   ;;  %s1129_s13 = smov 0   ;;  %s1587_s0 = inlined_call_operand.vmem [shape: f32[162,512], index: 0, kind: input, shape index: {}]   ;;  %s1588_s1 = inlined_call_operand.vmem [shape: f32[512,64], index: 1, kind: input, shape index: {}]   ;;  %s1589_s2 = inlined_call_operand.vmem [shape: f32[1,64], index: 2, kind: input, shape index: {}]   ;;  %s1590_s3 = inlined_call_operand.vmem [shape: f32[162,64], index: 3, kind: output, shape index: {}]  }
   0x1   :  { %s1131_s14 = smov 0  }
   0x2 LB: > { %s1140_s15 = sadd.s32 4294967295, %s1073_s14   ;;  %s1142_s16 = sadd.s32 1, %s1073_s14   ;;  %s1073_s14 = sphi %s1131_s14, %s1599_s14   ;;  %s1069_s13 = sphi %s1129_s13, %s1598_s13   ;;  %s1065_s12 = sphi %s1127_s12, %s1597_s12  }
   0x3   : > { %s85_s17 = ssub.s32 %s1073_s14, %s1142_s16  ;;  %s88_s18 = sadd.s32 1, %s1069_s13 }
   0x4   : > { %p86_p0 = scmp.eq.s32.totalorder %s85_s17, 0  ;;  %p98_p1 = scmp.ne.s32.totalorder %s1069_s13, %s1065_s12 }
   0x5   : > { %p99_p2 = scmp.eq.s32.totalorder %s1140_s15, 1  ;;  %p904_p3 = scmp.ge.s32.totalorder %s1073_s14, 1 }
   0x6   : > { %s1150_s19 = scalar_select %p86_p0, %s1069_s13, %s88_s18  }
   0x7   : > { %p1152_p4 = por %p99_p2, %p98_p1  ;;  %p149_p5 = scmp.lt.s32.totalorder %s1073_s14, 3 }
   0x9   : > { %p150_p6 = pnand %p904_p3, %p149_p5 }
   0xa   : > { %s1247_s14 = sshll.u32 (!%p150_p6), %s1140_s15, 4  ;;  %s175_s7 = sand.u32 (!%p150_p6), 1, %s1065_s12  }
   0xb   : > { %153 = sbr.rel (%p150_p6) target bundleno = 356 (0x164), region = 32  ;;  %p184_p7 = scmp.lt.s32.totalorder (!%p150_p6), %s1247_s14, 20 }
   0xc   : > { %s905_s8 = sshll.u32 (!%p150_p6), %s175_s7, 7 }
   0xd   : > { %s1435_s9 = scalar_lea.vmem (!%p150_p6), [#allocation2], %s905_s8  }
  0x10   : > { %v311_v0 = vld [vmem:[%s1588_s1 + $0x178] sm:$0xff]  ;;  %v310_v2 = vld [vmem:[%s1588_s1 + $0x170] sm:$0xff]  ;;  %v309_v6 = vld [vmem:[%s1588_s1 + $0x168] sm:$0xff]  ;;  %s1295_s27 = scalar_select %p184_p7, %s1247_s14, 20  ;;  %vm608_vm0 = vcmask 523264  }
  0x11   : > { %v279_v1 = vld [vmem:[%s1588_s1 + $0x78] sm:$0xff]  ;;  %462 = vmatpush.msra.mxu2 %v311_v0  ;;  %v278_v4 = vld [vmem:[%s1588_s1 + $0x70] sm:$0xff]  ;;  %v277_v8 = vld [vmem:[%s1588_s1 + $0x68] sm:$0xff]  ;;  %s633_s12 = ssub.s32 (%p1152_p4), 21, %s1247_s14  ;;  %s927_s10 = sshll.u32 (%p1152_p4), %s1140_s15, 7 }
  0x12   : > { %332 = vmatpush.msra.mxu0 %v279_v1  ;;  %v327_v3 = vld [vmem:[%s1588_s1 + $0x1f8] sm:$0xff]  ;;  %v326_v7 = vld [vmem:[%s1588_s1 + $0x1f0] sm:$0xff]  ;;  %v325_v10 = vld [vmem:[%s1588_s1 + $0x1e8] sm:$0xff]  ;;  %s926_s24 = sshll.u32 %s1295_s27, 5  ;;  %p634_p8 = scmp.lt.s32.totalorder (%p1152_p4), %s633_s12, 16 }
  0x13   : > { %v295_v5 = vld [vmem:[%s1588_s1 + $0xf8] sm:$0xff]  ;;  %527 = vmatpush.msra.mxu3 %v327_v3  ;;  %463 = vmatpush.msra.mxu2 %v310_v2  ;;  %v294_v9 = vld [vmem:[%s1588_s1 + $0xf0] sm:$0xff]  ;;  %v308_v11 = vld [vmem:[%s1588_s1 + $0x160] sm:$0xff]  ;;  %s1343_s17 = scalar_lea.vmem %s1587_s0, %s926_s24  ;;  %s1490_s18 = scalar_lea.vmem (%p1152_p4), %s1590_s3, %s927_s10  }
  0x14   : > { %397 = vmatpush.msra.mxu1 %v295_v5  ;;  %333 = vmatpush.msra.mxu0 %v278_v4  ;;  %v276_v12 = vld [vmem:[%s1588_s1 + $0x60] sm:$0xff]  ;;  %v293_v13 = vld [vmem:[%s1588_s1 + $0xe8] sm:$0xff]  ;;  %v307_v16 = vld [vmem:[%s1588_s1 + $0x158] sm:$0xff] }
  0x15   : > { %528 = vmatpush.msra.mxu3 %v326_v7  ;;  %464 = vmatpush.msra.mxu2 %v309_v6  ;;  %v324_v14 = vld [vmem:[%s1588_s1 + $0x1e0] sm:$0xff]  ;;  %v275_v17 = vld [vmem:[%s1588_s1 + $0x58] sm:$0xff]  ;;  %v306_v20 = vld [vmem:[%s1588_s1 + $0x150] sm:$0xff] }
  0x16   : > { %398 = vmatpush.msra.mxu1 %v294_v9  ;;  %334 = vmatpush.msra.mxu0 %v277_v8  ;;  %v292_v15 = vld [vmem:[%s1588_s1 + $0xe0] sm:$0xff]  ;;  %v323_v18 = vld [vmem:[%s1588_s1 + $0x1d8] sm:$0xff]  ;;  %v274_v21 = vld [vmem:[%s1588_s1 + $0x50] sm:$0xff] }
  0x17   : > { %529 = vmatpush.msra.mxu3 %v325_v10  ;;  %465 = vmatpush.msra.mxu2 %v308_v11  ;;  %v291_v19 = vld [vmem:[%s1588_s1 + $0xd8] sm:$0xff]  ;;  %v322_v22 = vld [vmem:[%s1588_s1 + $0x1d0] sm:$0xff]  ;;  %v305_v24 = vld [vmem:[%s1588_s1 + $0x148] sm:$0xff] }
  0x18   : > { %399 = vmatpush.msra.mxu1 %v293_v13  ;;  %335 = vmatpush.msra.mxu0 %v276_v12  ;;  %v290_v23 = vld [vmem:[%s1588_s1 + $0xd0] sm:$0xff]  ;;  %v273_v25 = vld [vmem:[%s1588_s1 + $0x48] sm:$0xff]  ;;  %v304_v28 = vld [vmem:[%s1588_s1 + $0x140] sm:$0xff] }
  0x19   : > { %530 = vmatpush.msra.mxu3 %v324_v14  ;;  %466 = vmatpush.msra.mxu2 %v307_v16  ;;  %v321_v26 = vld [vmem:[%s1588_s1 + $0x1c8] sm:$0xff]  ;;  %v272_v29 = vld [vmem:[%s1588_s1 + $0x40] sm:$0xff]  ;;  %v303_v32 = vld [vmem:[%s1588_s1 + $0x138] sm:$0xff] }
  0x1a   : > { %400 = vmatpush.msra.mxu1 %v292_v15  ;;  %336 = vmatpush.msra.mxu0 %v275_v17  ;;  %v289_v27 = vld [vmem:[%s1588_s1 + $0xc8] sm:$0xff]  ;;  %v320_v30 = vld [vmem:[%s1588_s1 + $0x1c0] sm:$0xff]  ;;  %v271_v33 = vld [vmem:[%s1588_s1 + $0x38] sm:$0xff] }
  0x1b   : > { %531 = vmatpush.msra.mxu3 %v323_v18  ;;  %467 = vmatpush.msra.mxu2 %v306_v20  ;;  %v288_v31 = vld [vmem:[%s1588_s1 + $0xc0] sm:$0xff]  ;;  %v319_v34 = vld [vmem:[%s1588_s1 + $0x1b8] sm:$0xff]  ;;  %v302_v36 = vld [vmem:[%s1588_s1 + $0x130] sm:$0xff] }
  0x1c   : > { %401 = vmatpush.msra.mxu1 %v291_v19  ;;  %337 = vmatpush.msra.mxu0 %v274_v21  ;;  %v287_v35 = vld [vmem:[%s1588_s1 + $0xb8] sm:$0xff]  ;;  %v270_v37 = vld [vmem:[%s1588_s1 + $0x30] sm:$0xff]  ;;  %v301_v40 = vld [vmem:[%s1588_s1 + $0x128] sm:$0xff] }
  0x1d   : > { %532 = vmatpush.msra.mxu3 %v322_v22  ;;  %468 = vmatpush.msra.mxu2 %v305_v24  ;;  %v318_v38 = vld [vmem:[%s1588_s1 + $0x1b0] sm:$0xff]  ;;  %v269_v41 = vld [vmem:[%s1588_s1 + $0x28] sm:$0xff]  ;;  %v300_v44 = vld [vmem:[%s1588_s1 + $0x120] sm:$0xff] }
  0x1e   : > { %402 = vmatpush.msra.mxu1 %v290_v23  ;;  %338 = vmatpush.msra.mxu0 %v273_v25  ;;  %v286_v39 = vld [vmem:[%s1588_s1 + $0xb0] sm:$0xff]  ;;  %v317_v42 = vld [vmem:[%s1588_s1 + $0x1a8] sm:$0xff]  ;;  %v268_v45 = vld [vmem:[%s1588_s1 + $0x20] sm:$0xff] }
  0x1f   : > { %533 = vmatpush.msra.mxu3 %v321_v26  ;;  %469 = vmatpush.msra.mxu2 %v304_v28  ;;  %v285_v43 = vld [vmem:[%s1588_s1 + $0xa8] sm:$0xff]  ;;  %v316_v46 = vld [vmem:[%s1588_s1 + $0x1a0] sm:$0xff]  ;;  %v299_v48 = vld [vmem:[%s1588_s1 + $0x118] sm:$0xff] }
  0x20   : > { %403 = vmatpush.msra.mxu1 %v289_v27  ;;  %339 = vmatpush.msra.mxu0 %v272_v29  ;;  %v284_v47 = vld [vmem:[%s1588_s1 + $0xa0] sm:$0xff]  ;;  %v267_v49 = vld [vmem:[%s1588_s1 + $0x18] sm:$0xff]  ;;  %v298_v52 = vld [vmem:[%s1588_s1 + $0x110] sm:$0xff] }
  0x21   : > { %534 = vmatpush.msra.mxu3 %v320_v30  ;;  %470 = vmatpush.msra.mxu2 %v303_v32  ;;  %v315_v50 = vld [vmem:[%s1588_s1 + $0x198] sm:$0xff]  ;;  %v266_v53 = vld [vmem:[%s1588_s1 + $0x10] sm:$0xff]  ;;  %v297_v56 = vld [vmem:[%s1588_s1 + $0x108] sm:$0xff] }
  0x22   : > { %404 = vmatpush.msra.mxu1 %v288_v31  ;;  %340 = vmatpush.msra.mxu0 %v271_v33  ;;  %v283_v51 = vld [vmem:[%s1588_s1 + $0x98] sm:$0xff]  ;;  %v314_v54 = vld [vmem:[%s1588_s1 + $0x190] sm:$0xff]  ;;  %v265_v57 = vld [vmem:[%s1588_s1 + $0x8] sm:$0xff] }
  0x23   : > { %535 = vmatpush.msra.mxu3 %v319_v34  ;;  %471 = vmatpush.msra.mxu2 %v302_v36  ;;  %v282_v55 = vld [vmem:[%s1588_s1 + $0x90] sm:$0xff]  ;;  %v313_v58 = vld [vmem:[%s1588_s1 + $0x188] sm:$0xff]  ;;  %v296_v60 = vld [vmem:[%s1588_s1 + $0x100] sm:$0xff] }
  0x24   : > { %405 = vmatpush.msra.mxu1 %v287_v35  ;;  %341 = vmatpush.msra.mxu0 %v270_v37  ;;  %v281_v59 = vld [vmem:[%s1588_s1 + $0x88] sm:$0xff]  ;;  %v264_v61 = vld [vmem:[%s1588_s1] sm:$0xff]  ;;  %v202_v62 = vld [vmem:[%s1343_s17 + $0x10] sm:$0xff] }
  0x25   : > { %536 = vmatpush.msra.mxu3 %v318_v38  ;;  %472 = vmatpush.msra.mxu2 %v301_v40  ;;  %v312_v63 = vld [vmem:[%s1588_s1 + $0x180] sm:$0xff]  ;;  %v203_v1 = vld [vmem:[%s1343_s17 + $0x18] sm:$0xff]  ;;  %v201_v3 = vld [vmem:[%s1343_s17 + $0x8] sm:$0xff] }
  0x26   : > { %406 = vmatpush.msra.mxu1 %v286_v39  ;;  %342 = vmatpush.msra.mxu0 %v269_v41  ;;  %v200_v0 = vld [vmem:[%s1343_s17] sm:$0xff]  ;;  %v206_v4 = vld [vmem:[%s1343_s17 + $0x30] sm:$0xff]  ;;  %v207_v6 = vld [vmem:[%s1343_s17 + $0x38] sm:$0xff] }
  0x27   : > { %537 = vmatpush.msra.mxu3 %v317_v42  ;;  %473 = vmatpush.msra.mxu2 %v300_v44  ;;  %v280_v2 = vld [vmem:[%s1588_s1 + $0x80] sm:$0xff]  ;;  %v205_v7 = vld [vmem:[%s1343_s17 + $0x28] sm:$0xff]  ;;  %v210_v8 = vld [vmem:[%s1343_s17 + $0x50] sm:$0xff] }
  0x28   : > { %407 = vmatpush.msra.mxu1 %v285_v43  ;;  %343 = vmatpush.msra.mxu0 %v268_v45  ;;  %v204_v5 = vld [vmem:[%s1343_s17 + $0x20] sm:$0xff]  ;;  %v211_v10 = vld [vmem:[%s1343_s17 + $0x58] sm:$0xff]  ;;  %v209_v11 = vld [vmem:[%s1343_s17 + $0x48] sm:$0xff] }
  0x29   : > { %538 = vmatpush.msra.mxu3 %v316_v46  ;;  %474 = vmatpush.msra.mxu2 %v299_v48  ;;  %v208_v9 = vld [vmem:[%s1343_s17 + $0x40] sm:$0xff]  ;;  %v214_v12 = vld [vmem:[%s1343_s17 + $0x70] sm:$0xff]  ;;  %v215_v14 = vld [vmem:[%s1343_s17 + $0x78] sm:$0xff] }
  0x2a   : > { %408 = vmatpush.msra.mxu1 %v284_v47  ;;  %344 = vmatpush.msra.mxu0 %v267_v49  ;;  %v212_v13 = vld [vmem:[%s1343_s17 + $0x60] sm:$0xff]  ;;  %v213_v15 = vld [vmem:[%s1343_s17 + $0x68] sm:$0xff]  ;;  %v218_v16 = vld [vmem:[%s1343_s17 + $0x90] sm:$0xff] }
  0x2b   : > { %539 = vmatpush.msra.mxu3 %v315_v50  ;;  %475 = vmatpush.msra.mxu2 %v298_v52  ;;  %v216_v17 = vld [vmem:[%s1343_s17 + $0x80] sm:$0xff]  ;;  %v219_v18 = vld [vmem:[%s1343_s17 + $0x98] sm:$0xff]  ;;  %v217_v19 = vld [vmem:[%s1343_s17 + $0x88] sm:$0xff] }
  0x2c   : > { %409 = vmatpush.msra.mxu1 %v283_v51  ;;  %345 = vmatpush.msra.mxu0 %v266_v53  ;;  %v222_v20 = vld [vmem:[%s1343_s17 + $0xb0] sm:$0xff]  ;;  %v220_v21 = vld [vmem:[%s1343_s17 + $0xa0] sm:$0xff]  ;;  %v223_v22 = vld [vmem:[%s1343_s17 + $0xb8] sm:$0xff] }
  0x2d   : > { %540 = vmatpush.msra.mxu3 %v314_v54  ;;  %476 = vmatpush.msra.mxu2 %v297_v56  ;;  %v221_v23 = vld [vmem:[%s1343_s17 + $0xa8] sm:$0xff]  ;;  %v226_v24 = vld [vmem:[%s1343_s17 + $0xd0] sm:$0xff]  ;;  %v224_v25 = vld [vmem:[%s1343_s17 + $0xc0] sm:$0xff] }
  0x2e   : > { %410 = vmatpush.msra.mxu1 %v282_v55  ;;  %346 = vmatpush.msra.mxu0 %v265_v57  ;;  %v227_v26 = vld [vmem:[%s1343_s17 + $0xd8] sm:$0xff]  ;;  %v225_v27 = vld [vmem:[%s1343_s17 + $0xc8] sm:$0xff]  ;;  %v230_v28 = vld [vmem:[%s1343_s17 + $0xf0] sm:$0xff] }
  0x2f   : > { %541 = vmatpush.msra.mxu3 %v313_v58  ;;  %477 = vmatpush.msra.mxu2 %v296_v60  ;;  %v228_v29 = vld [vmem:[%s1343_s17 + $0xe0] sm:$0xff]  ;;  %v231_v30 = vld [vmem:[%s1343_s17 + $0xf8] sm:$0xff]  ;;  %v229_v31 = vld [vmem:[%s1343_s17 + $0xe8] sm:$0xff] }
  0x30   : > { %411 = vmatpush.msra.mxu1 %v281_v59  ;;  %347 = vmatpush.msra.mxu0 %v264_v61  ;;  %v234_v32 = vld [vmem:[%s1343_s17 + $0x110] sm:$0xff]  ;;  %v232_v33 = vld [vmem:[%s1343_s17 + $0x100] sm:$0xff]  ;;  %v235_v34 = vld [vmem:[%s1343_s17 + $0x118] sm:$0xff] }
  0x31   : > { %478 = vmatmul.f32.vlgmr.msra.gmra.mxu2 %v202_v62  ;;  %542 = vmatpush.msra.mxu3 %v312_v63  ;;  %v233_v35 = vld [vmem:[%s1343_s17 + $0x108] sm:$0xff]  ;;  %v238_v36 = vld [vmem:[%s1343_s17 + $0x130] sm:$0xff]  ;;  %v236_v37 = vld [vmem:[%s1343_s17 + $0x120] sm:$0xff] }
  0x32   : > { %348 = vmatmul.f32.vlgmr.msra.gmra.mxu0 %v200_v0  ;;  %543 = vmatmul.f32.vlgmr.msra.gmra.mxu3 %v203_v1  ;;  %v239_v38 = vld [vmem:[%s1343_s17 + $0x138] sm:$0xff]  ;;  %v237_v39 = vld [vmem:[%s1343_s17 + $0x128] sm:$0xff]  ;;  %v242_v40 = vld [vmem:[%s1343_s17 + $0x150] sm:$0xff] }
  0x33   : > { %412 = vmatpush.msra.mxu1 %v280_v2  ;;  %v240_v41 = vld [vmem:[%s1343_s17 + $0x140] sm:$0xff]  ;;  %v243_v42 = vld [vmem:[%s1343_s17 + $0x158] sm:$0xff]  ;;  %v241_v43 = vld [vmem:[%s1343_s17 + $0x148] sm:$0xff] }
  0x34   : > { %413 = vmatmul.f32.vlgmr.msra.gmra.mxu1 %v201_v3  ;;  %v246_v44 = vld [vmem:[%s1343_s17 + $0x170] sm:$0xff]  ;;  %v244_v45 = vld [vmem:[%s1343_s17 + $0x160] sm:$0xff]  ;;  %v247_v46 = vld [vmem:[%s1343_s17 + $0x178] sm:$0xff] }
  0x35   : > { %v245_v47 = vld [vmem:[%s1343_s17 + $0x168] sm:$0xff]  ;;  %v250_v48 = vld [vmem:[%s1343_s17 + $0x190] sm:$0xff]  ;;  %v248_v49 = vld [vmem:[%s1343_s17 + $0x180] sm:$0xff] }
  0x36   : > { %v251_v50 = vld [vmem:[%s1343_s17 + $0x198] sm:$0xff]  ;;  %v249_v51 = vld [vmem:[%s1343_s17 + $0x188] sm:$0xff]  ;;  %v254_v52 = vld [vmem:[%s1343_s17 + $0x1b0] sm:$0xff] }
  0x37   : > { %v252_v53 = vld [vmem:[%s1343_s17 + $0x1a0] sm:$0xff]  ;;  %v255_v54 = vld [vmem:[%s1343_s17 + $0x1b8] sm:$0xff]  ;;  %v253_v55 = vld [vmem:[%s1343_s17 + $0x1a8] sm:$0xff] }
  0x38   : > { %v258_v56 = vld [vmem:[%s1343_s17 + $0x1d0] sm:$0xff]  ;;  %v256_v57 = vld [vmem:[%s1343_s17 + $0x1c0] sm:$0xff]  ;;  %v259_v58 = vld [vmem:[%s1343_s17 + $0x1d8] sm:$0xff] }
  0x39   : > { %481 = vmatmul.f32.gmra.mxu2 %v206_v4  ;;  %v257_v59 = vld [vmem:[%s1343_s17 + $0x1c8] sm:$0xff]  ;;  %v262_v60 = vld [vmem:[%s1343_s17 + $0x1f0] sm:$0xff]  ;;  %v260_v61 = vld [vmem:[%s1343_s17 + $0x1e0] sm:$0xff] }
  0x3a   : > { %351 = vmatmul.f32.gmra.mxu0 %v204_v5  ;;  %546 = vmatmul.f32.gmra.mxu3 %v207_v6  ;;  %v263_v62 = vld [vmem:[%s1343_s17 + $0x1f8] sm:$0xff]  ;;  %v261_v63 = vld [vmem:[%s1343_s17 + $0x1e8] sm:$0xff]  ;;  %v1430_v0 = vld [vmem:[%s1589_s2] ss:$0 sm:$0xff] }
  0x3c   : > { %416 = vmatmul.f32.gmra.mxu1 %v205_v7 }
  0x41   : > { %484 = vmatmul.f32.gmra.mxu2 %v210_v8 }
  0x42   : > { %354 = vmatmul.f32.gmra.mxu0 %v208_v9  ;;  %549 = vmatmul.f32.gmra.mxu3 %v211_v10 }
  0x44   : > { %419 = vmatmul.f32.gmra.mxu1 %v209_v11 }
  0x49   : > { %487 = vmatmul.f32.gmra.mxu2 %v214_v12 }
  0x4a   : > { %357 = vmatmul.f32.gmra.mxu0 %v212_v13  ;;  %552 = vmatmul.f32.gmra.mxu3 %v215_v14 }
  0x4c   : > { %422 = vmatmul.f32.gmra.mxu1 %v213_v15 }
  0x51   : > { %490 = vmatmul.f32.gmra.mxu2 %v218_v16 }
  0x52   : > { %360 = vmatmul.f32.gmra.mxu0 %v216_v17  ;;  %555 = vmatmul.f32.gmra.mxu3 %v219_v18 }
  0x54   : > { %425 = vmatmul.f32.gmra.mxu1 %v217_v19 }
  0x59   : > { %493 = vmatmul.f32.gmra.mxu2 %v222_v20 }
  0x5a   : > { %363 = vmatmul.f32.gmra.mxu0 %v220_v21  ;;  %558 = vmatmul.f32.gmra.mxu3 %v223_v22 }
  0x5c   : > { %428 = vmatmul.f32.gmra.mxu1 %v221_v23 }
  0x61   : > { %496 = vmatmul.f32.gmra.mxu2 %v226_v24 }
  0x62   : > { %366 = vmatmul.f32.gmra.mxu0 %v224_v25  ;;  %561 = vmatmul.f32.gmra.mxu3 %v227_v26 }
  0x64   : > { %431 = vmatmul.f32.gmra.mxu1 %v225_v27 }
  0x69   : > { %499 = vmatmul.f32.gmra.mxu2 %v230_v28 }
  0x6a   : > { %369 = vmatmul.f32.gmra.mxu0 %v228_v29  ;;  %564 = vmatmul.f32.gmra.mxu3 %v231_v30 }
  0x6c   : > { %434 = vmatmul.f32.gmra.mxu1 %v229_v31 }
  0x71   : > { %502 = vmatmul.f32.gmra.mxu2 %v234_v32 }
  0x72   : > { %372 = vmatmul.f32.gmra.mxu0 %v232_v33  ;;  %567 = vmatmul.f32.gmra.mxu3 %v235_v34 }
  0x74   : > { %437 = vmatmul.f32.gmra.mxu1 %v233_v35 }
  0x79   : > { %505 = vmatmul.f32.gmra.mxu2 %v238_v36 }
  0x7a   : > { %375 = vmatmul.f32.gmra.mxu0 %v236_v37  ;;  %570 = vmatmul.f32.gmra.mxu3 %v239_v38 }
  0x7c   : > { %440 = vmatmul.f32.gmra.mxu1 %v237_v39 }
  0x81   : > { %508 = vmatmul.f32.gmra.mxu2 %v242_v40 }
  0x82   : > { %378 = vmatmul.f32.gmra.mxu0 %v240_v41  ;;  %573 = vmatmul.f32.gmra.mxu3 %v243_v42 }
  0x84   : > { %443 = vmatmul.f32.gmra.mxu1 %v241_v43 }
  0x89   : > { %511 = vmatmul.f32.gmra.mxu2 %v246_v44 }
  0x8a   : > { %381 = vmatmul.f32.gmra.mxu0 %v244_v45  ;;  %576 = vmatmul.f32.gmra.mxu3 %v247_v46 }
  0x8c   : > { %446 = vmatmul.f32.gmra.mxu1 %v245_v47 }
  0x91   : > { %514 = vmatmul.f32.gmra.mxu2 %v250_v48 }
  0x92   : > { %384 = vmatmul.f32.gmra.mxu0 %v248_v49  ;;  %579 = vmatmul.f32.gmra.mxu3 %v251_v50 }
  0x94   : > { %449 = vmatmul.f32.gmra.mxu1 %v249_v51 }
  0x99   : > { %517 = vmatmul.f32.gmra.mxu2 %v254_v52 }
  0x9a   : > { %387 = vmatmul.f32.gmra.mxu0 %v252_v53  ;;  %582 = vmatmul.f32.gmra.mxu3 %v255_v54 }
  0x9c   : > { %452 = vmatmul.f32.gmra.mxu1 %v253_v55 }
  0xa1   : > { %520 = vmatmul.f32.gmra.mxu2 %v258_v56 }
  0xa2   : > { %390 = vmatmul.f32.gmra.mxu0 %v256_v57  ;;  %585 = vmatmul.f32.gmra.mxu3 %v259_v58 }
  0xa4   : > { %455 = vmatmul.f32.gmra.mxu1 %v257_v59 }
  0xa9   : > { %523 = vmatmul.f32.gmra.mxu2 %v262_v60 }
  0xaa   : > { %393 = vmatmul.f32.gmra.mxu0 %v260_v61  ;;  %588 = vmatmul.f32.gmra.mxu3 %v263_v62 }
  0xac   : > { %458 = vmatmul.f32.gmra.mxu1 %v261_v63 }
  0xaf   : > { %v349_v1 = vpop.f32.mrf.mxu0 }
  0xb0   : > { %v350_v2 = vadd.f32 %v1430_v0, %v349_v1 }
  0xb1   : > { %v414_v3 = vpop.f32.mrf.mxu1 }
  0xb2   : > { %v415_v4 = vadd.f32 %v414_v3, %v350_v2 }
  0xb4   : > { %v479_v5 = vpop.f32.mrf.mxu2 }
  0xb5   : > { %v480_v6 = vadd.f32 %v479_v5, %v415_v4  ;;  %v544_v7 = vpop.f32.mrf.mxu3 }
  0xb7   : > { %v545_v8 = vadd.f32 %v544_v7, %v480_v6  ;;  %v352_v9 = vpop.f32.mrf.mxu0 }
  0xb8   : > { %v353_v10 = vadd.f32 %v1430_v0, %v352_v9 }
  0xb9   : > { %v592_v11 = vmax.f32 %v545_v8, 0.0  ;;  %v417_v12 = vpop.f32.mrf.mxu1 }
  0xba   : > { %v418_v13 = vadd.f32 %v417_v12, %v353_v10 }
  0xbb   : > { %609 = vst.msk [vmem:[%s1435_s9] sm:$0xff] %vm608_vm0, %v592_v11 }
  0xbc   : > { %v482_v14 = vpop.f32.mrf.mxu2 }
  0xbd   : > { %v483_v15 = vadd.f32 %v482_v14, %v418_v13  ;;  %v547_v16 = vpop.f32.mrf.mxu3 }
  0xbf   : > { %v548_v17 = vadd.f32 %v547_v16, %v483_v15  ;;  %v355_v18 = vpop.f32.mrf.mxu0 }
  0xc0   : > { %v356_v19 = vadd.f32 %v1430_v0, %v355_v18 }
  0xc1   : > { %v593_v20 = vmax.f32 %v548_v17, 0.0  ;;  %v420_v21 = vpop.f32.mrf.mxu1 }
  0xc2   : > { %v421_v22 = vadd.f32 %v420_v21, %v356_v19 }
  0xc3   : > { %610 = vst.msk [vmem:[%s1435_s9 + $0x8] sm:$0xff] %vm608_vm0, %v593_v20 }
  0xc4   : > { %v485_v23 = vpop.f32.mrf.mxu2 }
  0xc5   : > { %v486_v24 = vadd.f32 %v485_v23, %v421_v22  ;;  %v550_v25 = vpop.f32.mrf.mxu3 }
  0xc7   : > { %v551_v26 = vadd.f32 %v550_v25, %v486_v24  ;;  %v358_v27 = vpop.f32.mrf.mxu0 }
  0xc8   : > { %v359_v28 = vadd.f32 %v1430_v0, %v358_v27 }
  0xc9   : > { %v594_v29 = vmax.f32 %v551_v26, 0.0  ;;  %v423_v30 = vpop.f32.mrf.mxu1 }
  0xca   : > { %v424_v31 = vadd.f32 %v423_v30, %v359_v28 }
  0xcb   : > { %611 = vst.msk [vmem:[%s1435_s9 + $0x10] sm:$0xff] %vm608_vm0, %v594_v29 }
  0xcc   : > { %v488_v32 = vpop.f32.mrf.mxu2 }
  0xcd   : > { %v489_v33 = vadd.f32 %v488_v32, %v424_v31  ;;  %v553_v34 = vpop.f32.mrf.mxu3 }
  0xcf   : > { %v554_v35 = vadd.f32 %v553_v34, %v489_v33  ;;  %v361_v36 = vpop.f32.mrf.mxu0 }
  0xd0   : > { %v362_v37 = vadd.f32 %v1430_v0, %v361_v36 }
  0xd1   : > { %v595_v38 = vmax.f32 %v554_v35, 0.0  ;;  %v426_v39 = vpop.f32.mrf.mxu1 }
  0xd2   : > { %v427_v40 = vadd.f32 %v426_v39, %v362_v37 }
  0xd3   : > { %612 = vst.msk [vmem:[%s1435_s9 + $0x18] sm:$0xff] %vm608_vm0, %v595_v38 }
  0xd4   : > { %v491_v41 = vpop.f32.mrf.mxu2 }
  0xd5   : > { %v492_v42 = vadd.f32 %v491_v41, %v427_v40  ;;  %v556_v43 = vpop.f32.mrf.mxu3 }
  0xd7   : > { %v557_v44 = vadd.f32 %v556_v43, %v492_v42  ;;  %v364_v45 = vpop.f32.mrf.mxu0 }
  0xd8   : > { %v365_v46 = vadd.f32 %v1430_v0, %v364_v45 }
  0xd9   : > { %v596_v47 = vmax.f32 %v557_v44, 0.0  ;;  %v429_v48 = vpop.f32.mrf.mxu1 }
  0xda   : > { %v430_v49 = vadd.f32 %v429_v48, %v365_v46 }
  0xdb   : > { %613 = vst.msk [vmem:[%s1435_s9 + $0x20] sm:$0xff] %vm608_vm0, %v596_v47 }
  0xdc   : > { %v494_v50 = vpop.f32.mrf.mxu2 }
  0xdd   : > { %v495_v51 = vadd.f32 %v494_v50, %v430_v49  ;;  %v559_v52 = vpop.f32.mrf.mxu3 }
  0xdf   : > { %v560_v53 = vadd.f32 %v559_v52, %v495_v51  ;;  %v367_v54 = vpop.f32.mrf.mxu0 }
  0xe0   : > { %v368_v55 = vadd.f32 %v1430_v0, %v367_v54 }
  0xe1   : > { %v597_v56 = vmax.f32 %v560_v53, 0.0  ;;  %v432_v57 = vpop.f32.mrf.mxu1 }
  0xe2   : > { %v433_v58 = vadd.f32 %v432_v57, %v368_v55 }
  0xe3   : > { %614 = vst.msk [vmem:[%s1435_s9 + $0x28] sm:$0xff] %vm608_vm0, %v597_v56 }
  0xe4   : > { %v497_v59 = vpop.f32.mrf.mxu2 }
  0xe5   : > { %v498_v60 = vadd.f32 %v497_v59, %v433_v58  ;;  %v562_v61 = vpop.f32.mrf.mxu3 }
  0xe7   : > { %v563_v62 = vadd.f32 %v562_v61, %v498_v60  ;;  %v370_v63 = vpop.f32.mrf.mxu0 }
  0xe8   : > { %v371_v1 = vadd.f32 %v1430_v0, %v370_v63 }
  0xe9   : > { %v598_v2 = vmax.f32 %v563_v62, 0.0  ;;  %v435_v3 = vpop.f32.mrf.mxu1 }
  0xea   : > { %v436_v4 = vadd.f32 %v435_v3, %v371_v1 }
  0xeb   : > { %615 = vst.msk [vmem:[%s1435_s9 + $0x30] sm:$0xff] %vm608_vm0, %v598_v2 }
  0xec   : > { %v500_v5 = vpop.f32.mrf.mxu2 }
  0xed   : > { %v501_v6 = vadd.f32 %v500_v5, %v436_v4  ;;  %v565_v7 = vpop.f32.mrf.mxu3 }
  0xef   : > { %v566_v8 = vadd.f32 %v565_v7, %v501_v6  ;;  %v373_v9 = vpop.f32.mrf.mxu0 }
  0xf0   : > { %v374_v10 = vadd.f32 %v1430_v0, %v373_v9 }
  0xf1   : > { %v599_v11 = vmax.f32 %v566_v8, 0.0  ;;  %v438_v12 = vpop.f32.mrf.mxu1 }
  0xf2   : > { %v439_v13 = vadd.f32 %v438_v12, %v374_v10 }
  0xf3   : > { %616 = vst.msk [vmem:[%s1435_s9 + $0x38] sm:$0xff] %vm608_vm0, %v599_v11 }
  0xf4   : > { %v503_v14 = vpop.f32.mrf.mxu2 }
  0xf5   : > { %v504_v15 = vadd.f32 %v503_v14, %v439_v13  ;;  %v568_v16 = vpop.f32.mrf.mxu3 }
  0xf7   : > { %v569_v17 = vadd.f32 %v568_v16, %v504_v15  ;;  %v376_v18 = vpop.f32.mrf.mxu0 }
  0xf8   : > { %v377_v19 = vadd.f32 %v1430_v0, %v376_v18 }
  0xf9   : > { %v600_v20 = vmax.f32 %v569_v17, 0.0  ;;  %v441_v21 = vpop.f32.mrf.mxu1 }
  0xfa   : > { %v442_v22 = vadd.f32 %v441_v21, %v377_v19 }
  0xfb   : > { %617 = vst.msk [vmem:[%s1435_s9 + $0x40] sm:$0xff] %vm608_vm0, %v600_v20 }
  0xfc   : > { %v506_v23 = vpop.f32.mrf.mxu2 }
  0xfd   : > { %v507_v24 = vadd.f32 %v506_v23, %v442_v22  ;;  %v571_v25 = vpop.f32.mrf.mxu3 }
  0xff   : > { %v572_v26 = vadd.f32 %v571_v25, %v507_v24  ;;  %v379_v27 = vpop.f32.mrf.mxu0 }
 0x100   : > { %v380_v28 = vadd.f32 %v1430_v0, %v379_v27 }
 0x101   : > { %v601_v29 = vmax.f32 %v572_v26, 0.0  ;;  %v444_v30 = vpop.f32.mrf.mxu1 }
 0x102   : > { %v445_v31 = vadd.f32 %v444_v30, %v380_v28 }
 0x103   : > { %618 = vst.msk [vmem:[%s1435_s9 + $0x48] sm:$0xff] %vm608_vm0, %v601_v29 }
 0x104   : > { %v509_v32 = vpop.f32.mrf.mxu2 }
 0x105   : > { %v510_v33 = vadd.f32 %v509_v32, %v445_v31  ;;  %v574_v34 = vpop.f32.mrf.mxu3 }
 0x107   : > { %v575_v35 = vadd.f32 %v574_v34, %v510_v33  ;;  %v382_v36 = vpop.f32.mrf.mxu0 }
 0x108   : > { %v383_v37 = vadd.f32 %v1430_v0, %v382_v36 }
 0x109   : > { %v602_v38 = vmax.f32 %v575_v35, 0.0  ;;  %v447_v39 = vpop.f32.mrf.mxu1 }
 0x10a   : > { %v448_v40 = vadd.f32 %v447_v39, %v383_v37 }
 0x10b   : > { %619 = vst.msk [vmem:[%s1435_s9 + $0x50] sm:$0xff] %vm608_vm0, %v602_v38 }
 0x10c   : > { %v512_v41 = vpop.f32.mrf.mxu2 }
 0x10d   : > { %v513_v42 = vadd.f32 %v512_v41, %v448_v40  ;;  %v577_v43 = vpop.f32.mrf.mxu3 }
 0x10f   : > { %v578_v44 = vadd.f32 %v577_v43, %v513_v42  ;;  %v385_v45 = vpop.f32.mrf.mxu0 }
 0x110   : > { %v386_v46 = vadd.f32 %v1430_v0, %v385_v45 }
 0x111   : > { %v603_v47 = vmax.f32 %v578_v44, 0.0  ;;  %v450_v48 = vpop.f32.mrf.mxu1 }
 0x112   : > { %v451_v49 = vadd.f32 %v450_v48, %v386_v46 }
 0x113   : > { %620 = vst.msk [vmem:[%s1435_s9 + $0x58] sm:$0xff] %vm608_vm0, %v603_v47 }
 0x114   : > { %v515_v50 = vpop.f32.mrf.mxu2 }
 0x115   : > { %v516_v51 = vadd.f32 %v515_v50, %v451_v49  ;;  %v580_v52 = vpop.f32.mrf.mxu3 }
 0x117   : > { %v581_v53 = vadd.f32 %v580_v52, %v516_v51  ;;  %v388_v54 = vpop.f32.mrf.mxu0 }
 0x118   : > { %v389_v55 = vadd.f32 %v1430_v0, %v388_v54 }
 0x119   : > { %v604_v56 = vmax.f32 %v581_v53, 0.0  ;;  %v453_v57 = vpop.f32.mrf.mxu1 }
 0x11a   : > { %v454_v58 = vadd.f32 %v453_v57, %v389_v55 }
 0x11b   : > { %621 = vst.msk [vmem:[%s1435_s9 + $0x60] sm:$0xff] %vm608_vm0, %v604_v56 }
 0x11c   : > { %v518_v59 = vpop.f32.mrf.mxu2 }
 0x11d   : > { %v519_v60 = vadd.f32 %v518_v59, %v454_v58  ;;  %v583_v61 = vpop.f32.mrf.mxu3 }
 0x11f   : > { %v584_v62 = vadd.f32 %v583_v61, %v519_v60  ;;  %v391_v63 = vpop.f32.mrf.mxu0 }
 0x120   : > { %v392_v1 = vadd.f32 %v1430_v0, %v391_v63 }
 0x121   : > { %v605_v2 = vmax.f32 %v584_v62, 0.0  ;;  %v456_v3 = vpop.f32.mrf.mxu1 }
 0x122   : > { %v457_v4 = vadd.f32 %v456_v3, %v392_v1 }
 0x123   : > { %622 = vst.msk [vmem:[%s1435_s9 + $0x68] sm:$0xff] %vm608_vm0, %v605_v2 }
 0x124   : > { %v521_v5 = vpop.f32.mrf.mxu2 }
 0x125   : > { %v522_v6 = vadd.f32 %v521_v5, %v457_v4  ;;  %v586_v7 = vpop.f32.mrf.mxu3 }
 0x127   : > { %v587_v8 = vadd.f32 %v586_v7, %v522_v6  ;;  %v394_v9 = vpop.f32.mrf.mxu0 }
 0x128   : > { %v395_v10 = vadd.f32 %v1430_v0, %v394_v9 }
 0x129   : > { %v606_v11 = vmax.f32 %v587_v8, 0.0  ;;  %v459_v12 = vpop.f32.mrf.mxu1 }
 0x12a   : > { %v460_v13 = vadd.f32 %v459_v12, %v395_v10 }
 0x12b   : > { %623 = vst.msk [vmem:[%s1435_s9 + $0x70] sm:$0xff] %vm608_vm0, %v606_v11 }
 0x12c   : > { %v524_v14 = vpop.f32.mrf.mxu2 }
 0x12d   : > { %v525_v15 = vadd.f32 %v524_v14, %v460_v13  ;;  %v589_v16 = vpop.f32.mrf.mxu3 }
 0x12f   : > { %v590_v17 = vadd.f32 %v589_v16, %v525_v15  ;;  %631 = sbr.rel (!%p1152_p4) target bundleno = 356 (0x164), region = 36 }
 0x131   : > { %v607_v18 = vmax.f32 %v590_v17, 0.0 }
 0x133   : > { %624 = vst.msk [vmem:[%s1435_s9 + $0x78] sm:$0xff] %vm608_vm0, %v607_v18 }
 0x134   : > { %s1601_s12 = smov (!%p634_p8, %s633_s12), 16 }
 0x135   : > { %s911_s21 = sshll.u32 %s1601_s12, 3 }
 0x136   : > { %p914_p9 = scmp.eq.s32.totalorder %s911_s21, 0 }
 0x137   : > { %s1496_s22 = sshrl.u32 (!%p914_p9), %s1601_s12, 4 }
 0x138   : > { %642 = sbr.rel (%p914_p9) target bundleno = 356 (0x164), region = 40  ;;  %p915_p10 = scmp.le.s32.totalorder (!%p914_p9), %s1496_s22, 0 }
 0x13d   : > { %857 = sbr.rel (%p915_p10) target bundleno = 339 (0x153), region = 116  ;;  %s1592_s15 = smov (!%p915_p10), %s1490_s18 }
 0x13e   : > { %s1593_s20 = smov (!%p915_p10), %s1435_s9  ;;  %s1505_s14 = smov (!%p915_p10), 0  }
 0x13f   : > { %s1507_s23 = smov (!%p915_p10), 0  }
 0x142 LB: >> { %v735_v0 = vld [vmem:[%s1081_s20] sm:$0xff]  ;;  %v737_v19 = vld [vmem:[%s1081_s20 + $0x8] sm:$0xff]  ;;  %v739_v20 = vld [vmem:[%s1081_s20 + $0x10] sm:$0xff]  ;;  %s767_s25 = sadd.s32 1, %s1085_s14  ;;  %s729_s23 = sadd.s32 1, %s1089_s23   ;;  %s1089_s23 = sphi %s1507_s23, %s729_s23   ;;  %s1085_s14 = sphi %s1505_s14, %s1596_s14   ;;  %s1081_s20 = sphi %s1593_s20, %s1595_s20   ;;  %s1077_s15 = sphi %s1592_s15, %s1594_s15  }
 0x143   : >> { %736 = vst [vmem:[%s1077_s15] sm:$0xff] %v735_v0  ;;  %v741_v21 = vld [vmem:[%s1081_s20 + $0x18] sm:$0xff]  ;;  %p768_p11 = scmp.ge.s32.totalorder %s767_s25, %s1496_s22  ;;  %v743_v22 = vld [vmem:[%s1081_s20 + $0x20] sm:$0xff]  ;;  %v745_v23 = vld [vmem:[%s1081_s20 + $0x28] sm:$0xff]  ;;  %p728_p12 = scmp.ge.s32.totalorder %s729_s23, %s1496_s22 }
 0x144   : >> { %738 = vst [vmem:[%s1077_s15 + $0x8] sm:$0xff] %v737_v19  ;;  %v747_v24 = vld [vmem:[%s1081_s20 + $0x30] sm:$0xff]  ;;  %v749_v25 = vld [vmem:[%s1081_s20 + $0x38] sm:$0xff]  ;;  %v751_v26 = vld [vmem:[%s1081_s20 + $0x40] sm:$0xff] }
 0x145   : >> { %740 = vst [vmem:[%s1077_s15 + $0x10] sm:$0xff] %v739_v20  ;;  %s1603_s25 = smov (%p768_p11, %s767_s25), 0  ;;  %v753_v27 = vld [vmem:[%s1081_s20 + $0x48] sm:$0xff]  ;;  %v755_v28 = vld [vmem:[%s1081_s20 + $0x50] sm:$0xff]  ;;  %v757_v29 = vld [vmem:[%s1081_s20 + $0x58] sm:$0xff] }
 0x146   : >> { %742 = vst [vmem:[%s1077_s15 + $0x18] sm:$0xff] %v741_v21  ;;  %s916_s26 = sshll.u32 %s1603_s25, 7  ;;  %v759_v30 = vld [vmem:[%s1081_s20 + $0x60] sm:$0xff]  ;;  %v761_v31 = vld [vmem:[%s1081_s20 + $0x68] sm:$0xff]  ;;  %v763_v32 = vld [vmem:[%s1081_s20 + $0x70] sm:$0xff]  ;;  %s1596_s14 = smov %s1603_s25 }
 0x147   : >> { %744 = vst [vmem:[%s1077_s15 + $0x20] sm:$0xff] %v743_v22  ;;  %s772_s24 = scalar_lea.vmem %s1435_s9, %s916_s26 [#allocation2]   ;;  %s773_s28 = scalar_lea.vmem %s1490_s18, %s916_s26   ;;  %v765_v33 = vld [vmem:[%s1081_s20 + $0x78] sm:$0xff] }
 0x148   : >> { %746 = vst [vmem:[%s1077_s15 + $0x28] sm:$0xff] %v745_v23  ;;  %s1595_s20 = smov %s772_s24 }
 0x149   : >> { %748 = vst [vmem:[%s1077_s15 + $0x30] sm:$0xff] %v747_v24 }
 0x14a   : >> { %750 = vst [vmem:[%s1077_s15 + $0x38] sm:$0xff] %v749_v25 }
 0x14b   : >> { %752 = vst [vmem:[%s1077_s15 + $0x40] sm:$0xff] %v751_v26 }
 0x14c   : >> { %754 = vst [vmem:[%s1077_s15 + $0x48] sm:$0xff] %v753_v27 }
 0x14d   : >> { %756 = vst [vmem:[%s1077_s15 + $0x50] sm:$0xff] %v755_v28 }
 0x14e   : >> { %758 = vst [vmem:[%s1077_s15 + $0x58] sm:$0xff] %v757_v29  ;;  %731 = sbr.rel (!%p728_p12) target bundleno = 322 (0x142), region = 122 }
 0x14f   : >> { %760 = vst [vmem:[%s1077_s15 + $0x60] sm:$0xff] %v759_v30 }
 0x150   : >> { %762 = vst [vmem:[%s1077_s15 + $0x68] sm:$0xff] %v761_v31 }
 0x151   : >> { %764 = vst [vmem:[%s1077_s15 + $0x70] sm:$0xff] %v763_v32 }
 0x152   : >> { %766 = vst [vmem:[%s1077_s15 + $0x78] sm:$0xff] %v765_v33  ;;  %s1594_s15 = smov %s773_s28 }
 0x153 PF: > { %s1569_s29 = sand.u32 15, %s1601_s12   ;;  %s928_s30 = sshll.u32 %s1496_s22, 7 }
 0x154   : > { %s778_s4 = scalar_lea.vmem %s1435_s9, %s928_s30 [#allocation2]   ;;  %s780_s5 = scalar_lea.vmem %s1490_s18, %s928_s30  }
 0x155   : > { %p921_p13 = scmp.le.s32.totalorder %s1569_s29, 0 }
 0x156   : > { %s1091_s6 = smov (!%p921_p13), %s780_s5   ;;  %s1095_s27 = smov (!%p921_p13), %s778_s4  }
 0x157   : > { %871 = sbr.rel (%p921_p13) target bundleno = 356 (0x164), region = 127  ;;  %s1099_s7 = smov (!%p921_p13), 0  }
 0x158   : > { %s1103_s8 = smov (!%p921_p13), 0  }
 0x15c LB: >> { %v790_v34 = vld [vmem:[%s1097_s27] sm:$0xff]  ;;  %s792_s12 = sadd.s32 1, %s1101_s7  ;;  %s784_s8 = sadd.s32 1, %s1105_s8   ;;  %s1105_s8 = sphi %s1103_s8, %s784_s8   ;;  %s1101_s7 = sphi %s1099_s7, %s1100_s7   ;;  %s1097_s27 = sphi %s1095_s27, %s797_s27   ;;  %s1093_s6 = sphi %s1091_s6, %s798_s6  }
 0x15d   : >> { %791 = vst [vmem:[%s1093_s6] sm:$0xff] %v790_v34  ;;  %p793_p0 = scmp.ge.s32.totalorder %s792_s12, %s1569_s29  ;;  %p783_p1 = scmp.ge.s32.totalorder %s784_s8, %s1569_s29 }
 0x15f   : >> { %s1605_s12 = smov (%p793_p0, %s792_s12), 0  ;;  %786 = sbr.rel (!%p783_p1) target bundleno = 348 (0x15c), region = 133 }
 0x160   : >> { %s922_s9 = sshll.u32 %s1605_s12, 3  ;;  %s1100_s7 = smov %s1605_s12  }
 0x161   : >> { %s797_s27 = scalar_lea.vmem %s778_s4, %s922_s9 [#allocation2]   ;;  %s798_s6 = scalar_lea.vmem %s780_s5, %s922_s9  }
 0x164 PF: > { %p10_p2 = scmp.ge.s32.totalorder %s1142_s16, 4   ;;  %s1597_s12 = smov %s1069_s13 }
 0x165   : > { %s1598_s13 = smov %s1150_s19  ;;  %s1599_s14 = smov %s1142_s16 }
 0x166   :  { %12 = sbr.rel (!%p10_p2) target bundleno = 2 (0x2), region = 144 }

// kernel: dqn_forward.6
= control target key start
LH: loop header
LB: loop body
LE: loop exit
PB: predicated region body
PF: predicated region fallthrough
CT: control target
= control target key end

     0   :  { %vm155_vm0 = vcmask 523264   ;;  %vm500_vm1 = vcmask 517120   ;;  %s1108_s1 = inlined_call_operand.vmem [shape: f32[576,64], index: 1, kind: input, shape index: {}]   ;;  %s1109_s0 = inlined_call_operand.vmem [shape: f32[98,576], index: 0, kind: input, shape index: {}]   ;;  %s1110_s2 = inlined_call_operand.vmem [shape: f32[1,64], index: 2, kind: input, shape index: {}]   ;;  %s1111_s3 = inlined_call_operand.vmem [shape: f32[98,64], index: 3, kind: output, shape index: {}]  }
   0x1   :  { %v94_v0 = vld [vmem:[%s1108_s1 + $0x78] sm:$0xff]  ;;  %v93_v1 = vld [vmem:[%s1108_s1 + $0x70] sm:$0xff]  ;;  %v92_v2 = vld [vmem:[%s1108_s1 + $0x68] sm:$0xff] }
   0x2   :  { %519 = vmatpush.msra.mxu1 %v94_v0  ;;  %520 = vmatpush.msra.mxu2 %v94_v0  ;;  %v91_v3 = vld [vmem:[%s1108_s1 + $0x60] sm:$0xff]  ;;  %v90_v4 = vld [vmem:[%s1108_s1 + $0x58] sm:$0xff]  ;;  %v89_v5 = vld [vmem:[%s1108_s1 + $0x50] sm:$0xff] }
   0x3   :  { %521 = vmatpush.msra.mxu3 %v94_v0  ;;  %195 = vmatpush.msra.mxu0 %v94_v0  ;;  %v88_v6 = vld [vmem:[%s1108_s1 + $0x48] sm:$0xff]  ;;  %v87_v7 = vld [vmem:[%s1108_s1 + $0x40] sm:$0xff]  ;;  %v86_v8 = vld [vmem:[%s1108_s1 + $0x38] sm:$0xff] }
   0x4   :  { %522 = vmatpush.msra.mxu1 %v93_v1  ;;  %523 = vmatpush.msra.mxu2 %v93_v1  ;;  %v85_v9 = vld [vmem:[%s1108_s1 + $0x30] sm:$0xff]  ;;  %v84_v10 = vld [vmem:[%s1108_s1 + $0x28] sm:$0xff]  ;;  %v83_v11 = vld [vmem:[%s1108_s1 + $0x20] sm:$0xff] }
   0x5   :  { %524 = vmatpush.msra.mxu3 %v93_v1  ;;  %196 = vmatpush.msra.mxu0 %v93_v1  ;;  %v82_v12 = vld [vmem:[%s1108_s1 + $0x18] sm:$0xff]  ;;  %v81_v13 = vld [vmem:[%s1108_s1 + $0x10] sm:$0xff]  ;;  %v80_v14 = vld [vmem:[%s1108_s1 + $0x8] sm:$0xff] }
   0x6   :  { %525 = vmatpush.msra.mxu1 %v92_v2  ;;  %526 = vmatpush.msra.mxu2 %v92_v2  ;;  %v79_v15 = vld [vmem:[%s1108_s1] sm:$0xff]  ;;  %v126_v18 = vld [vmem:[%s1108_s1 + $0x178] sm:$0xff]  ;;  %v125_v20 = vld [vmem:[%s1108_s1 + $0x170] sm:$0xff] }
   0x7   :  { %527 = vmatpush.msra.mxu3 %v92_v2  ;;  %197 = vmatpush.msra.mxu0 %v92_v2  ;;  %v34_v16 = vld [vmem:[%s1109_s0 + $0xa0] sm:$0xff]  ;;  %v110_v19 = vld [vmem:[%s1108_s1 + $0xf8] sm:$0xff]  ;;  %v109_v21 = vld [vmem:[%s1108_s1 + $0xf0] sm:$0xff] }
   0x8   :  { %528 = vmatpush.msra.mxu1 %v91_v3  ;;  %529 = vmatpush.msra.mxu2 %v91_v3  ;;  %v54_v17 = vld [vmem:[%s1109_s0 + $0x140] sm:$0xff]  ;;  %v142_v22 = vld [vmem:[%s1108_s1 + $0x1f8] sm:$0xff]  ;;  %v124_v24 = vld [vmem:[%s1108_s1 + $0x168] sm:$0xff] }
   0x9   :  { %530 = vmatpush.msra.mxu3 %v91_v3  ;;  %198 = vmatpush.msra.mxu0 %v91_v3  ;;  %v14_v23 = vld [vmem:[%s1109_s0] sm:$0xff]  ;;  %v108_v25 = vld [vmem:[%s1108_s1 + $0xe8] sm:$0xff]  ;;  %v141_v26 = vld [vmem:[%s1108_s1 + $0x1f0] sm:$0xff] }
   0xa   :  { %531 = vmatpush.msra.mxu1 %v90_v4  ;;  %532 = vmatpush.msra.mxu2 %v90_v4  ;;  %v150_v27 = vld [vmem:[%s1108_s1 + $0x238] sm:$0xff]  ;;  %v123_v28 = vld [vmem:[%s1108_s1 + $0x160] sm:$0xff]  ;;  %v140_v30 = vld [vmem:[%s1108_s1 + $0x1e8] sm:$0xff] }
   0xb   :  { %533 = vmatpush.msra.mxu3 %v90_v4  ;;  %199 = vmatpush.msra.mxu0 %v90_v4  ;;  %v107_v29 = vld [vmem:[%s1108_s1 + $0xe0] sm:$0xff]  ;;  %v39_v31 = vld [vmem:[%s1109_s0 + $0xc8] sm:$0xff]  ;;  %v106_v33 = vld [vmem:[%s1108_s1 + $0xd8] sm:$0xff] }
   0xc   :  { %534 = vmatpush.msra.mxu1 %v89_v5  ;;  %535 = vmatpush.msra.mxu2 %v89_v5  ;;  %v59_v32 = vld [vmem:[%s1109_s0 + $0x168] sm:$0xff]  ;;  %v122_v34 = vld [vmem:[%s1108_s1 + $0x158] sm:$0xff]  ;;  %v139_v35 = vld [vmem:[%s1108_s1 + $0x1e0] sm:$0xff] }
   0xd   :  { %536 = vmatpush.msra.mxu3 %v89_v5  ;;  %200 = vmatpush.msra.mxu0 %v89_v5  ;;  %v105_v36 = vld [vmem:[%s1108_s1 + $0xd0] sm:$0xff]  ;;  %v138_v39 = vld [vmem:[%s1108_s1 + $0x1d8] sm:$0xff]  ;;  %v104_v40 = vld [vmem:[%s1108_s1 + $0xc8] sm:$0xff] }
   0xe   :  { %537 = vmatpush.msra.mxu1 %v88_v6  ;;  %538 = vmatpush.msra.mxu2 %v88_v6  ;;  %v149_v37 = vld [vmem:[%s1108_s1 + $0x230] sm:$0xff]  ;;  %v19_v41 = vld [vmem:[%s1109_s0 + $0x28] sm:$0xff]  ;;  %v103_v44 = vld [vmem:[%s1108_s1 + $0xc0] sm:$0xff] }
   0xf   :  { %539 = vmatpush.msra.mxu3 %v88_v6  ;;  %201 = vmatpush.msra.mxu0 %v88_v6  ;;  %v121_v38 = vld [vmem:[%s1108_s1 + $0x150] sm:$0xff]  ;;  %v120_v42 = vld [vmem:[%s1108_s1 + $0x148] sm:$0xff]  ;;  %v119_v46 = vld [vmem:[%s1108_s1 + $0x140] sm:$0xff] }
  0x10   :  { %540 = vmatpush.msra.mxu1 %v87_v7  ;;  %541 = vmatpush.msra.mxu2 %v87_v7  ;;  %v137_v43 = vld [vmem:[%s1108_s1 + $0x1d0] sm:$0xff]  ;;  %v148_v45 = vld [vmem:[%s1108_s1 + $0x228] sm:$0xff]  ;;  %v118_v50 = vld [vmem:[%s1108_s1 + $0x138] sm:$0xff] }
  0x11   :  { %542 = vmatpush.msra.mxu3 %v87_v7  ;;  %202 = vmatpush.msra.mxu0 %v87_v7  ;;  %v136_v47 = vld [vmem:[%s1108_s1 + $0x1c8] sm:$0xff]  ;;  %v44_v48 = vld [vmem:[%s1109_s0 + $0xf0] sm:$0xff]  ;;  %v102_v51 = vld [vmem:[%s1108_s1 + $0xb8] sm:$0xff] }
  0x12   :  { %543 = vmatpush.msra.mxu1 %v86_v8  ;;  %544 = vmatpush.msra.mxu2 %v86_v8  ;;  %v64_v49 = vld [vmem:[%s1109_s0 + $0x190] sm:$0xff]  ;;  %v135_v52 = vld [vmem:[%s1108_s1 + $0x1c0] sm:$0xff]  ;;  %v134_v56 = vld [vmem:[%s1108_s1 + $0x1b8] sm:$0xff] }
  0x13   :  { %545 = vmatpush.msra.mxu3 %v86_v8  ;;  %203 = vmatpush.msra.mxu0 %v86_v8  ;;  %v147_v53 = vld [vmem:[%s1108_s1 + $0x220] sm:$0xff]  ;;  %v117_v54 = vld [vmem:[%s1108_s1 + $0x130] sm:$0xff]  ;;  %v116_v58 = vld [vmem:[%s1108_s1 + $0x128] sm:$0xff] }
  0x14   :  { %546 = vmatpush.msra.mxu1 %v85_v9  ;;  %547 = vmatpush.msra.mxu2 %v85_v9  ;;  %v101_v55 = vld [vmem:[%s1108_s1 + $0xb0] sm:$0xff]  ;;  %v100_v59 = vld [vmem:[%s1108_s1 + $0xa8] sm:$0xff]  ;;  %v146_v61 = vld [vmem:[%s1108_s1 + $0x218] sm:$0xff] }
  0x15   :  { %548 = vmatpush.msra.mxu3 %v85_v9  ;;  %204 = vmatpush.msra.mxu0 %v85_v9  ;;  %v24_v57 = vld [vmem:[%s1109_s0 + $0x50] sm:$0xff]  ;;  %v115_v62 = vld [vmem:[%s1108_s1 + $0x120] sm:$0xff]  ;;  %v132_v0 = vld [vmem:[%s1108_s1 + $0x1a8] sm:$0xff] }
  0x16   :  { %549 = vmatpush.msra.mxu1 %v84_v10  ;;  %550 = vmatpush.msra.mxu2 %v84_v10  ;;  %v133_v60 = vld [vmem:[%s1108_s1 + $0x1b0] sm:$0xff]  ;;  %v99_v63 = vld [vmem:[%s1108_s1 + $0xa0] sm:$0xff]  ;;  %v49_v1 = vld [vmem:[%s1109_s0 + $0x118] sm:$0xff] }
  0x17   :  { %551 = vmatpush.msra.mxu3 %v84_v10  ;;  %205 = vmatpush.msra.mxu0 %v84_v10  ;;  %v69_v2 = vld [vmem:[%s1109_s0 + $0x1b8] sm:$0xff]  ;;  %v131_v5 = vld [vmem:[%s1108_s1 + $0x1a0] sm:$0xff]  ;;  %v97_v7 = vld [vmem:[%s1108_s1 + $0x90] sm:$0xff] }
  0x18   :  { %552 = vmatpush.msra.mxu1 %v83_v11  ;;  %553 = vmatpush.msra.mxu2 %v83_v11  ;;  %v98_v3 = vld [vmem:[%s1108_s1 + $0x98] sm:$0xff]  ;;  %v74_v6 = vld [vmem:[%s1109_s0 + $0x1e0] sm:$0x3]  ;;  %v113_v8 = vld [vmem:[%s1108_s1 + $0x110] sm:$0xff] }
  0x19   :  { %554 = vmatpush.msra.mxu3 %v83_v11  ;;  %206 = vmatpush.msra.mxu0 %v83_v11  ;;  %v114_v4 = vld [vmem:[%s1108_s1 + $0x118] sm:$0xff]  ;;  %v96_v10 = vld [vmem:[%s1108_s1 + $0x88] sm:$0xff]  ;;  %v145_v11 = vld [vmem:[%s1108_s1 + $0x210] sm:$0xff] }
  0x1a   :  { %555 = vmatpush.msra.mxu1 %v82_v12  ;;  %556 = vmatpush.msra.mxu2 %v82_v12  ;;  %v130_v9 = vld [vmem:[%s1108_s1 + $0x198] sm:$0xff] }
  0x1b   :  { %557 = vmatpush.msra.mxu3 %v82_v12  ;;  %207 = vmatpush.msra.mxu0 %v82_v12  ;;  %v112_v12 = vld [vmem:[%s1108_s1 + $0x108] sm:$0xff] }
  0x1c   :  { %558 = vmatpush.msra.mxu1 %v81_v13  ;;  %559 = vmatpush.msra.mxu2 %v81_v13 }
  0x1d   :  { %560 = vmatpush.msra.mxu3 %v81_v13  ;;  %208 = vmatpush.msra.mxu0 %v81_v13  ;;  %v129_v13 = vld [vmem:[%s1108_s1 + $0x190] sm:$0xff] }
  0x1e   :  { %561 = vmatpush.msra.mxu1 %v80_v14  ;;  %562 = vmatpush.msra.mxu2 %v80_v14 }
  0x1f   :  { %563 = vmatpush.msra.mxu3 %v80_v14  ;;  %209 = vmatpush.msra.mxu0 %v80_v14  ;;  %v95_v14 = vld [vmem:[%s1108_s1 + $0x80] sm:$0xff] }
  0x20   :  { %564 = vmatpush.msra.mxu1 %v79_v15  ;;  %565 = vmatpush.msra.mxu2 %v79_v15 }
  0x21   :  { %223 = vmatmul.f32.vlgmr.msra.gmra.mxu1 %v34_v16  ;;  %235 = vmatmul.f32.vlgmr.msra.gmra.mxu2 %v54_v17  ;;  %v111_v16 = vld [vmem:[%s1108_s1 + $0x100] sm:$0xff]  ;;  %v128_v17 = vld [vmem:[%s1108_s1 + $0x188] sm:$0xff] }
  0x22   :  { %307 = vmatpush.msrb.mxu2 %v126_v18  ;;  %251 = vmatpush.msrb.mxu1 %v110_v19  ;;  %v15_v18 = vld [vmem:[%s1109_s0 + $0x8] sm:$0xff]  ;;  %v16_v19 = vld [vmem:[%s1109_s0 + $0x10] sm:$0xff] }
  0x23   :  { %566 = vmatpush.msra.mxu3 %v79_v15  ;;  %210 = vmatpush.msra.mxu0 %v79_v15  ;;  %v29_v15 = vld [vmem:[%s1109_s0 + $0x78] sm:$0xff] }
  0x24   :  { %308 = vmatpush.msrb.mxu2 %v125_v20  ;;  %252 = vmatpush.msrb.mxu1 %v109_v21  ;;  %v127_v20 = vld [vmem:[%s1108_s1 + $0x180] sm:$0xff]  ;;  %v144_v21 = vld [vmem:[%s1108_s1 + $0x208] sm:$0xff] }
  0x25   :  { %363 = vmatpush.msrb.mxu3 %v142_v22  ;;  %211 = vmatmul.f32.vlgmr.msra.gmra.mxu0 %v14_v23  ;;  %v17_v22 = vld [vmem:[%s1109_s0 + $0x18] sm:$0xff]  ;;  %v143_v23 = vld [vmem:[%s1108_s1 + $0x200] sm:$0xff] }
  0x26   :  { %309 = vmatpush.msrb.mxu2 %v124_v24  ;;  %253 = vmatpush.msrb.mxu1 %v108_v25  ;;  %v18_v24 = vld [vmem:[%s1109_s0 + $0x20] sm:$0xff]  ;;  %v20_v25 = vld [vmem:[%s1109_s0 + $0x30] sm:$0xff] }
  0x27   :  { %364 = vmatpush.msrb.mxu3 %v141_v26  ;;  %427 = vmatpush.msrb.mxu0 %v150_v27  ;;  %v21_v26 = vld [vmem:[%s1109_s0 + $0x38] sm:$0xff]  ;;  %v22_v27 = vld [vmem:[%s1109_s0 + $0x40] sm:$0xff] }
  0x28   :  { %310 = vmatpush.msrb.mxu2 %v123_v28  ;;  %254 = vmatpush.msrb.mxu1 %v107_v29  ;;  %v23_v28 = vld [vmem:[%s1109_s0 + $0x48] sm:$0xff]  ;;  %v25_v29 = vld [vmem:[%s1109_s0 + $0x58] sm:$0xff] }
  0x29   :  { %365 = vmatpush.msrb.mxu3 %v140_v30  ;;  %226 = vmatmul.f32.gmra.mxu1 %v39_v31  ;;  %v26_v30 = vld [vmem:[%s1109_s0 + $0x60] sm:$0xff]  ;;  %v27_v31 = vld [vmem:[%s1109_s0 + $0x68] sm:$0xff] }
  0x2a   :  { %238 = vmatmul.f32.gmra.mxu2 %v59_v32  ;;  %255 = vmatpush.msrb.mxu1 %v106_v33  ;;  %v28_v32 = vld [vmem:[%s1109_s0 + $0x70] sm:$0xff]  ;;  %v30_v33 = vld [vmem:[%s1109_s0 + $0x80] sm:$0xff] }
  0x2b   :  { %311 = vmatpush.msrb.mxu2 %v122_v34  ;;  %366 = vmatpush.msrb.mxu3 %v139_v35  ;;  %v31_v34 = vld [vmem:[%s1109_s0 + $0x88] sm:$0xff]  ;;  %v32_v35 = vld [vmem:[%s1109_s0 + $0x90] sm:$0xff] }
  0x2c   :  { %256 = vmatpush.msrb.mxu1 %v105_v36  ;;  %428 = vmatpush.msrb.mxu0 %v149_v37  ;;  %v33_v36 = vld [vmem:[%s1109_s0 + $0x98] sm:$0xff]  ;;  %v35_v37 = vld [vmem:[%s1109_s0 + $0xa8] sm:$0xff] }
  0x2d   :  { %312 = vmatpush.msrb.mxu2 %v121_v38  ;;  %367 = vmatpush.msrb.mxu3 %v138_v39  ;;  %v36_v38 = vld [vmem:[%s1109_s0 + $0xb0] sm:$0xff]  ;;  %v37_v39 = vld [vmem:[%s1109_s0 + $0xb8] sm:$0xff] }
  0x2e   :  { %257 = vmatpush.msrb.mxu1 %v104_v40  ;;  %214 = vmatmul.f32.gmra.mxu0 %v19_v41  ;;  %v38_v40 = vld [vmem:[%s1109_s0 + $0xc0] sm:$0xff]  ;;  %v40_v41 = vld [vmem:[%s1109_s0 + $0xd0] sm:$0xff] }
  0x2f   :  { %313 = vmatpush.msrb.mxu2 %v120_v42  ;;  %368 = vmatpush.msrb.mxu3 %v137_v43  ;;  %v41_v42 = vld [vmem:[%s1109_s0 + $0xd8] sm:$0xff]  ;;  %v42_v43 = vld [vmem:[%s1109_s0 + $0xe0] sm:$0xff] }
  0x30   :  { %258 = vmatpush.msrb.mxu1 %v103_v44  ;;  %429 = vmatpush.msrb.mxu0 %v148_v45  ;;  %v43_v44 = vld [vmem:[%s1109_s0 + $0xe8] sm:$0xff]  ;;  %v45_v45 = vld [vmem:[%s1109_s0 + $0xf8] sm:$0xff] }
  0x31   :  { %314 = vmatpush.msrb.mxu2 %v119_v46  ;;  %369 = vmatpush.msrb.mxu3 %v136_v47  ;;  %v46_v46 = vld [vmem:[%s1109_s0 + $0x100] sm:$0xff]  ;;  %v47_v47 = vld [vmem:[%s1109_s0 + $0x108] sm:$0xff] }
  0x32   :  { %229 = vmatmul.f32.gmra.mxu1 %v44_v48  ;;  %241 = vmatmul.f32.gmra.mxu2 %v64_v49  ;;  %v48_v48 = vld [vmem:[%s1109_s0 + $0x110] sm:$0xff]  ;;  %v50_v49 = vld [vmem:[%s1109_s0 + $0x120] sm:$0xff] }
  0x33   :  { %315 = vmatpush.msrb.mxu2 %v118_v50  ;;  %259 = vmatpush.msrb.mxu1 %v102_v51  ;;  %v51_v50 = vld [vmem:[%s1109_s0 + $0x128] sm:$0xff]  ;;  %v52_v51 = vld [vmem:[%s1109_s0 + $0x130] sm:$0xff] }
  0x34   :  { %370 = vmatpush.msrb.mxu3 %v135_v52  ;;  %430 = vmatpush.msrb.mxu0 %v147_v53  ;;  %v53_v52 = vld [vmem:[%s1109_s0 + $0x138] sm:$0xff]  ;;  %v55_v53 = vld [vmem:[%s1109_s0 + $0x148] sm:$0xff] }
  0x35   :  { %316 = vmatpush.msrb.mxu2 %v117_v54  ;;  %260 = vmatpush.msrb.mxu1 %v101_v55  ;;  %v56_v54 = vld [vmem:[%s1109_s0 + $0x150] sm:$0xff]  ;;  %v57_v55 = vld [vmem:[%s1109_s0 + $0x158] sm:$0xff] }
  0x36   :  { %371 = vmatpush.msrb.mxu3 %v134_v56  ;;  %217 = vmatmul.f32.gmra.mxu0 %v24_v57  ;;  %v58_v56 = vld [vmem:[%s1109_s0 + $0x160] sm:$0xff]  ;;  %v60_v57 = vld [vmem:[%s1109_s0 + $0x170] sm:$0xff] }
  0x37   :  { %317 = vmatpush.msrb.mxu2 %v116_v58  ;;  %261 = vmatpush.msrb.mxu1 %v100_v59  ;;  %v61_v58 = vld [vmem:[%s1109_s0 + $0x178] sm:$0xff]  ;;  %v62_v59 = vld [vmem:[%s1109_s0 + $0x180] sm:$0xff] }
  0x38   :  { %372 = vmatpush.msrb.mxu3 %v133_v60  ;;  %431 = vmatpush.msrb.mxu0 %v146_v61  ;;  %v63_v60 = vld [vmem:[%s1109_s0 + $0x188] sm:$0xff]  ;;  %v65_v61 = vld [vmem:[%s1109_s0 + $0x198] sm:$0xff] }
  0x39   :  { %318 = vmatpush.msrb.mxu2 %v115_v62  ;;  %262 = vmatpush.msrb.mxu1 %v99_v63  ;;  %v66_v62 = vld [vmem:[%s1109_s0 + $0x1a0] sm:$0xff]  ;;  %v67_v63 = vld [vmem:[%s1109_s0 + $0x1a8] sm:$0xff] }
  0x3a   :  { %373 = vmatpush.msrb.mxu3 %v132_v0  ;;  %232 = vmatmul.f32.gmra.mxu1 %v49_v1  ;;  %v68_v0 = vld [vmem:[%s1109_s0 + $0x1b0] sm:$0xff]  ;;  %v70_v1 = vld [vmem:[%s1109_s0 + $0x1c0] sm:$0xff] }
  0x3b   :  { %244 = vmatmul.f32.gmra.mxu2 %v69_v2  ;;  %263 = vmatpush.msrb.mxu1 %v98_v3  ;;  %v71_v2 = vld [vmem:[%s1109_s0 + $0x1c8] sm:$0xff]  ;;  %v72_v3 = vld [vmem:[%s1109_s0 + $0x1d0] sm:$0xff] }
  0x3c   :  { %319 = vmatpush.msrb.mxu2 %v114_v4  ;;  %374 = vmatpush.msrb.mxu3 %v131_v5  ;;  %v73_v5 = vld [vmem:[%s1109_s0 + $0x1d8] sm:$0xff] }
  0x3d   :  { %247 = vmatmul.f32.vlgmr.msra.gmra.mxu3 %v74_v6  ;;  %264 = vmatpush.msrb.mxu1 %v97_v7  ;;  %v75_v6 = vld [vmem:[%s1109_s0 + $0x1e8] sm:$0x3]  ;;  %v76_v7 = vld [vmem:[%s1109_s0 + $0x1f0] sm:$0x3] }
  0x3e   :  { %320 = vmatpush.msrb.mxu2 %v113_v8  ;;  %375 = vmatpush.msrb.mxu3 %v130_v9  ;;  %v77_v8 = vld [vmem:[%s1109_s0 + $0x1f8] sm:$0x3] }
  0x3f   :  { %265 = vmatpush.msrb.mxu1 %v96_v10  ;;  %432 = vmatpush.msrb.mxu0 %v145_v11  ;;  %v1013_v10 = vld [vmem:[%s1110_s2] ss:$0 sm:$0xff] }
  0x40   :  { %321 = vmatpush.msrb.mxu2 %v112_v12  ;;  %376 = vmatpush.msrb.mxu3 %v129_v13 }
  0x41   :  { %266 = vmatpush.msrb.mxu1 %v95_v14  ;;  %220 = vmatmul.f32.gmra.mxu0 %v29_v15  ;;  %v78_v14 = vld [vmem:[%s1109_s0 + $0x200] sm:$0x3] }
  0x42   :  { %322 = vmatpush.msrb.mxu2 %v111_v16  ;;  %377 = vmatpush.msrb.mxu3 %v128_v17 }
  0x43   :  { %267 = vmatmul.f32.vlgmr.msrb.gmra.mxu1 %v15_v18  ;;  %323 = vmatmul.f32.vlgmr.msrb.gmra.mxu2 %v16_v19 }
  0x44   :  { %378 = vmatpush.msrb.mxu3 %v127_v20  ;;  %433 = vmatpush.msrb.mxu0 %v144_v21 }
  0x45   :  { %379 = vmatmul.f32.vlgmr.msrb.gmra.mxu3 %v17_v22 }
  0x46   :  { %434 = vmatpush.msrb.mxu0 %v143_v23 }
  0x49   :  { %506 = vmatmul.msk.f32.vlgmr.msrb.gmra.mxu0 %vm155_vm0, %v18_v24 }
  0x4b   :  { %270 = vmatmul.f32.gmra.mxu1 %v20_v25  ;;  %326 = vmatmul.f32.gmra.mxu2 %v21_v26 }
  0x4d   :  { %382 = vmatmul.f32.gmra.mxu3 %v22_v27 }
  0x51   :  { %507 = vmatmul.msk.f32.gmra.mxu0 %vm155_vm0, %v23_v28 }
  0x53   :  { %273 = vmatmul.f32.gmra.mxu1 %v25_v29  ;;  %329 = vmatmul.f32.gmra.mxu2 %v26_v30 }
  0x55   :  { %385 = vmatmul.f32.gmra.mxu3 %v27_v31 }
  0x59   :  { %508 = vmatmul.msk.f32.gmra.mxu0 %vm155_vm0, %v28_v32 }
  0x5b   :  { %276 = vmatmul.f32.gmra.mxu1 %v30_v33  ;;  %332 = vmatmul.f32.gmra.mxu2 %v31_v34 }
  0x5d   :  { %388 = vmatmul.f32.gmra.mxu3 %v32_v35 }
  0x61   :  { %509 = vmatmul.msk.f32.gmra.mxu0 %vm155_vm0, %v33_v36 }
  0x63   :  { %279 = vmatmul.f32.gmra.mxu1 %v35_v37  ;;  %335 = vmatmul.f32.gmra.mxu2 %v36_v38 }
  0x65   :  { %391 = vmatmul.f32.gmra.mxu3 %v37_v39 }
  0x69   :  { %510 = vmatmul.msk.f32.gmra.mxu0 %vm155_vm0, %v38_v40 }
  0x6b   :  { %282 = vmatmul.f32.gmra.mxu1 %v40_v41  ;;  %338 = vmatmul.f32.gmra.mxu2 %v41_v42 }
  0x6d   :  { %394 = vmatmul.f32.gmra.mxu3 %v42_v43 }
  0x71   :  { %511 = vmatmul.msk.f32.gmra.mxu0 %vm155_vm0, %v43_v44 }
  0x73   :  { %285 = vmatmul.f32.gmra.mxu1 %v45_v45  ;;  %341 = vmatmul.f32.gmra.mxu2 %v46_v46 }
  0x75   :  { %397 = vmatmul.f32.gmra.mxu3 %v47_v47 }
  0x79   :  { %512 = vmatmul.msk.f32.gmra.mxu0 %vm155_vm0, %v48_v48 }
  0x7b   :  { %288 = vmatmul.f32.gmra.mxu1 %v50_v49  ;;  %344 = vmatmul.f32.gmra.mxu2 %v51_v50 }
  0x7d   :  { %400 = vmatmul.f32.gmra.mxu3 %v52_v51 }
  0x81   :  { %513 = vmatmul.msk.f32.gmra.mxu0 %vm155_vm0, %v53_v52 }
  0x83   :  { %291 = vmatmul.f32.gmra.mxu1 %v55_v53  ;;  %347 = vmatmul.f32.gmra.mxu2 %v56_v54 }
  0x85   :  { %403 = vmatmul.f32.gmra.mxu3 %v57_v55 }
  0x89   :  { %514 = vmatmul.msk.f32.gmra.mxu0 %vm155_vm0, %v58_v56 }
  0x8b   :  { %294 = vmatmul.f32.gmra.mxu1 %v60_v57  ;;  %350 = vmatmul.f32.gmra.mxu2 %v61_v58 }
  0x8d   :  { %406 = vmatmul.f32.gmra.mxu3 %v62_v59 }
  0x91   :  { %515 = vmatmul.msk.f32.gmra.mxu0 %vm155_vm0, %v63_v60 }
  0x93   :  { %297 = vmatmul.f32.gmra.mxu1 %v65_v61  ;;  %353 = vmatmul.f32.gmra.mxu2 %v66_v62 }
  0x95   :  { %409 = vmatmul.f32.gmra.mxu3 %v67_v63 }
  0x99   :  { %516 = vmatmul.msk.f32.gmra.mxu0 %vm155_vm0, %v68_v0 }
  0x9b   :  { %300 = vmatmul.f32.gmra.mxu1 %v70_v1  ;;  %356 = vmatmul.f32.gmra.mxu2 %v71_v2 }
  0x9d   :  { %412 = vmatmul.f32.gmra.mxu3 %v72_v3 }
  0x9e   :  { %v995_v4 = vpop.f32.mrf.mxu1 }
  0x9f   :  { %v225_v3 = vadd.f32 %v1013_v10, %v995_v4 }
  0xa1   :  { %517 = vmatmul.msk.f32.gmra.mxu0 %vm155_vm0, %v73_v5 }
  0xa2   :  { %v212_v9 = vpop.f32.mrf.mxu0 }
  0xa3   :  { %303 = vmatmul.f32.gmra.mxu1 %v75_v6  ;;  %359 = vmatmul.f32.gmra.mxu2 %v76_v7  ;;  %v213_v29 = vadd.f32 %v1013_v10, %v212_v9 }
  0xa4   :  { %v236_v11 = vpop.f32.mrf.mxu2 }
  0xa5   :  { %415 = vmatmul.f32.gmra.mxu3 %v77_v8  ;;  %v1016_v12 = vadd.f32 %v1013_v10, %v236_v11 }
  0xa6   :  { %v1018_v13 = vpop.f32.mrf.mxu1 }
  0xa9   :  { %518 = vmatmul.msk.f32.gmra.mxu0 %vm155_vm0, %v78_v14 }
  0xab   :  { %v215_v15 = vpop.f32.mrf.mxu0 }
  0xac   :  { %v216_v37 = vadd.f32 %v1013_v10, %v215_v15 }
  0xad   :  { %v239_v16 = vpop.f32.mrf.mxu2 }
  0xae   :  { %v1025_v17 = vadd.f32 %v1013_v10, %v239_v16 }
  0xaf   :  { %v1027_v18 = vpop.f32.mrf.mxu1 }
  0xb3   :  { %v218_v19 = vpop.f32.mrf.mxu0 }
  0xb4   :  { %v219_v47 = vadd.f32 %v1013_v10, %v218_v19  ;;  %v228_v19 = vadd.f32 %v1013_v10, %v1018_v13 }
  0xb5   :  { %v242_v20 = vpop.f32.mrf.mxu2 }
  0xb6   :  { %v1030_v21 = vadd.f32 %v1013_v10, %v242_v20 }
  0xb7   :  { %v1032_v22 = vpop.f32.mrf.mxu1 }
  0xbe   :  { %v245_v23 = vpop.f32.mrf.mxu2  ;;  %v221_v24 = vpop.f32.mrf.mxu0 }
  0xbf   :  { %v1035_v25 = vadd.f32 %v1013_v10, %v245_v23  ;;  %v222_v57 = vadd.f32 %v1013_v10, %v221_v24 }
  0xc0   :  { %v248_v26 = vpop.f32.mrf.mxu3  ;;  %v268_v27 = vpop.f32.mrf.mxu1 }
  0xc1   :  { %v1038_v28 = vadd.f32 %v1013_v10, %v248_v26  ;;  %v269_v30 = vadd.f32 %v268_v27, %v213_v29 }
  0xc6   :  { %v324_v31 = vpop.f32.mrf.mxu2  ;;  %v436_v32 = vpop.f32.mrf.mxu0 }
  0xc7   :  { %v325_v33 = vadd.f32 %v324_v31, %v269_v30 }
  0xc8   :  { %v271_v34 = vpop.f32.mrf.mxu1  ;;  %v380_v35 = vpop.f32.mrf.mxu3 }
  0xc9   :  { %v381_v36 = vadd.f32 %v380_v35, %v325_v33  ;;  %v272_v39 = vadd.f32 %v271_v34, %v216_v37 }
  0xcb   :  { %v437_v38 = vadd.f32 %v436_v32, %v381_v36  ;;  %v231_v32 = vadd.f32 %v1013_v10, %v1027_v18 }
  0xcd   :  { %v475_v40 = vmax.f32 %v437_v38, 0.0 }
  0xce   :  { %v327_v41 = vpop.f32.mrf.mxu2  ;;  %v439_v42 = vpop.f32.mrf.mxu0 }
  0xcf   :  { %488 = vst.msk [vmem:[%s1111_s3] sm:$0xff] %vm155_vm0, %v475_v40  ;;  %v328_v43 = vadd.f32 %v327_v41, %v272_v39  ;;  %v234_v41 = vadd.f32 %v1013_v10, %v1032_v22 }
  0xd0   :  { %v274_v44 = vpop.f32.mrf.mxu1  ;;  %v383_v45 = vpop.f32.mrf.mxu3 }
  0xd1   :  { %v384_v46 = vadd.f32 %v383_v45, %v328_v43  ;;  %v275_v49 = vadd.f32 %v274_v44, %v219_v47 }
  0xd3   :  { %v440_v48 = vadd.f32 %v439_v42, %v384_v46 }
  0xd5   :  { %v476_v50 = vmax.f32 %v440_v48, 0.0 }
  0xd6   :  { %v330_v51 = vpop.f32.mrf.mxu2  ;;  %v442_v52 = vpop.f32.mrf.mxu0 }
  0xd7   :  { %489 = vst.msk [vmem:[%s1111_s3 + $0x8] sm:$0xff] %vm155_vm0, %v476_v50  ;;  %v331_v53 = vadd.f32 %v330_v51, %v275_v49 }
  0xd8   :  { %v277_v54 = vpop.f32.mrf.mxu1  ;;  %v386_v55 = vpop.f32.mrf.mxu3 }
  0xd9   :  { %v387_v56 = vadd.f32 %v386_v55, %v331_v53  ;;  %v278_v59 = vadd.f32 %v277_v54, %v222_v57 }
  0xdb   :  { %v443_v58 = vadd.f32 %v442_v52, %v387_v56 }
  0xdd   :  { %v477_v60 = vmax.f32 %v443_v58, 0.0 }
  0xde   :  { %v333_v61 = vpop.f32.mrf.mxu2  ;;  %v445_v62 = vpop.f32.mrf.mxu0 }
  0xdf   :  { %490 = vst.msk [vmem:[%s1111_s3 + $0x10] sm:$0xff] %vm155_vm0, %v477_v60  ;;  %v334_v63 = vadd.f32 %v333_v61, %v278_v59 }
  0xe0   :  { %v280_v0 = vpop.f32.mrf.mxu1  ;;  %v389_v1 = vpop.f32.mrf.mxu3 }
  0xe1   :  { %v390_v2 = vadd.f32 %v389_v1, %v334_v63  ;;  %v281_v6 = vadd.f32 %v280_v0, %v225_v3 }
  0xe3   :  { %v446_v5 = vadd.f32 %v445_v62, %v390_v2 }
  0xe5   :  { %v478_v7 = vmax.f32 %v446_v5, 0.0 }
  0xe6   :  { %v336_v8 = vpop.f32.mrf.mxu2  ;;  %v448_v9 = vpop.f32.mrf.mxu0 }
  0xe7   :  { %491 = vst.msk [vmem:[%s1111_s3 + $0x18] sm:$0xff] %vm155_vm0, %v478_v7  ;;  %v337_v11 = vadd.f32 %v336_v8, %v281_v6 }
  0xe8   :  { %v283_v14 = vpop.f32.mrf.mxu1  ;;  %v392_v15 = vpop.f32.mrf.mxu3 }
  0xe9   :  { %v393_v16 = vadd.f32 %v392_v15, %v337_v11  ;;  %v284_v23 = vadd.f32 %v283_v14, %v228_v19 }
  0xeb   :  { %v449_v20 = vadd.f32 %v448_v9, %v393_v16 }
  0xed   :  { %v479_v4 = vmax.f32 %v449_v20, 0.0 }
  0xee   :  { %v339_v24 = vpop.f32.mrf.mxu2  ;;  %v451_v26 = vpop.f32.mrf.mxu0 }
  0xef   :  { %492 = vst.msk [vmem:[%s1111_s3 + $0x20] sm:$0xff] %vm155_vm0, %v479_v4  ;;  %v340_v27 = vadd.f32 %v339_v24, %v284_v23 }
  0xf0   :  { %v286_v29 = vpop.f32.mrf.mxu1  ;;  %v395_v30 = vpop.f32.mrf.mxu3 }
  0xf1   :  { %v396_v31 = vadd.f32 %v395_v30, %v340_v27  ;;  %v287_v34 = vadd.f32 %v286_v29, %v231_v32 }
  0xf3   :  { %v452_v33 = vadd.f32 %v451_v26, %v396_v31 }
  0xf5   :  { %v480_v13 = vmax.f32 %v452_v33, 0.0 }
  0xf6   :  { %v342_v35 = vpop.f32.mrf.mxu2  ;;  %v454_v36 = vpop.f32.mrf.mxu0 }
  0xf7   :  { %493 = vst.msk [vmem:[%s1111_s3 + $0x28] sm:$0xff] %vm155_vm0, %v480_v13  ;;  %v343_v37 = vadd.f32 %v342_v35, %v287_v34 }
  0xf8   :  { %v289_v38 = vpop.f32.mrf.mxu1  ;;  %v398_v39 = vpop.f32.mrf.mxu3 }
  0xf9   :  { %v399_v40 = vadd.f32 %v398_v39, %v343_v37  ;;  %v290_v43 = vadd.f32 %v289_v38, %v234_v41 }
  0xfb   :  { %v455_v42 = vadd.f32 %v454_v36, %v399_v40 }
  0xfd   :  { %v481_v18 = vmax.f32 %v455_v42, 0.0 }
  0xfe   :  { %v345_v44 = vpop.f32.mrf.mxu2  ;;  %v457_v45 = vpop.f32.mrf.mxu0 }
  0xff   :  { %494 = vst.msk [vmem:[%s1111_s3 + $0x30] sm:$0xff] %vm155_vm0, %v481_v18  ;;  %v346_v46 = vadd.f32 %v345_v44, %v290_v43 }
 0x100   :  { %v292_v47 = vpop.f32.mrf.mxu1  ;;  %v401_v48 = vpop.f32.mrf.mxu3 }
 0x101   :  { %v402_v49 = vadd.f32 %v401_v48, %v346_v46  ;;  %v293_v51 = vadd.f32 %v292_v47, %v1016_v12 }
 0x103   :  { %v458_v50 = vadd.f32 %v457_v45, %v402_v49 }
 0x105   :  { %v482_v52 = vmax.f32 %v458_v50, 0.0 }
 0x106   :  { %v348_v53 = vpop.f32.mrf.mxu2  ;;  %v460_v10 = vpop.f32.mrf.mxu0 }
 0x107   :  { %495 = vst.msk [vmem:[%s1111_s3 + $0x38] sm:$0xff] %vm155_vm0, %v482_v52  ;;  %v349_v22 = vadd.f32 %v348_v53, %v293_v51 }
 0x108   :  { %v295_v54 = vpop.f32.mrf.mxu1  ;;  %v404_v55 = vpop.f32.mrf.mxu3 }
 0x109   :  { %v405_v56 = vadd.f32 %v404_v55, %v349_v22  ;;  %v296_v58 = vadd.f32 %v295_v54, %v1025_v17 }
 0x10b   :  { %v461_v57 = vadd.f32 %v460_v10, %v405_v56 }
 0x10d   :  { %v483_v59 = vmax.f32 %v461_v57, 0.0 }
 0x10e   :  { %v351_v60 = vpop.f32.mrf.mxu2  ;;  %v463_v61 = vpop.f32.mrf.mxu0 }
 0x10f   :  { %496 = vst.msk [vmem:[%s1111_s3 + $0x40] sm:$0xff] %vm155_vm0, %v483_v59  ;;  %v352_v12 = vadd.f32 %v351_v60, %v296_v58 }
 0x110   :  { %v298_v62 = vpop.f32.mrf.mxu1  ;;  %v407_v63 = vpop.f32.mrf.mxu3 }
 0x111   :  { %v408_v0 = vadd.f32 %v407_v63, %v352_v12  ;;  %v299_v2 = vadd.f32 %v298_v62, %v1030_v21 }
 0x113   :  { %v464_v1 = vadd.f32 %v463_v61, %v408_v0 }
 0x115   :  { %v484_v3 = vmax.f32 %v464_v1, 0.0 }
 0x116   :  { %v354_v5 = vpop.f32.mrf.mxu2  ;;  %v466_v6 = vpop.f32.mrf.mxu0 }
 0x117   :  { %497 = vst.msk [vmem:[%s1111_s3 + $0x48] sm:$0xff] %vm155_vm0, %v484_v3  ;;  %v355_v17 = vadd.f32 %v354_v5, %v299_v2 }
 0x118   :  { %v301_v7 = vpop.f32.mrf.mxu1  ;;  %v410_v8 = vpop.f32.mrf.mxu3 }
 0x119   :  { %v411_v9 = vadd.f32 %v410_v8, %v355_v17  ;;  %v302_v14 = vadd.f32 %v301_v7, %v1035_v25 }
 0x11b   :  { %v467_v11 = vadd.f32 %v466_v6, %v411_v9 }
 0x11d   :  { %v485_v15 = vmax.f32 %v467_v11, 0.0 }
 0x11e   :  { %v357_v16 = vpop.f32.mrf.mxu2  ;;  %v469_v19 = vpop.f32.mrf.mxu0 }
 0x11f   :  { %498 = vst.msk [vmem:[%s1111_s3 + $0x50] sm:$0xff] %vm155_vm0, %v485_v15  ;;  %v358_v21 = vadd.f32 %v357_v16, %v302_v14 }
 0x120   :  { %v413_v20 = vpop.f32.mrf.mxu3  ;;  %v304_v4 = vpop.f32.mrf.mxu1 }
 0x121   :  { %v414_v23 = vadd.f32 %v413_v20, %v358_v21  ;;  %v305_v26 = vadd.f32 %v304_v4, %v1038_v28 }
 0x123   :  { %v470_v24 = vadd.f32 %v469_v19, %v414_v23 }
 0x125   :  { %v486_v27 = vmax.f32 %v470_v24, 0.0 }
 0x126   :  { %v360_v29 = vpop.f32.mrf.mxu2  ;;  %v472_v31 = vpop.f32.mrf.mxu0 }
 0x127   :  { %499 = vst.msk [vmem:[%s1111_s3 + $0x58] sm:$0xff] %vm155_vm0, %v486_v27  ;;  %v361_v25 = vadd.f32 %v360_v29, %v305_v26 }
 0x128   :  { %v416_v30 = vpop.f32.mrf.mxu3 }
 0x129   :  { %v417_v32 = vadd.f32 %v416_v30, %v361_v25 }
 0x12b   :  { %v473_v33 = vadd.f32 %v472_v31, %v417_v32 }
 0x12d   :  { %v487_v34 = vmax.f32 %v473_v33, 0.0 }
 0x12f   :  { %501 = vst.msk [vmem:[%s1111_s3 + $0x60] sm:$0x3] %vm500_vm1, %v487_v34 }

// kernel: dqn_forward.7
= control target key start
LH: loop header
LB: loop body
LE: loop exit
PB: predicated region body
PF: predicated region fallthrough
CT: control target
= control target key end

     0   :  { %s9067_s0 = inlined_call_operand.vmem [shape: f32[2,3136], index: 0, kind: input, shape index: {}]   ;;  %s9068_s1 = inlined_call_operand.vmem [shape: f32[3136,512], index: 1, kind: input, shape index: {}]   ;;  %s9069_s2 = inlined_call_operand.vmem [shape: f32[1,512], index: 2, kind: input, shape index: {}]   ;;  %s9070_s3 = inlined_call_operand.vmem [shape: f32[512,6], index: 3, kind: input, shape index: {}]   ;;  %s9071_s4 = inlined_call_operand.vmem [shape: f32[1,6], index: 4, kind: input, shape index: {}]   ;;  %s9072_s5 = inlined_call_operand.hbm [shape: f32[2,6], index: 5, kind: output, shape index: {}]  }
   0x1   :  { %v88_v0 = vld [vmem:[%s9068_s1 + $0x1e0] sm:$0xff] }
   0x2   :  { %v152_v1 = vld [vmem:[%s9068_s1 + $0x3e0] sm:$0xff]  ;;  %1673 = vmatpush.msra.mxu0 %v88_v0 }
   0x3   :  { %v216_v2 = vld [vmem:[%s9068_s1 + $0x5e0] sm:$0xff]  ;;  %1693 = vmatpush.msra.mxu1 %v152_v1 }
   0x4   :  { %v280_v3 = vld [vmem:[%s9068_s1 + $0x7e0] sm:$0xff]  ;;  %1713 = vmatpush.msra.mxu2 %v216_v2 }
   0x5   :  { %v84_v4 = vld [vmem:[%s9068_s1 + $0x1c0] sm:$0xff]  ;;  %1733 = vmatpush.msra.mxu3 %v280_v3 }
   0x6   :  { %v148_v5 = vld [vmem:[%s9068_s1 + $0x3c0] sm:$0xff]  ;;  %1674 = vmatpush.msra.mxu0 %v84_v4 }
   0x7   :  { %v212_v6 = vld [vmem:[%s9068_s1 + $0x5c0] sm:$0xff]  ;;  %1694 = vmatpush.msra.mxu1 %v148_v5 }
   0x8   :  { %v276_v7 = vld [vmem:[%s9068_s1 + $0x7c0] sm:$0xff]  ;;  %1714 = vmatpush.msra.mxu2 %v212_v6 }
   0x9   :  { %v80_v8 = vld [vmem:[%s9068_s1 + $0x1a0] sm:$0xff]  ;;  %1734 = vmatpush.msra.mxu3 %v276_v7 }
   0xa   :  { %v144_v9 = vld [vmem:[%s9068_s1 + $0x3a0] sm:$0xff]  ;;  %1675 = vmatpush.msra.mxu0 %v80_v8 }
   0xb   :  { %v208_v10 = vld [vmem:[%s9068_s1 + $0x5a0] sm:$0xff]  ;;  %1695 = vmatpush.msra.mxu1 %v144_v9 }
   0xc   :  { %v272_v11 = vld [vmem:[%s9068_s1 + $0x7a0] sm:$0xff]  ;;  %1715 = vmatpush.msra.mxu2 %v208_v10 }
   0xd   :  { %v76_v12 = vld [vmem:[%s9068_s1 + $0x180] sm:$0xff]  ;;  %1735 = vmatpush.msra.mxu3 %v272_v11 }
   0xe   :  { %v140_v13 = vld [vmem:[%s9068_s1 + $0x380] sm:$0xff]  ;;  %1676 = vmatpush.msra.mxu0 %v76_v12 }
   0xf   :  { %v204_v14 = vld [vmem:[%s9068_s1 + $0x580] sm:$0xff]  ;;  %1696 = vmatpush.msra.mxu1 %v140_v13 }
  0x10   :  { %v268_v15 = vld [vmem:[%s9068_s1 + $0x780] sm:$0xff]  ;;  %1716 = vmatpush.msra.mxu2 %v204_v14 }
  0x11   :  { %v72_v16 = vld [vmem:[%s9068_s1 + $0x160] sm:$0xff]  ;;  %1736 = vmatpush.msra.mxu3 %v268_v15 }
  0x12   :  { %v136_v17 = vld [vmem:[%s9068_s1 + $0x360] sm:$0xff]  ;;  %1677 = vmatpush.msra.mxu0 %v72_v16 }
  0x13   :  { %v200_v18 = vld [vmem:[%s9068_s1 + $0x560] sm:$0xff]  ;;  %1697 = vmatpush.msra.mxu1 %v136_v17 }
  0x14   :  { %v264_v19 = vld [vmem:[%s9068_s1 + $0x760] sm:$0xff]  ;;  %1717 = vmatpush.msra.mxu2 %v200_v18 }
  0x15   :  { %v68_v20 = vld [vmem:[%s9068_s1 + $0x140] sm:$0xff]  ;;  %1737 = vmatpush.msra.mxu3 %v264_v19 }
  0x16   :  { %v132_v21 = vld [vmem:[%s9068_s1 + $0x340] sm:$0xff]  ;;  %1678 = vmatpush.msra.mxu0 %v68_v20 }
  0x17   :  { %v196_v22 = vld [vmem:[%s9068_s1 + $0x540] sm:$0xff]  ;;  %1698 = vmatpush.msra.mxu1 %v132_v21 }
  0x18   :  { %v260_v23 = vld [vmem:[%s9068_s1 + $0x740] sm:$0xff]  ;;  %1718 = vmatpush.msra.mxu2 %v196_v22 }
  0x19   :  { %v64_v24 = vld [vmem:[%s9068_s1 + $0x120] sm:$0xff]  ;;  %1738 = vmatpush.msra.mxu3 %v260_v23 }
  0x1a   :  { %v128_v25 = vld [vmem:[%s9068_s1 + $0x320] sm:$0xff]  ;;  %1679 = vmatpush.msra.mxu0 %v64_v24 }
  0x1b   :  { %v192_v26 = vld [vmem:[%s9068_s1 + $0x520] sm:$0xff]  ;;  %1699 = vmatpush.msra.mxu1 %v128_v25 }
  0x1c   :  { %v256_v27 = vld [vmem:[%s9068_s1 + $0x720] sm:$0xff]  ;;  %1719 = vmatpush.msra.mxu2 %v192_v26 }
  0x1d   :  { %v60_v28 = vld [vmem:[%s9068_s1 + $0x100] sm:$0xff]  ;;  %1739 = vmatpush.msra.mxu3 %v256_v27 }
  0x1e   :  { %v124_v29 = vld [vmem:[%s9068_s1 + $0x300] sm:$0xff]  ;;  %1680 = vmatpush.msra.mxu0 %v60_v28 }
  0x1f   :  { %v188_v30 = vld [vmem:[%s9068_s1 + $0x500] sm:$0xff]  ;;  %1700 = vmatpush.msra.mxu1 %v124_v29 }
  0x20   :  { %v252_v31 = vld [vmem:[%s9068_s1 + $0x700] sm:$0xff]  ;;  %1720 = vmatpush.msra.mxu2 %v188_v30 }
  0x21   :  { %v56_v32 = vld [vmem:[%s9068_s1 + $0xe0] sm:$0xff]  ;;  %1740 = vmatpush.msra.mxu3 %v252_v31 }
  0x22   :  { %v120_v33 = vld [vmem:[%s9068_s1 + $0x2e0] sm:$0xff]  ;;  %1681 = vmatpush.msra.mxu0 %v56_v32 }
  0x23   :  { %v184_v34 = vld [vmem:[%s9068_s1 + $0x4e0] sm:$0xff]  ;;  %1701 = vmatpush.msra.mxu1 %v120_v33 }
  0x24   :  { %v248_v35 = vld [vmem:[%s9068_s1 + $0x6e0] sm:$0xff]  ;;  %1721 = vmatpush.msra.mxu2 %v184_v34 }
  0x25   :  { %v52_v36 = vld [vmem:[%s9068_s1 + $0xc0] sm:$0xff]  ;;  %1741 = vmatpush.msra.mxu3 %v248_v35 }
  0x26   :  { %v116_v37 = vld [vmem:[%s9068_s1 + $0x2c0] sm:$0xff]  ;;  %1682 = vmatpush.msra.mxu0 %v52_v36 }
  0x27   :  { %v180_v38 = vld [vmem:[%s9068_s1 + $0x4c0] sm:$0xff]  ;;  %1702 = vmatpush.msra.mxu1 %v116_v37 }
  0x28   :  { %v244_v39 = vld [vmem:[%s9068_s1 + $0x6c0] sm:$0xff]  ;;  %1722 = vmatpush.msra.mxu2 %v180_v38 }
  0x29   :  { %v48_v40 = vld [vmem:[%s9068_s1 + $0xa0] sm:$0xff]  ;;  %1742 = vmatpush.msra.mxu3 %v244_v39 }
  0x2a   :  { %v112_v41 = vld [vmem:[%s9068_s1 + $0x2a0] sm:$0xff]  ;;  %1683 = vmatpush.msra.mxu0 %v48_v40 }
  0x2b   :  { %v176_v42 = vld [vmem:[%s9068_s1 + $0x4a0] sm:$0xff]  ;;  %1703 = vmatpush.msra.mxu1 %v112_v41 }
  0x2c   :  { %v240_v43 = vld [vmem:[%s9068_s1 + $0x6a0] sm:$0xff]  ;;  %1723 = vmatpush.msra.mxu2 %v176_v42 }
  0x2d   :  { %v44_v44 = vld [vmem:[%s9068_s1 + $0x80] sm:$0xff]  ;;  %1743 = vmatpush.msra.mxu3 %v240_v43  ;;  %v22_v43 = vld [vmem:[%s9067_s0 + $0x8] sm:$0xff] }
  0x2e   :  { %v108_v45 = vld [vmem:[%s9068_s1 + $0x280] sm:$0xff]  ;;  %1684 = vmatpush.msra.mxu0 %v44_v44  ;;  %1615 = vst [vmem:[#allocation1 + $0x20] ss:$4 sm:$0xff] %v22_v43 }
  0x2f   :  { %v172_v46 = vld [vmem:[%s9068_s1 + $0x480] sm:$0xff]  ;;  %1704 = vmatpush.msra.mxu1 %v108_v45 }
  0x30   :  { %v236_v47 = vld [vmem:[%s9068_s1 + $0x680] sm:$0xff]  ;;  %1724 = vmatpush.msra.mxu2 %v172_v46  ;;  %v23_v46 = vld [vmem:[%s9067_s0 + $0x10] sm:$0xff] }
  0x31   :  { %v40_v48 = vld [vmem:[%s9068_s1 + $0x60] sm:$0xff]  ;;  %1744 = vmatpush.msra.mxu3 %v236_v47 }
  0x32   :  { %v104_v49 = vld [vmem:[%s9068_s1 + $0x260] sm:$0xff]  ;;  %1685 = vmatpush.msra.mxu0 %v40_v48 }
  0x33   :  { %v168_v50 = vld [vmem:[%s9068_s1 + $0x460] sm:$0xff]  ;;  %1705 = vmatpush.msra.mxu1 %v104_v49 }
  0x34   :  { %v232_v51 = vld [vmem:[%s9068_s1 + $0x660] sm:$0xff]  ;;  %1725 = vmatpush.msra.mxu2 %v168_v50 }
  0x35   :  { %v36_v52 = vld [vmem:[%s9068_s1 + $0x40] sm:$0xff]  ;;  %1745 = vmatpush.msra.mxu3 %v232_v51 }
  0x36   :  { %v100_v53 = vld [vmem:[%s9068_s1 + $0x240] sm:$0xff]  ;;  %1686 = vmatpush.msra.mxu0 %v36_v52 }
  0x37   :  { %v164_v54 = vld [vmem:[%s9068_s1 + $0x440] sm:$0xff]  ;;  %1706 = vmatpush.msra.mxu1 %v100_v53 }
  0x38   :  { %v228_v55 = vld [vmem:[%s9068_s1 + $0x640] sm:$0xff]  ;;  %1726 = vmatpush.msra.mxu2 %v164_v54 }
  0x39   :  { %v32_v56 = vld [vmem:[%s9068_s1 + $0x20] sm:$0xff]  ;;  %1746 = vmatpush.msra.mxu3 %v228_v55 }
  0x3a   :  { %v96_v57 = vld [vmem:[%s9068_s1 + $0x220] sm:$0xff]  ;;  %1687 = vmatpush.msra.mxu0 %v32_v56 }
  0x3b   :  { %v160_v58 = vld [vmem:[%s9068_s1 + $0x420] sm:$0xff]  ;;  %1707 = vmatpush.msra.mxu1 %v96_v57 }
  0x3c   :  { %v224_v59 = vld [vmem:[%s9068_s1 + $0x620] sm:$0xff]  ;;  %1727 = vmatpush.msra.mxu2 %v160_v58 }
  0x3d   :  { %v28_v60 = vld [vmem:[%s9068_s1] sm:$0xff]  ;;  %1747 = vmatpush.msra.mxu3 %v224_v59 }
  0x3e   :  { %v92_v61 = vld [vmem:[%s9068_s1 + $0x200] sm:$0xff]  ;;  %1688 = vmatpush.msra.mxu0 %v28_v60 }
  0x3f   :  { %v156_v62 = vld [vmem:[%s9068_s1 + $0x400] sm:$0xff]  ;;  %1708 = vmatpush.msra.mxu1 %v92_v61 }
  0x40   :  { %v220_v63 = vld [vmem:[%s9068_s1 + $0x600] sm:$0xff]  ;;  %1728 = vmatpush.msra.mxu2 %v156_v62 }
  0x41   :  { %v344_v0 = vld [vmem:[%s9068_s1 + $0x9e0] sm:$0xff]  ;;  %1748 = vmatpush.msra.mxu3 %v220_v63  ;;  %v24_v63 = vld [vmem:[%s9067_s0 + $0x18] sm:$0xff] }
  0x42   :  { %v408_v1 = vld [vmem:[%s9068_s1 + $0xbe0] sm:$0xff]  ;;  %1753 = vmatpush.msrb.mxu0 %v344_v0  ;;  %v4302_v0 = vld.sshfl [vmem:[#allocation1 + $0x30] sm:$0xff pattern:$0x73625140] }
  0x43   :  { %v472_v2 = vld [vmem:[%s9068_s1 + $0xde0] sm:$0xff]  ;;  %1773 = vmatpush.msrb.mxu1 %v408_v1 }
  0x44   :  { %v536_v3 = vld [vmem:[%s9068_s1 + $0xfe0] sm:$0xff]  ;;  %1793 = vmatpush.msrb.mxu2 %v472_v2  ;;  %v4306_v2 = vld.sshfl [vmem:[#allocation1 + $0x38] sm:$0xff pattern:$0x73625140] }
  0x45   :  { %v340_v4 = vld [vmem:[%s9068_s1 + $0x9c0] sm:$0xff]  ;;  %1813 = vmatpush.msrb.mxu3 %v536_v3  ;;  %v4308_v3 = vld.sshfl [vmem:[#allocation1 + $0x28] sm:$0xff pattern:$0x73625140] }
  0x46   :  { %v404_v5 = vld [vmem:[%s9068_s1 + $0xbc0] sm:$0xff]  ;;  %1754 = vmatpush.msrb.mxu0 %v340_v4 }
  0x47   :  { %v468_v6 = vld [vmem:[%s9068_s1 + $0xdc0] sm:$0xff]  ;;  %1774 = vmatpush.msrb.mxu1 %v404_v5 }
  0x48   :  { %v532_v7 = vld [vmem:[%s9068_s1 + $0xfc0] sm:$0xff]  ;;  %1794 = vmatpush.msrb.mxu2 %v468_v6 }
  0x49   :  { %v336_v8 = vld [vmem:[%s9068_s1 + $0x9a0] sm:$0xff]  ;;  %1814 = vmatpush.msrb.mxu3 %v532_v7 }
  0x4a   :  { %v400_v9 = vld [vmem:[%s9068_s1 + $0xba0] sm:$0xff]  ;;  %1755 = vmatpush.msrb.mxu0 %v336_v8 }
  0x4b   :  { %v464_v10 = vld [vmem:[%s9068_s1 + $0xda0] sm:$0xff]  ;;  %1775 = vmatpush.msrb.mxu1 %v400_v9 }
  0x4c   :  { %v528_v11 = vld [vmem:[%s9068_s1 + $0xfa0] sm:$0xff]  ;;  %1795 = vmatpush.msrb.mxu2 %v464_v10 }
  0x4d   :  { %v332_v12 = vld [vmem:[%s9068_s1 + $0x980] sm:$0xff]  ;;  %1815 = vmatpush.msrb.mxu3 %v528_v11 }
  0x4e   :  { %v396_v13 = vld [vmem:[%s9068_s1 + $0xb80] sm:$0xff]  ;;  %1756 = vmatpush.msrb.mxu0 %v332_v12 }
  0x4f   :  { %v460_v14 = vld [vmem:[%s9068_s1 + $0xd80] sm:$0xff]  ;;  %1776 = vmatpush.msrb.mxu1 %v396_v13 }
  0x50   :  { %v524_v15 = vld [vmem:[%s9068_s1 + $0xf80] sm:$0xff]  ;;  %1796 = vmatpush.msrb.mxu2 %v460_v14 }
  0x51   :  { %v328_v16 = vld [vmem:[%s9068_s1 + $0x960] sm:$0xff]  ;;  %1816 = vmatpush.msrb.mxu3 %v524_v15 }
  0x52   :  { %v392_v17 = vld [vmem:[%s9068_s1 + $0xb60] sm:$0xff]  ;;  %1757 = vmatpush.msrb.mxu0 %v328_v16 }
  0x53   :  { %v456_v18 = vld [vmem:[%s9068_s1 + $0xd60] sm:$0xff]  ;;  %1777 = vmatpush.msrb.mxu1 %v392_v17 }
  0x54   :  { %v520_v19 = vld [vmem:[%s9068_s1 + $0xf60] sm:$0xff]  ;;  %1797 = vmatpush.msrb.mxu2 %v456_v18 }
  0x55   :  { %v324_v20 = vld [vmem:[%s9068_s1 + $0x940] sm:$0xff]  ;;  %1817 = vmatpush.msrb.mxu3 %v520_v19 }
  0x56   :  { %v388_v21 = vld [vmem:[%s9068_s1 + $0xb40] sm:$0xff]  ;;  %1758 = vmatpush.msrb.mxu0 %v324_v20 }
  0x57   :  { %v452_v22 = vld [vmem:[%s9068_s1 + $0xd40] sm:$0xff]  ;;  %1778 = vmatpush.msrb.mxu1 %v388_v21 }
  0x58   :  { %v516_v23 = vld [vmem:[%s9068_s1 + $0xf40] sm:$0xff]  ;;  %1798 = vmatpush.msrb.mxu2 %v452_v22 }
  0x59   :  { %v320_v24 = vld [vmem:[%s9068_s1 + $0x920] sm:$0xff]  ;;  %1818 = vmatpush.msrb.mxu3 %v516_v23 }
  0x5a   :  { %v384_v25 = vld [vmem:[%s9068_s1 + $0xb20] sm:$0xff]  ;;  %1759 = vmatpush.msrb.mxu0 %v320_v24 }
  0x5b   :  { %v21_v26 = vld [vmem:[%s9067_s0] sm:$0xff]  ;;  %1779 = vmatpush.msrb.mxu1 %v384_v25 }
  0x5c   :  { %v448_v27 = vld [vmem:[%s9068_s1 + $0xd20] sm:$0xff]  ;;  %1613 = vst [vmem:[#allocation1] ss:$4 sm:$0xff] %v21_v26 }
  0x5d   :  { %v512_v28 = vld [vmem:[%s9068_s1 + $0xf20] sm:$0xff]  ;;  %1799 = vmatpush.msrb.mxu2 %v448_v27 }
  0x5e   :  { %v316_v29 = vld [vmem:[%s9068_s1 + $0x900] sm:$0xff]  ;;  %1819 = vmatpush.msrb.mxu3 %v512_v28 }
  0x5f   :  { %v380_v30 = vld [vmem:[%s9068_s1 + $0xb00] sm:$0xff]  ;;  %1760 = vmatpush.msrb.mxu0 %v316_v29 }
  0x60   :  { %v444_v31 = vld [vmem:[%s9068_s1 + $0xd00] sm:$0xff]  ;;  %1780 = vmatpush.msrb.mxu1 %v380_v30 }
  0x61   :  { %v508_v32 = vld [vmem:[%s9068_s1 + $0xf00] sm:$0xff]  ;;  %1800 = vmatpush.msrb.mxu2 %v444_v31 }
  0x62   :  { %v312_v33 = vld [vmem:[%s9068_s1 + $0x8e0] sm:$0xff]  ;;  %1820 = vmatpush.msrb.mxu3 %v508_v32 }
  0x63   :  { %v376_v34 = vld [vmem:[%s9068_s1 + $0xae0] sm:$0xff]  ;;  %1761 = vmatpush.msrb.mxu0 %v312_v33  ;;  %v4260_v49 = vld.sshfl [vmem:[#allocation1 + $0x8] sm:$0xff pattern:$0x73625140] }
  0x64   :  { %v440_v35 = vld [vmem:[%s9068_s1 + $0xce0] sm:$0xff]  ;;  %1781 = vmatpush.msrb.mxu1 %v376_v34  ;;  %v4262_v50 = vld.sshfl [vmem:[#allocation1 + $0x10] sm:$0xff pattern:$0x73625140] }
  0x65   :  { %v504_v36 = vld [vmem:[%s9068_s1 + $0xee0] sm:$0xff]  ;;  %1801 = vmatpush.msrb.mxu2 %v440_v35  ;;  %v4264_v51 = vld.sshfl [vmem:[#allocation1 + $0x18] sm:$0xff pattern:$0x73625140]  ;;  %1709 = vmatmul.f32.vlgmr.msra.gmra.mxu1 %v4260_v49 }
  0x66   :  { %v308_v37 = vld [vmem:[%s9068_s1 + $0x8c0] sm:$0xff]  ;;  %1821 = vmatpush.msrb.mxu3 %v504_v36  ;;  %1729 = vmatmul.f32.vlgmr.msra.gmra.mxu2 %v4262_v50 }
  0x67   :  { %v372_v38 = vld [vmem:[%s9068_s1 + $0xac0] sm:$0xff]  ;;  %1762 = vmatpush.msrb.mxu0 %v308_v37  ;;  %1749 = vmatmul.f32.vlgmr.msra.gmra.mxu3 %v4264_v51 }
  0x68   :  { %v436_v39 = vld [vmem:[%s9068_s1 + $0xcc0] sm:$0xff]  ;;  %1782 = vmatpush.msrb.mxu1 %v372_v38 }
  0x69   :  { %v500_v40 = vld [vmem:[%s9068_s1 + $0xec0] sm:$0xff]  ;;  %1802 = vmatpush.msrb.mxu2 %v436_v39 }
  0x6a   :  { %v304_v41 = vld [vmem:[%s9068_s1 + $0x8a0] sm:$0xff]  ;;  %1822 = vmatpush.msrb.mxu3 %v500_v40 }
  0x6b   :  { %v368_v42 = vld [vmem:[%s9068_s1 + $0xaa0] sm:$0xff]  ;;  %1763 = vmatpush.msrb.mxu0 %v304_v41 }
  0x6c   :  { %v432_v44 = vld [vmem:[%s9068_s1 + $0xca0] sm:$0xff]  ;;  %1783 = vmatpush.msrb.mxu1 %v368_v42 }
  0x6d   :  { %v496_v45 = vld [vmem:[%s9068_s1 + $0xea0] sm:$0xff]  ;;  %1803 = vmatpush.msrb.mxu2 %v432_v44 }
  0x6e   :  { %v300_v47 = vld [vmem:[%s9068_s1 + $0x880] sm:$0xff]  ;;  %1823 = vmatpush.msrb.mxu3 %v496_v45 }
  0x6f   :  { %v4258_v48 = vld.sshfl [vmem:[#allocation1] sm:$0xff pattern:$0x73625140]  ;;  %1764 = vmatpush.msrb.mxu0 %v300_v47 }
  0x70   :  { %v364_v52 = vld [vmem:[%s9068_s1 + $0xa80] sm:$0xff]  ;;  %1624 = vst [vmem:[#allocation1] ss:$4 sm:$0xff] %v23_v46  ;;  %1689 = vmatmul.f32.vlgmr.msra.gmra.mxu0 %v4258_v48 }
  0x71   :  { %v428_v53 = vld [vmem:[%s9068_s1 + $0xc80] sm:$0xff]  ;;  %1784 = vmatpush.msrb.mxu1 %v364_v52 }
  0x72   :  { %v492_v54 = vld [vmem:[%s9068_s1 + $0xe80] sm:$0xff]  ;;  %1804 = vmatpush.msrb.mxu2 %v428_v53 }
  0x73   :  { %v296_v55 = vld [vmem:[%s9068_s1 + $0x860] sm:$0xff]  ;;  %1824 = vmatpush.msrb.mxu3 %v492_v54 }
  0x74   :  { %v360_v56 = vld [vmem:[%s9068_s1 + $0xa60] sm:$0xff]  ;;  %1765 = vmatpush.msrb.mxu0 %v296_v55 }
  0x75   :  { %v424_v57 = vld [vmem:[%s9068_s1 + $0xc60] sm:$0xff]  ;;  %1785 = vmatpush.msrb.mxu1 %v360_v56 }
  0x76   :  { %v488_v58 = vld [vmem:[%s9068_s1 + $0xe60] sm:$0xff]  ;;  %1805 = vmatpush.msrb.mxu2 %v424_v57 }
  0x77   :  { %v292_v59 = vld [vmem:[%s9068_s1 + $0x840] sm:$0xff]  ;;  %1825 = vmatpush.msrb.mxu3 %v488_v58  ;;  %v4385_v28 = vld.sshfl [vmem:[#allocation1 + $0x10] sm:$0xff pattern:$0x73625140] }
  0x78   :  { %v356_v60 = vld [vmem:[%s9068_s1 + $0xa40] sm:$0xff]  ;;  %1766 = vmatpush.msrb.mxu0 %v292_v59  ;;  %v4390_v30 = vld.sshfl [vmem:[#allocation1 + $0x8] sm:$0xff pattern:$0x73625140] }
  0x79   :  { %v420_v61 = vld [vmem:[%s9068_s1 + $0xc40] sm:$0xff]  ;;  %1786 = vmatpush.msrb.mxu1 %v356_v60  ;;  %v4398_v33 = vld.sshfl [vmem:[#allocation1 + $0x18] sm:$0xff pattern:$0x73625140] }
  0x7a   :  { %v484_v62 = vld [vmem:[%s9068_s1 + $0xe40] sm:$0xff]  ;;  %1806 = vmatpush.msrb.mxu2 %v420_v61 }
  0x7b   :  { %v4304_v1 = vld.sshfl [vmem:[#allocation1 + $0x20] sm:$0xff pattern:$0x73625140]  ;;  %1826 = vmatpush.msrb.mxu3 %v484_v62 }
  0x7c   :  { %v288_v4 = vld [vmem:[%s9068_s1 + $0x820] sm:$0xff]  ;;  %1625 = vst [vmem:[#allocation1 + $0x20] ss:$4 sm:$0xff] %v24_v63 }
  0x7d   :  { %v352_v5 = vld [vmem:[%s9068_s1 + $0xa20] sm:$0xff]  ;;  %1767 = vmatpush.msrb.mxu0 %v288_v4 }
  0x7e   :  { %v416_v6 = vld [vmem:[%s9068_s1 + $0xc20] sm:$0xff]  ;;  %1787 = vmatpush.msrb.mxu1 %v352_v5 }
  0x7f   :  { %v480_v7 = vld [vmem:[%s9068_s1 + $0xe20] sm:$0xff]  ;;  %1807 = vmatpush.msrb.mxu2 %v416_v6 }
  0x80   :  { %v284_v8 = vld [vmem:[%s9068_s1 + $0x800] sm:$0xff]  ;;  %1827 = vmatpush.msrb.mxu3 %v480_v7 }
  0x81   :  { %v348_v9 = vld [vmem:[%s9068_s1 + $0xa00] sm:$0xff]  ;;  %1768 = vmatpush.msrb.mxu0 %v284_v8 }
  0x82   :  { %v412_v10 = vld [vmem:[%s9068_s1 + $0xc00] sm:$0xff]  ;;  %1788 = vmatpush.msrb.mxu1 %v348_v9 }
  0x83   :  { %v476_v11 = vld [vmem:[%s9068_s1 + $0xe00] sm:$0xff]  ;;  %1808 = vmatpush.msrb.mxu2 %v412_v10 }
  0x84   :  { %1828 = vmatpush.msrb.mxu3 %v476_v11  ;;  %v600_v12 = vld [vmem:[%s9068_s1 + $0x11e0] sm:$0xff] }
  0x85   :  { %v664_v13 = vld [vmem:[%s9068_s1 + $0x13e0] sm:$0xff]  ;;  %1833 = vmatpush.msra.mxu0 %v600_v12 }
  0x86   :  { %v728_v14 = vld [vmem:[%s9068_s1 + $0x15e0] sm:$0xff]  ;;  %1853 = vmatpush.msra.mxu1 %v664_v13 }
  0x87   :  { %v792_v15 = vld [vmem:[%s9068_s1 + $0x17e0] sm:$0xff]  ;;  %1873 = vmatpush.msra.mxu2 %v728_v14 }
  0x88   :  { %v596_v16 = vld [vmem:[%s9068_s1 + $0x11c0] sm:$0xff]  ;;  %1893 = vmatpush.msra.mxu3 %v792_v15 }
  0x89   :  { %v660_v17 = vld [vmem:[%s9068_s1 + $0x13c0] sm:$0xff]  ;;  %1834 = vmatpush.msra.mxu0 %v596_v16 }
  0x8a   :  { %v724_v18 = vld [vmem:[%s9068_s1 + $0x15c0] sm:$0xff]  ;;  %1854 = vmatpush.msra.mxu1 %v660_v17 }
  0x8b   :  { %v788_v19 = vld [vmem:[%s9068_s1 + $0x17c0] sm:$0xff]  ;;  %1874 = vmatpush.msra.mxu2 %v724_v18 }
  0x8c   :  { %v592_v20 = vld [vmem:[%s9068_s1 + $0x11a0] sm:$0xff]  ;;  %1894 = vmatpush.msra.mxu3 %v788_v19 }
  0x8d   :  { %v656_v21 = vld [vmem:[%s9068_s1 + $0x13a0] sm:$0xff]  ;;  %1835 = vmatpush.msra.mxu0 %v592_v20 }
  0x8e   :  { %v720_v22 = vld [vmem:[%s9068_s1 + $0x15a0] sm:$0xff]  ;;  %1855 = vmatpush.msra.mxu1 %v656_v21 }
  0x8f   :  { %v784_v23 = vld [vmem:[%s9068_s1 + $0x17a0] sm:$0xff]  ;;  %1875 = vmatpush.msra.mxu2 %v720_v22 }
  0x90   :  { %v588_v24 = vld [vmem:[%s9068_s1 + $0x1180] sm:$0xff]  ;;  %1895 = vmatpush.msra.mxu3 %v784_v23 }
  0x91   :  { %v652_v25 = vld [vmem:[%s9068_s1 + $0x1380] sm:$0xff]  ;;  %1836 = vmatpush.msra.mxu0 %v588_v24 }
  0x92   :  { %v716_v26 = vld [vmem:[%s9068_s1 + $0x1580] sm:$0xff]  ;;  %1856 = vmatpush.msra.mxu1 %v652_v25 }
  0x93   :  { %v4383_v27 = vld.sshfl [vmem:[#allocation1] sm:$0xff pattern:$0x73625140]  ;;  %1876 = vmatpush.msra.mxu2 %v716_v26 }
  0x94   :  { %v780_v29 = vld [vmem:[%s9068_s1 + $0x1780] sm:$0xff] }
  0x95   :  { %v584_v31 = vld [vmem:[%s9068_s1 + $0x1160] sm:$0xff]  ;;  %1896 = vmatpush.msra.mxu3 %v780_v29 }
  0x96   :  { %v25_v32 = vld [vmem:[%s9067_s0 + $0x20] sm:$0xff] }
  0x97   :  { %v648_v34 = vld [vmem:[%s9068_s1 + $0x1360] sm:$0xff]  ;;  %1634 = vst [vmem:[#allocation1] ss:$4 sm:$0xff] %v25_v32 }
  0x98   :  { %v712_v35 = vld [vmem:[%s9068_s1 + $0x1560] sm:$0xff] }
  0x99   :  { %v776_v36 = vld [vmem:[%s9068_s1 + $0x1760] sm:$0xff] }
  0x9a   :  { %10 = vsyncpa [#allocation3], 0  ;;  %1809 = vmatmul.f32.vlgmr.msrb.gmra.mxu2 %v4302_v0  ;;  %1837 = vmatpush.msra.mxu0 %v584_v31  ;;  %v580_v37 = vld [vmem:[%s9068_s1 + $0x1140] sm:$0xff]  ;;  %vm1670_vm0 = vcmask 523264   ;;  %s3891_s10 = smov [#allocation2]   ;;  %s3834_s14 = sshll.u32 %s9072_s5, 4  ;;  %s3835_s14 = int_to_ptr.hbm [resolvable:$true] %s3834_s14 }
  0x9b   :  { %1857 = vmatpush.msra.mxu1 %v648_v34  ;;  %1877 = vmatpush.msra.mxu2 %v712_v35  ;;  %v644_v38 = vld [vmem:[%s9068_s1 + $0x1340] sm:$0xff]  ;;  %s3832_s11 = sshll.u32 %s3891_s10, 4  ;;  %vm3825_vm1 = vcmask 41984   ;;  %s3833_s11 = int_to_ptr.vmem [resolvable:$true] %s3832_s11 }
  0x9c   :  { %v708_v39 = vld [vmem:[%s9068_s1 + $0x1540] sm:$0xff]  ;;  %1897 = vmatpush.msra.mxu3 %v776_v36  ;;  %1769 = vmatmul.f32.vlgmr.msrb.gmra.mxu0 %v4304_v1 }
  0x9d   :  { %v772_v40 = vld [vmem:[%s9068_s1 + $0x1740] sm:$0xff]  ;;  %1829 = vmatmul.f32.vlgmr.msrb.gmra.mxu3 %v4306_v2  ;;  %1838 = vmatpush.msra.mxu0 %v580_v37 }
  0x9e   :  { %v576_v41 = vld [vmem:[%s9068_s1 + $0x1120] sm:$0xff]  ;;  %1858 = vmatpush.msra.mxu1 %v644_v38  ;;  %1878 = vmatpush.msra.mxu2 %v708_v39 }
  0x9f   :  { %v640_v42 = vld [vmem:[%s9068_s1 + $0x1320] sm:$0xff]  ;;  %1898 = vmatpush.msra.mxu3 %v772_v40  ;;  %1789 = vmatmul.f32.vlgmr.msrb.gmra.mxu1 %v4308_v3 }
  0xa0   :  { %v704_v43 = vld [vmem:[%s9068_s1 + $0x1520] sm:$0xff]  ;;  %1839 = vmatpush.msra.mxu0 %v576_v41  ;;  %1859 = vmatpush.msra.mxu1 %v640_v42 }
  0xa1   :  { %v768_v44 = vld [vmem:[%s9068_s1 + $0x1720] sm:$0xff]  ;;  %1879 = vmatpush.msra.mxu2 %v704_v43  ;;  %v4590_v43 = vld.sshfl [vmem:[#allocation1 + $0x30] sm:$0xff pattern:$0x73625140] }
  0xa2   :  { %v572_v45 = vld [vmem:[%s9068_s1 + $0x1100] sm:$0xff]  ;;  %1899 = vmatpush.msra.mxu3 %v768_v44  ;;  %v4592_v44 = vld.sshfl [vmem:[#allocation1 + $0x28] sm:$0xff pattern:$0x73625140] }
  0xa3   :  { %v636_v46 = vld [vmem:[%s9068_s1 + $0x1300] sm:$0xff]  ;;  %1840 = vmatpush.msra.mxu0 %v572_v45 }
  0xa4   :  { %v700_v47 = vld [vmem:[%s9068_s1 + $0x1500] sm:$0xff]  ;;  %1860 = vmatpush.msra.mxu1 %v636_v46  ;;  %v26_v46 = vld [vmem:[%s9067_s0 + $0x28] sm:$0xff] }
  0xa5   :  { %v764_v52 = vld [vmem:[%s9068_s1 + $0x1700] sm:$0xff]  ;;  %1880 = vmatpush.msra.mxu2 %v700_v47  ;;  %v4600_v47 = vld.sshfl [vmem:[#allocation1 + $0x38] sm:$0xff pattern:$0x73625140] }
  0xa6   :  { %v568_v53 = vld [vmem:[%s9068_s1 + $0x10e0] sm:$0xff]  ;;  %1900 = vmatpush.msra.mxu3 %v764_v52 }
  0xa7   :  { %v632_v54 = vld [vmem:[%s9068_s1 + $0x12e0] sm:$0xff]  ;;  %1841 = vmatpush.msra.mxu0 %v568_v53 }
  0xa8   :  { %v696_v55 = vld [vmem:[%s9068_s1 + $0x14e0] sm:$0xff]  ;;  %1861 = vmatpush.msra.mxu1 %v632_v54 }
  0xa9   :  { %v760_v56 = vld [vmem:[%s9068_s1 + $0x16e0] sm:$0xff]  ;;  %1881 = vmatpush.msra.mxu2 %v696_v55 }
  0xaa   :  { %v564_v57 = vld [vmem:[%s9068_s1 + $0x10c0] sm:$0xff]  ;;  %1901 = vmatpush.msra.mxu3 %v760_v56 }
  0xab   :  { %v628_v58 = vld [vmem:[%s9068_s1 + $0x12c0] sm:$0xff]  ;;  %1842 = vmatpush.msra.mxu0 %v564_v57 }
  0xac   :  { %v692_v59 = vld [vmem:[%s9068_s1 + $0x14c0] sm:$0xff]  ;;  %1862 = vmatpush.msra.mxu1 %v628_v58 }
  0xad   :  { %v756_v60 = vld [vmem:[%s9068_s1 + $0x16c0] sm:$0xff]  ;;  %1882 = vmatpush.msra.mxu2 %v692_v59 }
  0xae   :  { %v560_v61 = vld [vmem:[%s9068_s1 + $0x10a0] sm:$0xff]  ;;  %1902 = vmatpush.msra.mxu3 %v756_v60 }
  0xaf   :  { %v624_v62 = vld [vmem:[%s9068_s1 + $0x12a0] sm:$0xff]  ;;  %1843 = vmatpush.msra.mxu0 %v560_v61 }
  0xb0   :  { %v688_v63 = vld [vmem:[%s9068_s1 + $0x14a0] sm:$0xff]  ;;  %1863 = vmatpush.msra.mxu1 %v624_v62 }
  0xb1   :  { %v752_v4 = vld [vmem:[%s9068_s1 + $0x16a0] sm:$0xff]  ;;  %1883 = vmatpush.msra.mxu2 %v688_v63 }
  0xb2   :  { %v556_v5 = vld [vmem:[%s9068_s1 + $0x1080] sm:$0xff]  ;;  %1903 = vmatpush.msra.mxu3 %v752_v4 }
  0xb3   :  { %v620_v6 = vld [vmem:[%s9068_s1 + $0x1280] sm:$0xff]  ;;  %1844 = vmatpush.msra.mxu0 %v556_v5 }
  0xb4   :  { %v684_v7 = vld [vmem:[%s9068_s1 + $0x1480] sm:$0xff]  ;;  %1864 = vmatpush.msra.mxu1 %v620_v6 }
  0xb5   :  { %v748_v8 = vld [vmem:[%s9068_s1 + $0x1680] sm:$0xff]  ;;  %1884 = vmatpush.msra.mxu2 %v684_v7 }
  0xb6   :  { %v552_v9 = vld [vmem:[%s9068_s1 + $0x1060] sm:$0xff]  ;;  %1904 = vmatpush.msra.mxu3 %v748_v8 }
  0xb7   :  { %v616_v10 = vld [vmem:[%s9068_s1 + $0x1260] sm:$0xff]  ;;  %1845 = vmatpush.msra.mxu0 %v552_v9 }
  0xb8   :  { %v680_v11 = vld [vmem:[%s9068_s1 + $0x1460] sm:$0xff]  ;;  %1865 = vmatpush.msra.mxu1 %v616_v10 }
  0xb9   :  { %v744_v12 = vld [vmem:[%s9068_s1 + $0x1660] sm:$0xff]  ;;  %1885 = vmatpush.msra.mxu2 %v680_v11 }
  0xba   :  { %v548_v13 = vld [vmem:[%s9068_s1 + $0x1040] sm:$0xff]  ;;  %1905 = vmatpush.msra.mxu3 %v744_v12 }
  0xbb   :  { %v612_v14 = vld [vmem:[%s9068_s1 + $0x1240] sm:$0xff]  ;;  %1846 = vmatpush.msra.mxu0 %v548_v13 }
  0xbc   :  { %v676_v15 = vld [vmem:[%s9068_s1 + $0x1440] sm:$0xff]  ;;  %1866 = vmatpush.msra.mxu1 %v612_v14 }
  0xbd   :  { %v740_v16 = vld [vmem:[%s9068_s1 + $0x1640] sm:$0xff]  ;;  %1886 = vmatpush.msra.mxu2 %v676_v15 }
  0xbe   :  { %v544_v17 = vld [vmem:[%s9068_s1 + $0x1020] sm:$0xff]  ;;  %1906 = vmatpush.msra.mxu3 %v740_v16 }
  0xbf   :  { %v608_v18 = vld [vmem:[%s9068_s1 + $0x1220] sm:$0xff]  ;;  %1847 = vmatpush.msra.mxu0 %v544_v17 }
  0xc0   :  { %v672_v19 = vld [vmem:[%s9068_s1 + $0x1420] sm:$0xff]  ;;  %1867 = vmatpush.msra.mxu1 %v608_v18 }
  0xc1   :  { %v736_v20 = vld [vmem:[%s9068_s1 + $0x1620] sm:$0xff]  ;;  %1887 = vmatpush.msra.mxu2 %v672_v19 }
  0xc2   :  { %v540_v21 = vld [vmem:[%s9068_s1 + $0x1000] sm:$0xff]  ;;  %1907 = vmatpush.msra.mxu3 %v736_v20 }
  0xc3   :  { %v604_v22 = vld [vmem:[%s9068_s1 + $0x1200] sm:$0xff]  ;;  %1848 = vmatpush.msra.mxu0 %v540_v21 }
  0xc4   :  { %v668_v23 = vld [vmem:[%s9068_s1 + $0x1400] sm:$0xff]  ;;  %1868 = vmatpush.msra.mxu1 %v604_v22  ;;  %1849 = vmatmul.f32.vlgmr.msra.gmra.mxu0 %v4383_v27 }
  0xc5   :  { %v732_v24 = vld [vmem:[%s9068_s1 + $0x1600] sm:$0xff]  ;;  %1888 = vmatpush.msra.mxu2 %v668_v23  ;;  %1869 = vmatmul.f32.vlgmr.msra.gmra.mxu1 %v4390_v30 }
  0xc6   :  { %v856_v25 = vld [vmem:[%s9068_s1 + $0x19e0] sm:$0xff]  ;;  %1908 = vmatpush.msra.mxu3 %v732_v24  ;;  %1889 = vmatmul.f32.vlgmr.msra.gmra.mxu2 %v4385_v28 }
  0xc7   :  { %v920_v26 = vld [vmem:[%s9068_s1 + $0x1be0] sm:$0xff]  ;;  %1913 = vmatpush.msrb.mxu0 %v856_v25  ;;  %1909 = vmatmul.f32.vlgmr.msra.gmra.mxu3 %v4398_v33 }
  0xc8   :  { %v984_v29 = vld [vmem:[%s9068_s1 + $0x1de0] sm:$0xff]  ;;  %1933 = vmatpush.msrb.mxu1 %v920_v26 }
  0xc9   :  { %v1048_v31 = vld [vmem:[%s9068_s1 + $0x1fe0] sm:$0xff]  ;;  %1953 = vmatpush.msrb.mxu2 %v984_v29 }
  0xca   :  { %v852_v32 = vld [vmem:[%s9068_s1 + $0x19c0] sm:$0xff]  ;;  %1973 = vmatpush.msrb.mxu3 %v1048_v31 }
  0xcb   :  { %v916_v34 = vld [vmem:[%s9068_s1 + $0x1bc0] sm:$0xff]  ;;  %1914 = vmatpush.msrb.mxu0 %v852_v32 }
  0xcc   :  { %v980_v35 = vld [vmem:[%s9068_s1 + $0x1dc0] sm:$0xff]  ;;  %1934 = vmatpush.msrb.mxu1 %v916_v34 }
  0xcd   :  { %v1044_v36 = vld [vmem:[%s9068_s1 + $0x1fc0] sm:$0xff]  ;;  %1954 = vmatpush.msrb.mxu2 %v980_v35 }
  0xce   :  { %v848_v37 = vld [vmem:[%s9068_s1 + $0x19a0] sm:$0xff]  ;;  %1974 = vmatpush.msrb.mxu3 %v1044_v36 }
  0xcf   :  { %v912_v38 = vld [vmem:[%s9068_s1 + $0x1ba0] sm:$0xff]  ;;  %1915 = vmatpush.msrb.mxu0 %v848_v37 }
  0xd0   :  { %v976_v39 = vld [vmem:[%s9068_s1 + $0x1da0] sm:$0xff]  ;;  %1935 = vmatpush.msrb.mxu1 %v912_v38 }
  0xd1   :  { %v1040_v40 = vld [vmem:[%s9068_s1 + $0x1fa0] sm:$0xff]  ;;  %1955 = vmatpush.msrb.mxu2 %v976_v39 }
  0xd2   :  { %v844_v41 = vld [vmem:[%s9068_s1 + $0x1980] sm:$0xff]  ;;  %1975 = vmatpush.msrb.mxu3 %v1040_v40 }
  0xd3   :  { %v4588_v42 = vld.sshfl [vmem:[#allocation1 + $0x20] sm:$0xff pattern:$0x73625140]  ;;  %1916 = vmatpush.msrb.mxu0 %v844_v41 }
  0xd4   :  { %v908_v45 = vld [vmem:[%s9068_s1 + $0x1b80] sm:$0xff]  ;;  %1635 = vst [vmem:[#allocation1 + $0x20] ss:$4 sm:$0xff] %v26_v46 }
  0xd5   :  { %v972_v52 = vld [vmem:[%s9068_s1 + $0x1d80] sm:$0xff]  ;;  %1936 = vmatpush.msrb.mxu1 %v908_v45 }
  0xd6   :  { %v1036_v53 = vld [vmem:[%s9068_s1 + $0x1f80] sm:$0xff]  ;;  %1956 = vmatpush.msrb.mxu2 %v972_v52 }
  0xd7   :  { %v840_v54 = vld [vmem:[%s9068_s1 + $0x1960] sm:$0xff]  ;;  %1976 = vmatpush.msrb.mxu3 %v1036_v53 }
  0xd8   :  { %v904_v55 = vld [vmem:[%s9068_s1 + $0x1b60] sm:$0xff]  ;;  %1917 = vmatpush.msrb.mxu0 %v840_v54 }
  0xd9   :  { %v968_v56 = vld [vmem:[%s9068_s1 + $0x1d60] sm:$0xff]  ;;  %1937 = vmatpush.msrb.mxu1 %v904_v55 }
  0xda   :  { %v1032_v57 = vld [vmem:[%s9068_s1 + $0x1f60] sm:$0xff]  ;;  %1957 = vmatpush.msrb.mxu2 %v968_v56 }
  0xdb   :  { %v836_v58 = vld [vmem:[%s9068_s1 + $0x1940] sm:$0xff]  ;;  %1977 = vmatpush.msrb.mxu3 %v1032_v57 }
  0xdc   :  { %v900_v59 = vld [vmem:[%s9068_s1 + $0x1b40] sm:$0xff]  ;;  %1918 = vmatpush.msrb.mxu0 %v836_v58 }
  0xdd   :  { %v964_v60 = vld [vmem:[%s9068_s1 + $0x1d40] sm:$0xff]  ;;  %1938 = vmatpush.msrb.mxu1 %v900_v59 }
  0xde   :  { %v1028_v61 = vld [vmem:[%s9068_s1 + $0x1f40] sm:$0xff]  ;;  %1958 = vmatpush.msrb.mxu2 %v964_v60 }
  0xdf   :  { %v832_v62 = vld [vmem:[%s9068_s1 + $0x1920] sm:$0xff]  ;;  %1978 = vmatpush.msrb.mxu3 %v1028_v61 }
  0xe0   :  { %v896_v63 = vld [vmem:[%s9068_s1 + $0x1b20] sm:$0xff]  ;;  %1919 = vmatpush.msrb.mxu0 %v832_v62 }
  0xe1   :  { %v960_v4 = vld [vmem:[%s9068_s1 + $0x1d20] sm:$0xff]  ;;  %1939 = vmatpush.msrb.mxu1 %v896_v63 }
  0xe2   :  { %v1024_v5 = vld [vmem:[%s9068_s1 + $0x1f20] sm:$0xff]  ;;  %1959 = vmatpush.msrb.mxu2 %v960_v4 }
  0xe3   :  { %v828_v6 = vld [vmem:[%s9068_s1 + $0x1900] sm:$0xff]  ;;  %1979 = vmatpush.msrb.mxu3 %v1024_v5 }
  0xe4   :  { %v892_v7 = vld [vmem:[%s9068_s1 + $0x1b00] sm:$0xff]  ;;  %1920 = vmatpush.msrb.mxu0 %v828_v6 }
  0xe5   :  { %v956_v8 = vld [vmem:[%s9068_s1 + $0x1d00] sm:$0xff]  ;;  %1940 = vmatpush.msrb.mxu1 %v892_v7 }
  0xe6   :  { %v1020_v9 = vld [vmem:[%s9068_s1 + $0x1f00] sm:$0xff]  ;;  %1960 = vmatpush.msrb.mxu2 %v956_v8 }
  0xe7   :  { %v824_v10 = vld [vmem:[%s9068_s1 + $0x18e0] sm:$0xff]  ;;  %1980 = vmatpush.msrb.mxu3 %v1020_v9 }
  0xe8   :  { %v888_v11 = vld [vmem:[%s9068_s1 + $0x1ae0] sm:$0xff]  ;;  %1921 = vmatpush.msrb.mxu0 %v824_v10 }
  0xe9   :  { %v952_v12 = vld [vmem:[%s9068_s1 + $0x1ce0] sm:$0xff]  ;;  %1941 = vmatpush.msrb.mxu1 %v888_v11 }
  0xea   :  { %v1016_v13 = vld [vmem:[%s9068_s1 + $0x1ee0] sm:$0xff]  ;;  %1961 = vmatpush.msrb.mxu2 %v952_v12 }
  0xeb   :  { %v820_v14 = vld [vmem:[%s9068_s1 + $0x18c0] sm:$0xff]  ;;  %1981 = vmatpush.msrb.mxu3 %v1016_v13 }
  0xec   :  { %v884_v15 = vld [vmem:[%s9068_s1 + $0x1ac0] sm:$0xff]  ;;  %1922 = vmatpush.msrb.mxu0 %v820_v14 }
  0xed   :  { %v948_v16 = vld [vmem:[%s9068_s1 + $0x1cc0] sm:$0xff]  ;;  %1942 = vmatpush.msrb.mxu1 %v884_v15 }
  0xee   :  { %v1012_v17 = vld [vmem:[%s9068_s1 + $0x1ec0] sm:$0xff]  ;;  %1962 = vmatpush.msrb.mxu2 %v948_v16 }
  0xef   :  { %v816_v18 = vld [vmem:[%s9068_s1 + $0x18a0] sm:$0xff]  ;;  %1982 = vmatpush.msrb.mxu3 %v1012_v17 }
  0xf0   :  { %v880_v19 = vld [vmem:[%s9068_s1 + $0x1aa0] sm:$0xff]  ;;  %1923 = vmatpush.msrb.mxu0 %v816_v18 }
  0xf1   :  { %v944_v20 = vld [vmem:[%s9068_s1 + $0x1ca0] sm:$0xff]  ;;  %1943 = vmatpush.msrb.mxu1 %v880_v19 }
  0xf2   :  { %v1008_v21 = vld [vmem:[%s9068_s1 + $0x1ea0] sm:$0xff]  ;;  %1963 = vmatpush.msrb.mxu2 %v944_v20 }
  0xf3   :  { %v812_v22 = vld [vmem:[%s9068_s1 + $0x1880] sm:$0xff]  ;;  %1983 = vmatpush.msrb.mxu3 %v1008_v21 }
  0xf4   :  { %v876_v23 = vld [vmem:[%s9068_s1 + $0x1a80] sm:$0xff]  ;;  %1924 = vmatpush.msrb.mxu0 %v812_v22 }
  0xf5   :  { %v940_v24 = vld [vmem:[%s9068_s1 + $0x1c80] sm:$0xff]  ;;  %1944 = vmatpush.msrb.mxu1 %v876_v23 }
  0xf6   :  { %v1004_v25 = vld [vmem:[%s9068_s1 + $0x1e80] sm:$0xff]  ;;  %1964 = vmatpush.msrb.mxu2 %v940_v24 }
  0xf7   :  { %v808_v26 = vld [vmem:[%s9068_s1 + $0x1860] sm:$0xff]  ;;  %1984 = vmatpush.msrb.mxu3 %v1004_v25 }
  0xf8   :  { %v872_v29 = vld [vmem:[%s9068_s1 + $0x1a60] sm:$0xff]  ;;  %1925 = vmatpush.msrb.mxu0 %v808_v26 }
  0xf9   :  { %v936_v31 = vld [vmem:[%s9068_s1 + $0x1c60] sm:$0xff]  ;;  %1945 = vmatpush.msrb.mxu1 %v872_v29 }
  0xfa   :  { %v1000_v32 = vld [vmem:[%s9068_s1 + $0x1e60] sm:$0xff]  ;;  %1965 = vmatpush.msrb.mxu2 %v936_v31 }
  0xfb   :  { %v804_v34 = vld [vmem:[%s9068_s1 + $0x1840] sm:$0xff]  ;;  %1985 = vmatpush.msrb.mxu3 %v1000_v32 }
  0xfc   :  { %v868_v35 = vld [vmem:[%s9068_s1 + $0x1a40] sm:$0xff]  ;;  %1926 = vmatpush.msrb.mxu0 %v804_v34 }
  0xfd   :  { %v932_v36 = vld [vmem:[%s9068_s1 + $0x1c40] sm:$0xff]  ;;  %1946 = vmatpush.msrb.mxu1 %v868_v35 }
  0xfe   :  { %v996_v37 = vld [vmem:[%s9068_s1 + $0x1e40] sm:$0xff]  ;;  %1966 = vmatpush.msrb.mxu2 %v932_v36 }
  0xff   :  { %v800_v38 = vld [vmem:[%s9068_s1 + $0x1820] sm:$0xff]  ;;  %1986 = vmatpush.msrb.mxu3 %v996_v37 }
 0x100   :  { %v864_v39 = vld [vmem:[%s9068_s1 + $0x1a20] sm:$0xff]  ;;  %1927 = vmatpush.msrb.mxu0 %v800_v38 }
 0x101   :  { %v928_v40 = vld [vmem:[%s9068_s1 + $0x1c20] sm:$0xff]  ;;  %1947 = vmatpush.msrb.mxu1 %v864_v39 }
 0x102   :  { %v992_v41 = vld [vmem:[%s9068_s1 + $0x1e20] sm:$0xff]  ;;  %1967 = vmatpush.msrb.mxu2 %v928_v40 }
 0x103   :  { %v796_v45 = vld [vmem:[%s9068_s1 + $0x1800] sm:$0xff]  ;;  %1987 = vmatpush.msrb.mxu3 %v992_v41 }
 0x104   :  { %v860_v46 = vld [vmem:[%s9068_s1 + $0x1a00] sm:$0xff]  ;;  %1928 = vmatpush.msrb.mxu0 %v796_v45 }
 0x105   :  { %v924_v52 = vld [vmem:[%s9068_s1 + $0x1c00] sm:$0xff]  ;;  %1948 = vmatpush.msrb.mxu1 %v860_v46  ;;  %1929 = vmatmul.f32.vlgmr.msrb.gmra.mxu0 %v4588_v42 }
 0x106   :  { %v988_v53 = vld [vmem:[%s9068_s1 + $0x1e00] sm:$0xff]  ;;  %1968 = vmatpush.msrb.mxu2 %v924_v52  ;;  %1949 = vmatmul.f32.vlgmr.msrb.gmra.mxu1 %v4592_v44 }
 0x107   :  { %v1112_v54 = vld [vmem:[%s9068_s1 + $0x21e0] sm:$0xff]  ;;  %1988 = vmatpush.msrb.mxu3 %v988_v53  ;;  %1969 = vmatmul.f32.vlgmr.msrb.gmra.mxu2 %v4590_v43 }
 0x108   :  { %v1176_v55 = vld [vmem:[%s9068_s1 + $0x23e0] sm:$0xff]  ;;  %1993 = vmatpush.msra.mxu0 %v1112_v54  ;;  %1989 = vmatmul.f32.vlgmr.msrb.gmra.mxu3 %v4600_v47 }
 0x109   :  { %v1240_v56 = vld [vmem:[%s9068_s1 + $0x25e0] sm:$0xff]  ;;  %2013 = vmatpush.msra.mxu1 %v1176_v55 }
 0x10a   :  { %v1304_v57 = vld [vmem:[%s9068_s1 + $0x27e0] sm:$0xff]  ;;  %2033 = vmatpush.msra.mxu2 %v1240_v56 }
 0x10b   :  { %v1108_v58 = vld [vmem:[%s9068_s1 + $0x21c0] sm:$0xff]  ;;  %2053 = vmatpush.msra.mxu3 %v1304_v57 }
 0x10c   :  { %v1172_v59 = vld [vmem:[%s9068_s1 + $0x23c0] sm:$0xff]  ;;  %1994 = vmatpush.msra.mxu0 %v1108_v58 }
 0x10d   :  { %v1236_v60 = vld [vmem:[%s9068_s1 + $0x25c0] sm:$0xff]  ;;  %2014 = vmatpush.msra.mxu1 %v1172_v59 }
 0x10e   :  { %v1300_v61 = vld [vmem:[%s9068_s1 + $0x27c0] sm:$0xff]  ;;  %2034 = vmatpush.msra.mxu2 %v1236_v60 }
 0x10f   :  { %v1104_v62 = vld [vmem:[%s9068_s1 + $0x21a0] sm:$0xff]  ;;  %2054 = vmatpush.msra.mxu3 %v1300_v61 }
 0x110   :  { %v1168_v63 = vld [vmem:[%s9068_s1 + $0x23a0] sm:$0xff]  ;;  %1995 = vmatpush.msra.mxu0 %v1104_v62 }
 0x111   :  { %v1232_v4 = vld [vmem:[%s9068_s1 + $0x25a0] sm:$0xff]  ;;  %2015 = vmatpush.msra.mxu1 %v1168_v63 }
 0x112   :  { %v1296_v5 = vld [vmem:[%s9068_s1 + $0x27a0] sm:$0xff]  ;;  %2035 = vmatpush.msra.mxu2 %v1232_v4 }
 0x113   :  { %v1100_v6 = vld [vmem:[%s9068_s1 + $0x2180] sm:$0xff]  ;;  %2055 = vmatpush.msra.mxu3 %v1296_v5 }
 0x114   :  { %v1164_v7 = vld [vmem:[%s9068_s1 + $0x2380] sm:$0xff]  ;;  %1996 = vmatpush.msra.mxu0 %v1100_v6 }
 0x115   :  { %v1228_v8 = vld [vmem:[%s9068_s1 + $0x2580] sm:$0xff]  ;;  %2016 = vmatpush.msra.mxu1 %v1164_v7 }
 0x116   :  { %v1292_v9 = vld [vmem:[%s9068_s1 + $0x2780] sm:$0xff]  ;;  %2036 = vmatpush.msra.mxu2 %v1228_v8 }
 0x117   :  { %v1096_v10 = vld [vmem:[%s9068_s1 + $0x2160] sm:$0xff]  ;;  %2056 = vmatpush.msra.mxu3 %v1292_v9 }
 0x118   :  { %v1160_v11 = vld [vmem:[%s9068_s1 + $0x2360] sm:$0xff]  ;;  %1997 = vmatpush.msra.mxu0 %v1096_v10 }
 0x119   :  { %v1224_v12 = vld [vmem:[%s9068_s1 + $0x2560] sm:$0xff]  ;;  %2017 = vmatpush.msra.mxu1 %v1160_v11  ;;  %v4950_v11 = vld.sshfl [vmem:[#allocation1 + $0x10] sm:$0xff pattern:$0x73625140] }
 0x11a   :  { %v1288_v13 = vld [vmem:[%s9068_s1 + $0x2760] sm:$0xff]  ;;  %2037 = vmatpush.msra.mxu2 %v1224_v12 }
 0x11b   :  { %v1092_v14 = vld [vmem:[%s9068_s1 + $0x2140] sm:$0xff]  ;;  %2057 = vmatpush.msra.mxu3 %v1288_v13 }
 0x11c   :  { %v1156_v15 = vld [vmem:[%s9068_s1 + $0x2340] sm:$0xff]  ;;  %1998 = vmatpush.msra.mxu0 %v1092_v14 }
 0x11d   :  { %v1220_v16 = vld [vmem:[%s9068_s1 + $0x2540] sm:$0xff]  ;;  %2018 = vmatpush.msra.mxu1 %v1156_v15 }
 0x11e   :  { %v1284_v17 = vld [vmem:[%s9068_s1 + $0x2740] sm:$0xff]  ;;  %2038 = vmatpush.msra.mxu2 %v1220_v16  ;;  %v4966_v16 = vld.sshfl [vmem:[#allocation1 + $0x8] sm:$0xff pattern:$0x73625140] }
 0x11f   :  { %v1088_v18 = vld [vmem:[%s9068_s1 + $0x2120] sm:$0xff]  ;;  %2058 = vmatpush.msra.mxu3 %v1284_v17  ;;  %v4968_v17 = vld.sshfl [vmem:[#allocation1 + $0x18] sm:$0xff pattern:$0x73625140] }
 0x120   :  { %v1152_v19 = vld [vmem:[%s9068_s1 + $0x2320] sm:$0xff]  ;;  %1999 = vmatpush.msra.mxu0 %v1088_v18 }
 0x121   :  { %v1216_v20 = vld [vmem:[%s9068_s1 + $0x2520] sm:$0xff]  ;;  %2019 = vmatpush.msra.mxu1 %v1152_v19 }
 0x122   :  { %v1280_v21 = vld [vmem:[%s9068_s1 + $0x2720] sm:$0xff]  ;;  %2039 = vmatpush.msra.mxu2 %v1216_v20 }
 0x123   :  { %v1084_v22 = vld [vmem:[%s9068_s1 + $0x2100] sm:$0xff]  ;;  %2059 = vmatpush.msra.mxu3 %v1280_v21 }
 0x124   :  { %v1148_v23 = vld [vmem:[%s9068_s1 + $0x2300] sm:$0xff]  ;;  %2000 = vmatpush.msra.mxu0 %v1084_v22 }
 0x125   :  { %v1212_v24 = vld [vmem:[%s9068_s1 + $0x2500] sm:$0xff]  ;;  %2020 = vmatpush.msra.mxu1 %v1148_v23 }
 0x126   :  { %v1276_v25 = vld [vmem:[%s9068_s1 + $0x2700] sm:$0xff]  ;;  %2040 = vmatpush.msra.mxu2 %v1212_v24 }
 0x127   :  { %v1080_v26 = vld [vmem:[%s9068_s1 + $0x20e0] sm:$0xff]  ;;  %2060 = vmatpush.msra.mxu3 %v1276_v25 }
 0x128   :  { %v1144_v29 = vld [vmem:[%s9068_s1 + $0x22e0] sm:$0xff]  ;;  %2001 = vmatpush.msra.mxu0 %v1080_v26 }
 0x129   :  { %v1208_v31 = vld [vmem:[%s9068_s1 + $0x24e0] sm:$0xff]  ;;  %2021 = vmatpush.msra.mxu1 %v1144_v29 }
 0x12a   :  { %v1272_v32 = vld [vmem:[%s9068_s1 + $0x26e0] sm:$0xff]  ;;  %2041 = vmatpush.msra.mxu2 %v1208_v31 }
 0x12b   :  { %v1076_v34 = vld [vmem:[%s9068_s1 + $0x20c0] sm:$0xff]  ;;  %2061 = vmatpush.msra.mxu3 %v1272_v32 }
 0x12c   :  { %v1140_v35 = vld [vmem:[%s9068_s1 + $0x22c0] sm:$0xff]  ;;  %2002 = vmatpush.msra.mxu0 %v1076_v34 }
 0x12d   :  { %v1204_v36 = vld [vmem:[%s9068_s1 + $0x24c0] sm:$0xff]  ;;  %2022 = vmatpush.msra.mxu1 %v1140_v35 }
 0x12e   :  { %v1268_v37 = vld [vmem:[%s9068_s1 + $0x26c0] sm:$0xff]  ;;  %2042 = vmatpush.msra.mxu2 %v1204_v36 }
 0x12f   :  { %v1072_v38 = vld [vmem:[%s9068_s1 + $0x20a0] sm:$0xff]  ;;  %2062 = vmatpush.msra.mxu3 %v1268_v37 }
 0x130   :  { %v1136_v39 = vld [vmem:[%s9068_s1 + $0x22a0] sm:$0xff]  ;;  %2003 = vmatpush.msra.mxu0 %v1072_v38 }
 0x131   :  { %v1200_v40 = vld [vmem:[%s9068_s1 + $0x24a0] sm:$0xff]  ;;  %2023 = vmatpush.msra.mxu1 %v1136_v39 }
 0x132   :  { %v1264_v41 = vld [vmem:[%s9068_s1 + $0x26a0] sm:$0xff]  ;;  %2043 = vmatpush.msra.mxu2 %v1200_v40 }
 0x133   :  { %v1068_v45 = vld [vmem:[%s9068_s1 + $0x2080] sm:$0xff]  ;;  %2063 = vmatpush.msra.mxu3 %v1264_v41 }
 0x134   :  { %v1132_v46 = vld [vmem:[%s9068_s1 + $0x2280] sm:$0xff]  ;;  %2004 = vmatpush.msra.mxu0 %v1068_v45 }
 0x135   :  { %v1196_v52 = vld [vmem:[%s9068_s1 + $0x2480] sm:$0xff]  ;;  %2024 = vmatpush.msra.mxu1 %v1132_v46 }
 0x136   :  { %v1260_v53 = vld [vmem:[%s9068_s1 + $0x2680] sm:$0xff]  ;;  %2044 = vmatpush.msra.mxu2 %v1196_v52  ;;  %v27_v52 = vld [vmem:[%s9067_s0 + $0x30] sm:$0x3] }
 0x137   :  { %v1064_v54 = vld [vmem:[%s9068_s1 + $0x2060] sm:$0xff]  ;;  %2064 = vmatpush.msra.mxu3 %v1260_v53 }
 0x138   :  { %v1128_v55 = vld [vmem:[%s9068_s1 + $0x2260] sm:$0xff]  ;;  %2005 = vmatpush.msra.mxu0 %v1064_v54 }
 0x139   :  { %v1192_v56 = vld [vmem:[%s9068_s1 + $0x2460] sm:$0xff]  ;;  %2025 = vmatpush.msra.mxu1 %v1128_v55 }
 0x13a   :  { %v1256_v57 = vld [vmem:[%s9068_s1 + $0x2660] sm:$0xff]  ;;  %2045 = vmatpush.msra.mxu2 %v1192_v56 }
 0x13b   :  { %v1060_v58 = vld [vmem:[%s9068_s1 + $0x2040] sm:$0xff]  ;;  %2065 = vmatpush.msra.mxu3 %v1256_v57 }
 0x13c   :  { %v1124_v59 = vld [vmem:[%s9068_s1 + $0x2240] sm:$0xff]  ;;  %2006 = vmatpush.msra.mxu0 %v1060_v58 }
 0x13d   :  { %v1188_v60 = vld [vmem:[%s9068_s1 + $0x2440] sm:$0xff]  ;;  %2026 = vmatpush.msra.mxu1 %v1124_v59 }
 0x13e   :  { %v1252_v61 = vld [vmem:[%s9068_s1 + $0x2640] sm:$0xff]  ;;  %2046 = vmatpush.msra.mxu2 %v1188_v60 }
 0x13f   :  { %v1056_v62 = vld [vmem:[%s9068_s1 + $0x2020] sm:$0xff]  ;;  %2066 = vmatpush.msra.mxu3 %v1252_v61 }
 0x140   :  { %v1120_v63 = vld [vmem:[%s9068_s1 + $0x2220] sm:$0xff]  ;;  %2007 = vmatpush.msra.mxu0 %v1056_v62 }
 0x141   :  { %v1184_v4 = vld [vmem:[%s9068_s1 + $0x2420] sm:$0xff]  ;;  %2027 = vmatpush.msra.mxu1 %v1120_v63 }
 0x142   :  { %v1248_v5 = vld [vmem:[%s9068_s1 + $0x2620] sm:$0xff]  ;;  %2047 = vmatpush.msra.mxu2 %v1184_v4 }
 0x143   :  { %v1052_v6 = vld [vmem:[%s9068_s1 + $0x2000] sm:$0xff]  ;;  %2067 = vmatpush.msra.mxu3 %v1248_v5 }
 0x144   :  { %v1116_v7 = vld [vmem:[%s9068_s1 + $0x2200] sm:$0xff]  ;;  %2008 = vmatpush.msra.mxu0 %v1052_v6 }
 0x145   :  { %v1180_v8 = vld [vmem:[%s9068_s1 + $0x2400] sm:$0xff]  ;;  %2028 = vmatpush.msra.mxu1 %v1116_v7 }
 0x146   :  { %v1244_v9 = vld [vmem:[%s9068_s1 + $0x2600] sm:$0xff]  ;;  %2048 = vmatpush.msra.mxu2 %v1180_v8  ;;  %2029 = vmatmul.f32.vlgmr.msra.gmra.mxu1 %v4966_v16 }
 0x147   :  { %v4948_v10 = vld.sshfl [vmem:[#allocation1] sm:$0xff pattern:$0x73625140]  ;;  %2068 = vmatpush.msra.mxu3 %v1244_v9  ;;  %2049 = vmatmul.f32.vlgmr.msra.gmra.mxu2 %v4950_v11 }
 0x148   :  { %v1368_v12 = vld [vmem:[%s9068_s1 + $0x29e0] sm:$0xff]  ;;  %2009 = vmatmul.f32.vlgmr.msra.gmra.mxu0 %v4948_v10  ;;  %2069 = vmatmul.f32.vlgmr.msra.gmra.mxu3 %v4968_v17  ;;  %1644 = vst [vmem:[#allocation1] ss:$4 sm:$0xff] %v27_v52 }
 0x149   :  { %v1432_v13 = vld [vmem:[%s9068_s1 + $0x2be0] sm:$0xff]  ;;  %2073 = vmatpush.msrb.mxu0 %v1368_v12 }
 0x14a   :  { %v1496_v14 = vld [vmem:[%s9068_s1 + $0x2de0] sm:$0xff]  ;;  %2093 = vmatpush.msrb.mxu1 %v1432_v13 }
 0x14b   :  { %v1560_v15 = vld [vmem:[%s9068_s1 + $0x2fe0] sm:$0xff]  ;;  %2113 = vmatpush.msrb.mxu2 %v1496_v14 }
 0x14c   :  { %v1364_v18 = vld [vmem:[%s9068_s1 + $0x29c0] sm:$0xff]  ;;  %2133 = vmatpush.msrb.mxu3 %v1560_v15 }
 0x14d   :  { %v1428_v19 = vld [vmem:[%s9068_s1 + $0x2bc0] sm:$0xff]  ;;  %2074 = vmatpush.msrb.mxu0 %v1364_v18 }
 0x14e   :  { %v1492_v20 = vld [vmem:[%s9068_s1 + $0x2dc0] sm:$0xff]  ;;  %2094 = vmatpush.msrb.mxu1 %v1428_v19 }
 0x14f   :  { %v1556_v21 = vld [vmem:[%s9068_s1 + $0x2fc0] sm:$0xff]  ;;  %2114 = vmatpush.msrb.mxu2 %v1492_v20 }
 0x150   :  { %v1360_v22 = vld [vmem:[%s9068_s1 + $0x29a0] sm:$0xff]  ;;  %2134 = vmatpush.msrb.mxu3 %v1556_v21 }
 0x151   :  { %v1424_v23 = vld [vmem:[%s9068_s1 + $0x2ba0] sm:$0xff]  ;;  %2075 = vmatpush.msrb.mxu0 %v1360_v22 }
 0x152   :  { %v1488_v24 = vld [vmem:[%s9068_s1 + $0x2da0] sm:$0xff]  ;;  %2095 = vmatpush.msrb.mxu1 %v1424_v23 }
 0x153   :  { %v1552_v25 = vld [vmem:[%s9068_s1 + $0x2fa0] sm:$0xff]  ;;  %2115 = vmatpush.msrb.mxu2 %v1488_v24 }
 0x154   :  { %v1356_v26 = vld [vmem:[%s9068_s1 + $0x2980] sm:$0xff]  ;;  %2135 = vmatpush.msrb.mxu3 %v1552_v25 }
 0x155   :  { %v1420_v29 = vld [vmem:[%s9068_s1 + $0x2b80] sm:$0xff]  ;;  %2076 = vmatpush.msrb.mxu0 %v1356_v26 }
 0x156   :  { %v1484_v31 = vld [vmem:[%s9068_s1 + $0x2d80] sm:$0xff]  ;;  %2096 = vmatpush.msrb.mxu1 %v1420_v29  ;;  %v1690_v29 = vpop.f32.mrf.mxu0 }
 0x157   :  { %v1548_v32 = vld [vmem:[%s9068_s1 + $0x2f80] sm:$0xff]  ;;  %2116 = vmatpush.msrb.mxu2 %v1484_v31 }
 0x158   :  { %v1352_v34 = vld [vmem:[%s9068_s1 + $0x2960] sm:$0xff]  ;;  %2136 = vmatpush.msrb.mxu3 %v1548_v32 }
 0x159   :  { %v1416_v35 = vld [vmem:[%s9068_s1 + $0x2b60] sm:$0xff]  ;;  %2077 = vmatpush.msrb.mxu0 %v1352_v34 }
 0x15a   :  { %v1480_v36 = vld [vmem:[%s9068_s1 + $0x2d60] sm:$0xff]  ;;  %2097 = vmatpush.msrb.mxu1 %v1416_v35 }
 0x15b   :  { %v1544_v37 = vld [vmem:[%s9068_s1 + $0x2f60] sm:$0xff]  ;;  %2117 = vmatpush.msrb.mxu2 %v1480_v36 }
 0x15c   :  { %v1348_v38 = vld [vmem:[%s9068_s1 + $0x2940] sm:$0xff]  ;;  %2137 = vmatpush.msrb.mxu3 %v1544_v37 }
 0x15d   :  { %v1412_v39 = vld [vmem:[%s9068_s1 + $0x2b40] sm:$0xff]  ;;  %2078 = vmatpush.msrb.mxu0 %v1348_v38 }
 0x15e   :  { %v1476_v40 = vld [vmem:[%s9068_s1 + $0x2d40] sm:$0xff]  ;;  %2098 = vmatpush.msrb.mxu1 %v1412_v39 }
 0x15f   :  { %v1540_v41 = vld [vmem:[%s9068_s1 + $0x2f40] sm:$0xff]  ;;  %2118 = vmatpush.msrb.mxu2 %v1476_v40 }
 0x160   :  { %v1344_v45 = vld [vmem:[%s9068_s1 + $0x2920] sm:$0xff]  ;;  %2138 = vmatpush.msrb.mxu3 %v1540_v41  ;;  %v1710_v41 = vpop.f32.mrf.mxu1 }
 0x161   :  { %v1408_v46 = vld [vmem:[%s9068_s1 + $0x2b20] sm:$0xff]  ;;  %2079 = vmatpush.msrb.mxu0 %v1344_v45 }
 0x162   :  { %v1472_v53 = vld [vmem:[%s9068_s1 + $0x2d20] sm:$0xff]  ;;  %2099 = vmatpush.msrb.mxu1 %v1408_v46 }
 0x163   :  { %v1536_v54 = vld [vmem:[%s9068_s1 + $0x2f20] sm:$0xff]  ;;  %2119 = vmatpush.msrb.mxu2 %v1472_v53  ;;  %v1642_v53 = vld.sshfl [vmem:[#allocation1 + $0x30] sm:$0xff pattern:$0x73625140] }
 0x164   :  { %v1340_v55 = vld [vmem:[%s9068_s1 + $0x2900] sm:$0xff]  ;;  %2139 = vmatpush.msrb.mxu3 %v1536_v54 }
 0x165   :  { %v1404_v56 = vld [vmem:[%s9068_s1 + $0x2b00] sm:$0xff]  ;;  %2080 = vmatpush.msrb.mxu0 %v1340_v55  ;;  %v89_v55 = vld [vmem:[%s9068_s1 + $0x1e8] sm:$0xff] }
 0x166   :  { %v1468_v57 = vld [vmem:[%s9068_s1 + $0x2d00] sm:$0xff]  ;;  %2100 = vmatpush.msrb.mxu1 %v1404_v56 }
 0x167   :  { %v1532_v58 = vld [vmem:[%s9068_s1 + $0x2f00] sm:$0xff]  ;;  %2120 = vmatpush.msrb.mxu2 %v1468_v57  ;;  %v153_v57 = vld [vmem:[%s9068_s1 + $0x3e8] sm:$0xff] }
 0x168   :  { %v1336_v59 = vld [vmem:[%s9068_s1 + $0x28e0] sm:$0xff]  ;;  %2140 = vmatpush.msrb.mxu3 %v1532_v58  ;;  %v217_v58 = vld [vmem:[%s9068_s1 + $0x5e8] sm:$0xff] }
 0x169   :  { %v1400_v60 = vld [vmem:[%s9068_s1 + $0x2ae0] sm:$0xff]  ;;  %2081 = vmatpush.msrb.mxu0 %v1336_v59  ;;  %v1730_v59 = vpop.f32.mrf.mxu2 }
 0x16a   :  { %v1464_v61 = vld [vmem:[%s9068_s1 + $0x2ce0] sm:$0xff]  ;;  %2101 = vmatpush.msrb.mxu1 %v1400_v60  ;;  %v1641_v60 = vld.sshfl [vmem:[#allocation1 + $0x28] sm:$0xff pattern:$0x73625140] }
 0x16b   :  { %v1528_v62 = vld [vmem:[%s9068_s1 + $0x2ee0] sm:$0xff]  ;;  %2121 = vmatpush.msrb.mxu2 %v1464_v61  ;;  %v1643_v61 = vld.sshfl [vmem:[#allocation1 + $0x38] sm:$0xff pattern:$0x73625140] }
 0x16c   :  { %v1332_v63 = vld [vmem:[%s9068_s1 + $0x28c0] sm:$0xff]  ;;  %2141 = vmatpush.msrb.mxu3 %v1528_v62 }
 0x16d   :  { %v1396_v4 = vld [vmem:[%s9068_s1 + $0x2ac0] sm:$0xff]  ;;  %2082 = vmatpush.msrb.mxu0 %v1332_v63  ;;  %v85_v63 = vld [vmem:[%s9068_s1 + $0x1c8] sm:$0xff] }
 0x16e   :  { %v1460_v5 = vld [vmem:[%s9068_s1 + $0x2cc0] sm:$0xff]  ;;  %2102 = vmatpush.msrb.mxu1 %v1396_v4  ;;  %v149_v4 = vld [vmem:[%s9068_s1 + $0x3c8] sm:$0xff] }
 0x16f   :  { %v1524_v6 = vld [vmem:[%s9068_s1 + $0x2ec0] sm:$0xff]  ;;  %2122 = vmatpush.msrb.mxu2 %v1460_v5  ;;  %v213_v5 = vld [vmem:[%s9068_s1 + $0x5c8] sm:$0xff] }
 0x170   :  { %v1328_v7 = vld [vmem:[%s9068_s1 + $0x28a0] sm:$0xff]  ;;  %2142 = vmatpush.msrb.mxu3 %v1524_v6 }
 0x171   :  { %v1392_v8 = vld [vmem:[%s9068_s1 + $0x2aa0] sm:$0xff]  ;;  %2083 = vmatpush.msrb.mxu0 %v1328_v7 }
 0x172   :  { %v1456_v9 = vld [vmem:[%s9068_s1 + $0x2ca0] sm:$0xff]  ;;  %2103 = vmatpush.msrb.mxu1 %v1392_v8  ;;  %v81_v8 = vld [vmem:[%s9068_s1 + $0x1a8] sm:$0xff] }
 0x173   :  { %v1520_v12 = vld [vmem:[%s9068_s1 + $0x2ea0] sm:$0xff]  ;;  %2123 = vmatpush.msrb.mxu2 %v1456_v9  ;;  %v1750_v9 = vpop.f32.mrf.mxu3 }
 0x174   :  { %v1324_v13 = vld [vmem:[%s9068_s1 + $0x2880] sm:$0xff]  ;;  %2143 = vmatpush.msrb.mxu3 %v1520_v12  ;;  %v145_v12 = vld [vmem:[%s9068_s1 + $0x3a8] sm:$0xff] }
 0x175   :  { %v1388_v14 = vld [vmem:[%s9068_s1 + $0x2a80] sm:$0xff]  ;;  %2084 = vmatpush.msrb.mxu0 %v1324_v13  ;;  %v209_v13 = vld [vmem:[%s9068_s1 + $0x5a8] sm:$0xff] }
 0x176   :  { %v1596_v15 = vld [vmem:[%s9069_s2] sm:$0xf]  ;;  %2104 = vmatpush.msrb.mxu1 %v1388_v14 }
 0x177   :  { %v1452_v18 = vld [vmem:[%s9068_s1 + $0x2c80] sm:$0xff]  ;;  %v1598_v24 = vperm.slane %v1596_v15, 0  ;;  %v77_v15 = vld [vmem:[%s9068_s1 + $0x188] sm:$0xff] }
 0x178   :  { %v1516_v19 = vld [vmem:[%s9068_s1 + $0x2e80] sm:$0xff]  ;;  %2124 = vmatpush.msrb.mxu2 %v1452_v18  ;;  %v141_v18 = vld [vmem:[%s9068_s1 + $0x388] sm:$0xff] }
 0x179   :  { %v1320_v20 = vld [vmem:[%s9068_s1 + $0x2860] sm:$0xff]  ;;  %2144 = vmatpush.msrb.mxu3 %v1516_v19  ;;  %v1691_v38 = vadd.f32 %v1690_v29, %v1598_v24  ;;  %v205_v19 = vld [vmem:[%s9068_s1 + $0x588] sm:$0xff] }
 0x17a   :  { %v1384_v21 = vld [vmem:[%s9068_s1 + $0x2a60] sm:$0xff]  ;;  %2085 = vmatpush.msrb.mxu0 %v1320_v20  ;;  %v137_v24 = vld [vmem:[%s9068_s1 + $0x368] sm:$0xff] }
 0x17b   :  { %v1448_v22 = vld [vmem:[%s9068_s1 + $0x2c60] sm:$0xff]  ;;  %2105 = vmatpush.msrb.mxu1 %v1384_v21  ;;  %v1711_v56 = vadd.f32 %v1710_v41, %v1691_v38  ;;  %v69_v29 = vld [vmem:[%s9068_s1 + $0x148] sm:$0xff] }
 0x17c   :  { %v1512_v23 = vld [vmem:[%s9068_s1 + $0x2e60] sm:$0xff]  ;;  %2125 = vmatpush.msrb.mxu2 %v1448_v22  ;;  %v73_v22 = vld [vmem:[%s9068_s1 + $0x168] sm:$0xff] }
 0x17d   :  { %v1316_v25 = vld [vmem:[%s9068_s1 + $0x2840] sm:$0xff]  ;;  %2145 = vmatpush.msrb.mxu3 %v1512_v23  ;;  %v1731_v6 = vadd.f32 %v1730_v59, %v1711_v56  ;;  %v1770_v23 = vpop.f32.mrf.mxu0  ;;  %v129_v38 = vld [vmem:[%s9068_s1 + $0x328] sm:$0xff] }
 0x17e   :  { %v1380_v26 = vld [vmem:[%s9068_s1 + $0x2a40] sm:$0xff]  ;;  %2086 = vmatpush.msrb.mxu0 %v1316_v25  ;;  %v201_v25 = vld [vmem:[%s9068_s1 + $0x568] sm:$0xff] }
 0x17f   :  { %v1444_v31 = vld [vmem:[%s9068_s1 + $0x2c40] sm:$0xff]  ;;  %2106 = vmatpush.msrb.mxu1 %v1380_v26  ;;  %v1751_v20 = vadd.f32 %v1750_v9, %v1731_v6  ;;  %v61_v41 = vld [vmem:[%s9068_s1 + $0x108] sm:$0xff] }
 0x180   :  { %v1508_v32 = vld [vmem:[%s9068_s1 + $0x2e40] sm:$0xff]  ;;  %2126 = vmatpush.msrb.mxu2 %v1444_v31  ;;  %v133_v31 = vld [vmem:[%s9068_s1 + $0x348] sm:$0xff] }
 0x181   :  { %v1312_v34 = vld [vmem:[%s9068_s1 + $0x2820] sm:$0xff]  ;;  %2146 = vmatpush.msrb.mxu3 %v1508_v32  ;;  %v197_v32 = vld [vmem:[%s9068_s1 + $0x548] sm:$0xff] }
 0x182   :  { %v1376_v35 = vld [vmem:[%s9068_s1 + $0x2a20] sm:$0xff]  ;;  %2087 = vmatpush.msrb.mxu0 %v1312_v34  ;;  %v1771_v34 = vadd.f32 %v1770_v23, %v1751_v20  ;;  %v281_v56 = vld [vmem:[%s9068_s1 + $0x7e8] sm:$0xff] }
 0x183   :  { %v1440_v36 = vld [vmem:[%s9068_s1 + $0x2c20] sm:$0xff]  ;;  %2107 = vmatpush.msrb.mxu1 %v1376_v35  ;;  %v53_v59 = vld [vmem:[%s9068_s1 + $0xc8] sm:$0xff] }
 0x184   :  { %v1504_v37 = vld [vmem:[%s9068_s1 + $0x2e20] sm:$0xff]  ;;  %2127 = vmatpush.msrb.mxu2 %v1440_v36  ;;  %v65_v36 = vld [vmem:[%s9068_s1 + $0x128] sm:$0xff] }
 0x185   :  { %v1308_v39 = vld [vmem:[%s9068_s1 + $0x2800] sm:$0xff]  ;;  %2147 = vmatpush.msrb.mxu3 %v1504_v37  ;;  %v1790_v37 = vpop.f32.mrf.mxu1  ;;  %v273_v6 = vld [vmem:[%s9068_s1 + $0x7a8] sm:$0xff] }
 0x186   :  { %v1372_v40 = vld [vmem:[%s9068_s1 + $0x2a00] sm:$0xff]  ;;  %2088 = vmatpush.msrb.mxu0 %v1308_v39  ;;  %v193_v39 = vld [vmem:[%s9068_s1 + $0x528] sm:$0xff] }
 0x187   :  { %v1436_v45 = vld [vmem:[%s9068_s1 + $0x2c00] sm:$0xff]  ;;  %2108 = vmatpush.msrb.mxu1 %v1372_v40  ;;  %v45_v9 = vld [vmem:[%s9068_s1 + $0x88] sm:$0xff] }
 0x188   :  { %v1500_v46 = vld [vmem:[%s9068_s1 + $0x2e00] sm:$0xff]  ;;  %2128 = vmatpush.msrb.mxu2 %v1436_v45  ;;  %2109 = vmatmul.f32.vlgmr.msrb.gmra.mxu1 %v1641_v60  ;;  %v1791_v45 = vadd.f32 %v1790_v37, %v1771_v34  ;;  %v265_v20 = vld [vmem:[%s9068_s1 + $0x768] sm:$0xff] }
 0x189   :  { %v1640_v52 = vld.sshfl [vmem:[#allocation1 + $0x20] sm:$0xff pattern:$0x73625140]  ;;  %2148 = vmatpush.msrb.mxu3 %v1500_v46  ;;  %2129 = vmatmul.f32.vlgmr.msrb.gmra.mxu2 %v1642_v53  ;;  %v125_v46 = vld [vmem:[%s9068_s1 + $0x308] sm:$0xff]  ;;  %v1810_v53 = vpop.f32.mrf.mxu2 }
 0x18a   :  { %v1592_v54 = vld [vmem:[%s9068_s1 + $0x30e0] sm:$0xff]  ;;  %2089 = vmatmul.f32.vlgmr.msrb.gmra.mxu0 %v1640_v52  ;;  %2173 = vmatpush.msra.mxu1 %v89_v55  ;;  %v189_v52 = vld [vmem:[%s9068_s1 + $0x508] sm:$0xff]  ;;  %v1811_v60 = vadd.f32 %v1810_v53, %v1791_v45 }
 0x18b   :  { %2161 = vmatpush.msra.mxu0 %v1592_v54  ;;  %v1588_v62 = vld [vmem:[%s9068_s1 + $0x30c0] sm:$0xff]  ;;  %2193 = vmatpush.msra.mxu2 %v153_v57  ;;  %v57_v55 = vld [vmem:[%s9068_s1 + $0xe8] sm:$0xff] }
 0x18c   :  { %2213 = vmatpush.msra.mxu3 %v217_v58  ;;  %v1584_v7 = vld [vmem:[%s9068_s1 + $0x30a0] sm:$0xff]  ;;  %2174 = vmatpush.msra.mxu1 %v85_v63  ;;  %v121_v57 = vld [vmem:[%s9068_s1 + $0x2e8] sm:$0xff]  ;;  %v1830_v63 = vpop.f32.mrf.mxu3 }
 0x18d   :  { %2149 = vmatmul.f32.vlgmr.msrb.gmra.mxu3 %v1643_v61  ;;  %2162 = vmatpush.msra.mxu0 %v1588_v62  ;;  %v1580_v14 = vld [vmem:[%s9068_s1 + $0x3080] sm:$0xff]  ;;  %v185_v58 = vld [vmem:[%s9068_s1 + $0x4e8] sm:$0xff] }
 0x18e   :  { %2194 = vmatpush.msra.mxu2 %v149_v4  ;;  %2214 = vmatpush.msra.mxu3 %v213_v5  ;;  %v1576_v21 = vld [vmem:[%s9068_s1 + $0x3060] sm:$0xff]  ;;  %v277_v61 = vld [vmem:[%s9068_s1 + $0x7c8] sm:$0xff] }
 0x18f   :  { %2163 = vmatpush.msra.mxu0 %v1584_v7  ;;  %2175 = vmatpush.msra.mxu1 %v81_v8  ;;  %v1572_v26 = vld [vmem:[%s9068_s1 + $0x3040] sm:$0xff]  ;;  %v117_v62 = vld [vmem:[%s9068_s1 + $0x2c8] sm:$0xff] }
 0x190   :  { %2195 = vmatpush.msra.mxu2 %v145_v12  ;;  %2215 = vmatpush.msra.mxu3 %v209_v13  ;;  %v1568_v35 = vld [vmem:[%s9068_s1 + $0x3020] sm:$0xff]  ;;  %v181_v4 = vld [vmem:[%s9068_s1 + $0x4c8] sm:$0xff]  ;;  %v1831_v12 = vadd.f32 %v1830_v63, %v1811_v60 }
 0x191   :  { %2164 = vmatpush.msra.mxu0 %v1580_v14  ;;  %2176 = vmatpush.msra.mxu1 %v77_v15  ;;  %v1564_v40 = vld [vmem:[%s9068_s1 + $0x3000] sm:$0xff]  ;;  %v49_v5 = vld [vmem:[%s9068_s1 + $0xa8] sm:$0xff] }
 0x192   :  { %2196 = vmatpush.msra.mxu2 %v141_v18  ;;  %2216 = vmatpush.msra.mxu3 %v205_v19  ;;  %v1645_v54 = vld.sshfl [vmem:[#allocation1] sm:$0xff pattern:$0x73625140]  ;;  %v113_v7 = vld [vmem:[%s9068_s1 + $0x2a8] sm:$0xff]  ;;  %v1850_v19 = vpop.f32.mrf.mxu0 }
 0x193   :  { %2165 = vmatpush.msra.mxu0 %v1576_v21  ;;  %2177 = vmatpush.msra.mxu1 %v73_v22  ;;  %v177_v8 = vld [vmem:[%s9068_s1 + $0x4a8] sm:$0xff]  ;;  %v1851_v22 = vadd.f32 %v1850_v19, %v1831_v12 }
 0x194   :  { %2197 = vmatpush.msra.mxu2 %v137_v24  ;;  %2217 = vmatpush.msra.mxu3 %v201_v25  ;;  %v269_v13 = vld [vmem:[%s9068_s1 + $0x788] sm:$0xff] }
 0x195   :  { %2166 = vmatpush.msra.mxu0 %v1572_v26  ;;  %2178 = vmatpush.msra.mxu1 %v69_v29  ;;  %v109_v14 = vld [vmem:[%s9068_s1 + $0x288] sm:$0xff]  ;;  %v1870_v29 = vpop.f32.mrf.mxu1 }
 0x196   :  { %2198 = vmatpush.msra.mxu2 %v133_v31  ;;  %2218 = vmatpush.msra.mxu3 %v197_v32  ;;  %v173_v15 = vld [vmem:[%s9068_s1 + $0x488] sm:$0xff]  ;;  %v1871_v34 = vadd.f32 %v1870_v29, %v1851_v22 }
 0x197   :  { %2167 = vmatpush.msra.mxu0 %v1568_v35  ;;  %2179 = vmatpush.msra.mxu1 %v65_v36  ;;  %v41_v18 = vld [vmem:[%s9068_s1 + $0x68] sm:$0xff] }
 0x198   :  { %2199 = vmatpush.msra.mxu2 %v129_v38  ;;  %2219 = vmatpush.msra.mxu3 %v193_v39  ;;  %v105_v21 = vld [vmem:[%s9068_s1 + $0x268] sm:$0xff]  ;;  %v1890_v39 = vpop.f32.mrf.mxu2 }
 0x199   :  { %2168 = vmatpush.msra.mxu0 %v1564_v40  ;;  %2180 = vmatpush.msra.mxu1 %v61_v41  ;;  %v169_v23 = vld [vmem:[%s9068_s1 + $0x468] sm:$0xff]  ;;  %v1891_v45 = vadd.f32 %v1890_v39, %v1871_v34 }
 0x19a   :  { %2200 = vmatpush.msra.mxu2 %v125_v46  ;;  %2220 = vmatpush.msra.mxu3 %v189_v52  ;;  %v37_v24 = vld [vmem:[%s9068_s1 + $0x48] sm:$0xff] }
 0x19b   :  { %3843 = vmatmul.msk.f32.vlgmr.msra.gmra.mxu0 %vm1670_vm0, %v1645_v54  ;;  %2181 = vmatpush.msra.mxu1 %v57_v55  ;;  %v261_v25 = vld [vmem:[%s9068_s1 + $0x748] sm:$0xff]  ;;  %v1910_v55 = vpop.f32.mrf.mxu3 }
 0x19c   :  { %2233 = vmatpush.msrb.mxu0 %v281_v56  ;;  %2201 = vmatpush.msra.mxu2 %v121_v57  ;;  %v101_v26 = vld [vmem:[%s9068_s1 + $0x248] sm:$0xff] }
 0x19d   :  { %2221 = vmatpush.msra.mxu3 %v185_v58  ;;  %2182 = vmatpush.msra.mxu1 %v53_v59  ;;  %v165_v31 = vld [vmem:[%s9068_s1 + $0x448] sm:$0xff]  ;;  %v5366_v58 = vadd.f32 %v1910_v55, %v1891_v45 }
 0x19e   :  { %2234 = vmatpush.msrb.mxu0 %v277_v61  ;;  %2202 = vmatpush.msra.mxu2 %v117_v62  ;;  %v33_v32 = vld [vmem:[%s9068_s1 + $0x28] sm:$0xff] }
 0x19f   :  { %2222 = vmatpush.msra.mxu3 %v181_v4  ;;  %2183 = vmatpush.msra.mxu1 %v49_v5  ;;  %v257_v35 = vld [vmem:[%s9068_s1 + $0x728] sm:$0xff] }
 0x1a0   :  { %2235 = vmatpush.msrb.mxu0 %v273_v6  ;;  %2203 = vmatpush.msra.mxu2 %v113_v7  ;;  %v97_v36 = vld [vmem:[%s9068_s1 + $0x228] sm:$0xff] }
 0x1a1   :  { %2223 = vmatpush.msra.mxu3 %v177_v8  ;;  %2184 = vmatpush.msra.mxu1 %v45_v9  ;;  %v161_v37 = vld [vmem:[%s9068_s1 + $0x428] sm:$0xff] }
 0x1a2   :  { %2236 = vmatpush.msrb.mxu0 %v269_v13  ;;  %2204 = vmatpush.msra.mxu2 %v109_v14  ;;  %v29_v38 = vld [vmem:[%s9068_s1 + $0x8] sm:$0xff] }
 0x1a3   :  { %2224 = vmatpush.msra.mxu3 %v173_v15  ;;  %2185 = vmatpush.msra.mxu1 %v41_v18  ;;  %v253_v40 = vld [vmem:[%s9068_s1 + $0x708] sm:$0xff] }
 0x1a4   :  { %2237 = vmatpush.msrb.mxu0 %v265_v20  ;;  %2205 = vmatpush.msra.mxu2 %v105_v21  ;;  %v93_v41 = vld [vmem:[%s9068_s1 + $0x208] sm:$0xff] }
 0x1a5   :  { %2225 = vmatpush.msra.mxu3 %v169_v23  ;;  %2186 = vmatpush.msra.mxu1 %v37_v24  ;;  %v157_v46 = vld [vmem:[%s9068_s1 + $0x408] sm:$0xff] }
 0x1a6   :  { %2238 = vmatpush.msrb.mxu0 %v261_v25  ;;  %2206 = vmatpush.msra.mxu2 %v101_v26  ;;  %v345_v52 = vld [vmem:[%s9068_s1 + $0x9e8] sm:$0xff] }
 0x1a7   :  { %2226 = vmatpush.msra.mxu3 %v165_v31  ;;  %2187 = vmatpush.msra.mxu1 %v33_v32  ;;  %v249_v53 = vld [vmem:[%s9068_s1 + $0x6e8] sm:$0xff] }
 0x1a8   :  { %2239 = vmatpush.msrb.mxu0 %v257_v35  ;;  %2207 = vmatpush.msra.mxu2 %v97_v36  ;;  %v409_v54 = vld [vmem:[%s9068_s1 + $0xbe8] sm:$0xff] }
 0x1a9   :  { %2227 = vmatpush.msra.mxu3 %v161_v37  ;;  %2188 = vmatpush.msra.mxu1 %v29_v38  ;;  %v473_v56 = vld [vmem:[%s9068_s1 + $0xde8] sm:$0xff] }
 0x1aa   :  { %2240 = vmatpush.msrb.mxu0 %v253_v40  ;;  %2208 = vmatpush.msra.mxu2 %v93_v41  ;;  %v341_v57 = vld [vmem:[%s9068_s1 + $0x9c8] sm:$0xff] }
 0x1ab   :  { %2228 = vmatpush.msra.mxu3 %v157_v46  ;;  %2253 = vmatpush.msrb.mxu1 %v345_v52  ;;  %v245_v59 = vld [vmem:[%s9068_s1 + $0x6c8] sm:$0xff] }
 0x1ac   :  { %v405_v60 = vld [vmem:[%s9068_s1 + $0xbc8] sm:$0xff]  ;;  %2241 = vmatpush.msrb.mxu0 %v249_v53  ;;  %2273 = vmatpush.msrb.mxu2 %v409_v54 }
 0x1ad   :  { %v469_v61 = vld [vmem:[%s9068_s1 + $0xdc8] sm:$0xff]  ;;  %2293 = vmatpush.msrb.mxu3 %v473_v56  ;;  %2254 = vmatpush.msrb.mxu1 %v341_v57 }
 0x1ae   :  { %v337_v62 = vld [vmem:[%s9068_s1 + $0x9a8] sm:$0xff]  ;;  %2242 = vmatpush.msrb.mxu0 %v245_v59  ;;  %2274 = vmatpush.msrb.mxu2 %v405_v60 }
 0x1af   :  { %v241_v63 = vld [vmem:[%s9068_s1 + $0x6a8] sm:$0xff]  ;;  %2294 = vmatpush.msrb.mxu3 %v469_v61  ;;  %2255 = vmatpush.msrb.mxu1 %v337_v62 }
 0x1b0   :  { %v401_v4 = vld [vmem:[%s9068_s1 + $0xba8] sm:$0xff]  ;;  %2243 = vmatpush.msrb.mxu0 %v241_v63  ;;  %2189 = vmatmul.f32.vlgmr.msra.gmra.mxu1 %v4258_v48 }
 0x1b1   :  { %v465_v5 = vld [vmem:[%s9068_s1 + $0xda8] sm:$0xff]  ;;  %2275 = vmatpush.msrb.mxu2 %v401_v4  ;;  %v1930_v4 = vpop.f32.mrf.mxu0  ;;  %2229 = vmatmul.f32.vlgmr.msra.gmra.mxu3 %v4262_v50 }
 0x1b2   :  { %v333_v6 = vld [vmem:[%s9068_s1 + $0x988] sm:$0xff]  ;;  %2295 = vmatpush.msrb.mxu3 %v465_v5  ;;  %2209 = vmatmul.f32.vlgmr.msra.gmra.mxu2 %v4260_v49 }
 0x1b3   :  { %v237_v7 = vld [vmem:[%s9068_s1 + $0x688] sm:$0xff]  ;;  %2256 = vmatpush.msrb.mxu1 %v333_v6 }
 0x1b4   :  { %v397_v8 = vld [vmem:[%s9068_s1 + $0xb88] sm:$0xff]  ;;  %2244 = vmatpush.msrb.mxu0 %v237_v7  ;;  %v1931_v7 = vadd.f32 %v1930_v4, %v5366_v58 }
 0x1b5   :  { %v461_v9 = vld [vmem:[%s9068_s1 + $0xd88] sm:$0xff]  ;;  %2276 = vmatpush.msrb.mxu2 %v397_v8 }
 0x1b6   :  { %v329_v12 = vld [vmem:[%s9068_s1 + $0x968] sm:$0xff]  ;;  %2296 = vmatpush.msrb.mxu3 %v461_v9 }
 0x1b7   :  { %v233_v13 = vld [vmem:[%s9068_s1 + $0x668] sm:$0xff]  ;;  %2257 = vmatpush.msrb.mxu1 %v329_v12 }
 0x1b8   :  { %v393_v14 = vld [vmem:[%s9068_s1 + $0xb68] sm:$0xff]  ;;  %2245 = vmatpush.msrb.mxu0 %v233_v13  ;;  %v1950_v13 = vpop.f32.mrf.mxu1 }
 0x1b9   :  { %v457_v15 = vld [vmem:[%s9068_s1 + $0xd68] sm:$0xff]  ;;  %2277 = vmatpush.msrb.mxu2 %v393_v14 }
 0x1ba   :  { %v325_v18 = vld [vmem:[%s9068_s1 + $0x948] sm:$0xff]  ;;  %2297 = vmatpush.msrb.mxu3 %v457_v15 }
 0x1bb   :  { %v229_v19 = vld [vmem:[%s9068_s1 + $0x648] sm:$0xff]  ;;  %2258 = vmatpush.msrb.mxu1 %v325_v18  ;;  %v1951_v18 = vadd.f32 %v1950_v13, %v1931_v7 }
 0x1bc   :  { %v389_v20 = vld [vmem:[%s9068_s1 + $0xb48] sm:$0xff]  ;;  %2246 = vmatpush.msrb.mxu0 %v229_v19 }
 0x1bd   :  { %v453_v21 = vld [vmem:[%s9068_s1 + $0xd48] sm:$0xff]  ;;  %2278 = vmatpush.msrb.mxu2 %v389_v20 }
 0x1be   :  { %v321_v22 = vld [vmem:[%s9068_s1 + $0x928] sm:$0xff]  ;;  %2298 = vmatpush.msrb.mxu3 %v453_v21 }
 0x1bf   :  { %v225_v23 = vld [vmem:[%s9068_s1 + $0x628] sm:$0xff]  ;;  %2259 = vmatpush.msrb.mxu1 %v321_v22  ;;  %v1970_v22 = vpop.f32.mrf.mxu2 }
 0x1c0   :  { %v385_v24 = vld [vmem:[%s9068_s1 + $0xb28] sm:$0xff]  ;;  %2247 = vmatpush.msrb.mxu0 %v225_v23  ;;  %v1971_v23 = vadd.f32 %v1970_v22, %v1951_v18 }
 0x1c1   :  { %v449_v25 = vld [vmem:[%s9068_s1 + $0xd28] sm:$0xff]  ;;  %2279 = vmatpush.msrb.mxu2 %v385_v24 }
 0x1c2   :  { %v317_v26 = vld [vmem:[%s9068_s1 + $0x908] sm:$0xff]  ;;  %2299 = vmatpush.msrb.mxu3 %v449_v25 }
 0x1c3   :  { %v221_v29 = vld [vmem:[%s9068_s1 + $0x608] sm:$0xff]  ;;  %2260 = vmatpush.msrb.mxu1 %v317_v26 }
 0x1c4   :  { %v381_v31 = vld [vmem:[%s9068_s1 + $0xb08] sm:$0xff]  ;;  %2248 = vmatpush.msrb.mxu0 %v221_v29 }
 0x1c5   :  { %v445_v32 = vld [vmem:[%s9068_s1 + $0xd08] sm:$0xff]  ;;  %2280 = vmatpush.msrb.mxu2 %v381_v31  ;;  %v1990_v31 = vpop.f32.mrf.mxu3  ;;  %2249 = vmatmul.f32.vlgmr.msrb.gmra.mxu0 %v4264_v51 }
 0x1c6   :  { %v537_v34 = vld [vmem:[%s9068_s1 + $0xfe8] sm:$0xff]  ;;  %2300 = vmatpush.msrb.mxu3 %v445_v32 }
 0x1c7   :  { %v313_v35 = vld [vmem:[%s9068_s1 + $0x8e8] sm:$0xff]  ;;  %2313 = vmatpush.msra.mxu0 %v537_v34 }
 0x1c8   :  { %v377_v36 = vld [vmem:[%s9068_s1 + $0xae8] sm:$0xff]  ;;  %2261 = vmatpush.msrb.mxu1 %v313_v35  ;;  %v5567_v35 = vadd.f32 %v1990_v31, %v1971_v23 }
 0x1c9   :  { %v441_v37 = vld [vmem:[%s9068_s1 + $0xce8] sm:$0xff]  ;;  %2281 = vmatpush.msrb.mxu2 %v377_v36 }
 0x1ca   :  { %v533_v38 = vld [vmem:[%s9068_s1 + $0xfc8] sm:$0xff]  ;;  %2301 = vmatpush.msrb.mxu3 %v441_v37 }
 0x1cb   :  { %v309_v39 = vld [vmem:[%s9068_s1 + $0x8c8] sm:$0xff]  ;;  %2314 = vmatpush.msra.mxu0 %v533_v38 }
 0x1cc   :  { %v373_v40 = vld [vmem:[%s9068_s1 + $0xac8] sm:$0xff]  ;;  %2262 = vmatpush.msrb.mxu1 %v309_v39 }
 0x1cd   :  { %v437_v41 = vld [vmem:[%s9068_s1 + $0xcc8] sm:$0xff]  ;;  %2282 = vmatpush.msrb.mxu2 %v373_v40 }
 0x1ce   :  { %v529_v45 = vld [vmem:[%s9068_s1 + $0xfa8] sm:$0xff]  ;;  %2302 = vmatpush.msrb.mxu3 %v437_v41 }
 0x1cf   :  { %v305_v46 = vld [vmem:[%s9068_s1 + $0x8a8] sm:$0xff]  ;;  %2315 = vmatpush.msra.mxu0 %v529_v45 }
 0x1d0   :  { %v369_v52 = vld [vmem:[%s9068_s1 + $0xaa8] sm:$0xff]  ;;  %2263 = vmatpush.msrb.mxu1 %v305_v46 }
 0x1d1   :  { %v433_v53 = vld [vmem:[%s9068_s1 + $0xca8] sm:$0xff]  ;;  %2283 = vmatpush.msrb.mxu2 %v369_v52 }
 0x1d2   :  { %v525_v54 = vld [vmem:[%s9068_s1 + $0xf88] sm:$0xff]  ;;  %2303 = vmatpush.msrb.mxu3 %v433_v53 }
 0x1d3   :  { %v301_v55 = vld [vmem:[%s9068_s1 + $0x888] sm:$0xff]  ;;  %2316 = vmatpush.msra.mxu0 %v525_v54 }
 0x1d4   :  { %v365_v56 = vld [vmem:[%s9068_s1 + $0xa88] sm:$0xff]  ;;  %2264 = vmatpush.msrb.mxu1 %v301_v55 }
 0x1d5   :  { %v429_v57 = vld [vmem:[%s9068_s1 + $0xc88] sm:$0xff]  ;;  %2284 = vmatpush.msrb.mxu2 %v365_v56 }
 0x1d6   :  { %v521_v59 = vld [vmem:[%s9068_s1 + $0xf68] sm:$0xff]  ;;  %2304 = vmatpush.msrb.mxu3 %v429_v57 }
 0x1d7   :  { %v297_v60 = vld [vmem:[%s9068_s1 + $0x868] sm:$0xff]  ;;  %2317 = vmatpush.msra.mxu0 %v521_v59 }
 0x1d8   :  { %v361_v61 = vld [vmem:[%s9068_s1 + $0xa68] sm:$0xff]  ;;  %2265 = vmatpush.msrb.mxu1 %v297_v60 }
 0x1d9   :  { %v425_v62 = vld [vmem:[%s9068_s1 + $0xc68] sm:$0xff]  ;;  %2285 = vmatpush.msrb.mxu2 %v361_v61 }
 0x1da   :  { %v517_v63 = vld [vmem:[%s9068_s1 + $0xf48] sm:$0xff]  ;;  %2305 = vmatpush.msrb.mxu3 %v425_v62 }
 0x1db   :  { %v293_v5 = vld [vmem:[%s9068_s1 + $0x848] sm:$0xff]  ;;  %2318 = vmatpush.msra.mxu0 %v517_v63 }
 0x1dc   :  { %v357_v6 = vld [vmem:[%s9068_s1 + $0xa48] sm:$0xff]  ;;  %2266 = vmatpush.msrb.mxu1 %v293_v5 }
 0x1dd   :  { %v421_v8 = vld [vmem:[%s9068_s1 + $0xc48] sm:$0xff]  ;;  %2286 = vmatpush.msrb.mxu2 %v357_v6 }
 0x1de   :  { %v513_v9 = vld [vmem:[%s9068_s1 + $0xf28] sm:$0xff]  ;;  %2306 = vmatpush.msrb.mxu3 %v421_v8 }
 0x1df   :  { %v289_v12 = vld [vmem:[%s9068_s1 + $0x828] sm:$0xff]  ;;  %2319 = vmatpush.msra.mxu0 %v513_v9 }
 0x1e0   :  { %v353_v58 = vld [vmem:[%s9068_s1 + $0xa28] sm:$0xff]  ;;  %2267 = vmatpush.msrb.mxu1 %v289_v12 }
 0x1e1   :  { %v417_v14 = vld [vmem:[%s9068_s1 + $0xc28] sm:$0xff]  ;;  %2287 = vmatpush.msrb.mxu2 %v353_v58 }
 0x1e2   :  { %v509_v15 = vld [vmem:[%s9068_s1 + $0xf08] sm:$0xff]  ;;  %2307 = vmatpush.msrb.mxu3 %v417_v14 }
 0x1e3   :  { %v285_v19 = vld [vmem:[%s9068_s1 + $0x808] sm:$0xff]  ;;  %2320 = vmatpush.msra.mxu0 %v509_v15 }
 0x1e4   :  { %v349_v20 = vld [vmem:[%s9068_s1 + $0xa08] sm:$0xff]  ;;  %2268 = vmatpush.msrb.mxu1 %v285_v19 }
 0x1e5   :  { %v413_v21 = vld [vmem:[%s9068_s1 + $0xc08] sm:$0xff]  ;;  %2288 = vmatpush.msrb.mxu2 %v349_v20  ;;  %2269 = vmatmul.f32.vlgmr.msrb.gmra.mxu1 %v4304_v1 }
 0x1e6   :  { %v505_v24 = vld [vmem:[%s9068_s1 + $0xee8] sm:$0xff]  ;;  %2308 = vmatpush.msrb.mxu3 %v413_v21  ;;  %2289 = vmatmul.f32.vlgmr.msrb.gmra.mxu2 %v4308_v3 }
 0x1e7   :  { %v601_v25 = vld [vmem:[%s9068_s1 + $0x11e8] sm:$0xff]  ;;  %2321 = vmatpush.msra.mxu0 %v505_v24  ;;  %2309 = vmatmul.f32.vlgmr.msrb.gmra.mxu3 %v4302_v0 }
 0x1e8   :  { %v665_v26 = vld [vmem:[%s9068_s1 + $0x13e8] sm:$0xff]  ;;  %2333 = vmatpush.msra.mxu1 %v601_v25 }
 0x1e9   :  { %v729_v29 = vld [vmem:[%s9068_s1 + $0x15e8] sm:$0xff]  ;;  %2353 = vmatpush.msra.mxu2 %v665_v26 }
 0x1ea   :  { %v501_v32 = vld [vmem:[%s9068_s1 + $0xec8] sm:$0xff]  ;;  %2373 = vmatpush.msra.mxu3 %v729_v29 }
 0x1eb   :  { %v597_v34 = vld [vmem:[%s9068_s1 + $0x11c8] sm:$0xff]  ;;  %2322 = vmatpush.msra.mxu0 %v501_v32 }
 0x1ec   :  { %v661_v36 = vld [vmem:[%s9068_s1 + $0x13c8] sm:$0xff]  ;;  %2334 = vmatpush.msra.mxu1 %v597_v34 }
 0x1ed   :  { %v725_v37 = vld [vmem:[%s9068_s1 + $0x15c8] sm:$0xff]  ;;  %2354 = vmatpush.msra.mxu2 %v661_v36  ;;  %v2010_v36 = vpop.f32.mrf.mxu0 }
 0x1ee   :  { %v497_v38 = vld [vmem:[%s9068_s1 + $0xea8] sm:$0xff]  ;;  %2374 = vmatpush.msra.mxu3 %v725_v37 }
 0x1ef   :  { %v593_v39 = vld [vmem:[%s9068_s1 + $0x11a8] sm:$0xff]  ;;  %2323 = vmatpush.msra.mxu0 %v497_v38 }
 0x1f0   :  { %v657_v40 = vld [vmem:[%s9068_s1 + $0x13a8] sm:$0xff]  ;;  %2335 = vmatpush.msra.mxu1 %v593_v39  ;;  %v2011_v39 = vadd.f32 %v2010_v36, %v5567_v35 }
 0x1f1   :  { %v721_v41 = vld [vmem:[%s9068_s1 + $0x15a8] sm:$0xff]  ;;  %2355 = vmatpush.msra.mxu2 %v657_v40 }
 0x1f2   :  { %v493_v45 = vld [vmem:[%s9068_s1 + $0xe88] sm:$0xff]  ;;  %2375 = vmatpush.msra.mxu3 %v721_v41 }
 0x1f3   :  { %v589_v46 = vld [vmem:[%s9068_s1 + $0x1188] sm:$0xff]  ;;  %2324 = vmatpush.msra.mxu0 %v493_v45 }
 0x1f4   :  { %v653_v52 = vld [vmem:[%s9068_s1 + $0x1388] sm:$0xff]  ;;  %2336 = vmatpush.msra.mxu1 %v589_v46  ;;  %v2030_v46 = vpop.f32.mrf.mxu1 }
 0x1f5   :  { %v717_v53 = vld [vmem:[%s9068_s1 + $0x1588] sm:$0xff]  ;;  %2356 = vmatpush.msra.mxu2 %v653_v52 }
 0x1f6   :  { %v489_v54 = vld [vmem:[%s9068_s1 + $0xe68] sm:$0xff]  ;;  %2376 = vmatpush.msra.mxu3 %v717_v53 }
 0x1f7   :  { %v585_v55 = vld [vmem:[%s9068_s1 + $0x1168] sm:$0xff]  ;;  %2325 = vmatpush.msra.mxu0 %v489_v54  ;;  %v2031_v54 = vadd.f32 %v2030_v46, %v2011_v39 }
 0x1f8   :  { %v649_v56 = vld [vmem:[%s9068_s1 + $0x1368] sm:$0xff]  ;;  %2337 = vmatpush.msra.mxu1 %v585_v55 }
 0x1f9   :  { %v713_v57 = vld [vmem:[%s9068_s1 + $0x1568] sm:$0xff]  ;;  %2357 = vmatpush.msra.mxu2 %v649_v56 }
 0x1fa   :  { %v485_v59 = vld [vmem:[%s9068_s1 + $0xe48] sm:$0xff]  ;;  %2377 = vmatpush.msra.mxu3 %v713_v57 }
 0x1fb   :  { %v581_v60 = vld [vmem:[%s9068_s1 + $0x1148] sm:$0xff]  ;;  %2326 = vmatpush.msra.mxu0 %v485_v59 }
 0x1fc   :  { %v645_v61 = vld [vmem:[%s9068_s1 + $0x1348] sm:$0xff]  ;;  %2338 = vmatpush.msra.mxu1 %v581_v60  ;;  %v2050_v60 = vpop.f32.mrf.mxu2 }
 0x1fd   :  { %v709_v62 = vld [vmem:[%s9068_s1 + $0x1548] sm:$0xff]  ;;  %2358 = vmatpush.msra.mxu2 %v645_v61 }
 0x1fe   :  { %v481_v63 = vld [vmem:[%s9068_s1 + $0xe28] sm:$0xff]  ;;  %2378 = vmatpush.msra.mxu3 %v709_v62 }
 0x1ff   :  { %v577_v4 = vld [vmem:[%s9068_s1 + $0x1128] sm:$0xff]  ;;  %2327 = vmatpush.msra.mxu0 %v481_v63  ;;  %v2051_v63 = vadd.f32 %v2050_v60, %v2031_v54 }
 0x200   :  { %v641_v5 = vld [vmem:[%s9068_s1 + $0x1328] sm:$0xff]  ;;  %2339 = vmatpush.msra.mxu1 %v577_v4 }
 0x201   :  { %v705_v6 = vld [vmem:[%s9068_s1 + $0x1528] sm:$0xff]  ;;  %2359 = vmatpush.msra.mxu2 %v641_v5 }
 0x202   :  { %v477_v7 = vld [vmem:[%s9068_s1 + $0xe08] sm:$0xff]  ;;  %2379 = vmatpush.msra.mxu3 %v705_v6  ;;  %v2070_v6 = vpop.f32.mrf.mxu3 }
 0x203   :  { %v573_v8 = vld [vmem:[%s9068_s1 + $0x1108] sm:$0xff]  ;;  %2328 = vmatpush.msra.mxu0 %v477_v7 }
 0x204   :  { %v637_v9 = vld [vmem:[%s9068_s1 + $0x1308] sm:$0xff]  ;;  %2340 = vmatpush.msra.mxu1 %v573_v8  ;;  %2329 = vmatmul.f32.vlgmr.msra.gmra.mxu0 %v4306_v2 }
 0x205   :  { %v701_v12 = vld [vmem:[%s9068_s1 + $0x1508] sm:$0xff]  ;;  %2360 = vmatpush.msra.mxu2 %v637_v9  ;;  %v5758_v9 = vadd.f32 %v2070_v6, %v2051_v63 }
 0x206   :  { %v793_v58 = vld [vmem:[%s9068_s1 + $0x17e8] sm:$0xff]  ;;  %2380 = vmatpush.msra.mxu3 %v701_v12 }
 0x207   :  { %v569_v13 = vld [vmem:[%s9068_s1 + $0x10e8] sm:$0xff]  ;;  %2393 = vmatpush.msrb.mxu0 %v793_v58 }
 0x208   :  { %v633_v14 = vld [vmem:[%s9068_s1 + $0x12e8] sm:$0xff]  ;;  %2341 = vmatpush.msra.mxu1 %v569_v13 }
 0x209   :  { %v697_v15 = vld [vmem:[%s9068_s1 + $0x14e8] sm:$0xff]  ;;  %2361 = vmatpush.msra.mxu2 %v633_v14 }
 0x20a   :  { %v789_v18 = vld [vmem:[%s9068_s1 + $0x17c8] sm:$0xff]  ;;  %2381 = vmatpush.msra.mxu3 %v697_v15 }
 0x20b   :  { %v565_v19 = vld [vmem:[%s9068_s1 + $0x10c8] sm:$0xff]  ;;  %2394 = vmatpush.msrb.mxu0 %v789_v18 }
 0x20c   :  { %v629_v20 = vld [vmem:[%s9068_s1 + $0x12c8] sm:$0xff]  ;;  %2342 = vmatpush.msra.mxu1 %v565_v19 }
 0x20d   :  { %v693_v21 = vld [vmem:[%s9068_s1 + $0x14c8] sm:$0xff]  ;;  %2362 = vmatpush.msra.mxu2 %v629_v20 }
 0x20e   :  { %v785_v22 = vld [vmem:[%s9068_s1 + $0x17a8] sm:$0xff]  ;;  %2382 = vmatpush.msra.mxu3 %v693_v21 }
 0x20f   :  { %v561_v23 = vld [vmem:[%s9068_s1 + $0x10a8] sm:$0xff]  ;;  %2395 = vmatpush.msrb.mxu0 %v785_v22 }
 0x210   :  { %v625_v24 = vld [vmem:[%s9068_s1 + $0x12a8] sm:$0xff]  ;;  %2343 = vmatpush.msra.mxu1 %v561_v23 }
 0x211   :  { %v689_v25 = vld [vmem:[%s9068_s1 + $0x14a8] sm:$0xff]  ;;  %2363 = vmatpush.msra.mxu2 %v625_v24 }
 0x212   :  { %v781_v26 = vld [vmem:[%s9068_s1 + $0x1788] sm:$0xff]  ;;  %2383 = vmatpush.msra.mxu3 %v689_v25 }
 0x213   :  { %v557_v29 = vld [vmem:[%s9068_s1 + $0x1088] sm:$0xff]  ;;  %2396 = vmatpush.msrb.mxu0 %v781_v26 }
 0x214   :  { %v621_v31 = vld [vmem:[%s9068_s1 + $0x1288] sm:$0xff]  ;;  %2344 = vmatpush.msra.mxu1 %v557_v29 }
 0x215   :  { %v685_v32 = vld [vmem:[%s9068_s1 + $0x1488] sm:$0xff]  ;;  %2364 = vmatpush.msra.mxu2 %v621_v31 }
 0x216   :  { %v777_v34 = vld [vmem:[%s9068_s1 + $0x1768] sm:$0xff]  ;;  %2384 = vmatpush.msra.mxu3 %v685_v32 }
 0x217   :  { %v553_v37 = vld [vmem:[%s9068_s1 + $0x1068] sm:$0xff]  ;;  %2397 = vmatpush.msrb.mxu0 %v777_v34 }
 0x218   :  { %v617_v38 = vld [vmem:[%s9068_s1 + $0x1268] sm:$0xff]  ;;  %2345 = vmatpush.msra.mxu1 %v553_v37 }
 0x219   :  { %v681_v40 = vld [vmem:[%s9068_s1 + $0x1468] sm:$0xff]  ;;  %2365 = vmatpush.msra.mxu2 %v617_v38 }
 0x21a   :  { %v773_v41 = vld [vmem:[%s9068_s1 + $0x1748] sm:$0xff]  ;;  %2385 = vmatpush.msra.mxu3 %v681_v40 }
 0x21b   :  { %v549_v45 = vld [vmem:[%s9068_s1 + $0x1048] sm:$0xff]  ;;  %2398 = vmatpush.msrb.mxu0 %v773_v41 }
 0x21c   :  { %v613_v35 = vld [vmem:[%s9068_s1 + $0x1248] sm:$0xff]  ;;  %2346 = vmatpush.msra.mxu1 %v549_v45 }
 0x21d   :  { %v677_v52 = vld [vmem:[%s9068_s1 + $0x1448] sm:$0xff]  ;;  %2366 = vmatpush.msra.mxu2 %v613_v35 }
 0x21e   :  { %v769_v53 = vld [vmem:[%s9068_s1 + $0x1728] sm:$0xff]  ;;  %2386 = vmatpush.msra.mxu3 %v677_v52 }
 0x21f   :  { %v545_v55 = vld [vmem:[%s9068_s1 + $0x1028] sm:$0xff]  ;;  %2399 = vmatpush.msrb.mxu0 %v769_v53 }
 0x220   :  { %v609_v56 = vld [vmem:[%s9068_s1 + $0x1228] sm:$0xff]  ;;  %2347 = vmatpush.msra.mxu1 %v545_v55 }
 0x221   :  { %v673_v57 = vld [vmem:[%s9068_s1 + $0x1428] sm:$0xff]  ;;  %2367 = vmatpush.msra.mxu2 %v609_v56 }
 0x222   :  { %v765_v59 = vld [vmem:[%s9068_s1 + $0x1708] sm:$0xff]  ;;  %2387 = vmatpush.msra.mxu3 %v673_v57 }
 0x223   :  { %v541_v61 = vld [vmem:[%s9068_s1 + $0x1008] sm:$0xff]  ;;  %2400 = vmatpush.msrb.mxu0 %v765_v59 }
 0x224   :  { %v605_v62 = vld [vmem:[%s9068_s1 + $0x1208] sm:$0xff]  ;;  %2348 = vmatpush.msra.mxu1 %v541_v61 }
 0x225   :  { %v669_v4 = vld [vmem:[%s9068_s1 + $0x1408] sm:$0xff]  ;;  %2368 = vmatpush.msra.mxu2 %v605_v62  ;;  %2349 = vmatmul.f32.vlgmr.msra.gmra.mxu1 %v4383_v27 }
 0x226   :  { %v761_v5 = vld [vmem:[%s9068_s1 + $0x16e8] sm:$0xff]  ;;  %2388 = vmatpush.msra.mxu3 %v669_v4  ;;  %2369 = vmatmul.f32.vlgmr.msra.gmra.mxu2 %v4390_v30 }
 0x227   :  { %v857_v7 = vld [vmem:[%s9068_s1 + $0x19e8] sm:$0xff]  ;;  %2401 = vmatpush.msrb.mxu0 %v761_v5  ;;  %2389 = vmatmul.f32.vlgmr.msra.gmra.mxu3 %v4385_v28 }
 0x228   :  { %v921_v8 = vld [vmem:[%s9068_s1 + $0x1be8] sm:$0xff]  ;;  %2413 = vmatpush.msrb.mxu1 %v857_v7 }
 0x229   :  { %v985_v12 = vld [vmem:[%s9068_s1 + $0x1de8] sm:$0xff]  ;;  %2433 = vmatpush.msrb.mxu2 %v921_v8 }
 0x22a   :  { %v757_v58 = vld [vmem:[%s9068_s1 + $0x16c8] sm:$0xff]  ;;  %2453 = vmatpush.msrb.mxu3 %v985_v12 }
 0x22b   :  { %v853_v13 = vld [vmem:[%s9068_s1 + $0x19c8] sm:$0xff]  ;;  %2402 = vmatpush.msrb.mxu0 %v757_v58 }
 0x22c   :  { %v917_v14 = vld [vmem:[%s9068_s1 + $0x1bc8] sm:$0xff]  ;;  %2414 = vmatpush.msrb.mxu1 %v853_v13 }
 0x22d   :  { %v981_v15 = vld [vmem:[%s9068_s1 + $0x1dc8] sm:$0xff]  ;;  %2434 = vmatpush.msrb.mxu2 %v917_v14  ;;  %v2090_v14 = vpop.f32.mrf.mxu0 }
 0x22e   :  { %v753_v18 = vld [vmem:[%s9068_s1 + $0x16a8] sm:$0xff]  ;;  %2454 = vmatpush.msrb.mxu3 %v981_v15 }
 0x22f   :  { %v849_v19 = vld [vmem:[%s9068_s1 + $0x19a8] sm:$0xff]  ;;  %2403 = vmatpush.msrb.mxu0 %v753_v18 }
 0x230   :  { %v913_v20 = vld [vmem:[%s9068_s1 + $0x1ba8] sm:$0xff]  ;;  %2415 = vmatpush.msrb.mxu1 %v849_v19  ;;  %v2091_v19 = vadd.f32 %v2090_v14, %v5758_v9 }
 0x231   :  { %v977_v21 = vld [vmem:[%s9068_s1 + $0x1da8] sm:$0xff]  ;;  %2435 = vmatpush.msrb.mxu2 %v913_v20 }
 0x232   :  { %v749_v22 = vld [vmem:[%s9068_s1 + $0x1688] sm:$0xff]  ;;  %2455 = vmatpush.msrb.mxu3 %v977_v21 }
 0x233   :  { %v845_v23 = vld [vmem:[%s9068_s1 + $0x1988] sm:$0xff]  ;;  %2404 = vmatpush.msrb.mxu0 %v749_v22 }
 0x234   :  { %v909_v24 = vld [vmem:[%s9068_s1 + $0x1b88] sm:$0xff]  ;;  %2416 = vmatpush.msrb.mxu1 %v845_v23  ;;  %v2110_v23 = vpop.f32.mrf.mxu1 }
 0x235   :  { %v973_v25 = vld [vmem:[%s9068_s1 + $0x1d88] sm:$0xff]  ;;  %2436 = vmatpush.msrb.mxu2 %v909_v24 }
 0x236   :  { %v745_v26 = vld [vmem:[%s9068_s1 + $0x1668] sm:$0xff]  ;;  %2456 = vmatpush.msrb.mxu3 %v973_v25 }
 0x237   :  { %v841_v29 = vld [vmem:[%s9068_s1 + $0x1968] sm:$0xff]  ;;  %2405 = vmatpush.msrb.mxu0 %v745_v26  ;;  %v2111_v26 = vadd.f32 %v2110_v23, %v2091_v19 }
 0x238   :  { %v905_v31 = vld [vmem:[%s9068_s1 + $0x1b68] sm:$0xff]  ;;  %2417 = vmatpush.msrb.mxu1 %v841_v29 }
 0x239   :  { %v969_v32 = vld [vmem:[%s9068_s1 + $0x1d68] sm:$0xff]  ;;  %2437 = vmatpush.msrb.mxu2 %v905_v31 }
 0x23a   :  { %v741_v34 = vld [vmem:[%s9068_s1 + $0x1648] sm:$0xff]  ;;  %2457 = vmatpush.msrb.mxu3 %v969_v32 }
 0x23b   :  { %v837_v36 = vld [vmem:[%s9068_s1 + $0x1948] sm:$0xff]  ;;  %2406 = vmatpush.msrb.mxu0 %v741_v34 }
 0x23c   :  { %v901_v37 = vld [vmem:[%s9068_s1 + $0x1b48] sm:$0xff]  ;;  %2418 = vmatpush.msrb.mxu1 %v837_v36  ;;  %v2130_v36 = vpop.f32.mrf.mxu2 }
 0x23d   :  { %v965_v38 = vld [vmem:[%s9068_s1 + $0x1d48] sm:$0xff]  ;;  %2438 = vmatpush.msrb.mxu2 %v901_v37 }
 0x23e   :  { %v737_v39 = vld [vmem:[%s9068_s1 + $0x1628] sm:$0xff]  ;;  %2458 = vmatpush.msrb.mxu3 %v965_v38 }
 0x23f   :  { %v833_v40 = vld [vmem:[%s9068_s1 + $0x1928] sm:$0xff]  ;;  %2407 = vmatpush.msrb.mxu0 %v737_v39  ;;  %v2131_v39 = vadd.f32 %v2130_v36, %v2111_v26 }
 0x240   :  { %v897_v41 = vld [vmem:[%s9068_s1 + $0x1b28] sm:$0xff]  ;;  %2419 = vmatpush.msrb.mxu1 %v833_v40 }
 0x241   :  { %v961_v45 = vld [vmem:[%s9068_s1 + $0x1d28] sm:$0xff]  ;;  %2439 = vmatpush.msrb.mxu2 %v897_v41 }
 0x242   :  { %v733_v35 = vld [vmem:[%s9068_s1 + $0x1608] sm:$0xff]  ;;  %2459 = vmatpush.msrb.mxu3 %v961_v45  ;;  %v2150_v45 = vpop.f32.mrf.mxu3 }
 0x243   :  { %v829_v46 = vld [vmem:[%s9068_s1 + $0x1908] sm:$0xff]  ;;  %2408 = vmatpush.msrb.mxu0 %v733_v35 }
 0x244   :  { %v893_v52 = vld [vmem:[%s9068_s1 + $0x1b08] sm:$0xff]  ;;  %2420 = vmatpush.msrb.mxu1 %v829_v46  ;;  %2409 = vmatmul.f32.vlgmr.msrb.gmra.mxu0 %v4398_v33 }
 0x245   :  { %v957_v53 = vld [vmem:[%s9068_s1 + $0x1d08] sm:$0xff]  ;;  %2440 = vmatpush.msrb.mxu2 %v893_v52  ;;  %v2151_v52 = vadd.f32 %v2150_v45, %v2131_v39 }
 0x246   :  { %v825_v54 = vld [vmem:[%s9068_s1 + $0x18e8] sm:$0xff]  ;;  %2460 = vmatpush.msrb.mxu3 %v957_v53 }
 0x247   :  { %v1049_v55 = vld [vmem:[%s9068_s1 + $0x1fe8] sm:$0xff]  ;;  %2421 = vmatpush.msrb.mxu1 %v825_v54 }
 0x248   :  { %v889_v56 = vld [vmem:[%s9068_s1 + $0x1ae8] sm:$0xff]  ;;  %2473 = vmatpush.msra.mxu0 %v1049_v55 }
 0x249   :  { %v953_v57 = vld [vmem:[%s9068_s1 + $0x1ce8] sm:$0xff]  ;;  %2441 = vmatpush.msrb.mxu2 %v889_v56 }
 0x24a   :  { %v821_v59 = vld [vmem:[%s9068_s1 + $0x18c8] sm:$0xff]  ;;  %2461 = vmatpush.msrb.mxu3 %v953_v57 }
 0x24b   :  { %v1045_v60 = vld [vmem:[%s9068_s1 + $0x1fc8] sm:$0xff]  ;;  %2422 = vmatpush.msrb.mxu1 %v821_v59 }
 0x24c   :  { %v885_v61 = vld [vmem:[%s9068_s1 + $0x1ac8] sm:$0xff]  ;;  %2474 = vmatpush.msra.mxu0 %v1045_v60 }
 0x24d   :  { %v949_v62 = vld [vmem:[%s9068_s1 + $0x1cc8] sm:$0xff]  ;;  %2442 = vmatpush.msrb.mxu2 %v885_v61 }
 0x24e   :  { %v817_v63 = vld [vmem:[%s9068_s1 + $0x18a8] sm:$0xff]  ;;  %2462 = vmatpush.msrb.mxu3 %v949_v62 }
 0x24f   :  { %v1041_v4 = vld [vmem:[%s9068_s1 + $0x1fa8] sm:$0xff]  ;;  %2423 = vmatpush.msrb.mxu1 %v817_v63 }
 0x250   :  { %v881_v5 = vld [vmem:[%s9068_s1 + $0x1aa8] sm:$0xff]  ;;  %2475 = vmatpush.msra.mxu0 %v1041_v4 }
 0x251   :  { %v945_v6 = vld [vmem:[%s9068_s1 + $0x1ca8] sm:$0xff]  ;;  %2443 = vmatpush.msrb.mxu2 %v881_v5 }
 0x252   :  { %v813_v7 = vld [vmem:[%s9068_s1 + $0x1888] sm:$0xff]  ;;  %2463 = vmatpush.msrb.mxu3 %v945_v6 }
 0x253   :  { %v1037_v8 = vld [vmem:[%s9068_s1 + $0x1f88] sm:$0xff]  ;;  %2424 = vmatpush.msrb.mxu1 %v813_v7 }
 0x254   :  { %v877_v12 = vld [vmem:[%s9068_s1 + $0x1a88] sm:$0xff]  ;;  %2476 = vmatpush.msra.mxu0 %v1037_v8 }
 0x255   :  { %v941_v58 = vld [vmem:[%s9068_s1 + $0x1c88] sm:$0xff]  ;;  %2444 = vmatpush.msrb.mxu2 %v877_v12  ;;  %v2170_v12 = vpop.f32.mrf.mxu0 }
 0x256   :  { %v809_v13 = vld [vmem:[%s9068_s1 + $0x1868] sm:$0xff]  ;;  %2464 = vmatpush.msrb.mxu3 %v941_v58  ;;  %v6011_v14 = vadd.f32 %v2170_v12, %v2151_v52 }
 0x257   :  { %v1033_v15 = vld [vmem:[%s9068_s1 + $0x1f68] sm:$0xff]  ;;  %2425 = vmatpush.msrb.mxu1 %v809_v13 }
 0x258   :  { %v873_v18 = vld [vmem:[%s9068_s1 + $0x1a68] sm:$0xff]  ;;  %2477 = vmatpush.msra.mxu0 %v1033_v15 }
 0x259   :  { %v937_v20 = vld [vmem:[%s9068_s1 + $0x1c68] sm:$0xff]  ;;  %2445 = vmatpush.msrb.mxu2 %v873_v18 }
 0x25a   :  { %v805_v21 = vld [vmem:[%s9068_s1 + $0x1848] sm:$0xff]  ;;  %2465 = vmatpush.msrb.mxu3 %v937_v20 }
 0x25b   :  { %v1029_v22 = vld [vmem:[%s9068_s1 + $0x1f48] sm:$0xff]  ;;  %2426 = vmatpush.msrb.mxu1 %v805_v21 }
 0x25c   :  { %v869_v9 = vld [vmem:[%s9068_s1 + $0x1a48] sm:$0xff]  ;;  %2478 = vmatpush.msra.mxu0 %v1029_v22 }
 0x25d   :  { %v933_v24 = vld [vmem:[%s9068_s1 + $0x1c48] sm:$0xff]  ;;  %2446 = vmatpush.msrb.mxu2 %v869_v9 }
 0x25e   :  { %v801_v25 = vld [vmem:[%s9068_s1 + $0x1828] sm:$0xff]  ;;  %2466 = vmatpush.msrb.mxu3 %v933_v24 }
 0x25f   :  { %v1025_v29 = vld [vmem:[%s9068_s1 + $0x1f28] sm:$0xff]  ;;  %2427 = vmatpush.msrb.mxu1 %v801_v25 }
 0x260   :  { %v865_v31 = vld [vmem:[%s9068_s1 + $0x1a28] sm:$0xff]  ;;  %2479 = vmatpush.msra.mxu0 %v1025_v29 }
 0x261   :  { %v929_v32 = vld [vmem:[%s9068_s1 + $0x1c28] sm:$0xff]  ;;  %2447 = vmatpush.msrb.mxu2 %v865_v31 }
 0x262   :  { %v797_v34 = vld [vmem:[%s9068_s1 + $0x1808] sm:$0xff]  ;;  %2467 = vmatpush.msrb.mxu3 %v929_v32 }
 0x263   :  { %v1021_v37 = vld [vmem:[%s9068_s1 + $0x1f08] sm:$0xff]  ;;  %2428 = vmatpush.msrb.mxu1 %v797_v34 }
 0x264   :  { %v861_v38 = vld [vmem:[%s9068_s1 + $0x1a08] sm:$0xff]  ;;  %2480 = vmatpush.msra.mxu0 %v1021_v37  ;;  %2429 = vmatmul.f32.vlgmr.msrb.gmra.mxu1 %v4588_v42 }
 0x265   :  { %v925_v40 = vld [vmem:[%s9068_s1 + $0x1c08] sm:$0xff]  ;;  %2448 = vmatpush.msrb.mxu2 %v861_v38 }
 0x266   :  { %v1017_v41 = vld [vmem:[%s9068_s1 + $0x1ee8] sm:$0xff]  ;;  %2468 = vmatpush.msrb.mxu3 %v925_v40  ;;  %2449 = vmatmul.f32.vlgmr.msrb.gmra.mxu2 %v4592_v44 }
 0x267   :  { %v1113_v35 = vld [vmem:[%s9068_s1 + $0x21e8] sm:$0xff]  ;;  %2481 = vmatpush.msra.mxu0 %v1017_v41  ;;  %2469 = vmatmul.f32.vlgmr.msrb.gmra.mxu3 %v4590_v43 }
 0x268   :  { %v1177_v46 = vld [vmem:[%s9068_s1 + $0x23e8] sm:$0xff]  ;;  %2493 = vmatpush.msra.mxu1 %v1113_v35 }
 0x269   :  { %v1241_v53 = vld [vmem:[%s9068_s1 + $0x25e8] sm:$0xff]  ;;  %2513 = vmatpush.msra.mxu2 %v1177_v46 }
 0x26a   :  { %v1013_v54 = vld [vmem:[%s9068_s1 + $0x1ec8] sm:$0xff]  ;;  %2533 = vmatpush.msra.mxu3 %v1241_v53 }
 0x26b   :  { %v1109_v55 = vld [vmem:[%s9068_s1 + $0x21c8] sm:$0xff]  ;;  %2482 = vmatpush.msra.mxu0 %v1013_v54 }
 0x26c   :  { %v1173_v56 = vld [vmem:[%s9068_s1 + $0x23c8] sm:$0xff]  ;;  %2494 = vmatpush.msra.mxu1 %v1109_v55 }
 0x26d   :  { %v1237_v57 = vld [vmem:[%s9068_s1 + $0x25c8] sm:$0xff]  ;;  %2514 = vmatpush.msra.mxu2 %v1173_v56 }
 0x26e   :  { %v1009_v59 = vld [vmem:[%s9068_s1 + $0x1ea8] sm:$0xff]  ;;  %2534 = vmatpush.msra.mxu3 %v1237_v57 }
 0x26f   :  { %v1105_v60 = vld [vmem:[%s9068_s1 + $0x21a8] sm:$0xff]  ;;  %2483 = vmatpush.msra.mxu0 %v1009_v59 }
 0x270   :  { %v1169_v61 = vld [vmem:[%s9068_s1 + $0x23a8] sm:$0xff]  ;;  %2495 = vmatpush.msra.mxu1 %v1105_v60 }
 0x271   :  { %v1233_v62 = vld [vmem:[%s9068_s1 + $0x25a8] sm:$0xff]  ;;  %2515 = vmatpush.msra.mxu2 %v1169_v61 }
 0x272   :  { %v1005_v63 = vld [vmem:[%s9068_s1 + $0x1e88] sm:$0xff]  ;;  %2535 = vmatpush.msra.mxu3 %v1233_v62 }
 0x273   :  { %v1101_v4 = vld [vmem:[%s9068_s1 + $0x2188] sm:$0xff]  ;;  %2484 = vmatpush.msra.mxu0 %v1005_v63 }
 0x274   :  { %v1165_v5 = vld [vmem:[%s9068_s1 + $0x2388] sm:$0xff]  ;;  %2496 = vmatpush.msra.mxu1 %v1101_v4 }
 0x275   :  { %v1229_v6 = vld [vmem:[%s9068_s1 + $0x2588] sm:$0xff]  ;;  %2516 = vmatpush.msra.mxu2 %v1165_v5 }
 0x276   :  { %v1001_v7 = vld [vmem:[%s9068_s1 + $0x1e68] sm:$0xff]  ;;  %2536 = vmatpush.msra.mxu3 %v1229_v6 }
 0x277   :  { %v1097_v8 = vld [vmem:[%s9068_s1 + $0x2168] sm:$0xff]  ;;  %2485 = vmatpush.msra.mxu0 %v1001_v7 }
 0x278   :  { %v1161_v58 = vld [vmem:[%s9068_s1 + $0x2368] sm:$0xff]  ;;  %2497 = vmatpush.msra.mxu1 %v1097_v8 }
 0x279   :  { %v1225_v13 = vld [vmem:[%s9068_s1 + $0x2568] sm:$0xff]  ;;  %2517 = vmatpush.msra.mxu2 %v1161_v58 }
 0x27a   :  { %v997_v15 = vld [vmem:[%s9068_s1 + $0x1e48] sm:$0xff]  ;;  %2537 = vmatpush.msra.mxu3 %v1225_v13 }
 0x27b   :  { %v1093_v18 = vld [vmem:[%s9068_s1 + $0x2148] sm:$0xff]  ;;  %2486 = vmatpush.msra.mxu0 %v997_v15 }
 0x27c   :  { %v1157_v19 = vld [vmem:[%s9068_s1 + $0x2348] sm:$0xff]  ;;  %2498 = vmatpush.msra.mxu1 %v1093_v18 }
 0x27d   :  { %v1221_v20 = vld [vmem:[%s9068_s1 + $0x2548] sm:$0xff]  ;;  %2518 = vmatpush.msra.mxu2 %v1157_v19 }
 0x27e   :  { %v993_v21 = vld [vmem:[%s9068_s1 + $0x1e28] sm:$0xff]  ;;  %2538 = vmatpush.msra.mxu3 %v1221_v20 }
 0x27f   :  { %v1089_v22 = vld [vmem:[%s9068_s1 + $0x2128] sm:$0xff]  ;;  %2487 = vmatpush.msra.mxu0 %v993_v21 }
 0x280   :  { %v1153_v9 = vld [vmem:[%s9068_s1 + $0x2328] sm:$0xff]  ;;  %2499 = vmatpush.msra.mxu1 %v1089_v22 }
 0x281   :  { %v1217_v23 = vld [vmem:[%s9068_s1 + $0x2528] sm:$0xff]  ;;  %2519 = vmatpush.msra.mxu2 %v1153_v9 }
 0x282   :  { %v989_v24 = vld [vmem:[%s9068_s1 + $0x1e08] sm:$0xff]  ;;  %2539 = vmatpush.msra.mxu3 %v1217_v23 }
 0x283   :  { %v1085_v25 = vld [vmem:[%s9068_s1 + $0x2108] sm:$0xff]  ;;  %2488 = vmatpush.msra.mxu0 %v989_v24 }
 0x284   :  { %v1149_v26 = vld [vmem:[%s9068_s1 + $0x2308] sm:$0xff]  ;;  %2500 = vmatpush.msra.mxu1 %v1085_v25  ;;  %2489 = vmatmul.f32.vlgmr.msra.gmra.mxu0 %v4600_v47 }
 0x285   :  { %v1213_v29 = vld [vmem:[%s9068_s1 + $0x2508] sm:$0xff]  ;;  %2520 = vmatpush.msra.mxu2 %v1149_v26 }
 0x286   :  { %v1081_v31 = vld [vmem:[%s9068_s1 + $0x20e8] sm:$0xff]  ;;  %2540 = vmatpush.msra.mxu3 %v1213_v29 }
 0x287   :  { %v1305_v32 = vld [vmem:[%s9068_s1 + $0x27e8] sm:$0xff]  ;;  %2501 = vmatpush.msra.mxu1 %v1081_v31 }
 0x288   :  { %v1145_v34 = vld [vmem:[%s9068_s1 + $0x22e8] sm:$0xff]  ;;  %2553 = vmatpush.msrb.mxu0 %v1305_v32 }
 0x289   :  { %v1209_v36 = vld [vmem:[%s9068_s1 + $0x24e8] sm:$0xff]  ;;  %2521 = vmatpush.msra.mxu2 %v1145_v34 }
 0x28a   :  { %v1077_v37 = vld [vmem:[%s9068_s1 + $0x20c8] sm:$0xff]  ;;  %2541 = vmatpush.msra.mxu3 %v1209_v36 }
 0x28b   :  { %v1301_v38 = vld [vmem:[%s9068_s1 + $0x27c8] sm:$0xff]  ;;  %2502 = vmatpush.msra.mxu1 %v1077_v37 }
 0x28c   :  { %v1141_v39 = vld [vmem:[%s9068_s1 + $0x22c8] sm:$0xff]  ;;  %2554 = vmatpush.msrb.mxu0 %v1301_v38 }
 0x28d   :  { %v1205_v40 = vld [vmem:[%s9068_s1 + $0x24c8] sm:$0xff]  ;;  %2522 = vmatpush.msra.mxu2 %v1141_v39 }
 0x28e   :  { %v1073_v41 = vld [vmem:[%s9068_s1 + $0x20a8] sm:$0xff]  ;;  %2542 = vmatpush.msra.mxu3 %v1205_v40 }
 0x28f   :  { %v1297_v45 = vld [vmem:[%s9068_s1 + $0x27a8] sm:$0xff]  ;;  %2503 = vmatpush.msra.mxu1 %v1073_v41 }
 0x290   :  { %v1137_v35 = vld [vmem:[%s9068_s1 + $0x22a8] sm:$0xff]  ;;  %2555 = vmatpush.msrb.mxu0 %v1297_v45 }
 0x291   :  { %v1201_v46 = vld [vmem:[%s9068_s1 + $0x24a8] sm:$0xff]  ;;  %2523 = vmatpush.msra.mxu2 %v1137_v35 }
 0x292   :  { %v1069_v52 = vld [vmem:[%s9068_s1 + $0x2088] sm:$0xff]  ;;  %2543 = vmatpush.msra.mxu3 %v1201_v46 }
 0x293   :  { %v1293_v53 = vld [vmem:[%s9068_s1 + $0x2788] sm:$0xff]  ;;  %2504 = vmatpush.msra.mxu1 %v1069_v52 }
 0x294   :  { %v1133_v54 = vld [vmem:[%s9068_s1 + $0x2288] sm:$0xff]  ;;  %2556 = vmatpush.msrb.mxu0 %v1293_v53 }
 0x295   :  { %v1197_v55 = vld [vmem:[%s9068_s1 + $0x2488] sm:$0xff]  ;;  %2524 = vmatpush.msra.mxu2 %v1133_v54 }
 0x296   :  { %v1065_v56 = vld [vmem:[%s9068_s1 + $0x2068] sm:$0xff]  ;;  %2544 = vmatpush.msra.mxu3 %v1197_v55 }
 0x297   :  { %v1289_v57 = vld [vmem:[%s9068_s1 + $0x2768] sm:$0xff]  ;;  %2505 = vmatpush.msra.mxu1 %v1065_v56 }
 0x298   :  { %v1129_v59 = vld [vmem:[%s9068_s1 + $0x2268] sm:$0xff]  ;;  %2557 = vmatpush.msrb.mxu0 %v1289_v57 }
 0x299   :  { %v1193_v60 = vld [vmem:[%s9068_s1 + $0x2468] sm:$0xff]  ;;  %2525 = vmatpush.msra.mxu2 %v1129_v59 }
 0x29a   :  { %v1061_v61 = vld [vmem:[%s9068_s1 + $0x2048] sm:$0xff]  ;;  %2545 = vmatpush.msra.mxu3 %v1193_v60 }
 0x29b   :  { %v1285_v62 = vld [vmem:[%s9068_s1 + $0x2748] sm:$0xff]  ;;  %2506 = vmatpush.msra.mxu1 %v1061_v61 }
 0x29c   :  { %v1125_v63 = vld [vmem:[%s9068_s1 + $0x2248] sm:$0xff]  ;;  %2558 = vmatpush.msrb.mxu0 %v1285_v62 }
 0x29d   :  { %v1189_v4 = vld [vmem:[%s9068_s1 + $0x2448] sm:$0xff]  ;;  %2526 = vmatpush.msra.mxu2 %v1125_v63 }
 0x29e   :  { %v1057_v5 = vld [vmem:[%s9068_s1 + $0x2028] sm:$0xff]  ;;  %2546 = vmatpush.msra.mxu3 %v1189_v4 }
 0x29f   :  { %v1281_v6 = vld [vmem:[%s9068_s1 + $0x2728] sm:$0xff]  ;;  %2507 = vmatpush.msra.mxu1 %v1057_v5 }
 0x2a0   :  { %v1121_v7 = vld [vmem:[%s9068_s1 + $0x2228] sm:$0xff]  ;;  %2559 = vmatpush.msrb.mxu0 %v1281_v6 }
 0x2a1   :  { %v1185_v8 = vld [vmem:[%s9068_s1 + $0x2428] sm:$0xff]  ;;  %2527 = vmatpush.msra.mxu2 %v1121_v7 }
 0x2a2   :  { %v1053_v12 = vld [vmem:[%s9068_s1 + $0x2008] sm:$0xff]  ;;  %2547 = vmatpush.msra.mxu3 %v1185_v8 }
 0x2a3   :  { %v1277_v58 = vld [vmem:[%s9068_s1 + $0x2708] sm:$0xff]  ;;  %2508 = vmatpush.msra.mxu1 %v1053_v12 }
 0x2a4   :  { %v1117_v13 = vld [vmem:[%s9068_s1 + $0x2208] sm:$0xff]  ;;  %2560 = vmatpush.msrb.mxu0 %v1277_v58  ;;  %2509 = vmatmul.f32.vlgmr.msra.gmra.mxu1 %v4948_v10 }
 0x2a5   :  { %v1181_v15 = vld [vmem:[%s9068_s1 + $0x2408] sm:$0xff]  ;;  %2528 = vmatpush.msra.mxu2 %v1117_v13 }
 0x2a6   :  { %v1273_v18 = vld [vmem:[%s9068_s1 + $0x26e8] sm:$0xff]  ;;  %2548 = vmatpush.msra.mxu3 %v1181_v15  ;;  %2529 = vmatmul.f32.vlgmr.msra.gmra.mxu2 %v4966_v16 }
 0x2a7   :  { %v1369_v19 = vld [vmem:[%s9068_s1 + $0x29e8] sm:$0xff]  ;;  %2561 = vmatpush.msrb.mxu0 %v1273_v18  ;;  %2549 = vmatmul.f32.vlgmr.msra.gmra.mxu3 %v4950_v11 }
 0x2a8   :  { %v1433_v20 = vld [vmem:[%s9068_s1 + $0x2be8] sm:$0xff]  ;;  %2573 = vmatpush.msrb.mxu1 %v1369_v19 }
 0x2a9   :  { %v1497_v21 = vld [vmem:[%s9068_s1 + $0x2de8] sm:$0xff]  ;;  %2593 = vmatpush.msrb.mxu2 %v1433_v20 }
 0x2aa   :  { %v1269_v22 = vld [vmem:[%s9068_s1 + $0x26c8] sm:$0xff]  ;;  %2613 = vmatpush.msrb.mxu3 %v1497_v21 }
 0x2ab   :  { %v1365_v9 = vld [vmem:[%s9068_s1 + $0x29c8] sm:$0xff]  ;;  %2562 = vmatpush.msrb.mxu0 %v1269_v22 }
 0x2ac   :  { %v1429_v23 = vld [vmem:[%s9068_s1 + $0x2bc8] sm:$0xff]  ;;  %2574 = vmatpush.msrb.mxu1 %v1365_v9 }
 0x2ad   :  { %v1493_v24 = vld [vmem:[%s9068_s1 + $0x2dc8] sm:$0xff]  ;;  %2594 = vmatpush.msrb.mxu2 %v1429_v23 }
 0x2ae   :  { %v1265_v25 = vld [vmem:[%s9068_s1 + $0x26a8] sm:$0xff]  ;;  %2614 = vmatpush.msrb.mxu3 %v1493_v24 }
 0x2af   :  { %v1361_v26 = vld [vmem:[%s9068_s1 + $0x29a8] sm:$0xff]  ;;  %2563 = vmatpush.msrb.mxu0 %v1265_v25 }
 0x2b0   :  { %v1425_v29 = vld [vmem:[%s9068_s1 + $0x2ba8] sm:$0xff]  ;;  %2575 = vmatpush.msrb.mxu1 %v1361_v26 }
 0x2b1   :  { %v1489_v31 = vld [vmem:[%s9068_s1 + $0x2da8] sm:$0xff]  ;;  %2595 = vmatpush.msrb.mxu2 %v1425_v29 }
 0x2b2   :  { %v1261_v32 = vld [vmem:[%s9068_s1 + $0x2688] sm:$0xff]  ;;  %2615 = vmatpush.msrb.mxu3 %v1489_v31 }
 0x2b3   :  { %v1357_v34 = vld [vmem:[%s9068_s1 + $0x2988] sm:$0xff]  ;;  %2564 = vmatpush.msrb.mxu0 %v1261_v32 }
 0x2b4   :  { %v1421_v36 = vld [vmem:[%s9068_s1 + $0x2b88] sm:$0xff]  ;;  %2576 = vmatpush.msrb.mxu1 %v1357_v34 }
 0x2b5   :  { %v1485_v37 = vld [vmem:[%s9068_s1 + $0x2d88] sm:$0xff]  ;;  %2596 = vmatpush.msrb.mxu2 %v1421_v36 }
 0x2b6   :  { %v1257_v38 = vld [vmem:[%s9068_s1 + $0x2668] sm:$0xff]  ;;  %2616 = vmatpush.msrb.mxu3 %v1485_v37 }
 0x2b7   :  { %v1353_v39 = vld [vmem:[%s9068_s1 + $0x2968] sm:$0xff]  ;;  %2565 = vmatpush.msrb.mxu0 %v1257_v38 }
 0x2b8   :  { %v1417_v40 = vld [vmem:[%s9068_s1 + $0x2b68] sm:$0xff]  ;;  %2577 = vmatpush.msrb.mxu1 %v1353_v39 }
 0x2b9   :  { %v1481_v41 = vld [vmem:[%s9068_s1 + $0x2d68] sm:$0xff]  ;;  %2597 = vmatpush.msrb.mxu2 %v1417_v40 }
 0x2ba   :  { %v1253_v45 = vld [vmem:[%s9068_s1 + $0x2648] sm:$0xff]  ;;  %2617 = vmatpush.msrb.mxu3 %v1481_v41 }
 0x2bb   :  { %v1349_v35 = vld [vmem:[%s9068_s1 + $0x2948] sm:$0xff]  ;;  %2566 = vmatpush.msrb.mxu0 %v1253_v45 }
 0x2bc   :  { %v1413_v46 = vld [vmem:[%s9068_s1 + $0x2b48] sm:$0xff]  ;;  %2578 = vmatpush.msrb.mxu1 %v1349_v35 }
 0x2bd   :  { %v1477_v52 = vld [vmem:[%s9068_s1 + $0x2d48] sm:$0xff]  ;;  %2598 = vmatpush.msrb.mxu2 %v1413_v46 }
 0x2be   :  { %v1249_v53 = vld [vmem:[%s9068_s1 + $0x2628] sm:$0xff]  ;;  %2618 = vmatpush.msrb.mxu3 %v1477_v52  ;;  %v90_v52 = vld [vmem:[%s9068_s1 + $0x1f0] sm:$0xff] }
 0x2bf   :  { %v1345_v54 = vld [vmem:[%s9068_s1 + $0x2928] sm:$0xff]  ;;  %2567 = vmatpush.msrb.mxu0 %v1249_v53  ;;  %v3849_v53 = vld.sshfl [vmem:[#allocation1 + $0x20] sm:$0xff pattern:$0x73625140] }
 0x2c0   :  { %v1409_v55 = vld [vmem:[%s9068_s1 + $0x2b28] sm:$0xff]  ;;  %2579 = vmatpush.msrb.mxu1 %v1345_v54  ;;  %v154_v54 = vld [vmem:[%s9068_s1 + $0x3f0] sm:$0xff] }
 0x2c1   :  { %v1473_v56 = vld [vmem:[%s9068_s1 + $0x2d28] sm:$0xff]  ;;  %2599 = vmatpush.msrb.mxu2 %v1409_v55 }
 0x2c2   :  { %v1245_v57 = vld [vmem:[%s9068_s1 + $0x2608] sm:$0xff]  ;;  %2619 = vmatpush.msrb.mxu3 %v1473_v56 }
 0x2c3   :  { %v1341_v59 = vld [vmem:[%s9068_s1 + $0x2908] sm:$0xff]  ;;  %2568 = vmatpush.msrb.mxu0 %v1245_v57 }
 0x2c4   :  { %v1405_v60 = vld [vmem:[%s9068_s1 + $0x2b08] sm:$0xff]  ;;  %2580 = vmatpush.msrb.mxu1 %v1341_v59  ;;  %2569 = vmatmul.f32.vlgmr.msrb.gmra.mxu0 %v4968_v17  ;;  %v86_v59 = vld [vmem:[%s9068_s1 + $0x1d0] sm:$0xff] }
 0x2c5   :  { %v1469_v61 = vld [vmem:[%s9068_s1 + $0x2d08] sm:$0xff]  ;;  %2600 = vmatpush.msrb.mxu2 %v1405_v60  ;;  %v150_v60 = vld [vmem:[%s9068_s1 + $0x3d0] sm:$0xff] }
 0x2c6   :  { %v1337_v62 = vld [vmem:[%s9068_s1 + $0x28e8] sm:$0xff]  ;;  %2620 = vmatpush.msrb.mxu3 %v1469_v61 }
 0x2c7   :  { %v1561_v63 = vld [vmem:[%s9068_s1 + $0x2fe8] sm:$0xff]  ;;  %2581 = vmatpush.msrb.mxu1 %v1337_v62 }
 0x2c8   :  { %v1401_v4 = vld [vmem:[%s9068_s1 + $0x2ae8] sm:$0xff]  ;;  %2633 = vmatpush.msra.mxu0 %v1561_v63  ;;  %v3851_v63 = vld.sshfl [vmem:[#allocation1 + $0x30] sm:$0xff pattern:$0x73625140] }
 0x2c9   :  { %v1465_v5 = vld [vmem:[%s9068_s1 + $0x2ce8] sm:$0xff]  ;;  %2601 = vmatpush.msrb.mxu2 %v1401_v4  ;;  %v82_v4 = vld [vmem:[%s9068_s1 + $0x1b0] sm:$0xff] }
 0x2ca   :  { %v1333_v6 = vld [vmem:[%s9068_s1 + $0x28c8] sm:$0xff]  ;;  %2621 = vmatpush.msrb.mxu3 %v1465_v5  ;;  %v146_v5 = vld [vmem:[%s9068_s1 + $0x3b0] sm:$0xff] }
 0x2cb   :  { %v1557_v7 = vld [vmem:[%s9068_s1 + $0x2fc8] sm:$0xff]  ;;  %2582 = vmatpush.msrb.mxu1 %v1333_v6 }
 0x2cc   :  { %v1397_v8 = vld [vmem:[%s9068_s1 + $0x2ac8] sm:$0xff]  ;;  %2634 = vmatpush.msra.mxu0 %v1557_v7 }
 0x2cd   :  { %v1461_v12 = vld [vmem:[%s9068_s1 + $0x2cc8] sm:$0xff]  ;;  %2602 = vmatpush.msrb.mxu2 %v1397_v8  ;;  %v78_v8 = vld [vmem:[%s9068_s1 + $0x190] sm:$0xff] }
 0x2ce   :  { %v1329_v58 = vld [vmem:[%s9068_s1 + $0x28a8] sm:$0xff]  ;;  %2622 = vmatpush.msrb.mxu3 %v1461_v12  ;;  %v142_v12 = vld [vmem:[%s9068_s1 + $0x390] sm:$0xff] }
 0x2cf   :  { %v1553_v13 = vld [vmem:[%s9068_s1 + $0x2fa8] sm:$0xff]  ;;  %2583 = vmatpush.msrb.mxu1 %v1329_v58 }
 0x2d0   :  { %v1393_v15 = vld [vmem:[%s9068_s1 + $0x2aa8] sm:$0xff]  ;;  %2635 = vmatpush.msra.mxu0 %v1553_v13 }
 0x2d1   :  { %v1457_v18 = vld [vmem:[%s9068_s1 + $0x2ca8] sm:$0xff]  ;;  %2603 = vmatpush.msrb.mxu2 %v1393_v15  ;;  %v74_v15 = vld [vmem:[%s9068_s1 + $0x170] sm:$0xff] }
 0x2d2   :  { %v1325_v19 = vld [vmem:[%s9068_s1 + $0x2888] sm:$0xff]  ;;  %2623 = vmatpush.msrb.mxu3 %v1457_v18  ;;  %v138_v18 = vld [vmem:[%s9068_s1 + $0x370] sm:$0xff] }
 0x2d3   :  { %v1549_v20 = vld [vmem:[%s9068_s1 + $0x2f88] sm:$0xff]  ;;  %2584 = vmatpush.msrb.mxu1 %v1325_v19 }
 0x2d4   :  { %v1389_v21 = vld [vmem:[%s9068_s1 + $0x2a88] sm:$0xff]  ;;  %2636 = vmatpush.msra.mxu0 %v1549_v20 }
 0x2d5   :  { %v1453_v22 = vld [vmem:[%s9068_s1 + $0x2c88] sm:$0xff]  ;;  %2604 = vmatpush.msrb.mxu2 %v1389_v21  ;;  %v70_v21 = vld [vmem:[%s9068_s1 + $0x150] sm:$0xff] }
 0x2d6   :  { %v1321_v9 = vld [vmem:[%s9068_s1 + $0x2868] sm:$0xff]  ;;  %2624 = vmatpush.msrb.mxu3 %v1453_v22  ;;  %v134_v22 = vld [vmem:[%s9068_s1 + $0x350] sm:$0xff] }
 0x2d7   :  { %v1545_v23 = vld [vmem:[%s9068_s1 + $0x2f68] sm:$0xff]  ;;  %2585 = vmatpush.msrb.mxu1 %v1321_v9 }
 0x2d8   :  { %v1385_v24 = vld [vmem:[%s9068_s1 + $0x2a68] sm:$0xff]  ;;  %2637 = vmatpush.msra.mxu0 %v1545_v23 }
 0x2d9   :  { %v1449_v25 = vld [vmem:[%s9068_s1 + $0x2c68] sm:$0xff]  ;;  %2605 = vmatpush.msrb.mxu2 %v1385_v24  ;;  %v66_v24 = vld [vmem:[%s9068_s1 + $0x130] sm:$0xff] }
 0x2da   :  { %v1317_v26 = vld [vmem:[%s9068_s1 + $0x2848] sm:$0xff]  ;;  %2625 = vmatpush.msrb.mxu3 %v1449_v25  ;;  %v130_v25 = vld [vmem:[%s9068_s1 + $0x330] sm:$0xff] }
 0x2db   :  { %v1541_v29 = vld [vmem:[%s9068_s1 + $0x2f48] sm:$0xff]  ;;  %2586 = vmatpush.msrb.mxu1 %v1317_v26 }
 0x2dc   :  { %v1381_v31 = vld [vmem:[%s9068_s1 + $0x2a48] sm:$0xff]  ;;  %2638 = vmatpush.msra.mxu0 %v1541_v29 }
 0x2dd   :  { %v1445_v32 = vld [vmem:[%s9068_s1 + $0x2c48] sm:$0xff]  ;;  %2606 = vmatpush.msrb.mxu2 %v1381_v31  ;;  %v62_v31 = vld [vmem:[%s9068_s1 + $0x110] sm:$0xff] }
 0x2de   :  { %v1313_v34 = vld [vmem:[%s9068_s1 + $0x2828] sm:$0xff]  ;;  %2626 = vmatpush.msrb.mxu3 %v1445_v32  ;;  %v126_v32 = vld [vmem:[%s9068_s1 + $0x310] sm:$0xff] }
 0x2df   :  { %v1537_v36 = vld [vmem:[%s9068_s1 + $0x2f28] sm:$0xff]  ;;  %2587 = vmatpush.msrb.mxu1 %v1313_v34  ;;  %v282_v34 = vld [vmem:[%s9068_s1 + $0x7f0] sm:$0xff] }
 0x2e0   :  { %v1377_v37 = vld [vmem:[%s9068_s1 + $0x2a28] sm:$0xff]  ;;  %2639 = vmatpush.msra.mxu0 %v1537_v36  ;;  %v218_v36 = vld [vmem:[%s9068_s1 + $0x5f0] sm:$0xff] }
 0x2e1   :  { %v1441_v38 = vld [vmem:[%s9068_s1 + $0x2c28] sm:$0xff]  ;;  %2607 = vmatpush.msrb.mxu2 %v1377_v37  ;;  %v58_v37 = vld [vmem:[%s9068_s1 + $0xf0] sm:$0xff] }
 0x2e2   :  { %v1309_v39 = vld [vmem:[%s9068_s1 + $0x2808] sm:$0xff]  ;;  %2627 = vmatpush.msrb.mxu3 %v1441_v38  ;;  %v122_v38 = vld [vmem:[%s9068_s1 + $0x2f0] sm:$0xff] }
 0x2e3   :  { %v1533_v40 = vld [vmem:[%s9068_s1 + $0x2f08] sm:$0xff]  ;;  %2588 = vmatpush.msrb.mxu1 %v1309_v39  ;;  %v3852_v39 = vld.sshfl [vmem:[#allocation1 + $0x38] sm:$0xff pattern:$0x73625140] }
 0x2e4   :  { %v1373_v41 = vld [vmem:[%s9068_s1 + $0x2a08] sm:$0xff]  ;;  %2640 = vmatpush.msra.mxu0 %v1533_v40  ;;  %2589 = vmatmul.f32.vlgmr.msrb.gmra.mxu1 %v3849_v53  ;;  %v214_v40 = vld [vmem:[%s9068_s1 + $0x5d0] sm:$0xff] }
 0x2e5   :  { %v1437_v45 = vld [vmem:[%s9068_s1 + $0x2c08] sm:$0xff]  ;;  %2608 = vmatpush.msrb.mxu2 %v1373_v41  ;;  %v278_v41 = vld [vmem:[%s9068_s1 + $0x7d0] sm:$0xff] }
 0x2e6   :  { %v1529_v35 = vld [vmem:[%s9068_s1 + $0x2ee8] sm:$0xff]  ;;  %2628 = vmatpush.msrb.mxu3 %v1437_v45  ;;  %v54_v45 = vld [vmem:[%s9068_s1 + $0xd0] sm:$0xff] }
 0x2e7   :  { %v1593_v46 = vld [vmem:[%s9068_s1 + $0x30e8] sm:$0xff]  ;;  %2641 = vmatpush.msra.mxu0 %v1529_v35  ;;  %2673 = vmatpush.msra.mxu2 %v90_v52  ;;  %v118_v35 = vld [vmem:[%s9068_s1 + $0x2d0] sm:$0xff] }
 0x2e8   :  { %v1525_v55 = vld [vmem:[%s9068_s1 + $0x2ec8] sm:$0xff]  ;;  %2661 = vmatpush.msra.mxu1 %v1593_v46  ;;  %2693 = vmatpush.msra.mxu3 %v154_v54  ;;  %v3853_v46 = vld.sshfl [vmem:[#allocation1] sm:$0xff pattern:$0x73625140]  ;;  %v210_v52 = vld [vmem:[%s9068_s1 + $0x5b0] sm:$0xff] }
 0x2e9   :  { %v3850_v56 = vld.sshfl [vmem:[#allocation1 + $0x28] sm:$0xff pattern:$0x73625140]  ;;  %2642 = vmatpush.msra.mxu0 %v1525_v55  ;;  %2629 = vmatmul.f32.vlgmr.msrb.gmra.mxu3 %v3851_v63  ;;  %v274_v53 = vld [vmem:[%s9068_s1 + $0x7b0] sm:$0xff] }
 0x2ea   :  { %2609 = vmatmul.f32.vlgmr.msrb.gmra.mxu2 %v3850_v56  ;;  %v1589_v57 = vld [vmem:[%s9068_s1 + $0x30c8] sm:$0xff]  ;;  %2694 = vmatpush.msra.mxu3 %v150_v60  ;;  %v50_v54 = vld [vmem:[%s9068_s1 + $0xb0] sm:$0xff] }
 0x2eb   :  { %v1521_v61 = vld [vmem:[%s9068_s1 + $0x2ea8] sm:$0xff]  ;;  %2662 = vmatpush.msra.mxu1 %v1589_v57  ;;  %2674 = vmatpush.msra.mxu2 %v86_v59  ;;  %v114_v55 = vld [vmem:[%s9068_s1 + $0x2b0] sm:$0xff] }
 0x2ec   :  { %v1585_v62 = vld [vmem:[%s9068_s1 + $0x30a8] sm:$0xff]  ;;  %2643 = vmatpush.msra.mxu0 %v1521_v61  ;;  %2695 = vmatpush.msra.mxu3 %v146_v5  ;;  %v206_v56 = vld [vmem:[%s9068_s1 + $0x590] sm:$0xff] }
 0x2ed   :  { %v1517_v6 = vld [vmem:[%s9068_s1 + $0x2e88] sm:$0xff]  ;;  %2663 = vmatpush.msra.mxu1 %v1585_v62  ;;  %2675 = vmatpush.msra.mxu2 %v82_v4  ;;  %v270_v57 = vld [vmem:[%s9068_s1 + $0x790] sm:$0xff] }
 0x2ee   :  { %v1581_v7 = vld [vmem:[%s9068_s1 + $0x3088] sm:$0xff]  ;;  %2644 = vmatpush.msra.mxu0 %v1517_v6  ;;  %2696 = vmatpush.msra.mxu3 %v142_v12  ;;  %v46_v59 = vld [vmem:[%s9068_s1 + $0x90] sm:$0xff] }
 0x2ef   :  { %v1513_v58 = vld [vmem:[%s9068_s1 + $0x2e68] sm:$0xff]  ;;  %2664 = vmatpush.msra.mxu1 %v1581_v7  ;;  %2676 = vmatpush.msra.mxu2 %v78_v8  ;;  %v110_v60 = vld [vmem:[%s9068_s1 + $0x290] sm:$0xff] }
 0x2f0   :  { %v1577_v13 = vld [vmem:[%s9068_s1 + $0x3068] sm:$0xff]  ;;  %2645 = vmatpush.msra.mxu0 %v1513_v58  ;;  %2697 = vmatpush.msra.mxu3 %v138_v18  ;;  %v202_v61 = vld [vmem:[%s9068_s1 + $0x570] sm:$0xff] }
 0x2f1   :  { %v1509_v19 = vld [vmem:[%s9068_s1 + $0x2e48] sm:$0xff]  ;;  %2665 = vmatpush.msra.mxu1 %v1577_v13  ;;  %2677 = vmatpush.msra.mxu2 %v74_v15  ;;  %v266_v62 = vld [vmem:[%s9068_s1 + $0x770] sm:$0xff] }
 0x2f2   :  { %v1573_v20 = vld [vmem:[%s9068_s1 + $0x3048] sm:$0xff]  ;;  %2646 = vmatpush.msra.mxu0 %v1509_v19  ;;  %2698 = vmatpush.msra.mxu3 %v134_v22  ;;  %v42_v63 = vld [vmem:[%s9068_s1 + $0x70] sm:$0xff] }
 0x2f3   :  { %v1505_v9 = vld [vmem:[%s9068_s1 + $0x2e28] sm:$0xff]  ;;  %2666 = vmatpush.msra.mxu1 %v1573_v20  ;;  %2678 = vmatpush.msra.mxu2 %v70_v21  ;;  %v106_v4 = vld [vmem:[%s9068_s1 + $0x270] sm:$0xff] }
 0x2f4   :  { %v1569_v23 = vld [vmem:[%s9068_s1 + $0x3028] sm:$0xff]  ;;  %2647 = vmatpush.msra.mxu0 %v1505_v9  ;;  %2699 = vmatpush.msra.mxu3 %v130_v25  ;;  %v198_v5 = vld [vmem:[%s9068_s1 + $0x550] sm:$0xff] }
 0x2f5   :  { %v1501_v26 = vld [vmem:[%s9068_s1 + $0x2e08] sm:$0xff]  ;;  %2667 = vmatpush.msra.mxu1 %v1569_v23  ;;  %2679 = vmatpush.msra.mxu2 %v66_v24  ;;  %v262_v6 = vld [vmem:[%s9068_s1 + $0x750] sm:$0xff] }
 0x2f6   :  { %v1565_v29 = vld [vmem:[%s9068_s1 + $0x3008] sm:$0xff]  ;;  %2648 = vmatpush.msra.mxu0 %v1501_v26  ;;  %2700 = vmatpush.msra.mxu3 %v126_v32  ;;  %v38_v7 = vld [vmem:[%s9068_s1 + $0x50] sm:$0xff] }
 0x2f7   :  { %2668 = vmatpush.msra.mxu1 %v1565_v29  ;;  %2680 = vmatpush.msra.mxu2 %v62_v31  ;;  %v102_v8 = vld [vmem:[%s9068_s1 + $0x250] sm:$0xff] }
 0x2f8   :  { %2649 = vmatmul.f32.vlgmr.msra.gmra.mxu0 %v3852_v39  ;;  %2701 = vmatpush.msra.mxu3 %v122_v38  ;;  %v194_v12 = vld [vmem:[%s9068_s1 + $0x530] sm:$0xff] }
 0x2f9   :  { %2733 = vmatpush.msrb.mxu1 %v282_v34  ;;  %2713 = vmatpush.msrb.mxu0 %v218_v36  ;;  %v258_v58 = vld [vmem:[%s9068_s1 + $0x730] sm:$0xff] }
 0x2fa   :  { %2681 = vmatpush.msra.mxu2 %v58_v37  ;;  %3844 = vmatmul.msk.f32.vlgmr.msra.gmra.mxu1 %vm1670_vm0, %v3853_v46  ;;  %v34_v13 = vld [vmem:[%s9068_s1 + $0x30] sm:$0xff] }
 0x2fb   :  { %2714 = vmatpush.msrb.mxu0 %v214_v40  ;;  %2734 = vmatpush.msrb.mxu1 %v278_v41  ;;  %v98_v15 = vld [vmem:[%s9068_s1 + $0x230] sm:$0xff] }
 0x2fc   :  { %2682 = vmatpush.msra.mxu2 %v54_v45  ;;  %2702 = vmatpush.msra.mxu3 %v118_v35  ;;  %v190_v18 = vld [vmem:[%s9068_s1 + $0x510] sm:$0xff] }
 0x2fd   :  { %2715 = vmatpush.msrb.mxu0 %v210_v52  ;;  %2735 = vmatpush.msrb.mxu1 %v274_v53  ;;  %v254_v19 = vld [vmem:[%s9068_s1 + $0x710] sm:$0xff] }
 0x2fe   :  { %2683 = vmatpush.msra.mxu2 %v50_v54  ;;  %2703 = vmatpush.msra.mxu3 %v114_v55  ;;  %v30_v20 = vld [vmem:[%s9068_s1 + $0x10] sm:$0xff] }
 0x2ff   :  { %2716 = vmatpush.msrb.mxu0 %v206_v56  ;;  %2736 = vmatpush.msrb.mxu1 %v270_v57  ;;  %v94_v21 = vld [vmem:[%s9068_s1 + $0x210] sm:$0xff] }
 0x300   :  { %2684 = vmatpush.msra.mxu2 %v46_v59  ;;  %2704 = vmatpush.msra.mxu3 %v110_v60  ;;  %v186_v22 = vld [vmem:[%s9068_s1 + $0x4f0] sm:$0xff] }
 0x301   :  { %2717 = vmatpush.msrb.mxu0 %v202_v61  ;;  %2737 = vmatpush.msrb.mxu1 %v266_v62  ;;  %v250_v9 = vld [vmem:[%s9068_s1 + $0x6f0] sm:$0xff] }
 0x302   :  { %2685 = vmatpush.msra.mxu2 %v42_v63  ;;  %2705 = vmatpush.msra.mxu3 %v106_v4  ;;  %v346_v23 = vld [vmem:[%s9068_s1 + $0x9f0] sm:$0xff] }
 0x303   :  { %2718 = vmatpush.msrb.mxu0 %v198_v5  ;;  %2738 = vmatpush.msrb.mxu1 %v262_v6  ;;  %v410_v24 = vld [vmem:[%s9068_s1 + $0xbf0] sm:$0xff] }
 0x304   :  { %2686 = vmatpush.msra.mxu2 %v38_v7  ;;  %2706 = vmatpush.msra.mxu3 %v102_v8  ;;  %v182_v25 = vld [vmem:[%s9068_s1 + $0x4d0] sm:$0xff] }
 0x305   :  { %2719 = vmatpush.msrb.mxu0 %v194_v12  ;;  %2739 = vmatpush.msrb.mxu1 %v258_v58  ;;  %v246_v26 = vld [vmem:[%s9068_s1 + $0x6d0] sm:$0xff] }
 0x306   :  { %2687 = vmatpush.msra.mxu2 %v34_v13  ;;  %2707 = vmatpush.msra.mxu3 %v98_v15  ;;  %v342_v29 = vld [vmem:[%s9068_s1 + $0x9d0] sm:$0xff] }
 0x307   :  { %2720 = vmatpush.msrb.mxu0 %v190_v18  ;;  %2740 = vmatpush.msrb.mxu1 %v254_v19  ;;  %v406_v31 = vld [vmem:[%s9068_s1 + $0xbd0] sm:$0xff] }
 0x308   :  { %2688 = vmatpush.msra.mxu2 %v30_v20  ;;  %2708 = vmatpush.msra.mxu3 %v94_v21  ;;  %v178_v32 = vld [vmem:[%s9068_s1 + $0x4b0] sm:$0xff] }
 0x309   :  { %2721 = vmatpush.msrb.mxu0 %v186_v22  ;;  %2741 = vmatpush.msrb.mxu1 %v250_v9  ;;  %v242_v34 = vld [vmem:[%s9068_s1 + $0x6b0] sm:$0xff] }
 0x30a   :  { %2753 = vmatpush.msrb.mxu2 %v346_v23  ;;  %2773 = vmatpush.msrb.mxu3 %v410_v24  ;;  %v338_v36 = vld [vmem:[%s9068_s1 + $0x9b0] sm:$0xff] }
 0x30b   :  { %2722 = vmatpush.msrb.mxu0 %v182_v25  ;;  %2742 = vmatpush.msrb.mxu1 %v246_v26  ;;  %v402_v37 = vld [vmem:[%s9068_s1 + $0xbb0] sm:$0xff] }
 0x30c   :  { %2754 = vmatpush.msrb.mxu2 %v342_v29  ;;  %2774 = vmatpush.msrb.mxu3 %v406_v31  ;;  %v174_v38 = vld [vmem:[%s9068_s1 + $0x490] sm:$0xff] }
 0x30d   :  { %v238_v39 = vld [vmem:[%s9068_s1 + $0x690] sm:$0xff]  ;;  %2723 = vmatpush.msrb.mxu0 %v178_v32  ;;  %2743 = vmatpush.msrb.mxu1 %v242_v34 }
 0x30e   :  { %v334_v40 = vld [vmem:[%s9068_s1 + $0x990] sm:$0xff]  ;;  %2755 = vmatpush.msrb.mxu2 %v338_v36  ;;  %2775 = vmatpush.msrb.mxu3 %v402_v37 }
 0x30f   :  { %v398_v41 = vld [vmem:[%s9068_s1 + $0xb90] sm:$0xff]  ;;  %2724 = vmatpush.msrb.mxu0 %v174_v38  ;;  %2744 = vmatpush.msrb.mxu1 %v238_v39 }
 0x310   :  { %v170_v45 = vld [vmem:[%s9068_s1 + $0x470] sm:$0xff]  ;;  %2756 = vmatpush.msrb.mxu2 %v334_v40  ;;  %2776 = vmatpush.msrb.mxu3 %v398_v41 }
 0x311   :  { %v234_v35 = vld [vmem:[%s9068_s1 + $0x670] sm:$0xff]  ;;  %2725 = vmatpush.msrb.mxu0 %v170_v45  ;;  %2689 = vmatmul.f32.vlgmr.msra.gmra.mxu2 %v4258_v48 }
 0x312   :  { %v330_v46 = vld [vmem:[%s9068_s1 + $0x970] sm:$0xff]  ;;  %2745 = vmatpush.msrb.mxu1 %v234_v35  ;;  %2709 = vmatmul.f32.vlgmr.msra.gmra.mxu3 %v4260_v49 }
 0x313   :  { %v394_v52 = vld [vmem:[%s9068_s1 + $0xb70] sm:$0xff]  ;;  %2757 = vmatpush.msrb.mxu2 %v330_v46 }
 0x314   :  { %v166_v53 = vld [vmem:[%s9068_s1 + $0x450] sm:$0xff]  ;;  %2777 = vmatpush.msrb.mxu3 %v394_v52 }
 0x315   :  { %v230_v54 = vld [vmem:[%s9068_s1 + $0x650] sm:$0xff]  ;;  %2726 = vmatpush.msrb.mxu0 %v166_v53 }
 0x316   :  { %v326_v55 = vld [vmem:[%s9068_s1 + $0x950] sm:$0xff]  ;;  %2746 = vmatpush.msrb.mxu1 %v230_v54 }
 0x317   :  { %v390_v56 = vld [vmem:[%s9068_s1 + $0xb50] sm:$0xff]  ;;  %2758 = vmatpush.msrb.mxu2 %v326_v55 }
 0x318   :  { %v162_v57 = vld [vmem:[%s9068_s1 + $0x430] sm:$0xff]  ;;  %2778 = vmatpush.msrb.mxu3 %v390_v56 }
 0x319   :  { %v226_v59 = vld [vmem:[%s9068_s1 + $0x630] sm:$0xff]  ;;  %2727 = vmatpush.msrb.mxu0 %v162_v57 }
 0x31a   :  { %v322_v60 = vld [vmem:[%s9068_s1 + $0x930] sm:$0xff]  ;;  %2747 = vmatpush.msrb.mxu1 %v226_v59 }
 0x31b   :  { %v386_v61 = vld [vmem:[%s9068_s1 + $0xb30] sm:$0xff]  ;;  %2759 = vmatpush.msrb.mxu2 %v322_v60 }
 0x31c   :  { %v158_v62 = vld [vmem:[%s9068_s1 + $0x410] sm:$0xff]  ;;  %2779 = vmatpush.msrb.mxu3 %v386_v61 }
 0x31d   :  { %v222_v63 = vld [vmem:[%s9068_s1 + $0x610] sm:$0xff]  ;;  %2728 = vmatpush.msrb.mxu0 %v158_v62 }
 0x31e   :  { %v318_v4 = vld [vmem:[%s9068_s1 + $0x910] sm:$0xff]  ;;  %2748 = vmatpush.msrb.mxu1 %v222_v63  ;;  %2729 = vmatmul.f32.vlgmr.msrb.gmra.mxu0 %v4262_v50 }
 0x31f   :  { %v382_v5 = vld [vmem:[%s9068_s1 + $0xb10] sm:$0xff]  ;;  %2760 = vmatpush.msrb.mxu2 %v318_v4  ;;  %2749 = vmatmul.f32.vlgmr.msrb.gmra.mxu1 %v4264_v51 }
 0x320   :  { %v474_v6 = vld [vmem:[%s9068_s1 + $0xdf0] sm:$0xff]  ;;  %2780 = vmatpush.msrb.mxu3 %v382_v5 }
 0x321   :  { %v538_v7 = vld [vmem:[%s9068_s1 + $0xff0] sm:$0xff]  ;;  %2793 = vmatpush.msra.mxu0 %v474_v6 }
 0x322   :  { %v314_v8 = vld [vmem:[%s9068_s1 + $0x8f0] sm:$0xff]  ;;  %2813 = vmatpush.msra.mxu1 %v538_v7 }
 0x323   :  { %v378_v12 = vld [vmem:[%s9068_s1 + $0xaf0] sm:$0xff]  ;;  %2761 = vmatpush.msrb.mxu2 %v314_v8 }
 0x324   :  { %v470_v58 = vld [vmem:[%s9068_s1 + $0xdd0] sm:$0xff]  ;;  %2781 = vmatpush.msrb.mxu3 %v378_v12 }
 0x325   :  { %v534_v13 = vld [vmem:[%s9068_s1 + $0xfd0] sm:$0xff]  ;;  %2794 = vmatpush.msra.mxu0 %v470_v58 }
 0x326   :  { %v310_v15 = vld [vmem:[%s9068_s1 + $0x8d0] sm:$0xff]  ;;  %2814 = vmatpush.msra.mxu1 %v534_v13 }
 0x327   :  { %v374_v18 = vld [vmem:[%s9068_s1 + $0xad0] sm:$0xff]  ;;  %2762 = vmatpush.msrb.mxu2 %v310_v15 }
 0x328   :  { %v466_v19 = vld [vmem:[%s9068_s1 + $0xdb0] sm:$0xff]  ;;  %2782 = vmatpush.msrb.mxu3 %v374_v18 }
 0x329   :  { %v530_v20 = vld [vmem:[%s9068_s1 + $0xfb0] sm:$0xff]  ;;  %2795 = vmatpush.msra.mxu0 %v466_v19 }
 0x32a   :  { %v306_v21 = vld [vmem:[%s9068_s1 + $0x8b0] sm:$0xff]  ;;  %2815 = vmatpush.msra.mxu1 %v530_v20 }
 0x32b   :  { %v370_v22 = vld [vmem:[%s9068_s1 + $0xab0] sm:$0xff]  ;;  %2763 = vmatpush.msrb.mxu2 %v306_v21 }
 0x32c   :  { %v462_v9 = vld [vmem:[%s9068_s1 + $0xd90] sm:$0xff]  ;;  %2783 = vmatpush.msrb.mxu3 %v370_v22 }
 0x32d   :  { %v526_v23 = vld [vmem:[%s9068_s1 + $0xf90] sm:$0xff]  ;;  %2796 = vmatpush.msra.mxu0 %v462_v9 }
 0x32e   :  { %v302_v24 = vld [vmem:[%s9068_s1 + $0x890] sm:$0xff]  ;;  %2816 = vmatpush.msra.mxu1 %v526_v23 }
 0x32f   :  { %v366_v25 = vld [vmem:[%s9068_s1 + $0xa90] sm:$0xff]  ;;  %2764 = vmatpush.msrb.mxu2 %v302_v24 }
 0x330   :  { %v458_v26 = vld [vmem:[%s9068_s1 + $0xd70] sm:$0xff]  ;;  %2784 = vmatpush.msrb.mxu3 %v366_v25 }
 0x331   :  { %v522_v29 = vld [vmem:[%s9068_s1 + $0xf70] sm:$0xff]  ;;  %2797 = vmatpush.msra.mxu0 %v458_v26 }
 0x332   :  { %v298_v31 = vld [vmem:[%s9068_s1 + $0x870] sm:$0xff]  ;;  %2817 = vmatpush.msra.mxu1 %v522_v29 }
 0x333   :  { %v362_v32 = vld [vmem:[%s9068_s1 + $0xa70] sm:$0xff]  ;;  %2765 = vmatpush.msrb.mxu2 %v298_v31 }
 0x334   :  { %v454_v34 = vld [vmem:[%s9068_s1 + $0xd50] sm:$0xff]  ;;  %2785 = vmatpush.msrb.mxu3 %v362_v32 }
 0x335   :  { %v518_v36 = vld [vmem:[%s9068_s1 + $0xf50] sm:$0xff]  ;;  %2798 = vmatpush.msra.mxu0 %v454_v34 }
 0x336   :  { %v294_v37 = vld [vmem:[%s9068_s1 + $0x850] sm:$0xff]  ;;  %2818 = vmatpush.msra.mxu1 %v518_v36 }
 0x337   :  { %v358_v38 = vld [vmem:[%s9068_s1 + $0xa50] sm:$0xff]  ;;  %2766 = vmatpush.msrb.mxu2 %v294_v37 }
 0x338   :  { %v450_v39 = vld [vmem:[%s9068_s1 + $0xd30] sm:$0xff]  ;;  %2786 = vmatpush.msrb.mxu3 %v358_v38 }
 0x339   :  { %v514_v40 = vld [vmem:[%s9068_s1 + $0xf30] sm:$0xff]  ;;  %2799 = vmatpush.msra.mxu0 %v450_v39 }
 0x33a   :  { %v290_v41 = vld [vmem:[%s9068_s1 + $0x830] sm:$0xff]  ;;  %2819 = vmatpush.msra.mxu1 %v514_v40 }
 0x33b   :  { %v354_v45 = vld [vmem:[%s9068_s1 + $0xa30] sm:$0xff]  ;;  %2767 = vmatpush.msrb.mxu2 %v290_v41 }
 0x33c   :  { %v446_v35 = vld [vmem:[%s9068_s1 + $0xd10] sm:$0xff]  ;;  %2787 = vmatpush.msrb.mxu3 %v354_v45 }
 0x33d   :  { %v510_v46 = vld [vmem:[%s9068_s1 + $0xf10] sm:$0xff]  ;;  %2800 = vmatpush.msra.mxu0 %v446_v35 }
 0x33e   :  { %v286_v52 = vld [vmem:[%s9068_s1 + $0x810] sm:$0xff]  ;;  %2820 = vmatpush.msra.mxu1 %v510_v46 }
 0x33f   :  { %v350_v53 = vld [vmem:[%s9068_s1 + $0xa10] sm:$0xff]  ;;  %2768 = vmatpush.msrb.mxu2 %v286_v52 }
 0x340   :  { %v442_v54 = vld [vmem:[%s9068_s1 + $0xcf0] sm:$0xff]  ;;  %2788 = vmatpush.msrb.mxu3 %v350_v53  ;;  %2769 = vmatmul.f32.vlgmr.msrb.gmra.mxu2 %v4304_v1 }
 0x341   :  { %v506_v55 = vld [vmem:[%s9068_s1 + $0xef0] sm:$0xff]  ;;  %2801 = vmatpush.msra.mxu0 %v442_v54  ;;  %2789 = vmatmul.f32.vlgmr.msrb.gmra.mxu3 %v4308_v3 }
 0x342   :  { %v602_v56 = vld [vmem:[%s9068_s1 + $0x11f0] sm:$0xff]  ;;  %2821 = vmatpush.msra.mxu1 %v506_v55 }
 0x343   :  { %v666_v57 = vld [vmem:[%s9068_s1 + $0x13f0] sm:$0xff]  ;;  %2833 = vmatpush.msra.mxu2 %v602_v56 }
 0x344   :  { %v438_v59 = vld [vmem:[%s9068_s1 + $0xcd0] sm:$0xff]  ;;  %2853 = vmatpush.msra.mxu3 %v666_v57 }
 0x345   :  { %v502_v60 = vld [vmem:[%s9068_s1 + $0xed0] sm:$0xff]  ;;  %2802 = vmatpush.msra.mxu0 %v438_v59 }
 0x346   :  { %v598_v61 = vld [vmem:[%s9068_s1 + $0x11d0] sm:$0xff]  ;;  %2822 = vmatpush.msra.mxu1 %v502_v60 }
 0x347   :  { %v662_v62 = vld [vmem:[%s9068_s1 + $0x13d0] sm:$0xff]  ;;  %2834 = vmatpush.msra.mxu2 %v598_v61 }
 0x348   :  { %v434_v63 = vld [vmem:[%s9068_s1 + $0xcb0] sm:$0xff]  ;;  %2854 = vmatpush.msra.mxu3 %v662_v62 }
 0x349   :  { %v498_v4 = vld [vmem:[%s9068_s1 + $0xeb0] sm:$0xff]  ;;  %2803 = vmatpush.msra.mxu0 %v434_v63 }
 0x34a   :  { %v594_v5 = vld [vmem:[%s9068_s1 + $0x11b0] sm:$0xff]  ;;  %2823 = vmatpush.msra.mxu1 %v498_v4 }
 0x34b   :  { %v658_v6 = vld [vmem:[%s9068_s1 + $0x13b0] sm:$0xff]  ;;  %2835 = vmatpush.msra.mxu2 %v594_v5 }
 0x34c   :  { %v430_v7 = vld [vmem:[%s9068_s1 + $0xc90] sm:$0xff]  ;;  %2855 = vmatpush.msra.mxu3 %v658_v6 }
 0x34d   :  { %v494_v8 = vld [vmem:[%s9068_s1 + $0xe90] sm:$0xff]  ;;  %2804 = vmatpush.msra.mxu0 %v430_v7 }
 0x34e   :  { %v590_v12 = vld [vmem:[%s9068_s1 + $0x1190] sm:$0xff]  ;;  %2824 = vmatpush.msra.mxu1 %v494_v8 }
 0x34f   :  { %v654_v58 = vld [vmem:[%s9068_s1 + $0x1390] sm:$0xff]  ;;  %2836 = vmatpush.msra.mxu2 %v590_v12 }
 0x350   :  { %v426_v13 = vld [vmem:[%s9068_s1 + $0xc70] sm:$0xff]  ;;  %2856 = vmatpush.msra.mxu3 %v654_v58 }
 0x351   :  { %v490_v15 = vld [vmem:[%s9068_s1 + $0xe70] sm:$0xff]  ;;  %2805 = vmatpush.msra.mxu0 %v426_v13 }
 0x352   :  { %v586_v18 = vld [vmem:[%s9068_s1 + $0x1170] sm:$0xff]  ;;  %2825 = vmatpush.msra.mxu1 %v490_v15 }
 0x353   :  { %v650_v19 = vld [vmem:[%s9068_s1 + $0x1370] sm:$0xff]  ;;  %2837 = vmatpush.msra.mxu2 %v586_v18 }
 0x354   :  { %v422_v20 = vld [vmem:[%s9068_s1 + $0xc50] sm:$0xff]  ;;  %2857 = vmatpush.msra.mxu3 %v650_v19 }
 0x355   :  { %v486_v21 = vld [vmem:[%s9068_s1 + $0xe50] sm:$0xff]  ;;  %2806 = vmatpush.msra.mxu0 %v422_v20 }
 0x356   :  { %v582_v22 = vld [vmem:[%s9068_s1 + $0x1150] sm:$0xff]  ;;  %2826 = vmatpush.msra.mxu1 %v486_v21 }
 0x357   :  { %v646_v9 = vld [vmem:[%s9068_s1 + $0x1350] sm:$0xff]  ;;  %2838 = vmatpush.msra.mxu2 %v582_v22 }
 0x358   :  { %v418_v23 = vld [vmem:[%s9068_s1 + $0xc30] sm:$0xff]  ;;  %2858 = vmatpush.msra.mxu3 %v646_v9 }
 0x359   :  { %v482_v24 = vld [vmem:[%s9068_s1 + $0xe30] sm:$0xff]  ;;  %2807 = vmatpush.msra.mxu0 %v418_v23 }
 0x35a   :  { %v578_v25 = vld [vmem:[%s9068_s1 + $0x1130] sm:$0xff]  ;;  %2827 = vmatpush.msra.mxu1 %v482_v24 }
 0x35b   :  { %v642_v26 = vld [vmem:[%s9068_s1 + $0x1330] sm:$0xff]  ;;  %2839 = vmatpush.msra.mxu2 %v578_v25 }
 0x35c   :  { %v414_v29 = vld [vmem:[%s9068_s1 + $0xc10] sm:$0xff]  ;;  %2859 = vmatpush.msra.mxu3 %v642_v26 }
 0x35d   :  { %v478_v31 = vld [vmem:[%s9068_s1 + $0xe10] sm:$0xff]  ;;  %2808 = vmatpush.msra.mxu0 %v414_v29 }
 0x35e   :  { %v574_v32 = vld [vmem:[%s9068_s1 + $0x1110] sm:$0xff]  ;;  %2828 = vmatpush.msra.mxu1 %v478_v31  ;;  %2809 = vmatmul.f32.vlgmr.msra.gmra.mxu0 %v4302_v0 }
 0x35f   :  { %v638_v34 = vld [vmem:[%s9068_s1 + $0x1310] sm:$0xff]  ;;  %2840 = vmatpush.msra.mxu2 %v574_v32  ;;  %2829 = vmatmul.f32.vlgmr.msra.gmra.mxu1 %v4306_v2 }
 0x360   :  { %v730_v36 = vld [vmem:[%s9068_s1 + $0x15f0] sm:$0xff]  ;;  %2860 = vmatpush.msra.mxu3 %v638_v34 }
 0x361   :  { %v794_v37 = vld [vmem:[%s9068_s1 + $0x17f0] sm:$0xff]  ;;  %2873 = vmatpush.msrb.mxu0 %v730_v36 }
 0x362   :  { %v570_v38 = vld [vmem:[%s9068_s1 + $0x10f0] sm:$0xff]  ;;  %2893 = vmatpush.msrb.mxu1 %v794_v37 }
 0x363   :  { %v634_v39 = vld [vmem:[%s9068_s1 + $0x12f0] sm:$0xff]  ;;  %2841 = vmatpush.msra.mxu2 %v570_v38 }
 0x364   :  { %v726_v40 = vld [vmem:[%s9068_s1 + $0x15d0] sm:$0xff]  ;;  %2861 = vmatpush.msra.mxu3 %v634_v39 }
 0x365   :  { %v790_v41 = vld [vmem:[%s9068_s1 + $0x17d0] sm:$0xff]  ;;  %2874 = vmatpush.msrb.mxu0 %v726_v40 }
 0x366   :  { %v566_v45 = vld [vmem:[%s9068_s1 + $0x10d0] sm:$0xff]  ;;  %2894 = vmatpush.msrb.mxu1 %v790_v41 }
 0x367   :  { %v630_v35 = vld [vmem:[%s9068_s1 + $0x12d0] sm:$0xff]  ;;  %2842 = vmatpush.msra.mxu2 %v566_v45 }
 0x368   :  { %v722_v46 = vld [vmem:[%s9068_s1 + $0x15b0] sm:$0xff]  ;;  %2862 = vmatpush.msra.mxu3 %v630_v35 }
 0x369   :  { %v786_v52 = vld [vmem:[%s9068_s1 + $0x17b0] sm:$0xff]  ;;  %2875 = vmatpush.msrb.mxu0 %v722_v46 }
 0x36a   :  { %v562_v53 = vld [vmem:[%s9068_s1 + $0x10b0] sm:$0xff]  ;;  %2895 = vmatpush.msrb.mxu1 %v786_v52 }
 0x36b   :  { %v626_v54 = vld [vmem:[%s9068_s1 + $0x12b0] sm:$0xff]  ;;  %2843 = vmatpush.msra.mxu2 %v562_v53 }
 0x36c   :  { %v718_v55 = vld [vmem:[%s9068_s1 + $0x1590] sm:$0xff]  ;;  %2863 = vmatpush.msra.mxu3 %v626_v54 }
 0x36d   :  { %v782_v56 = vld [vmem:[%s9068_s1 + $0x1790] sm:$0xff]  ;;  %2876 = vmatpush.msrb.mxu0 %v718_v55 }
 0x36e   :  { %v558_v57 = vld [vmem:[%s9068_s1 + $0x1090] sm:$0xff]  ;;  %2896 = vmatpush.msrb.mxu1 %v782_v56 }
 0x36f   :  { %v622_v59 = vld [vmem:[%s9068_s1 + $0x1290] sm:$0xff]  ;;  %2844 = vmatpush.msra.mxu2 %v558_v57 }
 0x370   :  { %v714_v60 = vld [vmem:[%s9068_s1 + $0x1570] sm:$0xff]  ;;  %2864 = vmatpush.msra.mxu3 %v622_v59 }
 0x371   :  { %v778_v61 = vld [vmem:[%s9068_s1 + $0x1770] sm:$0xff]  ;;  %2877 = vmatpush.msrb.mxu0 %v714_v60 }
 0x372   :  { %v554_v62 = vld [vmem:[%s9068_s1 + $0x1070] sm:$0xff]  ;;  %2897 = vmatpush.msrb.mxu1 %v778_v61 }
 0x373   :  { %v618_v63 = vld [vmem:[%s9068_s1 + $0x1270] sm:$0xff]  ;;  %2845 = vmatpush.msra.mxu2 %v554_v62 }
 0x374   :  { %v710_v4 = vld [vmem:[%s9068_s1 + $0x1550] sm:$0xff]  ;;  %2865 = vmatpush.msra.mxu3 %v618_v63 }
 0x375   :  { %v774_v5 = vld [vmem:[%s9068_s1 + $0x1750] sm:$0xff]  ;;  %2878 = vmatpush.msrb.mxu0 %v710_v4 }
 0x376   :  { %v550_v6 = vld [vmem:[%s9068_s1 + $0x1050] sm:$0xff]  ;;  %2898 = vmatpush.msrb.mxu1 %v774_v5 }
 0x377   :  { %v614_v7 = vld [vmem:[%s9068_s1 + $0x1250] sm:$0xff]  ;;  %2846 = vmatpush.msra.mxu2 %v550_v6 }
 0x378   :  { %v706_v8 = vld [vmem:[%s9068_s1 + $0x1530] sm:$0xff]  ;;  %2866 = vmatpush.msra.mxu3 %v614_v7 }
 0x379   :  { %v770_v12 = vld [vmem:[%s9068_s1 + $0x1730] sm:$0xff]  ;;  %2879 = vmatpush.msrb.mxu0 %v706_v8 }
 0x37a   :  { %v546_v58 = vld [vmem:[%s9068_s1 + $0x1030] sm:$0xff]  ;;  %2899 = vmatpush.msrb.mxu1 %v770_v12 }
 0x37b   :  { %v610_v13 = vld [vmem:[%s9068_s1 + $0x1230] sm:$0xff]  ;;  %2847 = vmatpush.msra.mxu2 %v546_v58 }
 0x37c   :  { %v702_v15 = vld [vmem:[%s9068_s1 + $0x1510] sm:$0xff]  ;;  %2867 = vmatpush.msra.mxu3 %v610_v13 }
 0x37d   :  { %v766_v18 = vld [vmem:[%s9068_s1 + $0x1710] sm:$0xff]  ;;  %2880 = vmatpush.msrb.mxu0 %v702_v15 }
 0x37e   :  { %v542_v19 = vld [vmem:[%s9068_s1 + $0x1010] sm:$0xff]  ;;  %2900 = vmatpush.msrb.mxu1 %v766_v18 }
 0x37f   :  { %v606_v20 = vld [vmem:[%s9068_s1 + $0x1210] sm:$0xff]  ;;  %2848 = vmatpush.msra.mxu2 %v542_v19 }
 0x380   :  { %v698_v21 = vld [vmem:[%s9068_s1 + $0x14f0] sm:$0xff]  ;;  %2868 = vmatpush.msra.mxu3 %v606_v20  ;;  %2849 = vmatmul.f32.vlgmr.msra.gmra.mxu2 %v4383_v27 }
 0x381   :  { %v762_v22 = vld [vmem:[%s9068_s1 + $0x16f0] sm:$0xff]  ;;  %2881 = vmatpush.msrb.mxu0 %v698_v21  ;;  %2869 = vmatmul.f32.vlgmr.msra.gmra.mxu3 %v4390_v30 }
 0x382   :  { %v858_v9 = vld [vmem:[%s9068_s1 + $0x19f0] sm:$0xff]  ;;  %2901 = vmatpush.msrb.mxu1 %v762_v22 }
 0x383   :  { %v922_v23 = vld [vmem:[%s9068_s1 + $0x1bf0] sm:$0xff]  ;;  %2913 = vmatpush.msrb.mxu2 %v858_v9 }
 0x384   :  { %v694_v24 = vld [vmem:[%s9068_s1 + $0x14d0] sm:$0xff]  ;;  %2933 = vmatpush.msrb.mxu3 %v922_v23 }
 0x385   :  { %v758_v25 = vld [vmem:[%s9068_s1 + $0x16d0] sm:$0xff]  ;;  %2882 = vmatpush.msrb.mxu0 %v694_v24 }
 0x386   :  { %v854_v26 = vld [vmem:[%s9068_s1 + $0x19d0] sm:$0xff]  ;;  %2902 = vmatpush.msrb.mxu1 %v758_v25 }
 0x387   :  { %v918_v29 = vld [vmem:[%s9068_s1 + $0x1bd0] sm:$0xff]  ;;  %2914 = vmatpush.msrb.mxu2 %v854_v26 }
 0x388   :  { %v690_v31 = vld [vmem:[%s9068_s1 + $0x14b0] sm:$0xff]  ;;  %2934 = vmatpush.msrb.mxu3 %v918_v29 }
 0x389   :  { %v754_v32 = vld [vmem:[%s9068_s1 + $0x16b0] sm:$0xff]  ;;  %2883 = vmatpush.msrb.mxu0 %v690_v31 }
 0x38a   :  { %v850_v34 = vld [vmem:[%s9068_s1 + $0x19b0] sm:$0xff]  ;;  %2903 = vmatpush.msrb.mxu1 %v754_v32 }
 0x38b   :  { %v914_v36 = vld [vmem:[%s9068_s1 + $0x1bb0] sm:$0xff]  ;;  %2915 = vmatpush.msrb.mxu2 %v850_v34 }
 0x38c   :  { %v686_v37 = vld [vmem:[%s9068_s1 + $0x1490] sm:$0xff]  ;;  %2935 = vmatpush.msrb.mxu3 %v914_v36 }
 0x38d   :  { %v750_v38 = vld [vmem:[%s9068_s1 + $0x1690] sm:$0xff]  ;;  %2884 = vmatpush.msrb.mxu0 %v686_v37 }
 0x38e   :  { %v846_v39 = vld [vmem:[%s9068_s1 + $0x1990] sm:$0xff]  ;;  %2904 = vmatpush.msrb.mxu1 %v750_v38 }
 0x38f   :  { %v910_v40 = vld [vmem:[%s9068_s1 + $0x1b90] sm:$0xff]  ;;  %2916 = vmatpush.msrb.mxu2 %v846_v39 }
 0x390   :  { %v682_v41 = vld [vmem:[%s9068_s1 + $0x1470] sm:$0xff]  ;;  %2936 = vmatpush.msrb.mxu3 %v910_v40 }
 0x391   :  { %v746_v45 = vld [vmem:[%s9068_s1 + $0x1670] sm:$0xff]  ;;  %2885 = vmatpush.msrb.mxu0 %v682_v41 }
 0x392   :  { %v842_v35 = vld [vmem:[%s9068_s1 + $0x1970] sm:$0xff]  ;;  %2905 = vmatpush.msrb.mxu1 %v746_v45 }
 0x393   :  { %v906_v46 = vld [vmem:[%s9068_s1 + $0x1b70] sm:$0xff]  ;;  %2917 = vmatpush.msrb.mxu2 %v842_v35 }
 0x394   :  { %v678_v52 = vld [vmem:[%s9068_s1 + $0x1450] sm:$0xff]  ;;  %2937 = vmatpush.msrb.mxu3 %v906_v46 }
 0x395   :  { %v742_v53 = vld [vmem:[%s9068_s1 + $0x1650] sm:$0xff]  ;;  %2886 = vmatpush.msrb.mxu0 %v678_v52 }
 0x396   :  { %v838_v54 = vld [vmem:[%s9068_s1 + $0x1950] sm:$0xff]  ;;  %2906 = vmatpush.msrb.mxu1 %v742_v53 }
 0x397   :  { %v902_v55 = vld [vmem:[%s9068_s1 + $0x1b50] sm:$0xff]  ;;  %2918 = vmatpush.msrb.mxu2 %v838_v54 }
 0x398   :  { %v674_v56 = vld [vmem:[%s9068_s1 + $0x1430] sm:$0xff]  ;;  %2938 = vmatpush.msrb.mxu3 %v902_v55 }
 0x399   :  { %v738_v57 = vld [vmem:[%s9068_s1 + $0x1630] sm:$0xff]  ;;  %2887 = vmatpush.msrb.mxu0 %v674_v56 }
 0x39a   :  { %v834_v59 = vld [vmem:[%s9068_s1 + $0x1930] sm:$0xff]  ;;  %2907 = vmatpush.msrb.mxu1 %v738_v57 }
 0x39b   :  { %v898_v60 = vld [vmem:[%s9068_s1 + $0x1b30] sm:$0xff]  ;;  %2919 = vmatpush.msrb.mxu2 %v834_v59 }
 0x39c   :  { %v670_v61 = vld [vmem:[%s9068_s1 + $0x1410] sm:$0xff]  ;;  %2939 = vmatpush.msrb.mxu3 %v898_v60 }
 0x39d   :  { %v734_v62 = vld [vmem:[%s9068_s1 + $0x1610] sm:$0xff]  ;;  %2888 = vmatpush.msrb.mxu0 %v670_v61 }
 0x39e   :  { %v830_v63 = vld [vmem:[%s9068_s1 + $0x1910] sm:$0xff]  ;;  %2908 = vmatpush.msrb.mxu1 %v734_v62  ;;  %2889 = vmatmul.f32.vlgmr.msrb.gmra.mxu0 %v4385_v28 }
 0x39f   :  { %v894_v4 = vld [vmem:[%s9068_s1 + $0x1b10] sm:$0xff]  ;;  %2920 = vmatpush.msrb.mxu2 %v830_v63  ;;  %2909 = vmatmul.f32.vlgmr.msrb.gmra.mxu1 %v4398_v33 }
 0x3a0   :  { %v1050_v5 = vld [vmem:[%s9068_s1 + $0x1ff0] sm:$0xff]  ;;  %2940 = vmatpush.msrb.mxu3 %v894_v4 }
 0x3a1   :  { %v986_v6 = vld [vmem:[%s9068_s1 + $0x1df0] sm:$0xff]  ;;  %2973 = vmatpush.msra.mxu1 %v1050_v5 }
 0x3a2   :  { %v826_v7 = vld [vmem:[%s9068_s1 + $0x18f0] sm:$0xff]  ;;  %2953 = vmatpush.msra.mxu0 %v986_v6 }
 0x3a3   :  { %v890_v8 = vld [vmem:[%s9068_s1 + $0x1af0] sm:$0xff]  ;;  %2921 = vmatpush.msrb.mxu2 %v826_v7 }
 0x3a4   :  { %v982_v12 = vld [vmem:[%s9068_s1 + $0x1dd0] sm:$0xff]  ;;  %2941 = vmatpush.msrb.mxu3 %v890_v8 }
 0x3a5   :  { %v1046_v58 = vld [vmem:[%s9068_s1 + $0x1fd0] sm:$0xff]  ;;  %2954 = vmatpush.msra.mxu0 %v982_v12 }
 0x3a6   :  { %v822_v13 = vld [vmem:[%s9068_s1 + $0x18d0] sm:$0xff]  ;;  %2974 = vmatpush.msra.mxu1 %v1046_v58 }
 0x3a7   :  { %v886_v15 = vld [vmem:[%s9068_s1 + $0x1ad0] sm:$0xff]  ;;  %2922 = vmatpush.msrb.mxu2 %v822_v13 }
 0x3a8   :  { %v978_v18 = vld [vmem:[%s9068_s1 + $0x1db0] sm:$0xff]  ;;  %2942 = vmatpush.msrb.mxu3 %v886_v15 }
 0x3a9   :  { %v1042_v19 = vld [vmem:[%s9068_s1 + $0x1fb0] sm:$0xff]  ;;  %2955 = vmatpush.msra.mxu0 %v978_v18 }
 0x3aa   :  { %v818_v20 = vld [vmem:[%s9068_s1 + $0x18b0] sm:$0xff]  ;;  %2975 = vmatpush.msra.mxu1 %v1042_v19 }
 0x3ab   :  { %v882_v21 = vld [vmem:[%s9068_s1 + $0x1ab0] sm:$0xff]  ;;  %2923 = vmatpush.msrb.mxu2 %v818_v20 }
 0x3ac   :  { %v974_v22 = vld [vmem:[%s9068_s1 + $0x1d90] sm:$0xff]  ;;  %2943 = vmatpush.msrb.mxu3 %v882_v21 }
 0x3ad   :  { %v1038_v9 = vld [vmem:[%s9068_s1 + $0x1f90] sm:$0xff]  ;;  %2956 = vmatpush.msra.mxu0 %v974_v22 }
 0x3ae   :  { %v814_v23 = vld [vmem:[%s9068_s1 + $0x1890] sm:$0xff]  ;;  %2976 = vmatpush.msra.mxu1 %v1038_v9 }
 0x3af   :  { %v878_v24 = vld [vmem:[%s9068_s1 + $0x1a90] sm:$0xff]  ;;  %2924 = vmatpush.msrb.mxu2 %v814_v23 }
 0x3b0   :  { %v970_v25 = vld [vmem:[%s9068_s1 + $0x1d70] sm:$0xff]  ;;  %2944 = vmatpush.msrb.mxu3 %v878_v24 }
 0x3b1   :  { %v1034_v26 = vld [vmem:[%s9068_s1 + $0x1f70] sm:$0xff]  ;;  %2957 = vmatpush.msra.mxu0 %v970_v25 }
 0x3b2   :  { %v810_v29 = vld [vmem:[%s9068_s1 + $0x1870] sm:$0xff]  ;;  %2977 = vmatpush.msra.mxu1 %v1034_v26 }
 0x3b3   :  { %v874_v31 = vld [vmem:[%s9068_s1 + $0x1a70] sm:$0xff]  ;;  %2925 = vmatpush.msrb.mxu2 %v810_v29 }
 0x3b4   :  { %v966_v32 = vld [vmem:[%s9068_s1 + $0x1d50] sm:$0xff]  ;;  %2945 = vmatpush.msrb.mxu3 %v874_v31 }
 0x3b5   :  { %v1030_v34 = vld [vmem:[%s9068_s1 + $0x1f50] sm:$0xff]  ;;  %2958 = vmatpush.msra.mxu0 %v966_v32 }
 0x3b6   :  { %v806_v36 = vld [vmem:[%s9068_s1 + $0x1850] sm:$0xff]  ;;  %2978 = vmatpush.msra.mxu1 %v1030_v34 }
 0x3b7   :  { %v870_v37 = vld [vmem:[%s9068_s1 + $0x1a50] sm:$0xff]  ;;  %2926 = vmatpush.msrb.mxu2 %v806_v36 }
 0x3b8   :  { %v962_v38 = vld [vmem:[%s9068_s1 + $0x1d30] sm:$0xff]  ;;  %2946 = vmatpush.msrb.mxu3 %v870_v37 }
 0x3b9   :  { %v1026_v39 = vld [vmem:[%s9068_s1 + $0x1f30] sm:$0xff]  ;;  %2959 = vmatpush.msra.mxu0 %v962_v38 }
 0x3ba   :  { %v802_v40 = vld [vmem:[%s9068_s1 + $0x1830] sm:$0xff]  ;;  %2979 = vmatpush.msra.mxu1 %v1026_v39 }
 0x3bb   :  { %v866_v41 = vld [vmem:[%s9068_s1 + $0x1a30] sm:$0xff]  ;;  %2927 = vmatpush.msrb.mxu2 %v802_v40 }
 0x3bc   :  { %v958_v45 = vld [vmem:[%s9068_s1 + $0x1d10] sm:$0xff]  ;;  %2947 = vmatpush.msrb.mxu3 %v866_v41 }
 0x3bd   :  { %v1022_v35 = vld [vmem:[%s9068_s1 + $0x1f10] sm:$0xff]  ;;  %2960 = vmatpush.msra.mxu0 %v958_v45 }
 0x3be   :  { %v798_v46 = vld [vmem:[%s9068_s1 + $0x1810] sm:$0xff]  ;;  %2980 = vmatpush.msra.mxu1 %v1022_v35 }
 0x3bf   :  { %v862_v52 = vld [vmem:[%s9068_s1 + $0x1a10] sm:$0xff]  ;;  %2928 = vmatpush.msrb.mxu2 %v798_v46 }
 0x3c0   :  { %v954_v53 = vld [vmem:[%s9068_s1 + $0x1cf0] sm:$0xff]  ;;  %2948 = vmatpush.msrb.mxu3 %v862_v52  ;;  %2929 = vmatmul.f32.vlgmr.msrb.gmra.mxu2 %v4588_v42 }
 0x3c1   :  { %v1018_v54 = vld [vmem:[%s9068_s1 + $0x1ef0] sm:$0xff]  ;;  %2961 = vmatpush.msra.mxu0 %v954_v53  ;;  %2949 = vmatmul.f32.vlgmr.msrb.gmra.mxu3 %v4592_v44 }
 0x3c2   :  { %v1114_v55 = vld [vmem:[%s9068_s1 + $0x21f0] sm:$0xff]  ;;  %2981 = vmatpush.msra.mxu1 %v1018_v54 }
 0x3c3   :  { %v1178_v56 = vld [vmem:[%s9068_s1 + $0x23f0] sm:$0xff]  ;;  %2993 = vmatpush.msra.mxu2 %v1114_v55 }
 0x3c4   :  { %v950_v57 = vld [vmem:[%s9068_s1 + $0x1cd0] sm:$0xff]  ;;  %3013 = vmatpush.msra.mxu3 %v1178_v56 }
 0x3c5   :  { %v1014_v59 = vld [vmem:[%s9068_s1 + $0x1ed0] sm:$0xff]  ;;  %2962 = vmatpush.msra.mxu0 %v950_v57 }
 0x3c6   :  { %v1110_v60 = vld [vmem:[%s9068_s1 + $0x21d0] sm:$0xff]  ;;  %2982 = vmatpush.msra.mxu1 %v1014_v59 }
 0x3c7   :  { %v1174_v61 = vld [vmem:[%s9068_s1 + $0x23d0] sm:$0xff]  ;;  %2994 = vmatpush.msra.mxu2 %v1110_v60 }
 0x3c8   :  { %v946_v62 = vld [vmem:[%s9068_s1 + $0x1cb0] sm:$0xff]  ;;  %3014 = vmatpush.msra.mxu3 %v1174_v61 }
 0x3c9   :  { %v1010_v63 = vld [vmem:[%s9068_s1 + $0x1eb0] sm:$0xff]  ;;  %2963 = vmatpush.msra.mxu0 %v946_v62 }
 0x3ca   :  { %v1106_v4 = vld [vmem:[%s9068_s1 + $0x21b0] sm:$0xff]  ;;  %2983 = vmatpush.msra.mxu1 %v1010_v63 }
 0x3cb   :  { %v1170_v5 = vld [vmem:[%s9068_s1 + $0x23b0] sm:$0xff]  ;;  %2995 = vmatpush.msra.mxu2 %v1106_v4 }
 0x3cc   :  { %v942_v6 = vld [vmem:[%s9068_s1 + $0x1c90] sm:$0xff]  ;;  %3015 = vmatpush.msra.mxu3 %v1170_v5 }
 0x3cd   :  { %v1006_v7 = vld [vmem:[%s9068_s1 + $0x1e90] sm:$0xff]  ;;  %2964 = vmatpush.msra.mxu0 %v942_v6 }
 0x3ce   :  { %v1102_v8 = vld [vmem:[%s9068_s1 + $0x2190] sm:$0xff]  ;;  %2984 = vmatpush.msra.mxu1 %v1006_v7 }
 0x3cf   :  { %v1166_v12 = vld [vmem:[%s9068_s1 + $0x2390] sm:$0xff]  ;;  %2996 = vmatpush.msra.mxu2 %v1102_v8 }
 0x3d0   :  { %v938_v58 = vld [vmem:[%s9068_s1 + $0x1c70] sm:$0xff]  ;;  %3016 = vmatpush.msra.mxu3 %v1166_v12 }
 0x3d1   :  { %v1002_v13 = vld [vmem:[%s9068_s1 + $0x1e70] sm:$0xff]  ;;  %2965 = vmatpush.msra.mxu0 %v938_v58 }
 0x3d2   :  { %v1098_v15 = vld [vmem:[%s9068_s1 + $0x2170] sm:$0xff]  ;;  %2985 = vmatpush.msra.mxu1 %v1002_v13 }
 0x3d3   :  { %v1162_v18 = vld [vmem:[%s9068_s1 + $0x2370] sm:$0xff]  ;;  %2997 = vmatpush.msra.mxu2 %v1098_v15 }
 0x3d4   :  { %v934_v19 = vld [vmem:[%s9068_s1 + $0x1c50] sm:$0xff]  ;;  %3017 = vmatpush.msra.mxu3 %v1162_v18 }
 0x3d5   :  { %v998_v20 = vld [vmem:[%s9068_s1 + $0x1e50] sm:$0xff]  ;;  %2966 = vmatpush.msra.mxu0 %v934_v19 }
 0x3d6   :  { %v1094_v21 = vld [vmem:[%s9068_s1 + $0x2150] sm:$0xff]  ;;  %2986 = vmatpush.msra.mxu1 %v998_v20 }
 0x3d7   :  { %v1158_v22 = vld [vmem:[%s9068_s1 + $0x2350] sm:$0xff]  ;;  %2998 = vmatpush.msra.mxu2 %v1094_v21 }
 0x3d8   :  { %v930_v9 = vld [vmem:[%s9068_s1 + $0x1c30] sm:$0xff]  ;;  %3018 = vmatpush.msra.mxu3 %v1158_v22 }
 0x3d9   :  { %v994_v23 = vld [vmem:[%s9068_s1 + $0x1e30] sm:$0xff]  ;;  %2967 = vmatpush.msra.mxu0 %v930_v9 }
 0x3da   :  { %v1090_v24 = vld [vmem:[%s9068_s1 + $0x2130] sm:$0xff]  ;;  %2987 = vmatpush.msra.mxu1 %v994_v23 }
 0x3db   :  { %v1154_v25 = vld [vmem:[%s9068_s1 + $0x2330] sm:$0xff]  ;;  %2999 = vmatpush.msra.mxu2 %v1090_v24 }
 0x3dc   :  { %v926_v26 = vld [vmem:[%s9068_s1 + $0x1c10] sm:$0xff]  ;;  %3019 = vmatpush.msra.mxu3 %v1154_v25 }
 0x3dd   :  { %v990_v29 = vld [vmem:[%s9068_s1 + $0x1e10] sm:$0xff]  ;;  %2968 = vmatpush.msra.mxu0 %v926_v26 }
 0x3de   :  { %v1086_v31 = vld [vmem:[%s9068_s1 + $0x2110] sm:$0xff]  ;;  %2988 = vmatpush.msra.mxu1 %v990_v29  ;;  %2969 = vmatmul.f32.vlgmr.msra.gmra.mxu0 %v4590_v43 }
 0x3df   :  { %v1150_v32 = vld [vmem:[%s9068_s1 + $0x2310] sm:$0xff]  ;;  %3000 = vmatpush.msra.mxu2 %v1086_v31  ;;  %2989 = vmatmul.f32.vlgmr.msra.gmra.mxu1 %v4600_v47 }
 0x3e0   :  { %v1306_v34 = vld [vmem:[%s9068_s1 + $0x27f0] sm:$0xff]  ;;  %3020 = vmatpush.msra.mxu3 %v1150_v32 }
 0x3e1   :  { %v1242_v36 = vld [vmem:[%s9068_s1 + $0x25f0] sm:$0xff]  ;;  %3053 = vmatpush.msrb.mxu1 %v1306_v34 }
 0x3e2   :  { %v1082_v37 = vld [vmem:[%s9068_s1 + $0x20f0] sm:$0xff]  ;;  %3033 = vmatpush.msrb.mxu0 %v1242_v36 }
 0x3e3   :  { %v1146_v38 = vld [vmem:[%s9068_s1 + $0x22f0] sm:$0xff]  ;;  %3001 = vmatpush.msra.mxu2 %v1082_v37 }
 0x3e4   :  { %v1238_v39 = vld [vmem:[%s9068_s1 + $0x25d0] sm:$0xff]  ;;  %3021 = vmatpush.msra.mxu3 %v1146_v38 }
 0x3e5   :  { %v1302_v40 = vld [vmem:[%s9068_s1 + $0x27d0] sm:$0xff]  ;;  %3034 = vmatpush.msrb.mxu0 %v1238_v39 }
 0x3e6   :  { %v1078_v41 = vld [vmem:[%s9068_s1 + $0x20d0] sm:$0xff]  ;;  %3054 = vmatpush.msrb.mxu1 %v1302_v40 }
 0x3e7   :  { %v1142_v45 = vld [vmem:[%s9068_s1 + $0x22d0] sm:$0xff]  ;;  %3002 = vmatpush.msra.mxu2 %v1078_v41 }
 0x3e8   :  { %v1234_v35 = vld [vmem:[%s9068_s1 + $0x25b0] sm:$0xff]  ;;  %3022 = vmatpush.msra.mxu3 %v1142_v45 }
 0x3e9   :  { %v1298_v46 = vld [vmem:[%s9068_s1 + $0x27b0] sm:$0xff]  ;;  %3035 = vmatpush.msrb.mxu0 %v1234_v35 }
 0x3ea   :  { %v1074_v52 = vld [vmem:[%s9068_s1 + $0x20b0] sm:$0xff]  ;;  %3055 = vmatpush.msrb.mxu1 %v1298_v46 }
 0x3eb   :  { %v1138_v53 = vld [vmem:[%s9068_s1 + $0x22b0] sm:$0xff]  ;;  %3003 = vmatpush.msra.mxu2 %v1074_v52 }
 0x3ec   :  { %v1230_v54 = vld [vmem:[%s9068_s1 + $0x2590] sm:$0xff]  ;;  %3023 = vmatpush.msra.mxu3 %v1138_v53 }
 0x3ed   :  { %v1294_v55 = vld [vmem:[%s9068_s1 + $0x2790] sm:$0xff]  ;;  %3036 = vmatpush.msrb.mxu0 %v1230_v54 }
 0x3ee   :  { %v1070_v56 = vld [vmem:[%s9068_s1 + $0x2090] sm:$0xff]  ;;  %3056 = vmatpush.msrb.mxu1 %v1294_v55 }
 0x3ef   :  { %v1134_v57 = vld [vmem:[%s9068_s1 + $0x2290] sm:$0xff]  ;;  %3004 = vmatpush.msra.mxu2 %v1070_v56 }
 0x3f0   :  { %v1226_v59 = vld [vmem:[%s9068_s1 + $0x2570] sm:$0xff]  ;;  %3024 = vmatpush.msra.mxu3 %v1134_v57 }
 0x3f1   :  { %v1290_v60 = vld [vmem:[%s9068_s1 + $0x2770] sm:$0xff]  ;;  %3037 = vmatpush.msrb.mxu0 %v1226_v59 }
 0x3f2   :  { %v1066_v61 = vld [vmem:[%s9068_s1 + $0x2070] sm:$0xff]  ;;  %3057 = vmatpush.msrb.mxu1 %v1290_v60 }
 0x3f3   :  { %v1130_v62 = vld [vmem:[%s9068_s1 + $0x2270] sm:$0xff]  ;;  %3005 = vmatpush.msra.mxu2 %v1066_v61 }
 0x3f4   :  { %v1222_v63 = vld [vmem:[%s9068_s1 + $0x2550] sm:$0xff]  ;;  %3025 = vmatpush.msra.mxu3 %v1130_v62 }
 0x3f5   :  { %v1286_v4 = vld [vmem:[%s9068_s1 + $0x2750] sm:$0xff]  ;;  %3038 = vmatpush.msrb.mxu0 %v1222_v63 }
 0x3f6   :  { %v1062_v5 = vld [vmem:[%s9068_s1 + $0x2050] sm:$0xff]  ;;  %3058 = vmatpush.msrb.mxu1 %v1286_v4 }
 0x3f7   :  { %v1126_v6 = vld [vmem:[%s9068_s1 + $0x2250] sm:$0xff]  ;;  %3006 = vmatpush.msra.mxu2 %v1062_v5 }
 0x3f8   :  { %v1218_v7 = vld [vmem:[%s9068_s1 + $0x2530] sm:$0xff]  ;;  %3026 = vmatpush.msra.mxu3 %v1126_v6 }
 0x3f9   :  { %v1282_v8 = vld [vmem:[%s9068_s1 + $0x2730] sm:$0xff]  ;;  %3039 = vmatpush.msrb.mxu0 %v1218_v7 }
 0x3fa   :  { %v1058_v12 = vld [vmem:[%s9068_s1 + $0x2030] sm:$0xff]  ;;  %3059 = vmatpush.msrb.mxu1 %v1282_v8 }
 0x3fb   :  { %v1122_v58 = vld [vmem:[%s9068_s1 + $0x2230] sm:$0xff]  ;;  %3007 = vmatpush.msra.mxu2 %v1058_v12 }
 0x3fc   :  { %v1214_v13 = vld [vmem:[%s9068_s1 + $0x2510] sm:$0xff]  ;;  %3027 = vmatpush.msra.mxu3 %v1122_v58 }
 0x3fd   :  { %v1278_v15 = vld [vmem:[%s9068_s1 + $0x2710] sm:$0xff]  ;;  %3040 = vmatpush.msrb.mxu0 %v1214_v13 }
 0x3fe   :  { %v1054_v18 = vld [vmem:[%s9068_s1 + $0x2010] sm:$0xff]  ;;  %3060 = vmatpush.msrb.mxu1 %v1278_v15 }
 0x3ff   :  { %v1118_v19 = vld [vmem:[%s9068_s1 + $0x2210] sm:$0xff]  ;;  %3008 = vmatpush.msra.mxu2 %v1054_v18 }
 0x400   :  { %v1210_v20 = vld [vmem:[%s9068_s1 + $0x24f0] sm:$0xff]  ;;  %3028 = vmatpush.msra.mxu3 %v1118_v19  ;;  %3009 = vmatmul.f32.vlgmr.msra.gmra.mxu2 %v4948_v10 }
 0x401   :  { %v1274_v21 = vld [vmem:[%s9068_s1 + $0x26f0] sm:$0xff]  ;;  %3041 = vmatpush.msrb.mxu0 %v1210_v20  ;;  %3029 = vmatmul.f32.vlgmr.msra.gmra.mxu3 %v4966_v16 }
 0x402   :  { %v1370_v22 = vld [vmem:[%s9068_s1 + $0x29f0] sm:$0xff]  ;;  %3061 = vmatpush.msrb.mxu1 %v1274_v21 }
 0x403   :  { %v1434_v9 = vld [vmem:[%s9068_s1 + $0x2bf0] sm:$0xff]  ;;  %3073 = vmatpush.msrb.mxu2 %v1370_v22 }
 0x404   :  { %v1206_v23 = vld [vmem:[%s9068_s1 + $0x24d0] sm:$0xff]  ;;  %3093 = vmatpush.msrb.mxu3 %v1434_v9 }
 0x405   :  { %v1270_v24 = vld [vmem:[%s9068_s1 + $0x26d0] sm:$0xff]  ;;  %3042 = vmatpush.msrb.mxu0 %v1206_v23 }
 0x406   :  { %v1366_v25 = vld [vmem:[%s9068_s1 + $0x29d0] sm:$0xff]  ;;  %3062 = vmatpush.msrb.mxu1 %v1270_v24 }
 0x407   :  { %v1430_v26 = vld [vmem:[%s9068_s1 + $0x2bd0] sm:$0xff]  ;;  %3074 = vmatpush.msrb.mxu2 %v1366_v25 }
 0x408   :  { %v1202_v29 = vld [vmem:[%s9068_s1 + $0x24b0] sm:$0xff]  ;;  %3094 = vmatpush.msrb.mxu3 %v1430_v26 }
 0x409   :  { %v1266_v31 = vld [vmem:[%s9068_s1 + $0x26b0] sm:$0xff]  ;;  %3043 = vmatpush.msrb.mxu0 %v1202_v29 }
 0x40a   :  { %v1362_v32 = vld [vmem:[%s9068_s1 + $0x29b0] sm:$0xff]  ;;  %3063 = vmatpush.msrb.mxu1 %v1266_v31 }
 0x40b   :  { %v1426_v34 = vld [vmem:[%s9068_s1 + $0x2bb0] sm:$0xff]  ;;  %3075 = vmatpush.msrb.mxu2 %v1362_v32 }
 0x40c   :  { %v1198_v36 = vld [vmem:[%s9068_s1 + $0x2490] sm:$0xff]  ;;  %3095 = vmatpush.msrb.mxu3 %v1426_v34 }
 0x40d   :  { %v1262_v37 = vld [vmem:[%s9068_s1 + $0x2690] sm:$0xff]  ;;  %3044 = vmatpush.msrb.mxu0 %v1198_v36 }
 0x40e   :  { %v1358_v38 = vld [vmem:[%s9068_s1 + $0x2990] sm:$0xff]  ;;  %3064 = vmatpush.msrb.mxu1 %v1262_v37 }
 0x40f   :  { %v1422_v39 = vld [vmem:[%s9068_s1 + $0x2b90] sm:$0xff]  ;;  %3076 = vmatpush.msrb.mxu2 %v1358_v38 }
 0x410   :  { %v1194_v40 = vld [vmem:[%s9068_s1 + $0x2470] sm:$0xff]  ;;  %3096 = vmatpush.msrb.mxu3 %v1422_v39 }
 0x411   :  { %v1258_v41 = vld [vmem:[%s9068_s1 + $0x2670] sm:$0xff]  ;;  %3045 = vmatpush.msrb.mxu0 %v1194_v40 }
 0x412   :  { %v1354_v45 = vld [vmem:[%s9068_s1 + $0x2970] sm:$0xff]  ;;  %3065 = vmatpush.msrb.mxu1 %v1258_v41 }
 0x413   :  { %v1418_v35 = vld [vmem:[%s9068_s1 + $0x2b70] sm:$0xff]  ;;  %3077 = vmatpush.msrb.mxu2 %v1354_v45 }
 0x414   :  { %v1190_v46 = vld [vmem:[%s9068_s1 + $0x2450] sm:$0xff]  ;;  %3097 = vmatpush.msrb.mxu3 %v1418_v35 }
 0x415   :  { %v1254_v52 = vld [vmem:[%s9068_s1 + $0x2650] sm:$0xff]  ;;  %3046 = vmatpush.msrb.mxu0 %v1190_v46 }
 0x416   :  { %v1350_v53 = vld [vmem:[%s9068_s1 + $0x2950] sm:$0xff]  ;;  %3066 = vmatpush.msrb.mxu1 %v1254_v52 }
 0x417   :  { %v1414_v54 = vld [vmem:[%s9068_s1 + $0x2b50] sm:$0xff]  ;;  %3078 = vmatpush.msrb.mxu2 %v1350_v53 }
 0x418   :  { %v1186_v55 = vld [vmem:[%s9068_s1 + $0x2430] sm:$0xff]  ;;  %3098 = vmatpush.msrb.mxu3 %v1414_v54 }
 0x419   :  { %v1250_v56 = vld [vmem:[%s9068_s1 + $0x2630] sm:$0xff]  ;;  %3047 = vmatpush.msrb.mxu0 %v1186_v55  ;;  %v91_v55 = vld [vmem:[%s9068_s1 + $0x1f8] sm:$0xff] }
 0x41a   :  { %v1346_v57 = vld [vmem:[%s9068_s1 + $0x2930] sm:$0xff]  ;;  %3067 = vmatpush.msrb.mxu1 %v1250_v56 }
 0x41b   :  { %v1410_v59 = vld [vmem:[%s9068_s1 + $0x2b30] sm:$0xff]  ;;  %3079 = vmatpush.msrb.mxu2 %v1346_v57  ;;  %v3854_v57 = vld.sshfl [vmem:[#allocation1 + $0x20] sm:$0xff pattern:$0x73625140] }
 0x41c   :  { %v1182_v60 = vld [vmem:[%s9068_s1 + $0x2410] sm:$0xff]  ;;  %3099 = vmatpush.msrb.mxu3 %v1410_v59 }
 0x41d   :  { %v1246_v61 = vld [vmem:[%s9068_s1 + $0x2610] sm:$0xff]  ;;  %3048 = vmatpush.msrb.mxu0 %v1182_v60 }
 0x41e   :  { %v1342_v62 = vld [vmem:[%s9068_s1 + $0x2910] sm:$0xff]  ;;  %3068 = vmatpush.msrb.mxu1 %v1246_v61  ;;  %3049 = vmatmul.f32.vlgmr.msrb.gmra.mxu0 %v4950_v11  ;;  %v87_v61 = vld [vmem:[%s9068_s1 + $0x1d8] sm:$0xff] }
 0x41f   :  { %v1406_v63 = vld [vmem:[%s9068_s1 + $0x2b10] sm:$0xff]  ;;  %3080 = vmatpush.msrb.mxu2 %v1342_v62  ;;  %3069 = vmatmul.f32.vlgmr.msrb.gmra.mxu1 %v4968_v17 }
 0x420   :  { %v1562_v4 = vld [vmem:[%s9068_s1 + $0x2ff0] sm:$0xff]  ;;  %3100 = vmatpush.msrb.mxu3 %v1406_v63 }
 0x421   :  { %v1498_v5 = vld [vmem:[%s9068_s1 + $0x2df0] sm:$0xff]  ;;  %3133 = vmatpush.msra.mxu1 %v1562_v4  ;;  %v3855_v4 = vld.sshfl [vmem:[#allocation1 + $0x28] sm:$0xff pattern:$0x73625140] }
 0x422   :  { %v1338_v6 = vld [vmem:[%s9068_s1 + $0x28f0] sm:$0xff]  ;;  %3113 = vmatpush.msra.mxu0 %v1498_v5 }
 0x423   :  { %v1402_v7 = vld [vmem:[%s9068_s1 + $0x2af0] sm:$0xff]  ;;  %3081 = vmatpush.msrb.mxu2 %v1338_v6  ;;  %v83_v6 = vld [vmem:[%s9068_s1 + $0x1b8] sm:$0xff] }
 0x424   :  { %v1494_v8 = vld [vmem:[%s9068_s1 + $0x2dd0] sm:$0xff]  ;;  %3101 = vmatpush.msrb.mxu3 %v1402_v7 }
 0x425   :  { %v1558_v12 = vld [vmem:[%s9068_s1 + $0x2fd0] sm:$0xff]  ;;  %3114 = vmatpush.msra.mxu0 %v1494_v8 }
 0x426   :  { %v1334_v58 = vld [vmem:[%s9068_s1 + $0x28d0] sm:$0xff]  ;;  %3134 = vmatpush.msra.mxu1 %v1558_v12 }
 0x427   :  { %v1398_v13 = vld [vmem:[%s9068_s1 + $0x2ad0] sm:$0xff]  ;;  %3082 = vmatpush.msrb.mxu2 %v1334_v58  ;;  %v79_v58 = vld [vmem:[%s9068_s1 + $0x198] sm:$0xff] }
 0x428   :  { %v1490_v15 = vld [vmem:[%s9068_s1 + $0x2db0] sm:$0xff]  ;;  %3102 = vmatpush.msrb.mxu3 %v1398_v13 }
 0x429   :  { %v1554_v18 = vld [vmem:[%s9068_s1 + $0x2fb0] sm:$0xff]  ;;  %3115 = vmatpush.msra.mxu0 %v1490_v15 }
 0x42a   :  { %v1330_v19 = vld [vmem:[%s9068_s1 + $0x28b0] sm:$0xff]  ;;  %3135 = vmatpush.msra.mxu1 %v1554_v18 }
 0x42b   :  { %v1394_v20 = vld [vmem:[%s9068_s1 + $0x2ab0] sm:$0xff]  ;;  %3083 = vmatpush.msrb.mxu2 %v1330_v19  ;;  %v75_v19 = vld [vmem:[%s9068_s1 + $0x178] sm:$0xff] }
 0x42c   :  { %v1486_v21 = vld [vmem:[%s9068_s1 + $0x2d90] sm:$0xff]  ;;  %3103 = vmatpush.msrb.mxu3 %v1394_v20 }
 0x42d   :  { %v1550_v22 = vld [vmem:[%s9068_s1 + $0x2f90] sm:$0xff]  ;;  %3116 = vmatpush.msra.mxu0 %v1486_v21 }
 0x42e   :  { %v1326_v9 = vld [vmem:[%s9068_s1 + $0x2890] sm:$0xff]  ;;  %3136 = vmatpush.msra.mxu1 %v1550_v22 }
 0x42f   :  { %v1390_v23 = vld [vmem:[%s9068_s1 + $0x2a90] sm:$0xff]  ;;  %3084 = vmatpush.msrb.mxu2 %v1326_v9  ;;  %v71_v9 = vld [vmem:[%s9068_s1 + $0x158] sm:$0xff] }
 0x430   :  { %v1482_v24 = vld [vmem:[%s9068_s1 + $0x2d70] sm:$0xff]  ;;  %3104 = vmatpush.msrb.mxu3 %v1390_v23 }
 0x431   :  { %v1546_v25 = vld [vmem:[%s9068_s1 + $0x2f70] sm:$0xff]  ;;  %3117 = vmatpush.msra.mxu0 %v1482_v24 }
 0x432   :  { %v1322_v26 = vld [vmem:[%s9068_s1 + $0x2870] sm:$0xff]  ;;  %3137 = vmatpush.msra.mxu1 %v1546_v25 }
 0x433   :  { %v1386_v29 = vld [vmem:[%s9068_s1 + $0x2a70] sm:$0xff]  ;;  %3085 = vmatpush.msrb.mxu2 %v1322_v26  ;;  %v67_v26 = vld [vmem:[%s9068_s1 + $0x138] sm:$0xff] }
 0x434   :  { %v1478_v31 = vld [vmem:[%s9068_s1 + $0x2d50] sm:$0xff]  ;;  %3105 = vmatpush.msrb.mxu3 %v1386_v29 }
 0x435   :  { %v1542_v32 = vld [vmem:[%s9068_s1 + $0x2f50] sm:$0xff]  ;;  %3118 = vmatpush.msra.mxu0 %v1478_v31 }
 0x436   :  { %v1318_v34 = vld [vmem:[%s9068_s1 + $0x2850] sm:$0xff]  ;;  %3138 = vmatpush.msra.mxu1 %v1542_v32 }
 0x437   :  { %v1382_v36 = vld [vmem:[%s9068_s1 + $0x2a50] sm:$0xff]  ;;  %3086 = vmatpush.msrb.mxu2 %v1318_v34  ;;  %v63_v34 = vld [vmem:[%s9068_s1 + $0x118] sm:$0xff] }
 0x438   :  { %v1474_v37 = vld [vmem:[%s9068_s1 + $0x2d30] sm:$0xff]  ;;  %3106 = vmatpush.msrb.mxu3 %v1382_v36  ;;  %v155_v36 = vld [vmem:[%s9068_s1 + $0x3f8] sm:$0xff] }
 0x439   :  { %v1538_v38 = vld [vmem:[%s9068_s1 + $0x2f30] sm:$0xff]  ;;  %3119 = vmatpush.msra.mxu0 %v1474_v37  ;;  %v219_v37 = vld [vmem:[%s9068_s1 + $0x5f8] sm:$0xff] }
 0x43a   :  { %v1314_v39 = vld [vmem:[%s9068_s1 + $0x2830] sm:$0xff]  ;;  %3139 = vmatpush.msra.mxu1 %v1538_v38  ;;  %v283_v38 = vld [vmem:[%s9068_s1 + $0x7f8] sm:$0xff] }
 0x43b   :  { %v1378_v40 = vld [vmem:[%s9068_s1 + $0x2a30] sm:$0xff]  ;;  %3087 = vmatpush.msrb.mxu2 %v1314_v39  ;;  %v59_v39 = vld [vmem:[%s9068_s1 + $0xf8] sm:$0xff] }
 0x43c   :  { %v1470_v41 = vld [vmem:[%s9068_s1 + $0x2d10] sm:$0xff]  ;;  %3107 = vmatpush.msrb.mxu3 %v1378_v40 }
 0x43d   :  { %v1534_v45 = vld [vmem:[%s9068_s1 + $0x2f10] sm:$0xff]  ;;  %3120 = vmatpush.msra.mxu0 %v1470_v41  ;;  %v3857_v41 = vld.sshfl [vmem:[#allocation1] sm:$0xff pattern:$0x73625140] }
 0x43e   :  { %v1310_v35 = vld [vmem:[%s9068_s1 + $0x2810] sm:$0xff]  ;;  %3140 = vmatpush.msra.mxu1 %v1534_v45  ;;  %v151_v45 = vld [vmem:[%s9068_s1 + $0x3d8] sm:$0xff] }
 0x43f   :  { %v1374_v46 = vld [vmem:[%s9068_s1 + $0x2a10] sm:$0xff]  ;;  %3088 = vmatpush.msrb.mxu2 %v1310_v35  ;;  %v215_v35 = vld [vmem:[%s9068_s1 + $0x5d8] sm:$0xff] }
 0x440   :  { %v1466_v52 = vld [vmem:[%s9068_s1 + $0x2cf0] sm:$0xff]  ;;  %3108 = vmatpush.msrb.mxu3 %v1374_v46  ;;  %3089 = vmatmul.f32.vlgmr.msrb.gmra.mxu2 %v3854_v57  ;;  %v279_v46 = vld [vmem:[%s9068_s1 + $0x7d8] sm:$0xff] }
 0x441   :  { %v1530_v53 = vld [vmem:[%s9068_s1 + $0x2ef0] sm:$0xff]  ;;  %3121 = vmatpush.msra.mxu0 %v1466_v52  ;;  %3109 = vmatmul.f32.vlgmr.msrb.gmra.mxu3 %v3855_v4  ;;  %v55_v52 = vld [vmem:[%s9068_s1 + $0xd8] sm:$0xff] }
 0x442   :  { %v1594_v54 = vld [vmem:[%s9068_s1 + $0x30f0] sm:$0xff]  ;;  %3141 = vmatpush.msra.mxu1 %v1530_v53  ;;  %3173 = vmatpush.msra.mxu3 %v91_v55  ;;  %v147_v53 = vld [vmem:[%s9068_s1 + $0x3b8] sm:$0xff] }
 0x443   :  { %v1462_v56 = vld [vmem:[%s9068_s1 + $0x2cd0] sm:$0xff]  ;;  %3161 = vmatpush.msra.mxu2 %v1594_v54  ;;  %v3858_v54 = vld.sshfl [vmem:[#allocation1 + $0x38] sm:$0xff pattern:$0x73625140] }
 0x444   :  { %v1526_v59 = vld [vmem:[%s9068_s1 + $0x2ed0] sm:$0xff]  ;;  %3122 = vmatpush.msra.mxu0 %v1462_v56  ;;  %3174 = vmatpush.msra.mxu3 %v87_v61  ;;  %v211_v55 = vld [vmem:[%s9068_s1 + $0x5b8] sm:$0xff] }
 0x445   :  { %v1590_v60 = vld [vmem:[%s9068_s1 + $0x30d0] sm:$0xff]  ;;  %3142 = vmatpush.msra.mxu1 %v1526_v59  ;;  %v275_v56 = vld [vmem:[%s9068_s1 + $0x7b8] sm:$0xff] }
 0x446   :  { %v1458_v62 = vld [vmem:[%s9068_s1 + $0x2cb0] sm:$0xff]  ;;  %3162 = vmatpush.msra.mxu2 %v1590_v60  ;;  %3175 = vmatpush.msra.mxu3 %v83_v6  ;;  %v51_v57 = vld [vmem:[%s9068_s1 + $0xb8] sm:$0xff] }
 0x447   :  { %v1522_v63 = vld [vmem:[%s9068_s1 + $0x2eb0] sm:$0xff]  ;;  %3123 = vmatpush.msra.mxu0 %v1458_v62  ;;  %v143_v59 = vld [vmem:[%s9068_s1 + $0x398] sm:$0xff] }
 0x448   :  { %v1586_v5 = vld [vmem:[%s9068_s1 + $0x30b0] sm:$0xff]  ;;  %3143 = vmatpush.msra.mxu1 %v1522_v63  ;;  %3176 = vmatpush.msra.mxu3 %v79_v58  ;;  %v207_v60 = vld [vmem:[%s9068_s1 + $0x598] sm:$0xff] }
 0x449   :  { %v1454_v7 = vld [vmem:[%s9068_s1 + $0x2c90] sm:$0xff]  ;;  %3163 = vmatpush.msra.mxu2 %v1586_v5  ;;  %v271_v61 = vld [vmem:[%s9068_s1 + $0x798] sm:$0xff] }
 0x44a   :  { %v1518_v8 = vld [vmem:[%s9068_s1 + $0x2e90] sm:$0xff]  ;;  %3124 = vmatpush.msra.mxu0 %v1454_v7  ;;  %3177 = vmatpush.msra.mxu3 %v75_v19  ;;  %v47_v62 = vld [vmem:[%s9068_s1 + $0x98] sm:$0xff] }
 0x44b   :  { %v1582_v12 = vld [vmem:[%s9068_s1 + $0x3090] sm:$0xff]  ;;  %3144 = vmatpush.msra.mxu1 %v1518_v8  ;;  %v139_v63 = vld [vmem:[%s9068_s1 + $0x378] sm:$0xff] }
 0x44c   :  { %v1450_v13 = vld [vmem:[%s9068_s1 + $0x2c70] sm:$0xff]  ;;  %3164 = vmatpush.msra.mxu2 %v1582_v12  ;;  %3178 = vmatpush.msra.mxu3 %v71_v9  ;;  %v203_v4 = vld [vmem:[%s9068_s1 + $0x578] sm:$0xff] }
 0x44d   :  { %v1514_v15 = vld [vmem:[%s9068_s1 + $0x2e70] sm:$0xff]  ;;  %3125 = vmatpush.msra.mxu0 %v1450_v13  ;;  %v267_v5 = vld [vmem:[%s9068_s1 + $0x778] sm:$0xff] }
 0x44e   :  { %v1578_v18 = vld [vmem:[%s9068_s1 + $0x3070] sm:$0xff]  ;;  %3145 = vmatpush.msra.mxu1 %v1514_v15  ;;  %3179 = vmatpush.msra.mxu3 %v67_v26  ;;  %v43_v6 = vld [vmem:[%s9068_s1 + $0x78] sm:$0xff] }
 0x44f   :  { %v1446_v20 = vld [vmem:[%s9068_s1 + $0x2c50] sm:$0xff]  ;;  %3165 = vmatpush.msra.mxu2 %v1578_v18  ;;  %v135_v7 = vld [vmem:[%s9068_s1 + $0x358] sm:$0xff] }
 0x450   :  { %v1510_v21 = vld [vmem:[%s9068_s1 + $0x2e50] sm:$0xff]  ;;  %3126 = vmatpush.msra.mxu0 %v1446_v20  ;;  %3180 = vmatpush.msra.mxu3 %v63_v34  ;;  %v199_v8 = vld [vmem:[%s9068_s1 + $0x558] sm:$0xff] }
 0x451   :  { %v1574_v22 = vld [vmem:[%s9068_s1 + $0x3050] sm:$0xff]  ;;  %3146 = vmatpush.msra.mxu1 %v1510_v21  ;;  %v263_v12 = vld [vmem:[%s9068_s1 + $0x758] sm:$0xff] }
 0x452   :  { %v1442_v23 = vld [vmem:[%s9068_s1 + $0x2c30] sm:$0xff]  ;;  %3166 = vmatpush.msra.mxu2 %v1574_v22  ;;  %3181 = vmatpush.msra.mxu3 %v59_v39  ;;  %v39_v58 = vld [vmem:[%s9068_s1 + $0x58] sm:$0xff] }
 0x453   :  { %v1506_v24 = vld [vmem:[%s9068_s1 + $0x2e30] sm:$0xff]  ;;  %3127 = vmatpush.msra.mxu0 %v1442_v23  ;;  %v131_v13 = vld [vmem:[%s9068_s1 + $0x338] sm:$0xff] }
 0x454   :  { %v1570_v25 = vld [vmem:[%s9068_s1 + $0x3030] sm:$0xff]  ;;  %3147 = vmatpush.msra.mxu1 %v1506_v24  ;;  %3182 = vmatpush.msra.mxu3 %v55_v52  ;;  %v195_v15 = vld [vmem:[%s9068_s1 + $0x538] sm:$0xff] }
 0x455   :  { %v1438_v29 = vld [vmem:[%s9068_s1 + $0x2c10] sm:$0xff]  ;;  %3167 = vmatpush.msra.mxu2 %v1570_v25  ;;  %v259_v18 = vld [vmem:[%s9068_s1 + $0x738] sm:$0xff] }
 0x456   :  { %v1502_v31 = vld [vmem:[%s9068_s1 + $0x2e10] sm:$0xff]  ;;  %3128 = vmatpush.msra.mxu0 %v1438_v29  ;;  %3183 = vmatpush.msra.mxu3 %v51_v57  ;;  %v35_v19 = vld [vmem:[%s9068_s1 + $0x38] sm:$0xff] }
 0x457   :  { %v1566_v32 = vld [vmem:[%s9068_s1 + $0x3010] sm:$0xff]  ;;  %3148 = vmatpush.msra.mxu1 %v1502_v31  ;;  %v127_v20 = vld [vmem:[%s9068_s1 + $0x318] sm:$0xff] }
 0x458   :  { %3168 = vmatpush.msra.mxu2 %v1566_v32  ;;  %v3856_v40 = vld.sshfl [vmem:[#allocation1 + $0x30] sm:$0xff pattern:$0x73625140]  ;;  %3193 = vmatpush.msrb.mxu0 %v155_v36  ;;  %v191_v21 = vld [vmem:[%s9068_s1 + $0x518] sm:$0xff] }
 0x459   :  { %3129 = vmatmul.f32.vlgmr.msra.gmra.mxu0 %v3856_v40  ;;  %3845 = vmatmul.msk.f32.vlgmr.msra.gmra.mxu2 %vm1670_vm0, %v3857_v41  ;;  %v255_v22 = vld [vmem:[%s9068_s1 + $0x718] sm:$0xff] }
 0x45a   :  { %3213 = vmatpush.msrb.mxu1 %v219_v37  ;;  %3233 = vmatpush.msrb.mxu2 %v283_v38  ;;  %v31_v9 = vld [vmem:[%s9068_s1 + $0x18] sm:$0xff] }
 0x45b   :  { %3149 = vmatmul.f32.vlgmr.msra.gmra.mxu1 %v3858_v54  ;;  %3194 = vmatpush.msrb.mxu0 %v151_v45  ;;  %v123_v23 = vld [vmem:[%s9068_s1 + $0x2f8] sm:$0xff] }
 0x45c   :  { %3214 = vmatpush.msrb.mxu1 %v215_v35  ;;  %3234 = vmatpush.msrb.mxu2 %v279_v46  ;;  %v187_v24 = vld [vmem:[%s9068_s1 + $0x4f8] sm:$0xff] }
 0x45d   :  { %3195 = vmatpush.msrb.mxu0 %v147_v53  ;;  %3184 = vmatpush.msra.mxu3 %v47_v62  ;;  %v251_v25 = vld [vmem:[%s9068_s1 + $0x6f8] sm:$0xff] }
 0x45e   :  { %3215 = vmatpush.msrb.mxu1 %v211_v55  ;;  %3235 = vmatpush.msrb.mxu2 %v275_v56  ;;  %v347_v26 = vld [vmem:[%s9068_s1 + $0x9f8] sm:$0xff] }
 0x45f   :  { %3196 = vmatpush.msrb.mxu0 %v143_v59  ;;  %3185 = vmatpush.msra.mxu3 %v43_v6  ;;  %v119_v29 = vld [vmem:[%s9068_s1 + $0x2d8] sm:$0xff] }
 0x460   :  { %3216 = vmatpush.msrb.mxu1 %v207_v60  ;;  %3236 = vmatpush.msrb.mxu2 %v271_v61  ;;  %v183_v31 = vld [vmem:[%s9068_s1 + $0x4d8] sm:$0xff] }
 0x461   :  { %3197 = vmatpush.msrb.mxu0 %v139_v63  ;;  %3186 = vmatpush.msra.mxu3 %v39_v58  ;;  %v247_v32 = vld [vmem:[%s9068_s1 + $0x6d8] sm:$0xff] }
 0x462   :  { %3217 = vmatpush.msrb.mxu1 %v203_v4  ;;  %3237 = vmatpush.msrb.mxu2 %v267_v5  ;;  %v343_v34 = vld [vmem:[%s9068_s1 + $0x9d8] sm:$0xff] }
 0x463   :  { %3198 = vmatpush.msrb.mxu0 %v135_v7  ;;  %3187 = vmatpush.msra.mxu3 %v35_v19  ;;  %v115_v36 = vld [vmem:[%s9068_s1 + $0x2b8] sm:$0xff] }
 0x464   :  { %3218 = vmatpush.msrb.mxu1 %v199_v8  ;;  %3238 = vmatpush.msrb.mxu2 %v263_v12  ;;  %v179_v37 = vld [vmem:[%s9068_s1 + $0x4b8] sm:$0xff] }
 0x465   :  { %3199 = vmatpush.msrb.mxu0 %v131_v13  ;;  %3188 = vmatpush.msra.mxu3 %v31_v9  ;;  %v243_v38 = vld [vmem:[%s9068_s1 + $0x6b8] sm:$0xff] }
 0x466   :  { %3219 = vmatpush.msrb.mxu1 %v195_v15  ;;  %3239 = vmatpush.msrb.mxu2 %v259_v18  ;;  %v339_v39 = vld [vmem:[%s9068_s1 + $0x9b8] sm:$0xff] }
 0x467   :  { %3200 = vmatpush.msrb.mxu0 %v127_v20  ;;  %3253 = vmatpush.msrb.mxu3 %v347_v26  ;;  %v111_v40 = vld [vmem:[%s9068_s1 + $0x298] sm:$0xff] }
 0x468   :  { %3220 = vmatpush.msrb.mxu1 %v191_v21  ;;  %3240 = vmatpush.msrb.mxu2 %v255_v22  ;;  %v175_v41 = vld [vmem:[%s9068_s1 + $0x498] sm:$0xff] }
 0x469   :  { %3201 = vmatpush.msrb.mxu0 %v123_v23  ;;  %3254 = vmatpush.msrb.mxu3 %v343_v34  ;;  %v239_v45 = vld [vmem:[%s9068_s1 + $0x698] sm:$0xff] }
 0x46a   :  { %3221 = vmatpush.msrb.mxu1 %v187_v24  ;;  %3241 = vmatpush.msrb.mxu2 %v251_v25  ;;  %v335_v35 = vld [vmem:[%s9068_s1 + $0x998] sm:$0xff] }
 0x46b   :  { %3202 = vmatpush.msrb.mxu0 %v119_v29  ;;  %v107_v46 = vld [vmem:[%s9068_s1 + $0x278] sm:$0xff]  ;;  %3255 = vmatpush.msrb.mxu3 %v339_v39 }
 0x46c   :  { %3222 = vmatpush.msrb.mxu1 %v183_v31  ;;  %3242 = vmatpush.msrb.mxu2 %v247_v32  ;;  %v171_v52 = vld [vmem:[%s9068_s1 + $0x478] sm:$0xff] }
 0x46d   :  { %3203 = vmatpush.msrb.mxu0 %v115_v36  ;;  %v235_v53 = vld [vmem:[%s9068_s1 + $0x678] sm:$0xff]  ;;  %3256 = vmatpush.msrb.mxu3 %v335_v35 }
 0x46e   :  { %3223 = vmatpush.msrb.mxu1 %v179_v37  ;;  %3243 = vmatpush.msrb.mxu2 %v243_v38  ;;  %v331_v54 = vld [vmem:[%s9068_s1 + $0x978] sm:$0xff] }
 0x46f   :  { %3204 = vmatpush.msrb.mxu0 %v111_v40  ;;  %v103_v55 = vld [vmem:[%s9068_s1 + $0x258] sm:$0xff]  ;;  %3257 = vmatpush.msrb.mxu3 %v331_v54 }
 0x470   :  { %3224 = vmatpush.msrb.mxu1 %v175_v41  ;;  %3244 = vmatpush.msrb.mxu2 %v239_v45  ;;  %v167_v56 = vld [vmem:[%s9068_s1 + $0x458] sm:$0xff] }
 0x471   :  { %3205 = vmatpush.msrb.mxu0 %v107_v46  ;;  %v231_v57 = vld [vmem:[%s9068_s1 + $0x658] sm:$0xff]  ;;  %3189 = vmatmul.f32.vlgmr.msra.gmra.mxu3 %v4258_v48 }
 0x472   :  { %3225 = vmatpush.msrb.mxu1 %v171_v52  ;;  %3245 = vmatpush.msrb.mxu2 %v235_v53  ;;  %v327_v59 = vld [vmem:[%s9068_s1 + $0x958] sm:$0xff] }
 0x473   :  { %v99_v60 = vld [vmem:[%s9068_s1 + $0x238] sm:$0xff]  ;;  %3206 = vmatpush.msrb.mxu0 %v103_v55  ;;  %3258 = vmatpush.msrb.mxu3 %v327_v59 }
 0x474   :  { %v163_v61 = vld [vmem:[%s9068_s1 + $0x438] sm:$0xff]  ;;  %3226 = vmatpush.msrb.mxu1 %v167_v56  ;;  %3246 = vmatpush.msrb.mxu2 %v231_v57 }
 0x475   :  { %v227_v62 = vld [vmem:[%s9068_s1 + $0x638] sm:$0xff]  ;;  %3207 = vmatpush.msrb.mxu0 %v99_v60 }
 0x476   :  { %v323_v63 = vld [vmem:[%s9068_s1 + $0x938] sm:$0xff]  ;;  %3227 = vmatpush.msrb.mxu1 %v163_v61  ;;  %3247 = vmatpush.msrb.mxu2 %v227_v62 }
 0x477   :  { %v95_v4 = vld [vmem:[%s9068_s1 + $0x218] sm:$0xff]  ;;  %3259 = vmatpush.msrb.mxu3 %v323_v63 }
 0x478   :  { %v159_v5 = vld [vmem:[%s9068_s1 + $0x418] sm:$0xff]  ;;  %3208 = vmatpush.msrb.mxu0 %v95_v4 }
 0x479   :  { %v223_v6 = vld [vmem:[%s9068_s1 + $0x618] sm:$0xff]  ;;  %3228 = vmatpush.msrb.mxu1 %v159_v5  ;;  %3209 = vmatmul.f32.vlgmr.msrb.gmra.mxu0 %v4260_v49 }
 0x47a   :  { %v319_v7 = vld [vmem:[%s9068_s1 + $0x918] sm:$0xff]  ;;  %3248 = vmatpush.msrb.mxu2 %v223_v6  ;;  %3229 = vmatmul.f32.vlgmr.msrb.gmra.mxu1 %v4262_v50 }
 0x47b   :  { %v411_v8 = vld [vmem:[%s9068_s1 + $0xbf8] sm:$0xff]  ;;  %3260 = vmatpush.msrb.mxu3 %v319_v7  ;;  %3249 = vmatmul.f32.vlgmr.msrb.gmra.mxu2 %v4264_v51 }
 0x47c   :  { %v475_v12 = vld [vmem:[%s9068_s1 + $0xdf8] sm:$0xff]  ;;  %3273 = vmatpush.msra.mxu0 %v411_v8 }
 0x47d   :  { %v539_v58 = vld [vmem:[%s9068_s1 + $0xff8] sm:$0xff]  ;;  %3293 = vmatpush.msra.mxu1 %v475_v12 }
 0x47e   :  { %v315_v13 = vld [vmem:[%s9068_s1 + $0x8f8] sm:$0xff]  ;;  %3313 = vmatpush.msra.mxu2 %v539_v58 }
 0x47f   :  { %v407_v15 = vld [vmem:[%s9068_s1 + $0xbd8] sm:$0xff]  ;;  %3261 = vmatpush.msrb.mxu3 %v315_v13 }
 0x480   :  { %v471_v18 = vld [vmem:[%s9068_s1 + $0xdd8] sm:$0xff]  ;;  %3274 = vmatpush.msra.mxu0 %v407_v15 }
 0x481   :  { %v535_v19 = vld [vmem:[%s9068_s1 + $0xfd8] sm:$0xff]  ;;  %3294 = vmatpush.msra.mxu1 %v471_v18 }
 0x482   :  { %v311_v20 = vld [vmem:[%s9068_s1 + $0x8d8] sm:$0xff]  ;;  %3314 = vmatpush.msra.mxu2 %v535_v19 }
 0x483   :  { %v403_v21 = vld [vmem:[%s9068_s1 + $0xbb8] sm:$0xff]  ;;  %3262 = vmatpush.msrb.mxu3 %v311_v20 }
 0x484   :  { %v467_v22 = vld [vmem:[%s9068_s1 + $0xdb8] sm:$0xff]  ;;  %3275 = vmatpush.msra.mxu0 %v403_v21 }
 0x485   :  { %v531_v9 = vld [vmem:[%s9068_s1 + $0xfb8] sm:$0xff]  ;;  %3295 = vmatpush.msra.mxu1 %v467_v22 }
 0x486   :  { %v307_v23 = vld [vmem:[%s9068_s1 + $0x8b8] sm:$0xff]  ;;  %3315 = vmatpush.msra.mxu2 %v531_v9 }
 0x487   :  { %v399_v24 = vld [vmem:[%s9068_s1 + $0xb98] sm:$0xff]  ;;  %3263 = vmatpush.msrb.mxu3 %v307_v23 }
 0x488   :  { %v463_v25 = vld [vmem:[%s9068_s1 + $0xd98] sm:$0xff]  ;;  %3276 = vmatpush.msra.mxu0 %v399_v24 }
 0x489   :  { %v527_v26 = vld [vmem:[%s9068_s1 + $0xf98] sm:$0xff]  ;;  %3296 = vmatpush.msra.mxu1 %v463_v25 }
 0x48a   :  { %v303_v29 = vld [vmem:[%s9068_s1 + $0x898] sm:$0xff]  ;;  %3316 = vmatpush.msra.mxu2 %v527_v26 }
 0x48b   :  { %v395_v31 = vld [vmem:[%s9068_s1 + $0xb78] sm:$0xff]  ;;  %3264 = vmatpush.msrb.mxu3 %v303_v29 }
 0x48c   :  { %v459_v32 = vld [vmem:[%s9068_s1 + $0xd78] sm:$0xff]  ;;  %3277 = vmatpush.msra.mxu0 %v395_v31 }
 0x48d   :  { %v523_v34 = vld [vmem:[%s9068_s1 + $0xf78] sm:$0xff]  ;;  %3297 = vmatpush.msra.mxu1 %v459_v32 }
 0x48e   :  { %v299_v36 = vld [vmem:[%s9068_s1 + $0x878] sm:$0xff]  ;;  %3317 = vmatpush.msra.mxu2 %v523_v34 }
 0x48f   :  { %v391_v37 = vld [vmem:[%s9068_s1 + $0xb58] sm:$0xff]  ;;  %3265 = vmatpush.msrb.mxu3 %v299_v36 }
 0x490   :  { %v455_v38 = vld [vmem:[%s9068_s1 + $0xd58] sm:$0xff]  ;;  %3278 = vmatpush.msra.mxu0 %v391_v37 }
 0x491   :  { %v519_v39 = vld [vmem:[%s9068_s1 + $0xf58] sm:$0xff]  ;;  %3298 = vmatpush.msra.mxu1 %v455_v38 }
 0x492   :  { %v295_v40 = vld [vmem:[%s9068_s1 + $0x858] sm:$0xff]  ;;  %3318 = vmatpush.msra.mxu2 %v519_v39 }
 0x493   :  { %v387_v41 = vld [vmem:[%s9068_s1 + $0xb38] sm:$0xff]  ;;  %3266 = vmatpush.msrb.mxu3 %v295_v40 }
 0x494   :  { %v451_v45 = vld [vmem:[%s9068_s1 + $0xd38] sm:$0xff]  ;;  %3279 = vmatpush.msra.mxu0 %v387_v41 }
 0x495   :  { %v515_v35 = vld [vmem:[%s9068_s1 + $0xf38] sm:$0xff]  ;;  %3299 = vmatpush.msra.mxu1 %v451_v45 }
 0x496   :  { %v291_v46 = vld [vmem:[%s9068_s1 + $0x838] sm:$0xff]  ;;  %3319 = vmatpush.msra.mxu2 %v515_v35 }
 0x497   :  { %v383_v52 = vld [vmem:[%s9068_s1 + $0xb18] sm:$0xff]  ;;  %3267 = vmatpush.msrb.mxu3 %v291_v46 }
 0x498   :  { %v447_v53 = vld [vmem:[%s9068_s1 + $0xd18] sm:$0xff]  ;;  %3280 = vmatpush.msra.mxu0 %v383_v52 }
 0x499   :  { %v511_v54 = vld [vmem:[%s9068_s1 + $0xf18] sm:$0xff]  ;;  %3300 = vmatpush.msra.mxu1 %v447_v53 }
 0x49a   :  { %v287_v55 = vld [vmem:[%s9068_s1 + $0x818] sm:$0xff]  ;;  %3320 = vmatpush.msra.mxu2 %v511_v54 }
 0x49b   :  { %v379_v56 = vld [vmem:[%s9068_s1 + $0xaf8] sm:$0xff]  ;;  %3268 = vmatpush.msrb.mxu3 %v287_v55 }
 0x49c   :  { %v443_v57 = vld [vmem:[%s9068_s1 + $0xcf8] sm:$0xff]  ;;  %3281 = vmatpush.msra.mxu0 %v379_v56  ;;  %3269 = vmatmul.f32.vlgmr.msrb.gmra.mxu3 %v4304_v1 }
 0x49d   :  { %v507_v59 = vld [vmem:[%s9068_s1 + $0xef8] sm:$0xff]  ;;  %3301 = vmatpush.msra.mxu1 %v443_v57 }
 0x49e   :  { %v603_v60 = vld [vmem:[%s9068_s1 + $0x11f8] sm:$0xff]  ;;  %3321 = vmatpush.msra.mxu2 %v507_v59 }
 0x49f   :  { %v375_v61 = vld [vmem:[%s9068_s1 + $0xad8] sm:$0xff]  ;;  %3333 = vmatpush.msra.mxu3 %v603_v60 }
 0x4a0   :  { %v439_v62 = vld [vmem:[%s9068_s1 + $0xcd8] sm:$0xff]  ;;  %3282 = vmatpush.msra.mxu0 %v375_v61 }
 0x4a1   :  { %v503_v63 = vld [vmem:[%s9068_s1 + $0xed8] sm:$0xff]  ;;  %3302 = vmatpush.msra.mxu1 %v439_v62 }
 0x4a2   :  { %v599_v4 = vld [vmem:[%s9068_s1 + $0x11d8] sm:$0xff]  ;;  %3322 = vmatpush.msra.mxu2 %v503_v63 }
 0x4a3   :  { %v371_v5 = vld [vmem:[%s9068_s1 + $0xab8] sm:$0xff]  ;;  %3334 = vmatpush.msra.mxu3 %v599_v4 }
 0x4a4   :  { %v435_v6 = vld [vmem:[%s9068_s1 + $0xcb8] sm:$0xff]  ;;  %3283 = vmatpush.msra.mxu0 %v371_v5 }
 0x4a5   :  { %v499_v48 = vld [vmem:[%s9068_s1 + $0xeb8] sm:$0xff]  ;;  %3303 = vmatpush.msra.mxu1 %v435_v6 }
 0x4a6   :  { %v595_v7 = vld [vmem:[%s9068_s1 + $0x11b8] sm:$0xff]  ;;  %3323 = vmatpush.msra.mxu2 %v499_v48 }
 0x4a7   :  { %v367_v8 = vld [vmem:[%s9068_s1 + $0xa98] sm:$0xff]  ;;  %3335 = vmatpush.msra.mxu3 %v595_v7 }
 0x4a8   :  { %v431_v12 = vld [vmem:[%s9068_s1 + $0xc98] sm:$0xff]  ;;  %3284 = vmatpush.msra.mxu0 %v367_v8 }
 0x4a9   :  { %v495_v58 = vld [vmem:[%s9068_s1 + $0xe98] sm:$0xff]  ;;  %3304 = vmatpush.msra.mxu1 %v431_v12 }
 0x4aa   :  { %v591_v13 = vld [vmem:[%s9068_s1 + $0x1198] sm:$0xff]  ;;  %3324 = vmatpush.msra.mxu2 %v495_v58 }
 0x4ab   :  { %v363_v15 = vld [vmem:[%s9068_s1 + $0xa78] sm:$0xff]  ;;  %3336 = vmatpush.msra.mxu3 %v591_v13 }
 0x4ac   :  { %v427_v18 = vld [vmem:[%s9068_s1 + $0xc78] sm:$0xff]  ;;  %3285 = vmatpush.msra.mxu0 %v363_v15 }
 0x4ad   :  { %v491_v19 = vld [vmem:[%s9068_s1 + $0xe78] sm:$0xff]  ;;  %3305 = vmatpush.msra.mxu1 %v427_v18 }
 0x4ae   :  { %v587_v20 = vld [vmem:[%s9068_s1 + $0x1178] sm:$0xff]  ;;  %3325 = vmatpush.msra.mxu2 %v491_v19 }
 0x4af   :  { %v359_v21 = vld [vmem:[%s9068_s1 + $0xa58] sm:$0xff]  ;;  %3337 = vmatpush.msra.mxu3 %v587_v20 }
 0x4b0   :  { %v423_v22 = vld [vmem:[%s9068_s1 + $0xc58] sm:$0xff]  ;;  %3286 = vmatpush.msra.mxu0 %v359_v21 }
 0x4b1   :  { %v487_v9 = vld [vmem:[%s9068_s1 + $0xe58] sm:$0xff]  ;;  %3306 = vmatpush.msra.mxu1 %v423_v22 }
 0x4b2   :  { %v583_v51 = vld [vmem:[%s9068_s1 + $0x1158] sm:$0xff]  ;;  %3326 = vmatpush.msra.mxu2 %v487_v9 }
 0x4b3   :  { %v355_v23 = vld [vmem:[%s9068_s1 + $0xa38] sm:$0xff]  ;;  %3338 = vmatpush.msra.mxu3 %v583_v51 }
 0x4b4   :  { %v419_v24 = vld [vmem:[%s9068_s1 + $0xc38] sm:$0xff]  ;;  %3287 = vmatpush.msra.mxu0 %v355_v23 }
 0x4b5   :  { %v483_v49 = vld [vmem:[%s9068_s1 + $0xe38] sm:$0xff]  ;;  %3307 = vmatpush.msra.mxu1 %v419_v24 }
 0x4b6   :  { %v579_v25 = vld [vmem:[%s9068_s1 + $0x1138] sm:$0xff]  ;;  %3327 = vmatpush.msra.mxu2 %v483_v49 }
 0x4b7   :  { %v351_v1 = vld [vmem:[%s9068_s1 + $0xa18] sm:$0xff]  ;;  %3339 = vmatpush.msra.mxu3 %v579_v25 }
 0x4b8   :  { %v415_v26 = vld [vmem:[%s9068_s1 + $0xc18] sm:$0xff]  ;;  %3288 = vmatpush.msra.mxu0 %v351_v1 }
 0x4b9   :  { %v479_v29 = vld [vmem:[%s9068_s1 + $0xe18] sm:$0xff]  ;;  %3308 = vmatpush.msra.mxu1 %v415_v26  ;;  %3289 = vmatmul.f32.vlgmr.msra.gmra.mxu0 %v4308_v3 }
 0x4ba   :  { %v575_v31 = vld [vmem:[%s9068_s1 + $0x1118] sm:$0xff]  ;;  %3328 = vmatpush.msra.mxu2 %v479_v29  ;;  %3309 = vmatmul.f32.vlgmr.msra.gmra.mxu1 %v4302_v0 }
 0x4bb   :  { %v667_v50 = vld [vmem:[%s9068_s1 + $0x13f8] sm:$0xff]  ;;  %3340 = vmatpush.msra.mxu3 %v575_v31  ;;  %3329 = vmatmul.f32.vlgmr.msra.gmra.mxu2 %v4306_v2 }
 0x4bc   :  { %v731_v32 = vld [vmem:[%s9068_s1 + $0x15f8] sm:$0xff]  ;;  %3353 = vmatpush.msrb.mxu0 %v667_v50 }
 0x4bd   :  { %v795_v34 = vld [vmem:[%s9068_s1 + $0x17f8] sm:$0xff]  ;;  %3373 = vmatpush.msrb.mxu1 %v731_v32 }
 0x4be   :  { %v571_v36 = vld [vmem:[%s9068_s1 + $0x10f8] sm:$0xff]  ;;  %3393 = vmatpush.msrb.mxu2 %v795_v34 }
 0x4bf   :  { %v663_v37 = vld [vmem:[%s9068_s1 + $0x13d8] sm:$0xff]  ;;  %3341 = vmatpush.msra.mxu3 %v571_v36 }
 0x4c0   :  { %v727_v38 = vld [vmem:[%s9068_s1 + $0x15d8] sm:$0xff]  ;;  %3354 = vmatpush.msrb.mxu0 %v663_v37 }
 0x4c1   :  { %v791_v39 = vld [vmem:[%s9068_s1 + $0x17d8] sm:$0xff]  ;;  %3374 = vmatpush.msrb.mxu1 %v727_v38 }
 0x4c2   :  { %v567_v40 = vld [vmem:[%s9068_s1 + $0x10d8] sm:$0xff]  ;;  %3394 = vmatpush.msrb.mxu2 %v791_v39 }
 0x4c3   :  { %v659_v41 = vld [vmem:[%s9068_s1 + $0x13b8] sm:$0xff]  ;;  %3342 = vmatpush.msra.mxu3 %v567_v40 }
 0x4c4   :  { %v723_v45 = vld [vmem:[%s9068_s1 + $0x15b8] sm:$0xff]  ;;  %3355 = vmatpush.msrb.mxu0 %v659_v41 }
 0x4c5   :  { %v787_v35 = vld [vmem:[%s9068_s1 + $0x17b8] sm:$0xff]  ;;  %3375 = vmatpush.msrb.mxu1 %v723_v45 }
 0x4c6   :  { %v563_v2 = vld [vmem:[%s9068_s1 + $0x10b8] sm:$0xff]  ;;  %3395 = vmatpush.msrb.mxu2 %v787_v35 }
 0x4c7   :  { %v655_v46 = vld [vmem:[%s9068_s1 + $0x1398] sm:$0xff]  ;;  %3343 = vmatpush.msra.mxu3 %v563_v2 }
 0x4c8   :  { %v719_v52 = vld [vmem:[%s9068_s1 + $0x1598] sm:$0xff]  ;;  %3356 = vmatpush.msrb.mxu0 %v655_v46 }
 0x4c9   :  { %v783_v53 = vld [vmem:[%s9068_s1 + $0x1798] sm:$0xff]  ;;  %3376 = vmatpush.msrb.mxu1 %v719_v52 }
 0x4ca   :  { %v559_v3 = vld [vmem:[%s9068_s1 + $0x1098] sm:$0xff]  ;;  %3396 = vmatpush.msrb.mxu2 %v783_v53  ;;  %v8203_v53 = vpop.f32.mrf.mxu2 }
 0x4cb   :  { %v651_v54 = vld [vmem:[%s9068_s1 + $0x1378] sm:$0xff]  ;;  %3344 = vmatpush.msra.mxu3 %v559_v3 }
 0x4cc   :  { %v715_v55 = vld [vmem:[%s9068_s1 + $0x1578] sm:$0xff]  ;;  %3357 = vmatpush.msrb.mxu0 %v651_v54 }
 0x4cd   :  { %v779_v56 = vld [vmem:[%s9068_s1 + $0x1778] sm:$0xff]  ;;  %3377 = vmatpush.msrb.mxu1 %v715_v55 }
 0x4ce   :  { %v555_v0 = vld [vmem:[%s9068_s1 + $0x1078] sm:$0xff]  ;;  %3397 = vmatpush.msrb.mxu2 %v779_v56 }
 0x4cf   :  { %v647_v57 = vld [vmem:[%s9068_s1 + $0x1358] sm:$0xff]  ;;  %3345 = vmatpush.msra.mxu3 %v555_v0 }
 0x4d0   :  { %v711_v59 = vld [vmem:[%s9068_s1 + $0x1558] sm:$0xff]  ;;  %3358 = vmatpush.msrb.mxu0 %v647_v57  ;;  %v8228_v57 = vpop.f32.mrf.mxu1 }
 0x4d1   :  { %v775_v60 = vld [vmem:[%s9068_s1 + $0x1758] sm:$0xff]  ;;  %3378 = vmatpush.msrb.mxu1 %v711_v59  ;;  %v8230_v59 = vpop.f32.mrf.mxu3 }
 0x4d2   :  { %v551_v61 = vld [vmem:[%s9068_s1 + $0x1058] sm:$0xff]  ;;  %3398 = vmatpush.msrb.mxu2 %v775_v60 }
 0x4d3   :  { %v643_v62 = vld [vmem:[%s9068_s1 + $0x1338] sm:$0xff]  ;;  %3346 = vmatpush.msra.mxu3 %v551_v61 }
 0x4d4   :  { %v707_v63 = vld [vmem:[%s9068_s1 + $0x1538] sm:$0xff]  ;;  %3359 = vmatpush.msrb.mxu0 %v643_v62 }
 0x4d5   :  { %v771_v4 = vld [vmem:[%s9068_s1 + $0x1738] sm:$0xff]  ;;  %3379 = vmatpush.msrb.mxu1 %v707_v63 }
 0x4d6   :  { %v547_v5 = vld [vmem:[%s9068_s1 + $0x1038] sm:$0xff]  ;;  %3399 = vmatpush.msrb.mxu2 %v771_v4 }
 0x4d7   :  { %v639_v6 = vld [vmem:[%s9068_s1 + $0x1318] sm:$0xff]  ;;  %3347 = vmatpush.msra.mxu3 %v547_v5 }
 0x4d8   :  { %v703_v48 = vld [vmem:[%s9068_s1 + $0x1518] sm:$0xff]  ;;  %3360 = vmatpush.msrb.mxu0 %v639_v6 }
 0x4d9   :  { %v767_v7 = vld [vmem:[%s9068_s1 + $0x1718] sm:$0xff]  ;;  %3380 = vmatpush.msrb.mxu1 %v703_v48  ;;  %v8257_v48 = vpop.f32.mrf.mxu0 }
 0x4da   :  { %v543_v8 = vld [vmem:[%s9068_s1 + $0x1018] sm:$0xff]  ;;  %3400 = vmatpush.msrb.mxu2 %v767_v7 }
 0x4db   :  { %v635_v12 = vld [vmem:[%s9068_s1 + $0x12f8] sm:$0xff]  ;;  %3348 = vmatpush.msra.mxu3 %v543_v8 }
 0x4dc   :  { %v699_v58 = vld [vmem:[%s9068_s1 + $0x14f8] sm:$0xff]  ;;  %3361 = vmatpush.msrb.mxu0 %v635_v12  ;;  %3349 = vmatmul.f32.vlgmr.msra.gmra.mxu3 %v4383_v27 }
 0x4dd   :  { %v763_v13 = vld [vmem:[%s9068_s1 + $0x16f8] sm:$0xff]  ;;  %3381 = vmatpush.msrb.mxu1 %v699_v58 }
 0x4de   :  { %v859_v15 = vld [vmem:[%s9068_s1 + $0x19f8] sm:$0xff]  ;;  %3401 = vmatpush.msrb.mxu2 %v763_v13  ;;  %v8271_v13 = vpop.f32.mrf.mxu2 }
 0x4df   :  { %v631_v18 = vld [vmem:[%s9068_s1 + $0x12d8] sm:$0xff]  ;;  %3413 = vmatpush.msrb.mxu3 %v859_v15 }
 0x4e0   :  { %v695_v19 = vld [vmem:[%s9068_s1 + $0x14d8] sm:$0xff]  ;;  %3362 = vmatpush.msrb.mxu0 %v631_v18 }
 0x4e1   :  { %v759_v20 = vld [vmem:[%s9068_s1 + $0x16d8] sm:$0xff]  ;;  %3382 = vmatpush.msrb.mxu1 %v695_v19 }
 0x4e2   :  { %v855_v21 = vld [vmem:[%s9068_s1 + $0x19d8] sm:$0xff]  ;;  %3402 = vmatpush.msrb.mxu2 %v759_v20 }
 0x4e3   :  { %v627_v22 = vld [vmem:[%s9068_s1 + $0x12b8] sm:$0xff]  ;;  %3414 = vmatpush.msrb.mxu3 %v855_v21 }
 0x4e4   :  { %v691_v9 = vld [vmem:[%s9068_s1 + $0x14b8] sm:$0xff]  ;;  %3363 = vmatpush.msrb.mxu0 %v627_v22 }
 0x4e5   :  { %v755_v27 = vld [vmem:[%s9068_s1 + $0x16b8] sm:$0xff]  ;;  %3383 = vmatpush.msrb.mxu1 %v691_v9 }
 0x4e6   :  { %v851_v51 = vld [vmem:[%s9068_s1 + $0x19b8] sm:$0xff]  ;;  %3403 = vmatpush.msrb.mxu2 %v755_v27 }
 0x4e7   :  { %v623_v23 = vld [vmem:[%s9068_s1 + $0x1298] sm:$0xff]  ;;  %3415 = vmatpush.msrb.mxu3 %v851_v51  ;;  %v8297_v51 = vpop.f32.mrf.mxu1 }
 0x4e8   :  { %v687_v24 = vld [vmem:[%s9068_s1 + $0x1498] sm:$0xff]  ;;  %3364 = vmatpush.msrb.mxu0 %v623_v23  ;;  %v8299_v23 = vpop.f32.mrf.mxu3 }
 0x4e9   :  { %v751_v49 = vld [vmem:[%s9068_s1 + $0x1698] sm:$0xff]  ;;  %3384 = vmatpush.msrb.mxu1 %v687_v24 }
 0x4ea   :  { %v847_v25 = vld [vmem:[%s9068_s1 + $0x1998] sm:$0xff]  ;;  %3404 = vmatpush.msrb.mxu2 %v751_v49 }
 0x4eb   :  { %v619_v1 = vld [vmem:[%s9068_s1 + $0x1278] sm:$0xff]  ;;  %3416 = vmatpush.msrb.mxu3 %v847_v25 }
 0x4ec   :  { %v683_v26 = vld [vmem:[%s9068_s1 + $0x1478] sm:$0xff]  ;;  %3365 = vmatpush.msrb.mxu0 %v619_v1 }
 0x4ed   :  { %v747_v29 = vld [vmem:[%s9068_s1 + $0x1678] sm:$0xff]  ;;  %3385 = vmatpush.msrb.mxu1 %v683_v26 }
 0x4ee   :  { %v843_v31 = vld [vmem:[%s9068_s1 + $0x1978] sm:$0xff]  ;;  %3405 = vmatpush.msrb.mxu2 %v747_v29 }
 0x4ef   :  { %v615_v50 = vld [vmem:[%s9068_s1 + $0x1258] sm:$0xff]  ;;  %3417 = vmatpush.msrb.mxu3 %v843_v31 }
 0x4f0   :  { %v679_v32 = vld [vmem:[%s9068_s1 + $0x1458] sm:$0xff]  ;;  %3366 = vmatpush.msrb.mxu0 %v615_v50  ;;  %v8322_v50 = vpop.f32.mrf.mxu0 }
 0x4f1   :  { %v743_v34 = vld [vmem:[%s9068_s1 + $0x1658] sm:$0xff]  ;;  %3386 = vmatpush.msrb.mxu1 %v679_v32  ;;  %v8324_v32 = vpop.f32.mrf.mxu2 }
 0x4f2   :  { %v839_v36 = vld [vmem:[%s9068_s1 + $0x1958] sm:$0xff]  ;;  %3406 = vmatpush.msrb.mxu2 %v743_v34 }
 0x4f3   :  { %v611_v37 = vld [vmem:[%s9068_s1 + $0x1238] sm:$0xff]  ;;  %3418 = vmatpush.msrb.mxu3 %v839_v36 }
 0x4f4   :  { %v675_v38 = vld [vmem:[%s9068_s1 + $0x1438] sm:$0xff]  ;;  %3367 = vmatpush.msrb.mxu0 %v611_v37 }
 0x4f5   :  { %v739_v39 = vld [vmem:[%s9068_s1 + $0x1638] sm:$0xff]  ;;  %3387 = vmatpush.msrb.mxu1 %v675_v38 }
 0x4f6   :  { %v835_v40 = vld [vmem:[%s9068_s1 + $0x1938] sm:$0xff]  ;;  %3407 = vmatpush.msrb.mxu2 %v739_v39 }
 0x4f7   :  { %v607_v41 = vld [vmem:[%s9068_s1 + $0x1218] sm:$0xff]  ;;  %3419 = vmatpush.msrb.mxu3 %v835_v40 }
 0x4f8   :  { %v671_v45 = vld [vmem:[%s9068_s1 + $0x1418] sm:$0xff]  ;;  %3368 = vmatpush.msrb.mxu0 %v607_v41 }
 0x4f9   :  { %v735_v35 = vld [vmem:[%s9068_s1 + $0x1618] sm:$0xff]  ;;  %3388 = vmatpush.msrb.mxu1 %v671_v45  ;;  %3369 = vmatmul.f32.vlgmr.msrb.gmra.mxu0 %v4390_v30  ;;  %v8351_v45 = vpop.f32.mrf.mxu1 }
 0x4fa   :  { %v831_v2 = vld [vmem:[%s9068_s1 + $0x1918] sm:$0xff]  ;;  %3408 = vmatpush.msrb.mxu2 %v735_v35  ;;  %3389 = vmatmul.f32.vlgmr.msrb.gmra.mxu1 %v4385_v28  ;;  %v8353_v35 = vpop.f32.mrf.mxu3 }
 0x4fb   :  { %v923_v46 = vld [vmem:[%s9068_s1 + $0x1bf8] sm:$0xff]  ;;  %3420 = vmatpush.msrb.mxu3 %v831_v2  ;;  %3409 = vmatmul.f32.vlgmr.msrb.gmra.mxu2 %v4398_v33 }
 0x4fc   :  { %v987_v52 = vld [vmem:[%s9068_s1 + $0x1df8] sm:$0xff]  ;;  %3433 = vmatpush.msra.mxu0 %v923_v46 }
 0x4fd   :  { %v1051_v3 = vld [vmem:[%s9068_s1 + $0x1ff8] sm:$0xff]  ;;  %3453 = vmatpush.msra.mxu1 %v987_v52 }
 0x4fe   :  { %v827_v54 = vld [vmem:[%s9068_s1 + $0x18f8] sm:$0xff]  ;;  %3473 = vmatpush.msra.mxu2 %v1051_v3 }
 0x4ff   :  { %v919_v55 = vld [vmem:[%s9068_s1 + $0x1bd8] sm:$0xff]  ;;  %3421 = vmatpush.msrb.mxu3 %v827_v54 }
 0x500   :  { %v983_v56 = vld [vmem:[%s9068_s1 + $0x1dd8] sm:$0xff]  ;;  %3434 = vmatpush.msra.mxu0 %v919_v55 }
 0x501   :  { %v1047_v0 = vld [vmem:[%s9068_s1 + $0x1fd8] sm:$0xff]  ;;  %3454 = vmatpush.msra.mxu1 %v983_v56 }
 0x502   :  { %v823_v30 = vld [vmem:[%s9068_s1 + $0x18d8] sm:$0xff]  ;;  %3474 = vmatpush.msra.mxu2 %v1047_v0 }
 0x503   :  { %v915_v33 = vld [vmem:[%s9068_s1 + $0x1bb8] sm:$0xff]  ;;  %3422 = vmatpush.msrb.mxu3 %v823_v30  ;;  %v8379_v30 = vpop.f32.mrf.mxu0 }
 0x504   :  { %v979_v60 = vld [vmem:[%s9068_s1 + $0x1db8] sm:$0xff]  ;;  %3435 = vmatpush.msra.mxu0 %v915_v33  ;;  %v8381_v33 = vpop.f32.mrf.mxu2 }
 0x505   :  { %v1043_v61 = vld [vmem:[%s9068_s1 + $0x1fb8] sm:$0xff]  ;;  %3455 = vmatpush.msra.mxu1 %v979_v60 }
 0x506   :  { %v819_v62 = vld [vmem:[%s9068_s1 + $0x18b8] sm:$0xff]  ;;  %3475 = vmatpush.msra.mxu2 %v1043_v61 }
 0x507   :  { %v911_v63 = vld [vmem:[%s9068_s1 + $0x1b98] sm:$0xff]  ;;  %3423 = vmatpush.msrb.mxu3 %v819_v62 }
 0x508   :  { %v975_v28 = vld [vmem:[%s9068_s1 + $0x1d98] sm:$0xff]  ;;  %3436 = vmatpush.msra.mxu0 %v911_v63 }
 0x509   :  { %v1039_v4 = vld [vmem:[%s9068_s1 + $0x1f98] sm:$0xff]  ;;  %3456 = vmatpush.msra.mxu1 %v975_v28 }
 0x50a   :  { %v815_v5 = vld [vmem:[%s9068_s1 + $0x1898] sm:$0xff]  ;;  %3476 = vmatpush.msra.mxu2 %v1039_v4 }
 0x50b   :  { %v907_v6 = vld [vmem:[%s9068_s1 + $0x1b78] sm:$0xff]  ;;  %3424 = vmatpush.msrb.mxu3 %v815_v5 }
 0x50c   :  { %v971_v7 = vld [vmem:[%s9068_s1 + $0x1d78] sm:$0xff]  ;;  %3437 = vmatpush.msra.mxu0 %v907_v6 }
 0x50d   :  { %v1035_v8 = vld [vmem:[%s9068_s1 + $0x1f78] sm:$0xff]  ;;  %3457 = vmatpush.msra.mxu1 %v971_v7  ;;  %v8407_v7 = vpop.f32.mrf.mxu1 }
 0x50e   :  { %v811_v12 = vld [vmem:[%s9068_s1 + $0x1878] sm:$0xff]  ;;  %3477 = vmatpush.msra.mxu2 %v1035_v8  ;;  %v8409_v8 = vpop.f32.mrf.mxu3 }
 0x50f   :  { %v903_v58 = vld [vmem:[%s9068_s1 + $0x1b58] sm:$0xff]  ;;  %3425 = vmatpush.msrb.mxu3 %v811_v12 }
 0x510   :  { %v967_v15 = vld [vmem:[%s9068_s1 + $0x1d58] sm:$0xff]  ;;  %3438 = vmatpush.msra.mxu0 %v903_v58 }
 0x511   :  { %v1031_v18 = vld [vmem:[%s9068_s1 + $0x1f58] sm:$0xff]  ;;  %3458 = vmatpush.msra.mxu1 %v967_v15 }
 0x512   :  { %v807_v19 = vld [vmem:[%s9068_s1 + $0x1858] sm:$0xff]  ;;  %3478 = vmatpush.msra.mxu2 %v1031_v18 }
 0x513   :  { %v899_v20 = vld [vmem:[%s9068_s1 + $0x1b38] sm:$0xff]  ;;  %3426 = vmatpush.msrb.mxu3 %v807_v19 }
 0x514   :  { %v963_v21 = vld [vmem:[%s9068_s1 + $0x1d38] sm:$0xff]  ;;  %3439 = vmatpush.msra.mxu0 %v899_v20 }
 0x515   :  { %v1027_v22 = vld [vmem:[%s9068_s1 + $0x1f38] sm:$0xff]  ;;  %3459 = vmatpush.msra.mxu1 %v963_v21  ;;  %v8429_v21 = vpop.f32.mrf.mxu0 }
 0x516   :  { %v803_v9 = vld [vmem:[%s9068_s1 + $0x1838] sm:$0xff]  ;;  %3479 = vmatpush.msra.mxu2 %v1027_v22  ;;  %v8431_v22 = vpop.f32.mrf.mxu2 }
 0x517   :  { %v895_v27 = vld [vmem:[%s9068_s1 + $0x1b18] sm:$0xff]  ;;  %3427 = vmatpush.msrb.mxu3 %v803_v9 }
 0x518   :  { %v959_v24 = vld [vmem:[%s9068_s1 + $0x1d18] sm:$0xff]  ;;  %3440 = vmatpush.msra.mxu0 %v895_v27 }
 0x519   :  { %v1023_v49 = vld [vmem:[%s9068_s1 + $0x1f18] sm:$0xff]  ;;  %3460 = vmatpush.msra.mxu1 %v959_v24 }
 0x51a   :  { %v799_v25 = vld [vmem:[%s9068_s1 + $0x1818] sm:$0xff]  ;;  %3480 = vmatpush.msra.mxu2 %v1023_v49 }
 0x51b   :  { %v891_v1 = vld [vmem:[%s9068_s1 + $0x1af8] sm:$0xff]  ;;  %3428 = vmatpush.msrb.mxu3 %v799_v25 }
 0x51c   :  { %v955_v26 = vld [vmem:[%s9068_s1 + $0x1cf8] sm:$0xff]  ;;  %3441 = vmatpush.msra.mxu0 %v891_v1  ;;  %3429 = vmatmul.f32.vlgmr.msrb.gmra.mxu3 %v4588_v42  ;;  %v8456_v1 = vpop.f32.mrf.mxu1 }
 0x51d   :  { %v1019_v29 = vld [vmem:[%s9068_s1 + $0x1ef8] sm:$0xff]  ;;  %3461 = vmatpush.msra.mxu1 %v955_v26  ;;  %v8458_v26 = vpop.f32.mrf.mxu3 }
 0x51e   :  { %v1115_v31 = vld [vmem:[%s9068_s1 + $0x21f8] sm:$0xff]  ;;  %3481 = vmatpush.msra.mxu2 %v1019_v29 }
 0x51f   :  { %v887_v34 = vld [vmem:[%s9068_s1 + $0x1ad8] sm:$0xff]  ;;  %3493 = vmatpush.msra.mxu3 %v1115_v31 }
 0x520   :  { %v951_v36 = vld [vmem:[%s9068_s1 + $0x1cd8] sm:$0xff]  ;;  %3442 = vmatpush.msra.mxu0 %v887_v34 }
 0x521   :  { %v1015_v37 = vld [vmem:[%s9068_s1 + $0x1ed8] sm:$0xff]  ;;  %3462 = vmatpush.msra.mxu1 %v951_v36 }
 0x522   :  { %v1111_v38 = vld [vmem:[%s9068_s1 + $0x21d8] sm:$0xff]  ;;  %3482 = vmatpush.msra.mxu2 %v1015_v37 }
 0x523   :  { %v883_v39 = vld [vmem:[%s9068_s1 + $0x1ab8] sm:$0xff]  ;;  %3494 = vmatpush.msra.mxu3 %v1111_v38 }
 0x524   :  { %v947_v40 = vld [vmem:[%s9068_s1 + $0x1cb8] sm:$0xff]  ;;  %3443 = vmatpush.msra.mxu0 %v883_v39 }
 0x525   :  { %v1011_v42 = vld [vmem:[%s9068_s1 + $0x1eb8] sm:$0xff]  ;;  %3463 = vmatpush.msra.mxu1 %v947_v40  ;;  %v8485_v40 = vpop.f32.mrf.mxu0 }
 0x526   :  { %v1107_v41 = vld [vmem:[%s9068_s1 + $0x21b8] sm:$0xff]  ;;  %3483 = vmatpush.msra.mxu2 %v1011_v42  ;;  %v8487_v42 = vpop.f32.mrf.mxu2 }
 0x527   :  { %v879_v2 = vld [vmem:[%s9068_s1 + $0x1a98] sm:$0xff]  ;;  %3495 = vmatpush.msra.mxu3 %v1107_v41 }
 0x528   :  { %v943_v46 = vld [vmem:[%s9068_s1 + $0x1c98] sm:$0xff]  ;;  %3444 = vmatpush.msra.mxu0 %v879_v2 }
 0x529   :  { %v1007_v52 = vld [vmem:[%s9068_s1 + $0x1e98] sm:$0xff]  ;;  %3464 = vmatpush.msra.mxu1 %v943_v46 }
 0x52a   :  { %v1103_v3 = vld [vmem:[%s9068_s1 + $0x2198] sm:$0xff]  ;;  %3484 = vmatpush.msra.mxu2 %v1007_v52 }
 0x52b   :  { %v875_v54 = vld [vmem:[%s9068_s1 + $0x1a78] sm:$0xff]  ;;  %3496 = vmatpush.msra.mxu3 %v1103_v3 }
 0x52c   :  { %v939_v55 = vld [vmem:[%s9068_s1 + $0x1c78] sm:$0xff]  ;;  %3445 = vmatpush.msra.mxu0 %v875_v54 }
 0x52d   :  { %v1003_v56 = vld [vmem:[%s9068_s1 + $0x1e78] sm:$0xff]  ;;  %3465 = vmatpush.msra.mxu1 %v939_v55 }
 0x52e   :  { %v1099_v0 = vld [vmem:[%s9068_s1 + $0x2178] sm:$0xff]  ;;  %3485 = vmatpush.msra.mxu2 %v1003_v56 }
 0x52f   :  { %v871_v60 = vld [vmem:[%s9068_s1 + $0x1a58] sm:$0xff]  ;;  %3497 = vmatpush.msra.mxu3 %v1099_v0  ;;  %v8513_v0 = vpop.f32.mrf.mxu1 }
 0x530   :  { %v935_v61 = vld [vmem:[%s9068_s1 + $0x1c58] sm:$0xff]  ;;  %3446 = vmatpush.msra.mxu0 %v871_v60  ;;  %v8515_v60 = vpop.f32.mrf.mxu3 }
 0x531   :  { %v999_v62 = vld [vmem:[%s9068_s1 + $0x1e58] sm:$0xff]  ;;  %3466 = vmatpush.msra.mxu1 %v935_v61 }
 0x532   :  { %v1095_v63 = vld [vmem:[%s9068_s1 + $0x2158] sm:$0xff]  ;;  %3486 = vmatpush.msra.mxu2 %v999_v62 }
 0x533   :  { %v867_v28 = vld [vmem:[%s9068_s1 + $0x1a38] sm:$0xff]  ;;  %3498 = vmatpush.msra.mxu3 %v1095_v63 }
 0x534   :  { %v931_v4 = vld [vmem:[%s9068_s1 + $0x1c38] sm:$0xff]  ;;  %3447 = vmatpush.msra.mxu0 %v867_v28 }
 0x535   :  { %v995_v5 = vld [vmem:[%s9068_s1 + $0x1e38] sm:$0xff]  ;;  %3467 = vmatpush.msra.mxu1 %v931_v4 }
 0x536   :  { %v1091_v6 = vld [vmem:[%s9068_s1 + $0x2138] sm:$0xff]  ;;  %3487 = vmatpush.msra.mxu2 %v995_v5 }
 0x537   :  { %v863_v12 = vld [vmem:[%s9068_s1 + $0x1a18] sm:$0xff]  ;;  %3499 = vmatpush.msra.mxu3 %v1091_v6  ;;  %v8538_v6 = vld [vmem:[%s9069_s2] sm:$0xf] }
 0x538   :  { %v927_v58 = vld [vmem:[%s9068_s1 + $0x1c18] sm:$0xff]  ;;  %3448 = vmatpush.msra.mxu0 %v863_v12  ;;  %v1600_v12 = vperm.slane %v8538_v6, 2 }
 0x539   :  { %v991_v15 = vld [vmem:[%s9068_s1 + $0x1e18] sm:$0xff]  ;;  %3468 = vmatpush.msra.mxu1 %v927_v58  ;;  %3449 = vmatmul.f32.vlgmr.msra.gmra.mxu0 %v4592_v44 }
 0x53a   :  { %v1087_v18 = vld [vmem:[%s9068_s1 + $0x2118] sm:$0xff]  ;;  %3488 = vmatpush.msra.mxu2 %v991_v15  ;;  %3469 = vmatmul.f32.vlgmr.msra.gmra.mxu1 %v4590_v43 }
 0x53b   :  { %v1179_v19 = vld [vmem:[%s9068_s1 + $0x23f8] sm:$0xff]  ;;  %3500 = vmatpush.msra.mxu3 %v1087_v18  ;;  %3489 = vmatmul.f32.vlgmr.msra.gmra.mxu2 %v4600_v47  ;;  %v8547_v18 = vpop.f32.mrf.mxu0 }
 0x53c   :  { %v1243_v20 = vld [vmem:[%s9068_s1 + $0x25f8] sm:$0xff]  ;;  %3513 = vmatpush.msrb.mxu0 %v1179_v19  ;;  %v2690_v19 = vpop.f32.mrf.mxu2 }
 0x53d   :  { %v1307_v9 = vld [vmem:[%s9068_s1 + $0x27f8] sm:$0xff]  ;;  %3533 = vmatpush.msrb.mxu1 %v1243_v20 }
 0x53e   :  { %v1083_v27 = vld [vmem:[%s9068_s1 + $0x20f8] sm:$0xff]  ;;  %3553 = vmatpush.msrb.mxu2 %v1307_v9 }
 0x53f   :  { %v1175_v24 = vld [vmem:[%s9068_s1 + $0x23d8] sm:$0xff]  ;;  %3501 = vmatpush.msra.mxu3 %v1083_v27 }
 0x540   :  { %v1239_v49 = vld [vmem:[%s9068_s1 + $0x25d8] sm:$0xff]  ;;  %3514 = vmatpush.msrb.mxu0 %v1175_v24 }
 0x541   :  { %v1303_v25 = vld [vmem:[%s9068_s1 + $0x27d8] sm:$0xff]  ;;  %3534 = vmatpush.msrb.mxu1 %v1239_v49 }
 0x542   :  { %v1079_v44 = vld [vmem:[%s9068_s1 + $0x20d8] sm:$0xff]  ;;  %3554 = vmatpush.msrb.mxu2 %v1303_v25  ;;  %v2691_v25 = vadd.f32 %v2690_v19, %v1600_v12 }
 0x543   :  { %v1171_v47 = vld [vmem:[%s9068_s1 + $0x23b8] sm:$0xff]  ;;  %3502 = vmatpush.msra.mxu3 %v1079_v44 }
 0x544   :  { %v1235_v29 = vld [vmem:[%s9068_s1 + $0x25b8] sm:$0xff]  ;;  %3515 = vmatpush.msrb.mxu0 %v1171_v47 }
 0x545   :  { %v1299_v31 = vld [vmem:[%s9068_s1 + $0x27b8] sm:$0xff]  ;;  %3535 = vmatpush.msrb.mxu1 %v1235_v29  ;;  %v1599_v29 = vperm.slane %v8538_v6, 1 }
 0x546   :  { %v1075_v34 = vld [vmem:[%s9068_s1 + $0x20b8] sm:$0xff]  ;;  %3555 = vmatpush.msrb.mxu2 %v1299_v31  ;;  %v8572_v31 = vpop.f32.mrf.mxu1 }
 0x547   :  { %v1167_v36 = vld [vmem:[%s9068_s1 + $0x2398] sm:$0xff]  ;;  %3503 = vmatpush.msra.mxu3 %v1075_v34  ;;  %v2710_v34 = vpop.f32.mrf.mxu3 }
 0x548   :  { %v1231_v43 = vld [vmem:[%s9068_s1 + $0x2598] sm:$0xff]  ;;  %3516 = vmatpush.msrb.mxu0 %v1167_v36 }
 0x549   :  { %v1295_v37 = vld [vmem:[%s9068_s1 + $0x2798] sm:$0xff]  ;;  %3536 = vmatpush.msrb.mxu1 %v1231_v43 }
 0x54a   :  { %v1071_v38 = vld [vmem:[%s9068_s1 + $0x2098] sm:$0xff]  ;;  %3556 = vmatpush.msrb.mxu2 %v1295_v37 }
 0x54b   :  { %v1163_v39 = vld [vmem:[%s9068_s1 + $0x2378] sm:$0xff]  ;;  %3504 = vmatpush.msra.mxu3 %v1071_v38 }
 0x54c   :  { %v1227_v41 = vld [vmem:[%s9068_s1 + $0x2578] sm:$0xff]  ;;  %3517 = vmatpush.msrb.mxu0 %v1163_v39 }
 0x54d   :  { %v1291_v2 = vld [vmem:[%s9068_s1 + $0x2778] sm:$0xff]  ;;  %3537 = vmatpush.msrb.mxu1 %v1227_v41  ;;  %v2711_v41 = vadd.f32 %v2710_v34, %v2691_v25 }
 0x54e   :  { %v1067_v46 = vld [vmem:[%s9068_s1 + $0x2078] sm:$0xff]  ;;  %3557 = vmatpush.msrb.mxu2 %v1291_v2  ;;  %v2750_v12 = vpop.f32.mrf.mxu1 }
 0x54f   :  { %v1159_v52 = vld [vmem:[%s9068_s1 + $0x2358] sm:$0xff]  ;;  %3505 = vmatpush.msra.mxu3 %v1067_v46 }
 0x550   :  { %v1223_v3 = vld [vmem:[%s9068_s1 + $0x2558] sm:$0xff]  ;;  %3518 = vmatpush.msrb.mxu0 %v1159_v52  ;;  %v2191_v52 = vadd.f32 %v8228_v57, %v1599_v29 }
 0x551   :  { %v1287_v54 = vld [vmem:[%s9068_s1 + $0x2758] sm:$0xff]  ;;  %3538 = vmatpush.msrb.mxu1 %v1223_v3  ;;  %v2730_v3 = vpop.f32.mrf.mxu0 }
 0x552   :  { %v1063_v55 = vld [vmem:[%s9068_s1 + $0x2058] sm:$0xff]  ;;  %3558 = vmatpush.msrb.mxu2 %v1287_v54 }
 0x553   :  { %v1155_v56 = vld [vmem:[%s9068_s1 + $0x2338] sm:$0xff]  ;;  %3506 = vmatpush.msra.mxu3 %v1063_v55 }
 0x554   :  { %v1219_v61 = vld [vmem:[%s9068_s1 + $0x2538] sm:$0xff]  ;;  %3519 = vmatpush.msrb.mxu0 %v1155_v56 }
 0x555   :  { %v1283_v62 = vld [vmem:[%s9068_s1 + $0x2738] sm:$0xff]  ;;  %3539 = vmatpush.msrb.mxu1 %v1219_v61 }
 0x556   :  { %v1059_v63 = vld [vmem:[%s9068_s1 + $0x2038] sm:$0xff]  ;;  %3559 = vmatpush.msrb.mxu2 %v1283_v62 }
 0x557   :  { %v1151_v28 = vld [vmem:[%s9068_s1 + $0x2318] sm:$0xff]  ;;  %3507 = vmatpush.msra.mxu3 %v1059_v63  ;;  %v2731_v63 = vadd.f32 %v2730_v3, %v2711_v41 }
 0x558   :  { %v1215_v4 = vld [vmem:[%s9068_s1 + $0x2518] sm:$0xff]  ;;  %3520 = vmatpush.msrb.mxu0 %v1151_v28 }
 0x559   :  { %v1279_v5 = vld [vmem:[%s9068_s1 + $0x2718] sm:$0xff]  ;;  %3540 = vmatpush.msrb.mxu1 %v1215_v4  ;;  %v2810_v3 = vpop.f32.mrf.mxu0 }
 0x55a   :  { %v1055_v58 = vld [vmem:[%s9068_s1 + $0x2018] sm:$0xff]  ;;  %3560 = vmatpush.msrb.mxu2 %v1279_v5  ;;  %v2211_v5 = vadd.f32 %v8203_v53, %v2191_v52 }
 0x55b   :  { %v1147_v15 = vld [vmem:[%s9068_s1 + $0x22f8] sm:$0xff]  ;;  %3508 = vmatpush.msra.mxu3 %v1055_v58 }
 0x55c   :  { %v1211_v20 = vld [vmem:[%s9068_s1 + $0x24f8] sm:$0xff]  ;;  %3521 = vmatpush.msrb.mxu0 %v1147_v15  ;;  %3509 = vmatmul.f32.vlgmr.msra.gmra.mxu3 %v4948_v10  ;;  %v2231_v25 = vadd.f32 %v8230_v59, %v2211_v5  ;;  %v2830_v5 = vpop.f32.mrf.mxu1 }
 0x55d   :  { %v1275_v9 = vld [vmem:[%s9068_s1 + $0x26f8] sm:$0xff]  ;;  %3541 = vmatpush.msrb.mxu1 %v1211_v20 }
 0x55e   :  { %v1371_v27 = vld [vmem:[%s9068_s1 + $0x29f8] sm:$0xff]  ;;  %3561 = vmatpush.msrb.mxu2 %v1275_v9 }
 0x55f   :  { %v1143_v24 = vld [vmem:[%s9068_s1 + $0x22d8] sm:$0xff]  ;;  %3573 = vmatpush.msrb.mxu3 %v1371_v27  ;;  %v2751_v27 = vadd.f32 %v2750_v12, %v2731_v63 }
 0x560   :  { %v1207_v49 = vld [vmem:[%s9068_s1 + $0x24d8] sm:$0xff]  ;;  %3522 = vmatpush.msrb.mxu0 %v1143_v24 }
 0x561   :  { %v1271_v44 = vld [vmem:[%s9068_s1 + $0x26d8] sm:$0xff]  ;;  %3542 = vmatpush.msrb.mxu1 %v1207_v49 }
 0x562   :  { %v1367_v47 = vld [vmem:[%s9068_s1 + $0x29d8] sm:$0xff]  ;;  %3562 = vmatpush.msrb.mxu2 %v1271_v44  ;;  %v2770_v44 = vpop.f32.mrf.mxu2 }
 0x563   :  { %v1139_v10 = vld [vmem:[%s9068_s1 + $0x22b8] sm:$0xff]  ;;  %3574 = vmatpush.msrb.mxu3 %v1367_v47 }
 0x564   :  { %v1203_v36 = vld [vmem:[%s9068_s1 + $0x24b8] sm:$0xff]  ;;  %3523 = vmatpush.msrb.mxu0 %v1139_v10  ;;  %v2771_v10 = vadd.f32 %v2770_v44, %v2751_v27 }
 0x565   :  { %v1267_v43 = vld [vmem:[%s9068_s1 + $0x26b8] sm:$0xff]  ;;  %3543 = vmatpush.msrb.mxu1 %v1203_v36 }
 0x566   :  { %v1363_v37 = vld [vmem:[%s9068_s1 + $0x29b8] sm:$0xff]  ;;  %3563 = vmatpush.msrb.mxu2 %v1267_v43  ;;  %v2251_v43 = vadd.f32 %v8257_v48, %v2231_v25 }
 0x567   :  { %v1135_v38 = vld [vmem:[%s9068_s1 + $0x2298] sm:$0xff]  ;;  %3575 = vmatpush.msrb.mxu3 %v1363_v37  ;;  %v2790_v37 = vpop.f32.mrf.mxu3 }
 0x568   :  { %v1199_v39 = vld [vmem:[%s9068_s1 + $0x2498] sm:$0xff]  ;;  %3524 = vmatpush.msrb.mxu0 %v1135_v38  ;;  %v2271_v52 = vadd.f32 %v8297_v51, %v2251_v43 }
 0x569   :  { %v1263_v2 = vld [vmem:[%s9068_s1 + $0x2698] sm:$0xff]  ;;  %3544 = vmatpush.msrb.mxu1 %v1199_v39 }
 0x56a   :  { %v1359_v46 = vld [vmem:[%s9068_s1 + $0x2998] sm:$0xff]  ;;  %3564 = vmatpush.msrb.mxu2 %v1263_v2  ;;  %v2791_v2 = vadd.f32 %v2790_v37, %v2771_v10  ;;  %v2890_v37 = vpop.f32.mrf.mxu0 }
 0x56b   :  { %v1131_v54 = vld [vmem:[%s9068_s1 + $0x2278] sm:$0xff]  ;;  %3576 = vmatpush.msrb.mxu3 %v1359_v46 }
 0x56c   :  { %v1195_v55 = vld [vmem:[%s9068_s1 + $0x2478] sm:$0xff]  ;;  %3525 = vmatpush.msrb.mxu0 %v1131_v54 }
 0x56d   :  { %v1259_v56 = vld [vmem:[%s9068_s1 + $0x2678] sm:$0xff]  ;;  %3545 = vmatpush.msrb.mxu1 %v1195_v55 }
 0x56e   :  { %v1355_v57 = vld [vmem:[%s9068_s1 + $0x2978] sm:$0xff]  ;;  %3565 = vmatpush.msrb.mxu2 %v1259_v56 }
 0x56f   :  { %v1127_v61 = vld [vmem:[%s9068_s1 + $0x2258] sm:$0xff]  ;;  %3577 = vmatpush.msrb.mxu3 %v1355_v57 }
 0x570   :  { %v1191_v62 = vld [vmem:[%s9068_s1 + $0x2458] sm:$0xff]  ;;  %3526 = vmatpush.msrb.mxu0 %v1127_v61 }
 0x571   :  { %v1255_v28 = vld [vmem:[%s9068_s1 + $0x2658] sm:$0xff]  ;;  %3546 = vmatpush.msrb.mxu1 %v1191_v62  ;;  %v2811_v62 = vadd.f32 %v2810_v3, %v2791_v2 }
 0x572   :  { %v1351_v4 = vld [vmem:[%s9068_s1 + $0x2958] sm:$0xff]  ;;  %3566 = vmatpush.msrb.mxu2 %v1255_v28 }
 0x573   :  { %v1123_v58 = vld [vmem:[%s9068_s1 + $0x2238] sm:$0xff]  ;;  %3578 = vmatpush.msrb.mxu3 %v1351_v4  ;;  %v2291_v4 = vadd.f32 %v8271_v13, %v2271_v52 }
 0x574   :  { %v1187_v15 = vld [vmem:[%s9068_s1 + $0x2438] sm:$0xff]  ;;  %3527 = vmatpush.msrb.mxu0 %v1123_v58 }
 0x575   :  { %v1251_v19 = vld [vmem:[%s9068_s1 + $0x2638] sm:$0xff]  ;;  %3547 = vmatpush.msrb.mxu1 %v1187_v15 }
 0x576   :  { %v1347_v53 = vld [vmem:[%s9068_s1 + $0x2938] sm:$0xff]  ;;  %3567 = vmatpush.msrb.mxu2 %v1251_v19  ;;  %v2850_v19 = vpop.f32.mrf.mxu2 }
 0x577   :  { %v1119_v20 = vld [vmem:[%s9068_s1 + $0x2218] sm:$0xff]  ;;  %3579 = vmatpush.msrb.mxu3 %v1347_v53 }
 0x578   :  { %v1183_v9 = vld [vmem:[%s9068_s1 + $0x2418] sm:$0xff]  ;;  %3528 = vmatpush.msrb.mxu0 %v1119_v20 }
 0x579   :  { %v1247_v24 = vld [vmem:[%s9068_s1 + $0x2618] sm:$0xff]  ;;  %3548 = vmatpush.msrb.mxu1 %v1183_v9  ;;  %3529 = vmatmul.f32.vlgmr.msrb.gmra.mxu0 %v4966_v16  ;;  %v2831_v9 = vadd.f32 %v2830_v5, %v2811_v62 }
 0x57a   :  { %v1343_v49 = vld [vmem:[%s9068_s1 + $0x2918] sm:$0xff]  ;;  %3568 = vmatpush.msrb.mxu2 %v1247_v24  ;;  %3549 = vmatmul.f32.vlgmr.msrb.gmra.mxu1 %v4950_v11 }
 0x57b   :  { %v1435_v47 = vld [vmem:[%s9068_s1 + $0x2bf8] sm:$0xff]  ;;  %3580 = vmatpush.msrb.mxu3 %v1343_v49  ;;  %3569 = vmatmul.f32.vlgmr.msrb.gmra.mxu2 %v4968_v17  ;;  %v2311_v49 = vadd.f32 %v8299_v23, %v2291_v4 }
 0x57c   :  { %v1499_v29 = vld [vmem:[%s9068_s1 + $0x2df8] sm:$0xff]  ;;  %3593 = vmatpush.msra.mxu0 %v1435_v47  ;;  %v2851_v47 = vadd.f32 %v2850_v19, %v2831_v9 }
 0x57d   :  { %v1563_v34 = vld [vmem:[%s9068_s1 + $0x2ff8] sm:$0xff]  ;;  %3613 = vmatpush.msra.mxu1 %v1499_v29  ;;  %v2331_v43 = vadd.f32 %v8322_v50, %v2311_v49  ;;  %v2970_v49 = vpop.f32.mrf.mxu0 }
 0x57e   :  { %v1339_v59 = vld [vmem:[%s9068_s1 + $0x28f8] sm:$0xff]  ;;  %3633 = vmatpush.msra.mxu2 %v1563_v34  ;;  %v2870_v34 = vpop.f32.mrf.mxu3 }
 0x57f   :  { %v1431_v36 = vld [vmem:[%s9068_s1 + $0x2bd8] sm:$0xff]  ;;  %3581 = vmatpush.msrb.mxu3 %v1339_v59 }
 0x580   :  { %v1495_v38 = vld [vmem:[%s9068_s1 + $0x2dd8] sm:$0xff]  ;;  %3594 = vmatpush.msra.mxu0 %v1431_v36 }
 0x581   :  { %v1559_v39 = vld [vmem:[%s9068_s1 + $0x2fd8] sm:$0xff]  ;;  %3614 = vmatpush.msra.mxu1 %v1495_v38 }
 0x582   :  { %v1335_v16 = vld [vmem:[%s9068_s1 + $0x28d8] sm:$0xff]  ;;  %3634 = vmatpush.msra.mxu2 %v1559_v39 }
 0x583   :  { %v1427_v17 = vld [vmem:[%s9068_s1 + $0x2bb8] sm:$0xff]  ;;  %3582 = vmatpush.msrb.mxu3 %v1335_v16  ;;  %v2871_v16 = vadd.f32 %v2870_v34, %v2851_v47 }
 0x584   :  { %v1491_v48 = vld [vmem:[%s9068_s1 + $0x2db8] sm:$0xff]  ;;  %3595 = vmatpush.msra.mxu0 %v1427_v17  ;;  %v3860_v17 = vld.sshfl [vmem:[#allocation1 + $0x20] sm:$0xff pattern:$0x73625140] }
 0x585   :  { %v1555_v41 = vld [vmem:[%s9068_s1 + $0x2fb8] sm:$0xff]  ;;  %3615 = vmatpush.msra.mxu1 %v1491_v48 }
 0x586   :  { %v1331_v46 = vld [vmem:[%s9068_s1 + $0x28b8] sm:$0xff]  ;;  %3635 = vmatpush.msra.mxu2 %v1555_v41  ;;  %v2351_v41 = vadd.f32 %v8351_v45, %v2331_v43 }
 0x587   :  { %v1423_v11 = vld [vmem:[%s9068_s1 + $0x2b98] sm:$0xff]  ;;  %3583 = vmatpush.msrb.mxu3 %v1331_v46 }
 0x588   :  { %v1487_v54 = vld [vmem:[%s9068_s1 + $0x2d98] sm:$0xff]  ;;  %3596 = vmatpush.msra.mxu0 %v1423_v11  ;;  %v2891_v11 = vadd.f32 %v2890_v37, %v2871_v16  ;;  %v2371_v3 = vadd.f32 %v8324_v32, %v2351_v41  ;;  %v3863_v41 = vld.sshfl [vmem:[#allocation1 + $0x30] sm:$0xff pattern:$0x73625140] }
 0x589   :  { %v1551_v55 = vld [vmem:[%s9068_s1 + $0x2f98] sm:$0xff]  ;;  %3616 = vmatpush.msra.mxu1 %v1487_v54  ;;  %v2910_v54 = vpop.f32.mrf.mxu1 }
 0x58a   :  { %v1327_v56 = vld [vmem:[%s9068_s1 + $0x2898] sm:$0xff]  ;;  %3636 = vmatpush.msra.mxu2 %v1551_v55  ;;  %v2391_v5 = vadd.f32 %v8353_v35, %v2371_v3  ;;  %v3689_v3 = vld [vmem:[%s9070_s3 + $0x60] sm:$0xff] }
 0x58b   :  { %v1419_v51 = vld [vmem:[%s9068_s1 + $0x2b78] sm:$0xff]  ;;  %3584 = vmatpush.msrb.mxu3 %v1327_v56 }
 0x58c   :  { %v1483_v57 = vld [vmem:[%s9068_s1 + $0x2d78] sm:$0xff]  ;;  %3597 = vmatpush.msra.mxu0 %v1419_v51  ;;  %v2411_v19 = vadd.f32 %v8379_v30, %v2391_v5  ;;  %v3686_v5 = vld [vmem:[%s9070_s3 + $0x48] sm:$0xff] }
 0x58d   :  { %v1547_v61 = vld [vmem:[%s9068_s1 + $0x2f78] sm:$0xff]  ;;  %3617 = vmatpush.msra.mxu1 %v1483_v57  ;;  %v2930_v57 = vpop.f32.mrf.mxu2 }
 0x58e   :  { %v1323_v63 = vld [vmem:[%s9068_s1 + $0x2878] sm:$0xff]  ;;  %3637 = vmatpush.msra.mxu2 %v1547_v61 }
 0x58f   :  { %v1415_v28 = vld [vmem:[%s9068_s1 + $0x2b58] sm:$0xff]  ;;  %3585 = vmatpush.msrb.mxu3 %v1323_v63  ;;  %v2911_v63 = vadd.f32 %v2910_v54, %v2891_v11  ;;  %v3706_v11 = vld [vmem:[%s9070_s3 + $0xe8] sm:$0xff] }
 0x590   :  { %v1479_v12 = vld [vmem:[%s9068_s1 + $0x2d58] sm:$0xff]  ;;  %3598 = vmatpush.msra.mxu0 %v1415_v28 }
 0x591   :  { %v1543_v58 = vld [vmem:[%s9068_s1 + $0x2f58] sm:$0xff]  ;;  %3618 = vmatpush.msra.mxu1 %v1479_v12 }
 0x592   :  { %v1319_v15 = vld [vmem:[%s9068_s1 + $0x2858] sm:$0xff]  ;;  %3638 = vmatpush.msra.mxu2 %v1543_v58 }
 0x593   :  { %v1411_v13 = vld [vmem:[%s9068_s1 + $0x2b38] sm:$0xff]  ;;  %3586 = vmatpush.msrb.mxu3 %v1319_v15  ;;  %v2931_v15 = vadd.f32 %v2930_v57, %v2911_v63  ;;  %v3050_v57 = vpop.f32.mrf.mxu0  ;;  %v3687_v63 = vld [vmem:[%s9070_s3 + $0x50] sm:$0xff] }
 0x594   :  { %v1475_v53 = vld [vmem:[%s9068_s1 + $0x2d38] sm:$0xff]  ;;  %3599 = vmatpush.msra.mxu0 %v1411_v13 }
 0x595   :  { %v1539_v20 = vld [vmem:[%s9068_s1 + $0x2f38] sm:$0xff]  ;;  %3619 = vmatpush.msra.mxu1 %v1475_v53  ;;  %v2950_v53 = vpop.f32.mrf.mxu3  ;;  %v3010_v16 = vpop.f32.mrf.mxu2 }
 0x596   :  { %v1315_v27 = vld [vmem:[%s9068_s1 + $0x2838] sm:$0xff]  ;;  %3639 = vmatpush.msra.mxu2 %v1539_v20  ;;  %v2951_v47 = vadd.f32 %v2950_v53, %v2931_v15  ;;  %v3702_v15 = vld [vmem:[%s9070_s3 + $0xc8] sm:$0xff] }
 0x597   :  { %v1407_v24 = vld [vmem:[%s9068_s1 + $0x2b18] sm:$0xff]  ;;  %3587 = vmatpush.msrb.mxu3 %v1315_v27 }
 0x598   :  { %v1471_v25 = vld [vmem:[%s9068_s1 + $0x2d18] sm:$0xff]  ;;  %3600 = vmatpush.msra.mxu0 %v1407_v24  ;;  %v2431_v24 = vadd.f32 %v8407_v7, %v2411_v19  ;;  %v2971_v34 = vadd.f32 %v2970_v49, %v2951_v47 }
 0x599   :  { %v1535_v44 = vld [vmem:[%s9068_s1 + $0x2f18] sm:$0xff]  ;;  %3620 = vmatpush.msra.mxu1 %v1471_v25 }
 0x59a   :  { %v1311_v29 = vld [vmem:[%s9068_s1 + $0x2818] sm:$0xff]  ;;  %3640 = vmatpush.msra.mxu2 %v1535_v44  ;;  %v2451_v7 = vadd.f32 %v8381_v33, %v2431_v24  ;;  %v3861_v33 = vld.sshfl [vmem:[#allocation1 + $0x28] sm:$0xff pattern:$0x73625140] }
 0x59b   :  { %v1403_v23 = vld [vmem:[%s9068_s1 + $0x2af8] sm:$0xff]  ;;  %3588 = vmatpush.msrb.mxu3 %v1311_v29 }
 0x59c   :  { %v1467_v59 = vld [vmem:[%s9068_s1 + $0x2cf8] sm:$0xff]  ;;  %3601 = vmatpush.msra.mxu0 %v1403_v23  ;;  %3589 = vmatmul.f32.vlgmr.msrb.gmra.mxu3 %v3860_v17  ;;  %v3707_v17 = vld [vmem:[%s9070_s3 + $0xf0] sm:$0xff] }
 0x59d   :  { %v1531_v10 = vld [vmem:[%s9068_s1 + $0x2ef8] sm:$0xff]  ;;  %3621 = vmatpush.msra.mxu1 %v1467_v59  ;;  %v3030_v54 = vpop.f32.mrf.mxu3  ;;  %v3090_v53 = vpop.f32.mrf.mxu2 }
 0x59e   :  { %v1399_v36 = vld [vmem:[%s9068_s1 + $0x2ad8] sm:$0xff]  ;;  %3641 = vmatpush.msra.mxu2 %v1531_v10 }
 0x59f   :  { %v1463_v38 = vld [vmem:[%s9068_s1 + $0x2cd8] sm:$0xff]  ;;  %3602 = vmatpush.msra.mxu0 %v1399_v36  ;;  %v2990_v36 = vpop.f32.mrf.mxu1 }
 0x5a0   :  { %v1595_v39 = vld [vmem:[%s9068_s1 + $0x30f8] sm:$0xff]  ;;  %3622 = vmatpush.msra.mxu1 %v1463_v38  ;;  %v3691_v38 = vld [vmem:[%s9070_s3 + $0x70] sm:$0xff] }
 0x5a1   :  { %v1527_v48 = vld [vmem:[%s9068_s1 + $0x2ed8] sm:$0xff]  ;;  %3661 = vmatpush.msra.mxu3 %v1595_v39  ;;  %v2471_v39 = vadd.f32 %v8409_v8, %v2451_v7  ;;  %v3682_v7 = vld [vmem:[%s9070_s3 + $0x28] sm:$0xff] }
 0x5a2   :  { %v1395_v50 = vld [vmem:[%s9068_s1 + $0x2ab8] sm:$0xff]  ;;  %3642 = vmatpush.msra.mxu2 %v1527_v48  ;;  %v3723_v48 = vld [vmem:[%s9070_s3 + $0x170] sm:$0xff] }
 0x5a3   :  { %v1459_v2 = vld [vmem:[%s9068_s1 + $0x2cb8] sm:$0xff]  ;;  %3603 = vmatpush.msra.mxu0 %v1395_v50  ;;  %v2991_v50 = vadd.f32 %v2990_v36, %v2971_v34  ;;  %v2491_v8 = vadd.f32 %v8429_v21, %v2471_v39  ;;  %v3714_v34 = vld [vmem:[%s9070_s3 + $0x128] sm:$0xff] }
 0x5a4   :  { %v1591_v46 = vld [vmem:[%s9068_s1 + $0x30d8] sm:$0xff]  ;;  %3623 = vmatpush.msra.mxu1 %v1459_v2  ;;  %v3690_v2 = vld [vmem:[%s9070_s3 + $0x68] sm:$0xff] }
 0x5a5   :  { %v1523_v52 = vld [vmem:[%s9068_s1 + $0x2eb8] sm:$0xff]  ;;  %3662 = vmatpush.msra.mxu3 %v1591_v46  ;;  %v3864_v46 = vld.sshfl [vmem:[#allocation1] sm:$0xff pattern:$0x73625140]  ;;  %v2511_v21 = vadd.f32 %v8456_v1, %v2491_v8  ;;  %v3110_v47 = vpop.f32.mrf.mxu3  ;;  %v3678_v8 = vld [vmem:[%s9070_s3 + $0x8] sm:$0xff] }
 0x5a6   :  { %v1391_v45 = vld [vmem:[%s9068_s1 + $0x2a98] sm:$0xff]  ;;  %3643 = vmatpush.msra.mxu2 %v1523_v52  ;;  %v3722_v52 = vld [vmem:[%s9070_s3 + $0x168] sm:$0xff] }
 0x5a7   :  { %v1455_v55 = vld [vmem:[%s9068_s1 + $0x2c98] sm:$0xff]  ;;  %3604 = vmatpush.msra.mxu0 %v1391_v45  ;;  %v3011_v45 = vadd.f32 %v3010_v16, %v2991_v50  ;;  %v3170_v50 = vpop.f32.mrf.mxu2 }
 0x5a8   :  { %v1587_v56 = vld [vmem:[%s9068_s1 + $0x30b8] sm:$0xff]  ;;  %3624 = vmatpush.msra.mxu1 %v1455_v55  ;;  %v3705_v55 = vld [vmem:[%s9070_s3 + $0xe0] sm:$0xff] }
 0x5a9   :  { %v1519_v51 = vld [vmem:[%s9068_s1 + $0x2e98] sm:$0xff]  ;;  %3663 = vmatpush.msra.mxu3 %v1587_v56  ;;  %v3721_v56 = vld [vmem:[%s9070_s3 + $0x160] sm:$0xff] }
 0x5aa   :  { %v1387_v32 = vld [vmem:[%s9068_s1 + $0x2a78] sm:$0xff]  ;;  %3644 = vmatpush.msra.mxu2 %v1519_v51 }
 0x5ab   :  { %v1451_v61 = vld [vmem:[%s9068_s1 + $0x2c78] sm:$0xff]  ;;  %3605 = vmatpush.msra.mxu0 %v1387_v32  ;;  %v2531_v32 = vadd.f32 %v8431_v22, %v2511_v21  ;;  %v3703_v22 = vld [vmem:[%s9070_s3 + $0xd0] sm:$0xff]  ;;  %v3709_v21 = vld [vmem:[%s9070_s3 + $0x100] sm:$0xff] }
 0x5ac   :  { %v1583_v62 = vld [vmem:[%s9068_s1 + $0x3098] sm:$0xff]  ;;  %3625 = vmatpush.msra.mxu1 %v1451_v61 }
 0x5ad   :  { %v1515_v28 = vld [vmem:[%s9068_s1 + $0x2e78] sm:$0xff]  ;;  %3664 = vmatpush.msra.mxu3 %v1583_v62  ;;  %v3031_v62 = vadd.f32 %v3030_v54, %v3011_v45  ;;  %v3673_v54 = vmax.f32 %v6011_v14, 0.0  ;;  %v3739_v14 = vld [vmem:[%s9070_s3 + $0x1f0] sm:$0xff] }
 0x5ae   :  { %v1383_v4 = vld [vmem:[%s9068_s1 + $0x2a58] sm:$0xff]  ;;  %3645 = vmatpush.msra.mxu2 %v1515_v28  ;;  %v3719_v28 = vld [vmem:[%s9070_s3 + $0x150] sm:$0xff] }
 0x5af   :  { %v1447_v12 = vld [vmem:[%s9068_s1 + $0x2c58] sm:$0xff]  ;;  %3606 = vmatpush.msra.mxu0 %v1383_v4  ;;  %v3051_v4 = vadd.f32 %v3050_v57, %v3031_v62 }
 0x5b0   :  { %v1579_v58 = vld [vmem:[%s9068_s1 + $0x3078] sm:$0xff]  ;;  %3626 = vmatpush.msra.mxu1 %v1447_v12  ;;  %v2551_v12 = vadd.f32 %v8458_v26, %v2531_v32  ;;  %v3701_v26 = vld [vmem:[%s9070_s3 + $0xc0] sm:$0xff]  ;;  %v3190_v32 = vpop.f32.mrf.mxu3 }
 0x5b1   :  { %v1511_v13 = vld [vmem:[%s9068_s1 + $0x2e58] sm:$0xff]  ;;  %3665 = vmatpush.msra.mxu3 %v1579_v58  ;;  %v3070_v58 = vpop.f32.mrf.mxu1 }
 0x5b2   :  { %v1379_v35 = vld [vmem:[%s9068_s1 + $0x2a38] sm:$0xff]  ;;  %3646 = vmatpush.msra.mxu2 %v1511_v13  ;;  %v3718_v13 = vld [vmem:[%s9070_s3 + $0x148] sm:$0xff]  ;;  %v2571_v19 = vadd.f32 %v8485_v40, %v2551_v12 }
 0x5b3   :  { %v1443_v20 = vld [vmem:[%s9068_s1 + $0x2c38] sm:$0xff]  ;;  %3607 = vmatpush.msra.mxu0 %v1379_v35  ;;  %v3685_v35 = vld [vmem:[%s9070_s3 + $0x40] sm:$0xff] }
 0x5b4   :  { %v1575_v9 = vld [vmem:[%s9068_s1 + $0x3058] sm:$0xff]  ;;  %3627 = vmatpush.msra.mxu1 %v1443_v20  ;;  %v3717_v20 = vld [vmem:[%s9070_s3 + $0x140] sm:$0xff] }
 0x5b5   :  { %v1507_v27 = vld [vmem:[%s9068_s1 + $0x2e38] sm:$0xff]  ;;  %3666 = vmatpush.msra.mxu3 %v1575_v9  ;;  %v3071_v9 = vadd.f32 %v3070_v58, %v3051_v4 }
 0x5b6   :  { %v1375_v30 = vld [vmem:[%s9068_s1 + $0x2a18] sm:$0xff]  ;;  %3647 = vmatpush.msra.mxu2 %v1507_v27 }
 0x5b7   :  { %v1439_v25 = vld [vmem:[%s9068_s1 + $0x2c18] sm:$0xff]  ;;  %3608 = vmatpush.msra.mxu0 %v1375_v30  ;;  %v2591_v30 = vadd.f32 %v8513_v0, %v2571_v19  ;;  %v3091_v49 = vadd.f32 %v3090_v53, %v3071_v9  ;;  %v3699_v0 = vld [vmem:[%s9070_s3 + $0xb0] sm:$0xff]  ;;  %v3734_v53 = vld [vmem:[%s9070_s3 + $0x1c8] sm:$0xff] }
 0x5b8   :  { %v1571_v44 = vld [vmem:[%s9068_s1 + $0x3038] sm:$0xff]  ;;  %3628 = vmatpush.msra.mxu1 %v1439_v25  ;;  %3609 = vmatmul.f32.vlgmr.msra.gmra.mxu0 %v3861_v33  ;;  %v3683_v25 = vld [vmem:[%s9070_s3 + $0x30] sm:$0xff]  ;;  %v3697_v33 = vld [vmem:[%s9070_s3 + $0xa0] sm:$0xff]  ;;  %v3270_v58 = vpop.f32.mrf.mxu3 }
 0x5b9   :  { %v1503_v29 = vld [vmem:[%s9068_s1 + $0x2e18] sm:$0xff]  ;;  %3667 = vmatpush.msra.mxu3 %v1571_v44  ;;  %3629 = vmatmul.f32.vlgmr.msra.gmra.mxu1 %v3863_v41  ;;  %v2611_v44 = vadd.f32 %v8487_v42, %v2591_v30  ;;  %v3698_v42 = vld [vmem:[%s9070_s3 + $0xa8] sm:$0xff]  ;;  %v3150_v16 = vpop.f32.mrf.mxu1  ;;  %v3711_v41 = vld [vmem:[%s9070_s3 + $0x110] sm:$0xff] }
 0x5ba   :  { %v3692_v23 = vld [vmem:[%s9070_s3 + $0x78] sm:$0xff]  ;;  %3648 = vmatpush.msra.mxu2 %v1503_v29  ;;  %v3715_v29 = vld [vmem:[%s9070_s3 + $0x130] sm:$0xff] }
 0x5bb   :  { %v3708_v59 = vld [vmem:[%s9070_s3 + $0xf8] sm:$0xff]  ;;  %3745 = vmatpush.msrb.mxu0 %v3692_v23  ;;  %v3130_v23 = vpop.f32.mrf.mxu0  ;;  %v2631_v36 = vadd.f32 %v8515_v60, %v2611_v44  ;;  %v3735_v19 = vld [vmem:[%s9070_s3 + $0x1d0] sm:$0xff] }
 0x5bc   :  { %v3724_v10 = vld [vmem:[%s9070_s3 + $0x178] sm:$0xff]  ;;  %3765 = vmatpush.msrb.mxu1 %v3708_v59  ;;  %v3111_v59 = vadd.f32 %v3110_v47, %v3091_v49 }
 0x5bd   :  { %v1567_v43 = vld [vmem:[%s9068_s1 + $0x3018] sm:$0xff]  ;;  %3785 = vmatpush.msrb.mxu2 %v3724_v10  ;;  %3746 = vmatpush.msrb.mxu0 %v3691_v38  ;;  %v3681_v10 = vld [vmem:[%s9070_s3 + $0x20] sm:$0xff]  ;;  %v2651_v39 = vadd.f32 %v8547_v18, %v2631_v36  ;;  %v3695_v18 = vld [vmem:[%s9070_s3 + $0x90] sm:$0xff] }
 0x5be   :  { %v3862_v37 = vld.sshfl [vmem:[#allocation1 + $0x38] sm:$0xff pattern:$0x73625140]  ;;  %3668 = vmatpush.msra.mxu3 %v1567_v43  ;;  %3766 = vmatpush.msrb.mxu1 %v3707_v17  ;;  %v3713_v43 = vld [vmem:[%s9070_s3 + $0x120] sm:$0xff] }
 0x5bf   :  { %3649 = vmatmul.f32.vlgmr.msra.gmra.mxu2 %v3862_v37  ;;  %3846 = vmatmul.msk.f32.vlgmr.msra.gmra.mxu3 %vm1670_vm0, %v3864_v46  ;;  %v3688_v51 = vld [vmem:[%s9070_s3 + $0x58] sm:$0xff]  ;;  %v3131_v37 = vadd.f32 %v3130_v23, %v3111_v59  ;;  %v2671_v46 = vadd.f32 %v8572_v31, %v2651_v39  ;;  %v3693_v31 = vld [vmem:[%s9070_s3 + $0x80] sm:$0xff] }
 0x5c0   :  { %3786 = vmatpush.msrb.mxu2 %v3723_v48  ;;  %3747 = vmatpush.msrb.mxu0 %v3690_v2  ;;  %v3704_v1 = vld [vmem:[%s9070_s3 + $0xd8] sm:$0xff]  ;;  %v3679_v48 = vld [vmem:[%s9070_s3 + $0x10] sm:$0xff] }
 0x5c1   :  { %3767 = vmatpush.msrb.mxu1 %v3706_v11  ;;  %v3720_v61 = vld [vmem:[%s9070_s3 + $0x158] sm:$0xff]  ;;  %v3151_v2 = vadd.f32 %v3150_v16, %v3131_v37  ;;  %v3694_v11 = vld [vmem:[%s9070_s3 + $0x88] sm:$0xff] }
 0x5c2   :  { %3787 = vmatpush.msrb.mxu2 %v3722_v52  ;;  %3748 = vmatpush.msrb.mxu0 %v3689_v3  ;;  %v3684_v27 = vld [vmem:[%s9070_s3 + $0x38] sm:$0xff]  ;;  %v3710_v52 = vld [vmem:[%s9070_s3 + $0x108] sm:$0xff]  ;;  %v3677_v3 = vld [vmem:[%s9070_s3] sm:$0xff] }
 0x5c3   :  { %3768 = vmatpush.msrb.mxu1 %v3705_v55  ;;  %v3700_v40 = vld [vmem:[%s9070_s3 + $0xb8] sm:$0xff]  ;;  %v3171_v45 = vadd.f32 %v3170_v50, %v3151_v2  ;;  %v3674_v55 = vmax.f32 %v2671_v46, 0.0  ;;  %v3726_v37 = vld [vmem:[%s9070_s3 + $0x188] sm:$0xff] }
 0x5c4   :  { %3788 = vmatpush.msrb.mxu2 %v3721_v56  ;;  %3749 = vmatpush.msrb.mxu0 %v3688_v51  ;;  %v3716_v24 = vld [vmem:[%s9070_s3 + $0x138] sm:$0xff]  ;;  %v1601_v51 = vperm.slane %v8538_v6, 3  ;;  %v3737_v6 = vld [vmem:[%s9070_s3 + $0x1e0] sm:$0xff] }
 0x5c5   :  { %3769 = vmatpush.msrb.mxu1 %v3704_v1  ;;  %v3680_v38 = vld [vmem:[%s9070_s3 + $0x18] sm:$0xff]  ;;  %v3675_v56 = vmax.f32 %v3171_v45, 0.0  ;;  %v3210_v1 = vpop.f32.mrf.mxu0 }
 0x5c6   :  { %3789 = vmatpush.msrb.mxu2 %v3720_v61  ;;  %3750 = vmatpush.msrb.mxu0 %v3687_v63  ;;  %v3696_v60 = vld [vmem:[%s9070_s3 + $0x98] sm:$0xff]  ;;  %v3191_v57 = vadd.f32 %v3190_v32, %v1601_v51  ;;  %v3738_v63 = vld [vmem:[%s9070_s3 + $0x1e8] sm:$0xff] }
 0x5c7   :  { %3770 = vmatpush.msrb.mxu1 %v3703_v22  ;;  %v3712_v17 = vld [vmem:[%s9070_s3 + $0x118] sm:$0xff]  ;;  %v3230_v22 = vpop.f32.mrf.mxu1 }
 0x5c8   :  { %3790 = vmatpush.msrb.mxu2 %v3719_v28  ;;  %3751 = vmatpush.msrb.mxu0 %v3686_v5  ;;  %v3740_v61 = vld [vmem:[%s9070_s3 + $0x1f8] sm:$0xff]  ;;  %v3211_v62 = vadd.f32 %v3210_v1, %v3191_v57  ;;  %v3250_v5 = vpop.f32.mrf.mxu2 }
 0x5c9   :  { %3771 = vmatpush.msrb.mxu1 %v3702_v15  ;;  %3805 = vmatpush.msrb.mxu3 %v3740_v61  ;;  %v3736_v4 = vld [vmem:[%s9070_s3 + $0x1d8] sm:$0xff]  ;;  %v3848_v61 = vld [vmem:[%s9071_s4] ss:$0 sm:$0xff] }
 0x5ca   :  { %3791 = vmatpush.msrb.mxu2 %v3718_v13  ;;  %3752 = vmatpush.msrb.mxu0 %v3685_v35  ;;  %v3231_v28 = vadd.f32 %v3230_v22, %v3211_v62 }
 0x5cb   :  { %3772 = vmatpush.msrb.mxu1 %v3701_v26  ;;  %3806 = vmatpush.msrb.mxu3 %v3739_v14 }
 0x5cc   :  { %3792 = vmatpush.msrb.mxu2 %v3717_v20  ;;  %3753 = vmatpush.msrb.mxu0 %v3684_v27  ;;  %v3251_v12 = vadd.f32 %v3250_v5, %v3231_v28  ;;  %v3733_v20 = vld [vmem:[%s9070_s3 + $0x1c0] sm:$0xff]  ;;  %v3732_v27 = vld [vmem:[%s9070_s3 + $0x1b8] sm:$0xff] }
 0x5cd   :  { %3773 = vmatpush.msrb.mxu1 %v3700_v40  ;;  %3807 = vmatpush.msrb.mxu3 %v3738_v63  ;;  %v3290_v13 = vpop.f32.mrf.mxu0  ;;  %v3350_v40 = vpop.f32.mrf.mxu3 }
 0x5ce   :  { %3793 = vmatpush.msrb.mxu2 %v3716_v24  ;;  %3754 = vmatpush.msrb.mxu0 %v3683_v25  ;;  %v3271_v15 = vadd.f32 %v3270_v58, %v3251_v12  ;;  %v3731_v25 = vld [vmem:[%s9070_s3 + $0x1b0] sm:$0xff] }
 0x5cf   :  { %3774 = vmatpush.msrb.mxu1 %v3699_v0  ;;  %3808 = vmatpush.msrb.mxu3 %v3737_v6  ;;  %v3310_v26 = vpop.f32.mrf.mxu1  ;;  %v3730_v0 = vld [vmem:[%s9070_s3 + $0x1a8] sm:$0xff] }
 0x5d0   :  { %3794 = vmatpush.msrb.mxu2 %v3715_v29  ;;  %3755 = vmatpush.msrb.mxu0 %v3682_v7  ;;  %v3291_v35 = vadd.f32 %v3290_v13, %v3271_v15  ;;  %v3330_v30 = vpop.f32.mrf.mxu2  ;;  %v3729_v29 = vld [vmem:[%s9070_s3 + $0x1a0] sm:$0xff] }
 0x5d1   :  { %3775 = vmatpush.msrb.mxu1 %v3698_v42  ;;  %3809 = vmatpush.msrb.mxu3 %v3736_v4 }
 0x5d2   :  { %3795 = vmatpush.msrb.mxu2 %v3714_v34  ;;  %3756 = vmatpush.msrb.mxu0 %v3681_v10  ;;  %v3311_v9 = vadd.f32 %v3310_v26, %v3291_v35  ;;  %v3728_v34 = vld [vmem:[%s9070_s3 + $0x198] sm:$0xff] }
 0x5d3   :  { %3776 = vmatpush.msrb.mxu1 %v3697_v33  ;;  %3810 = vmatpush.msrb.mxu3 %v3735_v19  ;;  %v3727_v33 = vld [vmem:[%s9070_s3 + $0x190] sm:$0xff] }
 0x5d4   :  { %3796 = vmatpush.msrb.mxu2 %v3713_v43  ;;  %3757 = vmatpush.msrb.mxu0 %v3680_v38  ;;  %v3331_v24 = vadd.f32 %v3330_v30, %v3311_v9  ;;  %v3725_v38 = vld [vmem:[%s9070_s3 + $0x180] sm:$0xff] }
 0x5d5   :  { %3777 = vmatpush.msrb.mxu1 %v3696_v60  ;;  %3811 = vmatpush.msrb.mxu3 %v3734_v53  ;;  %v3370_v49 = vpop.f32.mrf.mxu0  ;;  %v3430_v59 = vpop.f32.mrf.mxu3 }
 0x5d6   :  { %3797 = vmatpush.msrb.mxu2 %v3712_v17  ;;  %3758 = vmatpush.msrb.mxu0 %v3679_v48  ;;  %v3351_v44 = vadd.f32 %v3350_v40, %v3331_v24 }
 0x5d7   :  { %3778 = vmatpush.msrb.mxu1 %v3695_v18  ;;  %3812 = vmatpush.msrb.mxu3 %v3733_v20  ;;  %v3390_v7 = vpop.f32.mrf.mxu1 }
 0x5d8   :  { %3798 = vmatpush.msrb.mxu2 %v3711_v41  ;;  %3759 = vmatpush.msrb.mxu0 %v3678_v8  ;;  %v3371_v47 = vadd.f32 %v3370_v49, %v3351_v44  ;;  %v3410_v23 = vpop.f32.mrf.mxu2 }
 0x5d9   :  { %3779 = vmatpush.msrb.mxu1 %v3694_v11  ;;  %3813 = vmatpush.msrb.mxu3 %v3732_v27 }
 0x5da   :  { %3799 = vmatpush.msrb.mxu2 %v3710_v52  ;;  %3760 = vmatpush.msrb.mxu0 %v3677_v3  ;;  %v3391_v42 = vadd.f32 %v3390_v7, %v3371_v47 }
 0x5db   :  { %3780 = vmatpush.msrb.mxu1 %v3693_v31  ;;  %3761 = vmatmul.f32.vlgmr.msrb.gmra.mxu0 %v3673_v54 }
 0x5dc   :  { %3800 = vmatpush.msrb.mxu2 %v3709_v21  ;;  %3781 = vmatmul.f32.vlgmr.msrb.gmra.mxu1 %v3674_v55  ;;  %v3411_v10 = vadd.f32 %v3410_v23, %v3391_v42 }
 0x5dd   :  { %3801 = vmatmul.f32.vlgmr.msrb.gmra.mxu2 %v3675_v56  ;;  %3814 = vmatpush.msrb.mxu3 %v3731_v25  ;;  %v3450_v36 = vpop.f32.mrf.mxu0 }
 0x5de   :  { %v3431_v43 = vadd.f32 %v3430_v59, %v3411_v10 }
 0x5df   :  { %3815 = vmatpush.msrb.mxu3 %v3730_v0  ;;  %v3470_v16 = vpop.f32.mrf.mxu1  ;;  %v3510_v48 = vpop.f32.mrf.mxu3 }
 0x5e0   :  { %v3451_v39 = vadd.f32 %v3450_v36, %v3431_v43  ;;  %v3490_v60 = vpop.f32.mrf.mxu2 }
 0x5e1   :  { %3816 = vmatpush.msrb.mxu3 %v3729_v29 }
 0x5e2   :  { %v3471_v17 = vadd.f32 %v3470_v16, %v3451_v39 }
 0x5e3   :  { %3817 = vmatpush.msrb.mxu3 %v3728_v34 }
 0x5e4   :  { %v3491_v50 = vadd.f32 %v3490_v60, %v3471_v17 }
 0x5e5   :  { %3818 = vmatpush.msrb.mxu3 %v3727_v33 }
 0x5e6   :  { %v3511_v41 = vadd.f32 %v3510_v48, %v3491_v50 }
 0x5e7   :  { %3819 = vmatpush.msrb.mxu3 %v3726_v37 }
 0x5e9   :  { %3820 = vmatpush.msrb.mxu3 %v3725_v38 }
 0x5f6   :  { %v3530_v18 = vpop.f32.mrf.mxu0 }
 0x5f7   :  { %v3531_v2 = vadd.f32 %v3530_v18, %v3511_v41  ;;  %v3550_v8 = vpop.f32.mrf.mxu1 }
 0x5f9   :  { %v3551_v11 = vadd.f32 %v3550_v8, %v3531_v2 }
 0x5fe   :  { %v3570_v46 = vpop.f32.mrf.mxu2 }
 0x5ff   :  { %v3571_v45 = vadd.f32 %v3570_v46, %v3551_v11 }
 0x61f   :  { %v3590_v52 = vpop.f32.mrf.mxu3 }
 0x620   :  { %v3591_v3 = vadd.f32 %v3590_v52, %v3571_v45 }
 0x635   :  { %v3610_v31 = vpop.f32.mrf.mxu0 }
 0x636   :  { %v3611_v21 = vadd.f32 %v3610_v31, %v3591_v3  ;;  %v3630_v54 = vpop.f32.mrf.mxu1 }
 0x638   :  { %v3631_v55 = vadd.f32 %v3630_v54, %v3611_v21 }
 0x642   :  { %v3650_v56 = vpop.f32.mrf.mxu2  ;;  %v3670_v32 = vpop.f32.mrf.mxu3 }
 0x643   :  { %v3651_v51 = vadd.f32 %v3650_v56, %v3631_v55 }
 0x645   :  { %v3671_v57 = vadd.f32 %v3670_v32, %v3651_v51 }
 0x647   :  { %v3676_v1 = vmax.f32 %v3671_v57, 0.0 }
 0x649   :  { %3821 = vmatmul.f32.vlgmr.msrb.gmra.mxu3 %v3676_v1 }
 0x658   :  { %v3762_v14 = vpop.f32.mrf.mxu0 }
 0x659   :  { %v3763_v62 = vadd.f32 %v3848_v61, %v3762_v14  ;;  %v3782_v63 = vpop.f32.mrf.mxu1 }
 0x65b   :  { %v3783_v6 = vadd.f32 %v3782_v63, %v3763_v62 }
 0x660   :  { %v3802_v22 = vpop.f32.mrf.mxu2 }
 0x661   :  { %v3803_v28 = vadd.f32 %v3802_v22, %v3783_v6 }
 0x6cc   :  { %v3822_v4 = vpop.f32.mrf.mxu3 }
 0x6cd   :  { %v3823_v5 = vadd.f32 %v3822_v4, %v3803_v28 }
 0x6cf   :  { %3826 = vst.msk [vmem:[#allocation2] sm:$0x3] %vm3825_vm1, %v3823_v5 }
 0x6d0   :  { %3837 = dma.vmem_to_hbm [thread:$0]  %s3833_s11, 32, %s3835_s14, [#allocation3]  }
 0x6d1   :  { %3889 = dma.done.wait [#allocation3], 32  }
 0x6d2   :  { %3890 = vsyncadd [#allocation3], 4294967264 }
 0x6d3   :  { %3842 = vsyncpa [#allocation3], 1 }

</bundles_post_ra>
